<compile_context>
chip_gen: v7x
topology: tpu7x:2x2x1
jax: 0.10.0
libtpu: 0.0.40
codegen_flags: <defaults>
</compile_context>

<pallas_src>
import functools

import jax
import jax.numpy as jnp
from jax.experimental import pallas as pl
from jax.experimental.pallas import tpu as pltpu


# ----------------------------------------------------------------------------
# Pallas kernels
# ----------------------------------------------------------------------------
def _matmul_kernel(x_ref, w_ref, s_ref, o_ref, *, activation):
    """act(x @ w + shift); x/w bf16 on the MXU, epilogue in f32."""
    acc = jnp.dot(x_ref[...], w_ref[...], preferred_element_type=jnp.float32)
    y = acc + s_ref[...]
    if activation == "relu":
        y = jnp.maximum(y, 0.0)
    elif activation == "tanh":
        y = jnp.tanh(y)
    o_ref[...] = y.astype(o_ref.dtype)


def fused_matmul(x, w, shift, activation="none", out_dtype=jnp.float32,
                 block_m=512):
    """act((x @ w) + shift).  x:(M,K) w:(K,N) shift:(1,N).  Tiled over M."""
    M, K = x.shape
    K2, N = w.shape
    assert K == K2
    x = x.astype(jnp.bfloat16)
    w = w.astype(jnp.bfloat16)
    shift = shift.reshape(1, N).astype(jnp.float32)

    if M <= block_m:
        tm, Mp = M, M
    else:
        tm = block_m
        Mp = pl.cdiv(M, tm) * tm
        if Mp != M:
            x = jnp.pad(x, ((0, Mp - M), (0, 0)))

    out = pl.pallas_call(
        functools.partial(_matmul_kernel, activation=activation),
        out_shape=jax.ShapeDtypeStruct((Mp, N), out_dtype),
        grid=(Mp // tm,),
        in_specs=[
            pl.BlockSpec((tm, K), lambda i: (i, 0)),
            pl.BlockSpec((K, N), lambda i: (0, 0)),
            pl.BlockSpec((1, N), lambda i: (0, 0)),
        ],
        out_specs=pl.BlockSpec((tm, N), lambda i: (i, 0)),
        compiler_params=pltpu.CompilerParams(
            dimension_semantics=("parallel",)),
    )(x, w, shift)
    return out if Mp == M else out[:M]


def _maxpool_kernel(x_ref, o_ref):
    """2x2 max pool on a contiguous view.
    x_ref: (bm, 2, W//2, 2*C)  -- [row-pair, h-parity, w-half, (w-parity, C)]
    o_ref: (bm, W//2, C)
    """
    x = x_ref[...]
    m = jnp.maximum(x[:, 0], x[:, 1])                  # pool over h-parity
    C = o_ref.shape[-1]
    o_ref[...] = jnp.maximum(m[..., :C], m[..., C:])   # pool over w-parity


def maxpool2x2(x_flat, B, H, W, C):
    """x_flat: NHWC flattened (B*H*W, C)  ->  (B, H//2, W//2, C)."""
    R = B * (H // 2)
    x4 = x_flat.reshape(R, 2, W // 2, 2 * C)   # contiguous reshape, no strides
    bm = min(R, 512)
    while R % bm:
        bm //= 2
    out = pl.pallas_call(
        _maxpool_kernel,
        out_shape=jax.ShapeDtypeStruct((R, W // 2, C), x_flat.dtype),
        grid=(R // bm,),
        in_specs=[pl.BlockSpec((bm, 2, W // 2, 2 * C),
                               lambda i: (i, 0, 0, 0))],
        out_specs=pl.BlockSpec((bm, W // 2, C), lambda i: (i, 0, 0)),
        compiler_params=pltpu.CompilerParams(
            dimension_semantics=("parallel",)),
    )(x4)
    return out.reshape(B, H // 2, W // 2, C)


def _latent_kernel(h_ref, w21_ref, b21_ref, w22_ref, b22_ref, eps_ref,
                   w3_ref, b3_ref, mu_ref, logvar_ref, h3_ref):
    """fc21 + fc22 + reparametrize + fc3 + ReLU, fused in one kernel."""
    h = h_ref[...]
    mu = jnp.dot(h, w21_ref[...],
                 preferred_element_type=jnp.float32) + b21_ref[...]
    logvar = jnp.dot(h, w22_ref[...],
                     preferred_element_type=jnp.float32) + b22_ref[...]
    mu_ref[...] = mu
    logvar_ref[...] = logvar
    z = mu + eps_ref[...] * jnp.exp(0.5 * logvar)
    h3 = jnp.dot(z.astype(w3_ref.dtype), w3_ref[...],
                 preferred_element_type=jnp.float32) + b3_ref[...]
    h3_ref[...] = jnp.maximum(h3, 0.0).astype(h3_ref.dtype)


def latent_block(h1, prep, eps):
    B, D = h1.shape
    L = eps.shape[1]
    Dh = prep["fc3_w"].shape[1]
    h1 = h1.astype(jnp.bfloat16)
    eps = eps.astype(jnp.float32)
    full = lambda a: pl.BlockSpec(a.shape, lambda i: (0,) * a.ndim)
    mu, logvar, h3 = pl.pallas_call(
        _latent_kernel,
        out_shape=(jax.ShapeDtypeStruct((B, L), jnp.float32),
                   jax.ShapeDtypeStruct((B, L), jnp.float32),
                   jax.ShapeDtypeStruct((B, Dh), jnp.bfloat16)),
        grid=(1,),
        in_specs=[
            pl.BlockSpec((B, D), lambda i: (0, 0)),
            full(prep["fc21_w"]), full(prep["fc21_b"]),
            full(prep["fc22_w"]), full(prep["fc22_b"]),
            pl.BlockSpec((B, L), lambda i: (0, 0)),
            full(prep["fc3_w"]), full(prep["fc3_b"]),
        ],
        out_specs=(pl.BlockSpec((B, L), lambda i: (0, 0)),
                   pl.BlockSpec((B, L), lambda i: (0, 0)),
                   pl.BlockSpec((B, Dh), lambda i: (0, 0))),
    )(h1, prep["fc21_w"], prep["fc21_b"], prep["fc22_w"], prep["fc22_b"],
      eps, prep["fc3_w"], prep["fc3_b"])
    return mu, logvar, h3


# ----------------------------------------------------------------------------
# Plain-JAX glue: im2col, depth-to-space
# ----------------------------------------------------------------------------
def im2col(x_nhwc, kh, kw, pad):
    """Stride-1 im2col; column ordering (kh, kw, c)."""
    B, H, W, C = x_nhwc.shape
    xp = jnp.pad(x_nhwc, ((0, 0), (pad, pad), (pad, pad), (0, 0)))
    OH = H + 2 * pad - kh + 1
    OW = W + 2 * pad - kw + 1
    cols = []
    for i in range(kh):
        for j in range(kw):
            cols.append(xp[:, i:i + OH, j:j + OW, :])
    patches = jnp.concatenate(cols, axis=-1)
    return patches.reshape(B * OH * OW, kh * kw * C), OH, OW


def pixel_shuffle_nhwc(y):
    """(B, H, W, 2, 2, C) quadrant-packed -> (B, 2H, 2W, C)."""
    B, H, W, _, _, C = y.shape
    return jnp.transpose(y, (0, 1, 3, 2, 4, 5)).reshape(B, 2 * H, 2 * W, C)


# ----------------------------------------------------------------------------
# Weight preparation (done ONCE, outside the jitted forward)
# ----------------------------------------------------------------------------
def conv_weight_to_mat(w):            # (O, C, KH, KW) -> (KH*KW*C, O)
    O, C, KH, KW = w.shape
    return jnp.transpose(w, (2, 3, 1, 0)).reshape(KH * KW * C, O)


def deconv_weight_quadrant_mat(w):
    """ConvTranspose2d(k=4, s=2, p=1) weight (Cin, Cout, 4, 4) ->
    (9*Cin, 4*Cout) matrix for the quadrant-packed direct form.  Rows follow
    the 3x3/pad-1 im2col tap order (tap, cin); columns are (q=r*2+s, cout)."""
    Cin, Cout, KH, KW = w.shape
    wq = jnp.zeros((9, Cin, 4, Cout), w.dtype)
    for r in range(2):
        for s in range(2):
            q = r * 2 + s
            for kh in range(KH):
                if kh % 2 != (r + 1) % 2:
                    continue
                kh_p = (r + 3 - kh) // 2          # im2col row-tap index (0..2)
                for kw in range(KW):
                    if kw % 2 != (s + 1) % 2:
                        continue
                    kw_p = (s + 3 - kw) // 2
                    t = kh_p * 3 + kw_p
                    wq = wq.at[t, :, q, :].set(w[:, :, kh, kw])
    return wq.reshape(9 * Cin, 4 * Cout)


def prepare_params(p):
    """Fold bias + eval-mode BN into weights, permute fc features so the
    NCHW<->NHWC transposes disappear, pre-cast matmul operands to bf16."""
    f = {}
    # encoder convs + BN folding
    for conv, bn in [("enc1", "bn1"), ("enc2", "bn2"),
                     ("enc3", "bn3"), ("enc4", "bn4")]:
        scale = p[bn + "_gamma"] / jnp.sqrt(p[bn + "_var"] + 1e-5)
        w_mat = conv_weight_to_mat(p[conv + "_w"]) * scale[None, :]
        shift = (p[conv + "_b"] - p[bn + "_mean"]) * scale + p[bn + "_beta"]
        f[conv + "_w"] = w_mat.astype(jnp.bfloat16)
        f[conv + "_shift"] = shift.reshape(1, -1).astype(jnp.float32)

    # fc21 / fc22; fold the NCHW->NHWC flatten permutation into the in-features
    def fc_in_perm(w):                # (out, 768) in-features (c,h,w)->(h,w,c)
        return jnp.transpose(w.reshape(-1, 48, 4, 4),
                             (0, 2, 3, 1)).reshape(-1, 768)
    f["fc21_w"] = fc_in_perm(p["fc21_w"]).T.astype(jnp.bfloat16)  # (768, 800)
    f["fc21_b"] = p["fc21_b"].reshape(1, -1).astype(jnp.float32)
    f["fc22_w"] = fc_in_perm(p["fc22_w"]).T.astype(jnp.bfloat16)
    f["fc22_b"] = p["fc22_b"].reshape(1, -1).astype(jnp.float32)

    # fc3; fold the NCHW->NHWC un-flatten permutation into the output features
    w3 = jnp.transpose(p["fc3_w"].reshape(48, 4, 4, 800),
                       (1, 2, 0, 3)).reshape(768, 800)
    f["fc3_w"] = w3.T.astype(jnp.bfloat16)                        # (800, 768)
    f["fc3_b"] = jnp.transpose(p["fc3_b"].reshape(48, 4, 4),
                               (1, 2, 0)).reshape(1, 768).astype(jnp.float32)

    # deconvs: quadrant-packed direct form
    for name in ["dconv3", "dconv2", "dconv1"]:
        f[name + "_w"] = deconv_weight_quadrant_mat(
            p[name + "_w"]).astype(jnp.bfloat16)
        f[name + "_shift"] = jnp.tile(p[name + "_b"], 4).reshape(
            1, -1).astype(jnp.float32)
    return f


# ----------------------------------------------------------------------------
# Parameters (deterministic, in-script; PyTorch-shaped)
# ----------------------------------------------------------------------------
def init_params(key):
    p = {}
    names_shapes = [
        ("enc1_w", (12, 3, 3, 3)), ("enc1_b", (12,)),
        ("enc2_w", (24, 12, 3, 3)), ("enc2_b", (24,)),
        ("enc3_w", (24, 24, 3, 3)), ("enc3_b", (24,)),
        ("enc4_w", (48, 24, 3, 3)), ("enc4_b", (48,)),
        ("fc21_w", (800, 768)), ("fc21_b", (800,)),
        ("fc22_w", (800, 768)), ("fc22_b", (800,)),
        ("fc3_w", (768, 800)), ("fc3_b", (768,)),
        ("dconv3_w", (48, 24, 4, 4)), ("dconv3_b", (24,)),
        ("dconv2_w", (24, 12, 4, 4)), ("dconv2_b", (12,)),
        ("dconv1_w", (12, 3, 4, 4)), ("dconv1_b", (3,)),
    ]
    keys = jax.random.split(key, len(names_shapes))
    for (name, shape), k in zip(names_shapes, keys):
        p[name] = 0.05 * jax.random.normal(k, shape, jnp.float32)
    for bn, c in [("bn1", 12), ("bn2", 24), ("bn3", 24), ("bn4", 48)]:
        p[bn + "_gamma"] = jnp.ones((c,), jnp.float32)
        p[bn + "_beta"] = jnp.zeros((c,), jnp.float32)
        p[bn + "_mean"] = jnp.zeros((c,), jnp.float32)
        p[bn + "_var"] = jnp.ones((c,), jnp.float32)
    return p


# ----------------------------------------------------------------------------
# Forward pass
# ----------------------------------------------------------------------------
def vae_forward(prep, x_nchw, eps):
    B, _, H, W = x_nchw.shape                      # expects 32x32 spatial
    x = jnp.transpose(x_nchw, (0, 2, 3, 1)).astype(jnp.bfloat16)   # NHWC bf16

    def conv_bn_relu(x_nhwc, name):
        cols, _, _ = im2col(x_nhwc, 3, 3, 1)
        return fused_matmul(cols, prep[name + "_w"], prep[name + "_shift"],
                            activation="relu", out_dtype=jnp.bfloat16)

    def deconv(x_nhwc, name, activation, out_dtype=jnp.bfloat16):
        Bc, Hh, Ww, _ = x_nhwc.shape
        cols, _, _ = im2col(x_nhwc, 3, 3, 1)
        y = fused_matmul(cols, prep[name + "_w"], prep[name + "_shift"],
                         activation=activation, out_dtype=out_dtype)
        Cout = prep[name + "_w"].shape[1] // 4
        return y.reshape(Bc, Hh, Ww, 2, 2, Cout)   # quadrant-packed

    # --- encoder (eval mode: Dropout = identity, BN folded) ---
    h = conv_bn_relu(x, "enc1")                                  # (B*32*32,12)
    h = maxpool2x2(h, B, H, W, 12)                               # (B,16,16,12)
    h = conv_bn_relu(h, "enc2")                                  # (B*16*16,24)
    h = maxpool2x2(h, B, H // 2, W // 2, 24)                     # (B,8,8,24)
    h = conv_bn_relu(h, "enc3")                                  # (B*8*8,24)
    h = conv_bn_relu(h.reshape(B, H // 4, W // 4, 24), "enc4")   # (B*8*8,48)
    h = maxpool2x2(h, B, H // 4, W // 4, 48)                     # (B,4,4,48)
    # F.relu after the encoder is redundant (output already ReLU'd + maxpooled)
    h1 = h.reshape(B, (H // 8) * (W // 8) * 48)    # (B,768), (h,w,c) order
                                                   # (fc weights pre-permuted)

    # --- fc21 + fc22 + reparametrize + fc3 + ReLU (one fused kernel) ---
    mu, logvar, h3 = latent_block(h1, prep, eps)

    # --- decoder: direct quadrant-packed ConvTranspose2d(k4,s2,p1) ---
    d = h3.reshape(B, H // 8, W // 8, 48)                        # (B,4,4,48)
    d = pixel_shuffle_nhwc(deconv(d, "dconv3", "relu"))          # (B,8,8,24)
    d = pixel_shuffle_nhwc(deconv(d, "dconv2", "relu"))          # (B,16,16,12)
    y = deconv(d, "dconv1", "tanh", out_dtype=jnp.float32)       # (B,16,16,2,2,3)
    recon = jnp.transpose(y, (0, 5, 1, 3, 2, 4)).reshape(B, 3, H, W)  # NCHW
    return recon, mu, logvar


# ----------------------------------------------------------------------------
if __name__ == "__main__":
    key = jax.random.PRNGKey(0)
    pkey, xkey, ekey = jax.random.split(key, 3)

    params = init_params(pkey)
    prep = prepare_params(params)        # weight folding / casting done once

    # fc21 expects 48*4*4 after 3 max-pools => input spatial must be 32x32.
    x = jax.random.normal(xkey, (2, 3, 32, 32), jnp.float32)
    eps = jax.random.normal(ekey, (2, 800), jnp.float32)

    recon, mu, logvar = jax.jit(vae_forward)(prep, x, eps)
    jax.block_until_ready((recon, mu, logvar))

    assert recon.shape == (2, 3, 32, 32)
    assert mu.shape == (2, 800) and logvar.shape == (2, 800)
    assert bool(jnp.all(jnp.isfinite(recon)))
    assert bool(jnp.all(jnp.isfinite(mu))) and bool(jnp.all(jnp.isfinite(logvar)))
    print("KERNEL_OK")
</pallas_src>

<mosaic_0001>
module attributes {stable_mosaic.version = 11 : i64} {
  func.func @_matmul_kernel(%arg0: i32, %arg1: memref<512x27xbf16, #tpu.memory_space<vmem>>, %arg2: memref<27x12xbf16, #tpu.memory_space<vmem>>, %arg3: memref<1x12xf32, #tpu.memory_space<vmem>>, %arg4: memref<512x12xbf16, #tpu.memory_space<vmem>>) attributes {dimension_semantics = [#tpu.dimension_semantics<parallel>], iteration_bounds = array<i64: 4>, scalar_prefetch = 0 : i64, scratch_operands = 0 : i64, tpu.core_type = #tpu.core_type<tc>, window_params = [{transform_indices = @transform_0, window_bounds = array<i64: 512, 27>}, {pipeline_mode = #tpu.pipeline_mode<synchronous>, transform_indices = @transform_1, window_bounds = array<i64: 27, 12>}, {pipeline_mode = #tpu.pipeline_mode<synchronous>, transform_indices = @transform_2, window_bounds = array<i64: 1, 12>}, {transform_indices = @transform_3, window_bounds = array<i64: 512, 12>}]} {
    %c0 = arith.constant 0 : index
    %c0_0 = arith.constant 0 : index
    %0 = vector.load %arg1[%c0, %c0_0] : memref<512x27xbf16, #tpu.memory_space<vmem>>, vector<512x27xbf16>
    %c0_1 = arith.constant 0 : index
    %c0_2 = arith.constant 0 : index
    %1 = vector.load %arg2[%c0_1, %c0_2] : memref<27x12xbf16, #tpu.memory_space<vmem>>, vector<27x12xbf16>
    %cst = arith.constant dense<0.000000e+00> : vector<512x12xf32>
    %2 = tpu.matmul %0, %1, %cst {dimension_numbers = #tpu.dot_dimension_numbers<[1], [0], [0], [1], [0, 0, 1, 1], [], []>} : vector<512x27xbf16>, vector<27x12xbf16>, vector<512x12xf32> -> vector<512x12xf32>
    %c0_3 = arith.constant 0 : index
    %c0_4 = arith.constant 0 : index
    %3 = vector.load %arg3[%c0_3, %c0_4] : memref<1x12xf32, #tpu.memory_space<vmem>>, vector<1x12xf32>
    %4 = vector.broadcast %3 : vector<1x12xf32> to vector<512x12xf32>
    %5 = arith.addf %2, %4 : vector<512x12xf32>
    %cst_5 = arith.constant 0.000000e+00 : f32
    %6 = vector.broadcast %cst_5 : f32 to vector<512x12xf32>
    %7 = arith.maximumf %5, %6 : vector<512x12xf32>
    %8 = arith.truncf %7 : vector<512x12xf32> to vector<512x12xbf16>
    %c0_6 = arith.constant 0 : index
    %c0_7 = arith.constant 0 : index
    %9 = vector.load %arg4[%c0_6, %c0_7] : memref<512x12xbf16, #tpu.memory_space<vmem>>, vector<512x12xbf16>
    tpu.vector_store %arg4[%c0_6, %c0_7], %8 {strides = array<i32>} : memref<512x12xbf16, #tpu.memory_space<vmem>>, vector<512x12xbf16>,
    return
  }
  func.func @transform_0(%arg0: i32) -> (i32, i32) {
    %c0_i32 = arith.constant 0 : i32
    %c0_i32_0 = arith.constant 0 : i32
    return %arg0, %c0_i32 : i32, i32
  }
  func.func @transform_1(%arg0: i32) -> (i32, i32) {
    %c0_i32 = arith.constant 0 : i32
    %c0_i32_0 = arith.constant 0 : i32
    %c0_i32_1 = arith.constant 0 : i32
    return %c0_i32, %c0_i32_0 : i32, i32
  }
  func.func @transform_2(%arg0: i32) -> (i32, i32) {
    %c0_i32 = arith.constant 0 : i32
    %c0_i32_0 = arith.constant 0 : i32
    %c0_i32_1 = arith.constant 0 : i32
    return %c0_i32, %c0_i32_0 : i32, i32
  }
  func.func @transform_3(%arg0: i32) -> (i32, i32) {
    %c0_i32 = arith.constant 0 : i32
    %c0_i32_0 = arith.constant 0 : i32
    return %arg0, %c0_i32 : i32, i32
  }
}

module attributes {stable_mosaic.version = 11 : i64} {
  func.func @_maxpool_kernel(%arg0: i32, %arg1: memref<32x2x16x24xbf16, #tpu.memory_space<vmem>>, %arg2: memref<32x16x12xbf16, #tpu.memory_space<vmem>>) attributes {dimension_semantics = [#tpu.dimension_semantics<parallel>], iteration_bounds = array<i64: 1>, scalar_prefetch = 0 : i64, scratch_operands = 0 : i64, tpu.core_type = #tpu.core_type<tc>, window_params = [{transform_indices = @transform_0, window_bounds = array<i64: 32, 2, 16, 24>}, {transform_indices = @transform_1, window_bounds = array<i64: 32, 16, 12>}]} {
    %c0 = arith.constant 0 : index
    %c0_0 = arith.constant 0 : index
    %c0_1 = arith.constant 0 : index
    %c0_2 = arith.constant 0 : index
    %0 = vector.load %arg1[%c0, %c0_0, %c0_1, %c0_2] : memref<32x2x16x24xbf16, #tpu.memory_space<vmem>>, vector<32x2x16x24xbf16>
    %1 = vector.extract_strided_slice %0 {offsets = [0, 0, 0, 0], sizes = [32, 1, 16, 24], strides = [1, 1, 1, 1]} : vector<32x2x16x24xbf16> to vector<32x1x16x24xbf16>
    %2 = vector.shape_cast %1 : vector<32x1x16x24xbf16> to vector<32x16x24xbf16>
    %3 = vector.extract_strided_slice %0 {offsets = [0, 1, 0, 0], sizes = [32, 1, 16, 24], strides = [1, 1, 1, 1]} : vector<32x2x16x24xbf16> to vector<32x1x16x24xbf16>
    %4 = vector.shape_cast %3 : vector<32x1x16x24xbf16> to vector<32x16x24xbf16>
    %5 = arith.maximumf %2, %4 : vector<32x16x24xbf16>
    %6 = vector.extract_strided_slice %5 {offsets = [0, 0, 0], sizes = [32, 16, 12], strides = [1, 1, 1]} : vector<32x16x24xbf16> to vector<32x16x12xbf16>
    %7 = vector.extract_strided_slice %5 {offsets = [0, 0, 12], sizes = [32, 16, 12], strides = [1, 1, 1]} : vector<32x16x24xbf16> to vector<32x16x12xbf16>
    %8 = arith.maximumf %6, %7 : vector<32x16x12xbf16>
    %c0_3 = arith.constant 0 : index
    %c0_4 = arith.constant 0 : index
    %c0_5 = arith.constant 0 : index
    %9 = vector.load %arg2[%c0_3, %c0_4, %c0_5] : memref<32x16x12xbf16, #tpu.memory_space<vmem>>, vector<32x16x12xbf16>
    tpu.vector_store %arg2[%c0_3, %c0_4, %c0_5], %8 {strides = array<i32>} : memref<32x16x12xbf16, #tpu.memory_space<vmem>>, vector<32x16x12xbf16>,
    return
  }
  func.func @transform_0(%arg0: i32) -> (i32, i32, i32, i32) {
    %c0_i32 = arith.constant 0 : i32
    %c0_i32_0 = arith.constant 0 : i32
    %c0_i32_1 = arith.constant 0 : i32
    %c0_i32_2 = arith.constant 0 : i32
    return %arg0, %c0_i32, %c0_i32_0, %c0_i32_1 : i32, i32, i32, i32
  }
  func.func @transform_1(%arg0: i32) -> (i32, i32, i32) {
    %c0_i32 = arith.constant 0 : i32
    %c0_i32_0 = arith.constant 0 : i32
    %c0_i32_1 = arith.constant 0 : i32
    return %arg0, %c0_i32, %c0_i32_0 : i32, i32, i32
  }
}

module attributes {stable_mosaic.version = 11 : i64} {
  func.func @_matmul_kernel(%arg0: i32, %arg1: memref<512x108xbf16, #tpu.memory_space<vmem>>, %arg2: memref<108x24xbf16, #tpu.memory_space<vmem>>, %arg3: memref<1x24xf32, #tpu.memory_space<vmem>>, %arg4: memref<512x24xbf16, #tpu.memory_space<vmem>>) attributes {dimension_semantics = [#tpu.dimension_semantics<parallel>], iteration_bounds = array<i64: 1>, scalar_prefetch = 0 : i64, scratch_operands = 0 : i64, tpu.core_type = #tpu.core_type<tc>, window_params = [{transform_indices = @transform_0, window_bounds = array<i64: 512, 108>}, {pipeline_mode = #tpu.pipeline_mode<synchronous>, transform_indices = @transform_1, window_bounds = array<i64: 108, 24>}, {pipeline_mode = #tpu.pipeline_mode<synchronous>, transform_indices = @transform_2, window_bounds = array<i64: 1, 24>}, {transform_indices = @transform_3, window_bounds = array<i64: 512, 24>}]} {
    %c0 = arith.constant 0 : index
    %c0_0 = arith.constant 0 : index
    %0 = vector.load %arg1[%c0, %c0_0] : memref<512x108xbf16, #tpu.memory_space<vmem>>, vector<512x108xbf16>
    %c0_1 = arith.constant 0 : index
    %c0_2 = arith.constant 0 : index
    %1 = vector.load %arg2[%c0_1, %c0_2] : memref<108x24xbf16, #tpu.memory_space<vmem>>, vector<108x24xbf16>
    %cst = arith.constant dense<0.000000e+00> : vector<512x24xf32>
    %2 = tpu.matmul %0, %1, %cst {dimension_numbers = #tpu.dot_dimension_numbers<[1], [0], [0], [1], [0, 0, 1, 1], [], []>} : vector<512x108xbf16>, vector<108x24xbf16>, vector<512x24xf32> -> vector<512x24xf32>
    %c0_3 = arith.constant 0 : index
    %c0_4 = arith.constant 0 : index
    %3 = vector.load %arg3[%c0_3, %c0_4] : memref<1x24xf32, #tpu.memory_space<vmem>>, vector<1x24xf32>
    %4 = vector.broadcast %3 : vector<1x24xf32> to vector<512x24xf32>
    %5 = arith.addf %2, %4 : vector<512x24xf32>
    %cst_5 = arith.constant 0.000000e+00 : f32
    %6 = vector.broadcast %cst_5 : f32 to vector<512x24xf32>
    %7 = arith.maximumf %5, %6 : vector<512x24xf32>
    %8 = arith.truncf %7 : vector<512x24xf32> to vector<512x24xbf16>
    %c0_6 = arith.constant 0 : index
    %c0_7 = arith.constant 0 : index
    %9 = vector.load %arg4[%c0_6, %c0_7] : memref<512x24xbf16, #tpu.memory_space<vmem>>, vector<512x24xbf16>
    tpu.vector_store %arg4[%c0_6, %c0_7], %8 {strides = array<i32>} : memref<512x24xbf16, #tpu.memory_space<vmem>>, vector<512x24xbf16>,
    return
  }
  func.func @transform_0(%arg0: i32) -> (i32, i32) {
    %c0_i32 = arith.constant 0 : i32
    %c0_i32_0 = arith.constant 0 : i32
    return %arg0, %c0_i32 : i32, i32
  }
  func.func @transform_1(%arg0: i32) -> (i32, i32) {
    %c0_i32 = arith.constant 0 : i32
    %c0_i32_0 = arith.constant 0 : i32
    %c0_i32_1 = arith.constant 0 : i32
    return %c0_i32, %c0_i32_0 : i32, i32
  }
  func.func @transform_2(%arg0: i32) -> (i32, i32) {
    %c0_i32 = arith.constant 0 : i32
    %c0_i32_0 = arith.constant 0 : i32
    %c0_i32_1 = arith.constant 0 : i32
    return %c0_i32, %c0_i32_0 : i32, i32
  }
  func.func @transform_3(%arg0: i32) -> (i32, i32) {
    %c0_i32 = arith.constant 0 : i32
    %c0_i32_0 = arith.constant 0 : i32
    return %arg0, %c0_i32 : i32, i32
  }
}

module attributes {stable_mosaic.version = 11 : i64} {
  func.func @_maxpool_kernel(%arg0: i32, %arg1: memref<16x2x8x48xbf16, #tpu.memory_space<vmem>>, %arg2: memref<16x8x24xbf16, #tpu.memory_space<vmem>>) attributes {dimension_semantics = [#tpu.dimension_semantics<parallel>], iteration_bounds = array<i64: 1>, scalar_prefetch = 0 : i64, scratch_operands = 0 : i64, tpu.core_type = #tpu.core_type<tc>, window_params = [{transform_indices = @transform_0, window_bounds = array<i64: 16, 2, 8, 48>}, {transform_indices = @transform_1, window_bounds = array<i64: 16, 8, 24>}]} {
    %c0 = arith.constant 0 : index
    %c0_0 = arith.constant 0 : index
    %c0_1 = arith.constant 0 : index
    %c0_2 = arith.constant 0 : index
    %0 = vector.load %arg1[%c0, %c0_0, %c0_1, %c0_2] : memref<16x2x8x48xbf16, #tpu.memory_space<vmem>>, vector<16x2x8x48xbf16>
    %1 = vector.extract_strided_slice %0 {offsets = [0, 0, 0, 0], sizes = [16, 1, 8, 48], strides = [1, 1, 1, 1]} : vector<16x2x8x48xbf16> to vector<16x1x8x48xbf16>
    %2 = vector.shape_cast %1 : vector<16x1x8x48xbf16> to vector<16x8x48xbf16>
    %3 = vector.extract_strided_slice %0 {offsets = [0, 1, 0, 0], sizes = [16, 1, 8, 48], strides = [1, 1, 1, 1]} : vector<16x2x8x48xbf16> to vector<16x1x8x48xbf16>
    %4 = vector.shape_cast %3 : vector<16x1x8x48xbf16> to vector<16x8x48xbf16>
    %5 = arith.maximumf %2, %4 : vector<16x8x48xbf16>
    %6 = vector.extract_strided_slice %5 {offsets = [0, 0, 0], sizes = [16, 8, 24], strides = [1, 1, 1]} : vector<16x8x48xbf16> to vector<16x8x24xbf16>
    %7 = vector.extract_strided_slice %5 {offsets = [0, 0, 24], sizes = [16, 8, 24], strides = [1, 1, 1]} : vector<16x8x48xbf16> to vector<16x8x24xbf16>
    %8 = arith.maximumf %6, %7 : vector<16x8x24xbf16>
    %c0_3 = arith.constant 0 : index
    %c0_4 = arith.constant 0 : index
    %c0_5 = arith.constant 0 : index
    %9 = vector.load %arg2[%c0_3, %c0_4, %c0_5] : memref<16x8x24xbf16, #tpu.memory_space<vmem>>, vector<16x8x24xbf16>
    tpu.vector_store %arg2[%c0_3, %c0_4, %c0_5], %8 {strides = array<i32>} : memref<16x8x24xbf16, #tpu.memory_space<vmem>>, vector<16x8x24xbf16>,
    return
  }
  func.func @transform_0(%arg0: i32) -> (i32, i32, i32, i32) {
    %c0_i32 = arith.constant 0 : i32
    %c0_i32_0 = arith.constant 0 : i32
    %c0_i32_1 = arith.constant 0 : i32
    %c0_i32_2 = arith.constant 0 : i32
    return %arg0, %c0_i32, %c0_i32_0, %c0_i32_1 : i32, i32, i32, i32
  }
  func.func @transform_1(%arg0: i32) -> (i32, i32, i32) {
    %c0_i32 = arith.constant 0 : i32
    %c0_i32_0 = arith.constant 0 : i32
    %c0_i32_1 = arith.constant 0 : i32
    return %arg0, %c0_i32, %c0_i32_0 : i32, i32, i32
  }
}

module attributes {stable_mosaic.version = 11 : i64} {
  func.func @_matmul_kernel(%arg0: i32, %arg1: memref<128x216xbf16, #tpu.memory_space<vmem>>, %arg2: memref<216x24xbf16, #tpu.memory_space<vmem>>, %arg3: memref<1x24xf32, #tpu.memory_space<vmem>>, %arg4: memref<128x24xbf16, #tpu.memory_space<vmem>>) attributes {dimension_semantics = [#tpu.dimension_semantics<parallel>], iteration_bounds = array<i64: 1>, scalar_prefetch = 0 : i64, scratch_operands = 0 : i64, tpu.core_type = #tpu.core_type<tc>, window_params = [{transform_indices = @transform_0, window_bounds = array<i64: 128, 216>}, {pipeline_mode = #tpu.pipeline_mode<synchronous>, transform_indices = @transform_1, window_bounds = array<i64: 216, 24>}, {pipeline_mode = #tpu.pipeline_mode<synchronous>, transform_indices = @transform_2, window_bounds = array<i64: 1, 24>}, {transform_indices = @transform_3, window_bounds = array<i64: 128, 24>}]} {
    %c0 = arith.constant 0 : index
    %c0_0 = arith.constant 0 : index
    %0 = vector.load %arg1[%c0, %c0_0] : memref<128x216xbf16, #tpu.memory_space<vmem>>, vector<128x216xbf16>
    %c0_1 = arith.constant 0 : index
    %c0_2 = arith.constant 0 : index
    %1 = vector.load %arg2[%c0_1, %c0_2] : memref<216x24xbf16, #tpu.memory_space<vmem>>, vector<216x24xbf16>
    %cst = arith.constant dense<0.000000e+00> : vector<128x24xf32>
    %2 = tpu.matmul %0, %1, %cst {dimension_numbers = #tpu.dot_dimension_numbers<[1], [0], [0], [1], [0, 0, 1, 1], [], []>} : vector<128x216xbf16>, vector<216x24xbf16>, vector<128x24xf32> -> vector<128x24xf32>
    %c0_3 = arith.constant 0 : index
    %c0_4 = arith.constant 0 : index
    %3 = vector.load %arg3[%c0_3, %c0_4] : memref<1x24xf32, #tpu.memory_space<vmem>>, vector<1x24xf32>
    %4 = vector.broadcast %3 : vector<1x24xf32> to vector<128x24xf32>
    %5 = arith.addf %2, %4 : vector<128x24xf32>
    %cst_5 = arith.constant 0.000000e+00 : f32
    %6 = vector.broadcast %cst_5 : f32 to vector<128x24xf32>
    %7 = arith.maximumf %5, %6 : vector<128x24xf32>
    %8 = arith.truncf %7 : vector<128x24xf32> to vector<128x24xbf16>
    %c0_6 = arith.constant 0 : index
    %c0_7 = arith.constant 0 : index
    %9 = vector.load %arg4[%c0_6, %c0_7] : memref<128x24xbf16, #tpu.memory_space<vmem>>, vector<128x24xbf16>
    tpu.vector_store %arg4[%c0_6, %c0_7], %8 {strides = array<i32>} : memref<128x24xbf16, #tpu.memory_space<vmem>>, vector<128x24xbf16>,
    return
  }
  func.func @transform_0(%arg0: i32) -> (i32, i32) {
    %c0_i32 = arith.constant 0 : i32
    %c0_i32_0 = arith.constant 0 : i32
    return %arg0, %c0_i32 : i32, i32
  }
  func.func @transform_1(%arg0: i32) -> (i32, i32) {
    %c0_i32 = arith.constant 0 : i32
    %c0_i32_0 = arith.constant 0 : i32
    %c0_i32_1 = arith.constant 0 : i32
    return %c0_i32, %c0_i32_0 : i32, i32
  }
  func.func @transform_2(%arg0: i32) -> (i32, i32) {
    %c0_i32 = arith.constant 0 : i32
    %c0_i32_0 = arith.constant 0 : i32
    %c0_i32_1 = arith.constant 0 : i32
    return %c0_i32, %c0_i32_0 : i32, i32
  }
  func.func @transform_3(%arg0: i32) -> (i32, i32) {
    %c0_i32 = arith.constant 0 : i32
    %c0_i32_0 = arith.constant 0 : i32
    return %arg0, %c0_i32 : i32, i32
  }
}

module attributes {stable_mosaic.version = 11 : i64} {
  func.func @_matmul_kernel(%arg0: i32, %arg1: memref<128x216xbf16, #tpu.memory_space<vmem>>, %arg2: memref<216x48xbf16, #tpu.memory_space<vmem>>, %arg3: memref<1x48xf32, #tpu.memory_space<vmem>>, %arg4: memref<128x48xbf16, #tpu.memory_space<vmem>>) attributes {dimension_semantics = [#tpu.dimension_semantics<parallel>], iteration_bounds = array<i64: 1>, scalar_prefetch = 0 : i64, scratch_operands = 0 : i64, tpu.core_type = #tpu.core_type<tc>, window_params = [{transform_indices = @transform_0, window_bounds = array<i64: 128, 216>}, {pipeline_mode = #tpu.pipeline_mode<synchronous>, transform_indices = @transform_1, window_bounds = array<i64: 216, 48>}, {pipeline_mode = #tpu.pipeline_mode<synchronous>, transform_indices = @transform_2, window_bounds = array<i64: 1, 48>}, {transform_indices = @transform_3, window_bounds = array<i64: 128, 48>}]} {
    %c0 = arith.constant 0 : index
    %c0_0 = arith.constant 0 : index
    %0 = vector.load %arg1[%c0, %c0_0] : memref<128x216xbf16, #tpu.memory_space<vmem>>, vector<128x216xbf16>
    %c0_1 = arith.constant 0 : index
    %c0_2 = arith.constant 0 : index
    %1 = vector.load %arg2[%c0_1, %c0_2] : memref<216x48xbf16, #tpu.memory_space<vmem>>, vector<216x48xbf16>
    %cst = arith.constant dense<0.000000e+00> : vector<128x48xf32>
    %2 = tpu.matmul %0, %1, %cst {dimension_numbers = #tpu.dot_dimension_numbers<[1], [0], [0], [1], [0, 0, 1, 1], [], []>} : vector<128x216xbf16>, vector<216x48xbf16>, vector<128x48xf32> -> vector<128x48xf32>
    %c0_3 = arith.constant 0 : index
    %c0_4 = arith.constant 0 : index
    %3 = vector.load %arg3[%c0_3, %c0_4] : memref<1x48xf32, #tpu.memory_space<vmem>>, vector<1x48xf32>
    %4 = vector.broadcast %3 : vector<1x48xf32> to vector<128x48xf32>
    %5 = arith.addf %2, %4 : vector<128x48xf32>
    %cst_5 = arith.constant 0.000000e+00 : f32
    %6 = vector.broadcast %cst_5 : f32 to vector<128x48xf32>
    %7 = arith.maximumf %5, %6 : vector<128x48xf32>
    %8 = arith.truncf %7 : vector<128x48xf32> to vector<128x48xbf16>
    %c0_6 = arith.constant 0 : index
    %c0_7 = arith.constant 0 : index
    %9 = vector.load %arg4[%c0_6, %c0_7] : memref<128x48xbf16, #tpu.memory_space<vmem>>, vector<128x48xbf16>
    tpu.vector_store %arg4[%c0_6, %c0_7], %8 {strides = array<i32>} : memref<128x48xbf16, #tpu.memory_space<vmem>>, vector<128x48xbf16>,
    return
  }
  func.func @transform_0(%arg0: i32) -> (i32, i32) {
    %c0_i32 = arith.constant 0 : i32
    %c0_i32_0 = arith.constant 0 : i32
    return %arg0, %c0_i32 : i32, i32
  }
  func.func @transform_1(%arg0: i32) -> (i32, i32) {
    %c0_i32 = arith.constant 0 : i32
    %c0_i32_0 = arith.constant 0 : i32
    %c0_i32_1 = arith.constant 0 : i32
    return %c0_i32, %c0_i32_0 : i32, i32
  }
  func.func @transform_2(%arg0: i32) -> (i32, i32) {
    %c0_i32 = arith.constant 0 : i32
    %c0_i32_0 = arith.constant 0 : i32
    %c0_i32_1 = arith.constant 0 : i32
    return %c0_i32, %c0_i32_0 : i32, i32
  }
  func.func @transform_3(%arg0: i32) -> (i32, i32) {
    %c0_i32 = arith.constant 0 : i32
    %c0_i32_0 = arith.constant 0 : i32
    return %arg0, %c0_i32 : i32, i32
  }
}

module attributes {stable_mosaic.version = 11 : i64} {
  func.func @_maxpool_kernel(%arg0: i32, %arg1: memref<8x2x4x96xbf16, #tpu.memory_space<vmem>>, %arg2: memref<8x4x48xbf16, #tpu.memory_space<vmem>>) attributes {dimension_semantics = [#tpu.dimension_semantics<parallel>], iteration_bounds = array<i64: 1>, scalar_prefetch = 0 : i64, scratch_operands = 0 : i64, tpu.core_type = #tpu.core_type<tc>, window_params = [{transform_indices = @transform_0, window_bounds = array<i64: 8, 2, 4, 96>}, {transform_indices = @transform_1, window_bounds = array<i64: 8, 4, 48>}]} {
    %c0 = arith.constant 0 : index
    %c0_0 = arith.constant 0 : index
    %c0_1 = arith.constant 0 : index
    %c0_2 = arith.constant 0 : index
    %0 = vector.load %arg1[%c0, %c0_0, %c0_1, %c0_2] : memref<8x2x4x96xbf16, #tpu.memory_space<vmem>>, vector<8x2x4x96xbf16>
    %1 = vector.extract_strided_slice %0 {offsets = [0, 0, 0, 0], sizes = [8, 1, 4, 96], strides = [1, 1, 1, 1]} : vector<8x2x4x96xbf16> to vector<8x1x4x96xbf16>
    %2 = vector.shape_cast %1 : vector<8x1x4x96xbf16> to vector<8x4x96xbf16>
    %3 = vector.extract_strided_slice %0 {offsets = [0, 1, 0, 0], sizes = [8, 1, 4, 96], strides = [1, 1, 1, 1]} : vector<8x2x4x96xbf16> to vector<8x1x4x96xbf16>
    %4 = vector.shape_cast %3 : vector<8x1x4x96xbf16> to vector<8x4x96xbf16>
    %5 = arith.maximumf %2, %4 : vector<8x4x96xbf16>
    %6 = vector.extract_strided_slice %5 {offsets = [0, 0, 0], sizes = [8, 4, 48], strides = [1, 1, 1]} : vector<8x4x96xbf16> to vector<8x4x48xbf16>
    %7 = vector.extract_strided_slice %5 {offsets = [0, 0, 48], sizes = [8, 4, 48], strides = [1, 1, 1]} : vector<8x4x96xbf16> to vector<8x4x48xbf16>
    %8 = arith.maximumf %6, %7 : vector<8x4x48xbf16>
    %c0_3 = arith.constant 0 : index
    %c0_4 = arith.constant 0 : index
    %c0_5 = arith.constant 0 : index
    %9 = vector.load %arg2[%c0_3, %c0_4, %c0_5] : memref<8x4x48xbf16, #tpu.memory_space<vmem>>, vector<8x4x48xbf16>
    tpu.vector_store %arg2[%c0_3, %c0_4, %c0_5], %8 {strides = array<i32>} : memref<8x4x48xbf16, #tpu.memory_space<vmem>>, vector<8x4x48xbf16>,
    return
  }
  func.func @transform_0(%arg0: i32) -> (i32, i32, i32, i32) {
    %c0_i32 = arith.constant 0 : i32
    %c0_i32_0 = arith.constant 0 : i32
    %c0_i32_1 = arith.constant 0 : i32
    %c0_i32_2 = arith.constant 0 : i32
    return %arg0, %c0_i32, %c0_i32_0, %c0_i32_1 : i32, i32, i32, i32
  }
  func.func @transform_1(%arg0: i32) -> (i32, i32, i32) {
    %c0_i32 = arith.constant 0 : i32
    %c0_i32_0 = arith.constant 0 : i32
    %c0_i32_1 = arith.constant 0 : i32
    return %arg0, %c0_i32, %c0_i32_0 : i32, i32, i32
  }
}

module attributes {stable_mosaic.version = 11 : i64} {
  func.func @_latent_kernel(%arg0: i32, %arg1: memref<2x768xbf16, #tpu.memory_space<vmem>>, %arg2: memref<768x800xbf16, #tpu.memory_space<vmem>>, %arg3: memref<1x800xf32, #tpu.memory_space<vmem>>, %arg4: memref<768x800xbf16, #tpu.memory_space<vmem>>, %arg5: memref<1x800xf32, #tpu.memory_space<vmem>>, %arg6: memref<2x800xf32, #tpu.memory_space<vmem>>, %arg7: memref<800x768xbf16, #tpu.memory_space<vmem>>, %arg8: memref<1x768xf32, #tpu.memory_space<vmem>>, %arg9: memref<2x800xf32, #tpu.memory_space<vmem>>, %arg10: memref<2x800xf32, #tpu.memory_space<vmem>>, %arg11: memref<2x768xbf16, #tpu.memory_space<vmem>>) attributes {dimension_semantics = [#tpu.dimension_semantics<arbitrary>], iteration_bounds = array<i64: 1>, scalar_prefetch = 0 : i64, scratch_operands = 0 : i64, tpu.core_type = #tpu.core_type<tc>, window_params = [{pipeline_mode = #tpu.pipeline_mode<synchronous>, transform_indices = @transform_0, window_bounds = array<i64: 2, 768>}, {pipeline_mode = #tpu.pipeline_mode<synchronous>, transform_indices = @transform_1, window_bounds = array<i64: 768, 800>}, {pipeline_mode = #tpu.pipeline_mode<synchronous>, transform_indices = @transform_2, window_bounds = array<i64: 1, 800>}, {pipeline_mode = #tpu.pipeline_mode<synchronous>, transform_indices = @transform_3, window_bounds = array<i64: 768, 800>}, {pipeline_mode = #tpu.pipeline_mode<synchronous>, transform_indices = @transform_4, window_bounds = array<i64: 1, 800>}, {pipeline_mode = #tpu.pipeline_mode<synchronous>, transform_indices = @transform_5, window_bounds = array<i64: 2, 800>}, {pipeline_mode = #tpu.pipeline_mode<synchronous>, transform_indices = @transform_6, window_bounds = array<i64: 800, 768>}, {pipeline_mode = #tpu.pipeline_mode<synchronous>, transform_indices = @transform_7, window_bounds = array<i64: 1, 768>}, {pipeline_mode = #tpu.pipeline_mode<synchronous>, transform_indices = @transform_8, window_bounds = array<i64: 2, 800>}, {pipeline_mode = #tpu.pipeline_mode<synchronous>, transform_indices = @transform_9, window_bounds = array<i64: 2, 800>}, {pipeline_mode = #tpu.pipeline_mode<synchronous>, transform_indices = @transform_10, window_bounds = array<i64: 2, 768>}]} {
    %c0 = arith.constant 0 : index
    %c0_0 = arith.constant 0 : index
    %0 = vector.load %arg1[%c0, %c0_0] : memref<2x768xbf16, #tpu.memory_space<vmem>>, vector<2x768xbf16>
    %c0_1 = arith.constant 0 : index
    %c0_2 = arith.constant 0 : index
    %1 = vector.load %arg2[%c0_1, %c0_2] : memref<768x800xbf16, #tpu.memory_space<vmem>>, vector<768x800xbf16>
    %cst = arith.constant dense<0.000000e+00> : vector<2x800xf32>
    %2 = tpu.matmul %0, %1, %cst {dimension_numbers = #tpu.dot_dimension_numbers<[1], [0], [0], [1], [0, 0, 1, 1], [], []>} : vector<2x768xbf16>, vector<768x800xbf16>, vector<2x800xf32> -> vector<2x800xf32>
    %c0_3 = arith.constant 0 : index
    %c0_4 = arith.constant 0 : index
    %3 = vector.load %arg3[%c0_3, %c0_4] : memref<1x800xf32, #tpu.memory_space<vmem>>, vector<1x800xf32>
    %4 = vector.broadcast %3 : vector<1x800xf32> to vector<2x800xf32>
    %5 = arith.addf %2, %4 : vector<2x800xf32>
    %c0_5 = arith.constant 0 : index
    %c0_6 = arith.constant 0 : index
    %6 = vector.load %arg4[%c0_5, %c0_6] : memref<768x800xbf16, #tpu.memory_space<vmem>>, vector<768x800xbf16>
    %cst_7 = arith.constant dense<0.000000e+00> : vector<2x800xf32>
    %7 = tpu.matmul %0, %6, %cst_7 {dimension_numbers = #tpu.dot_dimension_numbers<[1], [0], [0], [1], [0, 0, 1, 1], [], []>} : vector<2x768xbf16>, vector<768x800xbf16>, vector<2x800xf32> -> vector<2x800xf32>
    %c0_8 = arith.constant 0 : index
    %c0_9 = arith.constant 0 : index
    %8 = vector.load %arg5[%c0_8, %c0_9] : memref<1x800xf32, #tpu.memory_space<vmem>>, vector<1x800xf32>
    %9 = vector.broadcast %8 : vector<1x800xf32> to vector<2x800xf32>
    %10 = arith.addf %7, %9 : vector<2x800xf32>
    %c0_10 = arith.constant 0 : index
    %c0_11 = arith.constant 0 : index
    %11 = vector.load %arg9[%c0_10, %c0_11] : memref<2x800xf32, #tpu.memory_space<vmem>>, vector<2x800xf32>
    tpu.vector_store %arg9[%c0_10, %c0_11], %5 {strides = array<i32>} : memref<2x800xf32, #tpu.memory_space<vmem>>, vector<2x800xf32>,
    %c0_12 = arith.constant 0 : index
    %c0_13 = arith.constant 0 : index
    %12 = vector.load %arg10[%c0_12, %c0_13] : memref<2x800xf32, #tpu.memory_space<vmem>>, vector<2x800xf32>
    tpu.vector_store %arg10[%c0_12, %c0_13], %10 {strides = array<i32>} : memref<2x800xf32, #tpu.memory_space<vmem>>, vector<2x800xf32>,
    %c0_14 = arith.constant 0 : index
    %c0_15 = arith.constant 0 : index
    %13 = vector.load %arg6[%c0_14, %c0_15] : memref<2x800xf32, #tpu.memory_space<vmem>>, vector<2x800xf32>
    %cst_16 = arith.constant 5.000000e-01 : f32
    %14 = vector.broadcast %cst_16 : f32 to vector<2x800xf32>
    %15 = arith.mulf %14, %10 : vector<2x800xf32>
    %16 = math.exp %15 : vector<2x800xf32>
    %17 = arith.mulf %13, %16 : vector<2x800xf32>
    %18 = arith.addf %5, %17 : vector<2x800xf32>
    %19 = arith.truncf %18 : vector<2x800xf32> to vector<2x800xbf16>
    %c0_17 = arith.constant 0 : index
    %c0_18 = arith.constant 0 : index
    %20 = vector.load %arg7[%c0_17, %c0_18] : memref<800x768xbf16, #tpu.memory_space<vmem>>, vector<800x768xbf16>
    %cst_19 = arith.constant dense<0.000000e+00> : vector<2x768xf32>
    %21 = tpu.matmul %19, %20, %cst_19 {dimension_numbers = #tpu.dot_dimension_numbers<[1], [0], [0], [1], [0, 0, 1, 1], [], []>} : vector<2x800xbf16>, vector<800x768xbf16>, vector<2x768xf32> -> vector<2x768xf32>
    %c0_20 = arith.constant 0 : index
    %c0_21 = arith.constant 0 : index
    %22 = vector.load %arg8[%c0_20, %c0_21] : memref<1x768xf32, #tpu.memory_space<vmem>>, vector<1x768xf32>
    %23 = vector.broadcast %22 : vector<1x768xf32> to vector<2x768xf32>
    %24 = arith.addf %21, %23 : vector<2x768xf32>
    %cst_22 = arith.constant 0.000000e+00 : f32
    %25 = vector.broadcast %cst_22 : f32 to vector<2x768xf32>
    %26 = arith.maximumf %24, %25 : vector<2x768xf32>
    %27 = arith.truncf %26 : vector<2x768xf32> to vector<2x768xbf16>
    %c0_23 = arith.constant 0 : index
    %c0_24 = arith.constant 0 : index
    %28 = vector.load %arg11[%c0_23, %c0_24] : memref<2x768xbf16, #tpu.memory_space<vmem>>, vector<2x768xbf16>
    tpu.vector_store %arg11[%c0_23, %c0_24], %27 {strides = array<i32>} : memref<2x768xbf16, #tpu.memory_space<vmem>>, vector<2x768xbf16>,
    return
  }
  func.func @transform_0(%arg0: i32) -> (i32, i32) {
    %c0_i32 = arith.constant 0 : i32
    %c0_i32_0 = arith.constant 0 : i32
    %c0_i32_1 = arith.constant 0 : i32
    return %c0_i32, %c0_i32_0 : i32, i32
  }
  func.func @transform_1(%arg0: i32) -> (i32, i32) {
    %c0_i32 = arith.constant 0 : i32
    %c0_i32_0 = arith.constant 0 : i32
    %c0_i32_1 = arith.constant 0 : i32
    return %c0_i32, %c0_i32_0 : i32, i32
  }
  func.func @transform_2(%arg0: i32) -> (i32, i32) {
    %c0_i32 = arith.constant 0 : i32
    %c0_i32_0 = arith.constant 0 : i32
    %c0_i32_1 = arith.constant 0 : i32
    return %c0_i32, %c0_i32_0 : i32, i32
  }
  func.func @transform_3(%arg0: i32) -> (i32, i32) {
    %c0_i32 = arith.constant 0 : i32
    %c0_i32_0 = arith.constant 0 : i32
    %c0_i32_1 = arith.constant 0 : i32
    return %c0_i32, %c0_i32_0 : i32, i32
  }
  func.func @transform_4(%arg0: i32) -> (i32, i32) {
    %c0_i32 = arith.constant 0 : i32
    %c0_i32_0 = arith.constant 0 : i32
    %c0_i32_1 = arith.constant 0 : i32
    return %c0_i32, %c0_i32_0 : i32, i32
  }
  func.func @transform_5(%arg0: i32) -> (i32, i32) {
    %c0_i32 = arith.constant 0 : i32
    %c0_i32_0 = arith.constant 0 : i32
    %c0_i32_1 = arith.constant 0 : i32
    return %c0_i32, %c0_i32_0 : i32, i32
  }
  func.func @transform_6(%arg0: i32) -> (i32, i32) {
    %c0_i32 = arith.constant 0 : i32
    %c0_i32_0 = arith.constant 0 : i32
    %c0_i32_1 = arith.constant 0 : i32
    return %c0_i32, %c0_i32_0 : i32, i32
  }
  func.func @transform_7(%arg0: i32) -> (i32, i32) {
    %c0_i32 = arith.constant 0 : i32
    %c0_i32_0 = arith.constant 0 : i32
    %c0_i32_1 = arith.constant 0 : i32
    return %c0_i32, %c0_i32_0 : i32, i32
  }
  func.func @transform_8(%arg0: i32) -> (i32, i32) {
    %c0_i32 = arith.constant 0 : i32
    %c0_i32_0 = arith.constant 0 : i32
    %c0_i32_1 = arith.constant 0 : i32
    return %c0_i32, %c0_i32_0 : i32, i32
  }
  func.func @transform_9(%arg0: i32) -> (i32, i32) {
    %c0_i32 = arith.constant 0 : i32
    %c0_i32_0 = arith.constant 0 : i32
    %c0_i32_1 = arith.constant 0 : i32
    return %c0_i32, %c0_i32_0 : i32, i32
  }
  func.func @transform_10(%arg0: i32) -> (i32, i32) {
    %c0_i32 = arith.constant 0 : i32
    %c0_i32_0 = arith.constant 0 : i32
    %c0_i32_1 = arith.constant 0 : i32
    return %c0_i32, %c0_i32_0 : i32, i32
  }
}

module attributes {stable_mosaic.version = 11 : i64} {
  func.func @_matmul_kernel(%arg0: i32, %arg1: memref<32x432xbf16, #tpu.memory_space<vmem>>, %arg2: memref<432x96xbf16, #tpu.memory_space<vmem>>, %arg3: memref<1x96xf32, #tpu.memory_space<vmem>>, %arg4: memref<32x96xbf16, #tpu.memory_space<vmem>>) attributes {dimension_semantics = [#tpu.dimension_semantics<parallel>], iteration_bounds = array<i64: 1>, scalar_prefetch = 0 : i64, scratch_operands = 0 : i64, tpu.core_type = #tpu.core_type<tc>, window_params = [{transform_indices = @transform_0, window_bounds = array<i64: 32, 432>}, {pipeline_mode = #tpu.pipeline_mode<synchronous>, transform_indices = @transform_1, window_bounds = array<i64: 432, 96>}, {pipeline_mode = #tpu.pipeline_mode<synchronous>, transform_indices = @transform_2, window_bounds = array<i64: 1, 96>}, {transform_indices = @transform_3, window_bounds = array<i64: 32, 96>}]} {
    %c0 = arith.constant 0 : index
    %c0_0 = arith.constant 0 : index
    %0 = vector.load %arg1[%c0, %c0_0] : memref<32x432xbf16, #tpu.memory_space<vmem>>, vector<32x432xbf16>
    %c0_1 = arith.constant 0 : index
    %c0_2 = arith.constant 0 : index
    %1 = vector.load %arg2[%c0_1, %c0_2] : memref<432x96xbf16, #tpu.memory_space<vmem>>, vector<432x96xbf16>
    %cst = arith.constant dense<0.000000e+00> : vector<32x96xf32>
    %2 = tpu.matmul %0, %1, %cst {dimension_numbers = #tpu.dot_dimension_numbers<[1], [0], [0], [1], [0, 0, 1, 1], [], []>} : vector<32x432xbf16>, vector<432x96xbf16>, vector<32x96xf32> -> vector<32x96xf32>
    %c0_3 = arith.constant 0 : index
    %c0_4 = arith.constant 0 : index
    %3 = vector.load %arg3[%c0_3, %c0_4] : memref<1x96xf32, #tpu.memory_space<vmem>>, vector<1x96xf32>
    %4 = vector.broadcast %3 : vector<1x96xf32> to vector<32x96xf32>
    %5 = arith.addf %2, %4 : vector<32x96xf32>
    %cst_5 = arith.constant 0.000000e+00 : f32
    %6 = vector.broadcast %cst_5 : f32 to vector<32x96xf32>
    %7 = arith.maximumf %5, %6 : vector<32x96xf32>
    %8 = arith.truncf %7 : vector<32x96xf32> to vector<32x96xbf16>
    %c0_6 = arith.constant 0 : index
    %c0_7 = arith.constant 0 : index
    %9 = vector.load %arg4[%c0_6, %c0_7] : memref<32x96xbf16, #tpu.memory_space<vmem>>, vector<32x96xbf16>
    tpu.vector_store %arg4[%c0_6, %c0_7], %8 {strides = array<i32>} : memref<32x96xbf16, #tpu.memory_space<vmem>>, vector<32x96xbf16>,
    return
  }
  func.func @transform_0(%arg0: i32) -> (i32, i32) {
    %c0_i32 = arith.constant 0 : i32
    %c0_i32_0 = arith.constant 0 : i32
    return %arg0, %c0_i32 : i32, i32
  }
  func.func @transform_1(%arg0: i32) -> (i32, i32) {
    %c0_i32 = arith.constant 0 : i32
    %c0_i32_0 = arith.constant 0 : i32
    %c0_i32_1 = arith.constant 0 : i32
    return %c0_i32, %c0_i32_0 : i32, i32
  }
  func.func @transform_2(%arg0: i32) -> (i32, i32) {
    %c0_i32 = arith.constant 0 : i32
    %c0_i32_0 = arith.constant 0 : i32
    %c0_i32_1 = arith.constant 0 : i32
    return %c0_i32, %c0_i32_0 : i32, i32
  }
  func.func @transform_3(%arg0: i32) -> (i32, i32) {
    %c0_i32 = arith.constant 0 : i32
    %c0_i32_0 = arith.constant 0 : i32
    return %arg0, %c0_i32 : i32, i32
  }
}

module attributes {stable_mosaic.version = 11 : i64} {
  func.func @_matmul_kernel(%arg0: i32, %arg1: memref<512x108xbf16, #tpu.memory_space<vmem>>, %arg2: memref<108x12xbf16, #tpu.memory_space<vmem>>, %arg3: memref<1x12xf32, #tpu.memory_space<vmem>>, %arg4: memref<512x12xf32, #tpu.memory_space<vmem>>) attributes {dimension_semantics = [#tpu.dimension_semantics<parallel>], iteration_bounds = array<i64: 1>, scalar_prefetch = 0 : i64, scratch_operands = 0 : i64, tpu.core_type = #tpu.core_type<tc>, window_params = [{transform_indices = @transform_0, window_bounds = array<i64: 512, 108>}, {pipeline_mode = #tpu.pipeline_mode<synchronous>, transform_indices = @transform_1, window_bounds = array<i64: 108, 12>}, {pipeline_mode = #tpu.pipeline_mode<synchronous>, transform_indices = @transform_2, window_bounds = array<i64: 1, 12>}, {transform_indices = @transform_3, window_bounds = array<i64: 512, 12>}]} {
    %c0 = arith.constant 0 : index
    %c0_0 = arith.constant 0 : index
    %0 = vector.load %arg1[%c0, %c0_0] : memref<512x108xbf16, #tpu.memory_space<vmem>>, vector<512x108xbf16>
    %c0_1 = arith.constant 0 : index
    %c0_2 = arith.constant 0 : index
    %1 = vector.load %arg2[%c0_1, %c0_2] : memref<108x12xbf16, #tpu.memory_space<vmem>>, vector<108x12xbf16>
    %cst = arith.constant dense<0.000000e+00> : vector<512x12xf32>
    %2 = tpu.matmul %0, %1, %cst {dimension_numbers = #tpu.dot_dimension_numbers<[1], [0], [0], [1], [0, 0, 1, 1], [], []>} : vector<512x108xbf16>, vector<108x12xbf16>, vector<512x12xf32> -> vector<512x12xf32>
    %c0_3 = arith.constant 0 : index
    %c0_4 = arith.constant 0 : index
    %3 = vector.load %arg3[%c0_3, %c0_4] : memref<1x12xf32, #tpu.memory_space<vmem>>, vector<1x12xf32>
    %4 = vector.broadcast %3 : vector<1x12xf32> to vector<512x12xf32>
    %5 = arith.addf %2, %4 : vector<512x12xf32>
    %6 = math.tanh %5 : vector<512x12xf32>
    %c0_5 = arith.constant 0 : index
    %c0_6 = arith.constant 0 : index
    %7 = vector.load %arg4[%c0_5, %c0_6] : memref<512x12xf32, #tpu.memory_space<vmem>>, vector<512x12xf32>
    tpu.vector_store %arg4[%c0_5, %c0_6], %6 {strides = array<i32>} : memref<512x12xf32, #tpu.memory_space<vmem>>, vector<512x12xf32>,
    return
  }
  func.func @transform_0(%arg0: i32) -> (i32, i32) {
    %c0_i32 = arith.constant 0 : i32
    %c0_i32_0 = arith.constant 0 : i32
    return %arg0, %c0_i32 : i32, i32
  }
  func.func @transform_1(%arg0: i32) -> (i32, i32) {
    %c0_i32 = arith.constant 0 : i32
    %c0_i32_0 = arith.constant 0 : i32
    %c0_i32_1 = arith.constant 0 : i32
    return %c0_i32, %c0_i32_0 : i32, i32
  }
  func.func @transform_2(%arg0: i32) -> (i32, i32) {
    %c0_i32 = arith.constant 0 : i32
    %c0_i32_0 = arith.constant 0 : i32
    %c0_i32_1 = arith.constant 0 : i32
    return %c0_i32, %c0_i32_0 : i32, i32
  }
  func.func @transform_3(%arg0: i32) -> (i32, i32) {
    %c0_i32 = arith.constant 0 : i32
    %c0_i32_0 = arith.constant 0 : i32
    return %arg0, %c0_i32 : i32, i32
  }
}

</mosaic_0001>

<bundles_post_ra>
// kernel: vae_forward.12
= control target key start
LH: loop header
LB: loop body
LE: loop exit
PB: predicated region body
PF: predicated region fallthrough
CT: control target
= control target key end

     0   :  { %s590_s22 = smov 116   ;;  %vm520_vm0 = vcmask 93184   ;;  %s1561_s0 = inlined_call_operand.vmem [shape: bf16[32,2,16,24], index: 0, kind: input, shape index: {}]   ;;  %s1562_s1 = inlined_call_operand.vmem [shape: bf16[32,16,12], index: 1, kind: output, shape index: {}]  }
   0x1   :  { %v12_v0 = vld [vmem:[%s1561_s0 + $0x10] sm:$0xf]  ;;  %v14_v1 = vld [vmem:[%s1561_s0 + $0x18] sm:$0xf]  ;;  %v8_v2 = vld [vmem:[%s1561_s0] sm:$0xf] }
   0x2   :  { %v610_v3 = vmax.bf16 %v14_v1, %v12_v0  ;;  %v10_v4 = vld [vmem:[%s1561_s0 + $0x8] sm:$0xf]  ;;  %v13_v5 = vld [vmem:[%s1561_s0 + $0x14] sm:$0xf]  ;;  %v15_v6 = vld [vmem:[%s1561_s0 + $0x1c] sm:$0xf] }
   0x3   :  { %v621_v7 = vmax.bf16 %v10_v4, %v8_v2  ;;  %v9_v8 = vld [vmem:[%s1561_s0 + $0x4] sm:$0xf]  ;;  %v11_v9 = vld [vmem:[%s1561_s0 + $0xc] sm:$0xf]  ;;  %v631_v10 = vmax.bf16 %v15_v6, %v13_v5  ;;  %v16_v14 = vld [vmem:[%s1561_s0 + $0x20] sm:$0xf] }
   0x4   :  { %268 = vrot.lane.b32.xlu1 %v610_v3, %s590_s22  ;;  %v635_v11 = vmax.bf16 %v11_v9, %v9_v8  ;;  %v17_v12 = vld [vmem:[%s1561_s0 + $0x24] sm:$0xf]  ;;  %v19_v13 = vld [vmem:[%s1561_s0 + $0x2c] sm:$0xf]  ;;  %v18_v15 = vld [vmem:[%s1561_s0 + $0x28] sm:$0xf] }
   0x5   :  { %264 = vrot.lane.b32.xlu0 %v621_v7, %s590_s22  ;;  %v651_v16 = vmax.bf16 %v19_v13, %v17_v12  ;;  %v655_v17 = vmax.bf16 %v18_v15, %v16_v14  ;;  %v21_v18 = vld [vmem:[%s1561_s0 + $0x34] sm:$0xf]  ;;  %v23_v19 = vld [vmem:[%s1561_s0 + $0x3c] sm:$0xf]  ;;  %v20_v20 = vld [vmem:[%s1561_s0 + $0x30] sm:$0xf] }
   0x6   :  { %v22_v21 = vld [vmem:[%s1561_s0 + $0x38] sm:$0xf]  ;;  %v671_v22 = vmax.bf16 %v23_v19, %v21_v18  ;;  %v25_v24 = vld [vmem:[%s1561_s0 + $0x44] sm:$0xf]  ;;  %v27_v25 = vld [vmem:[%s1561_s0 + $0x4c] sm:$0xf] }
   0x7   :  { %v675_v23 = vmax.bf16 %v22_v21, %v20_v20  ;;  %v24_v26 = vld [vmem:[%s1561_s0 + $0x40] sm:$0xf]  ;;  %v26_v27 = vld [vmem:[%s1561_s0 + $0x48] sm:$0xf]  ;;  %v691_v28 = vmax.bf16 %v27_v25, %v25_v24  ;;  %v29_v30 = vld [vmem:[%s1561_s0 + $0x54] sm:$0xf] }
   0x8   :  { %270 = vrot.lane.b32.xlu1 %v631_v10, %s590_s22  ;;  %v695_v29 = vmax.bf16 %v26_v27, %v24_v26  ;;  %v31_v31 = vld [vmem:[%s1561_s0 + $0x5c] sm:$0xf]  ;;  %v28_v32 = vld [vmem:[%s1561_s0 + $0x50] sm:$0xf]  ;;  %v30_v33 = vld [vmem:[%s1561_s0 + $0x58] sm:$0xf] }
   0x9   :  { %266 = vrot.lane.b32.xlu0 %v635_v11, %s590_s22  ;;  %v711_v34 = vmax.bf16 %v31_v31, %v29_v30  ;;  %v715_v35 = vmax.bf16 %v30_v33, %v28_v32  ;;  %v33_v36 = vld [vmem:[%s1561_s0 + $0x64] sm:$0xf]  ;;  %v35_v37 = vld [vmem:[%s1561_s0 + $0x6c] sm:$0xf]  ;;  %v32_v38 = vld [vmem:[%s1561_s0 + $0x60] sm:$0xf] }
   0xa   :  { %v34_v39 = vld [vmem:[%s1561_s0 + $0x68] sm:$0xf]  ;;  %v731_v40 = vmax.bf16 %v35_v37, %v33_v36  ;;  %v37_v42 = vld [vmem:[%s1561_s0 + $0x74] sm:$0xf]  ;;  %v39_v43 = vld [vmem:[%s1561_s0 + $0x7c] sm:$0xf] }
   0xb   :  { %v735_v41 = vmax.bf16 %v34_v39, %v32_v38  ;;  %v36_v44 = vld [vmem:[%s1561_s0 + $0x70] sm:$0xf]  ;;  %v38_v45 = vld [vmem:[%s1561_s0 + $0x78] sm:$0xf]  ;;  %v751_v46 = vmax.bf16 %v39_v43, %v37_v42  ;;  %v41_v48 = vld [vmem:[%s1561_s0 + $0x84] sm:$0xf] }
   0xc   :  { %274 = vrot.lane.b32.xlu1 %v651_v16, %s590_s22  ;;  %v755_v47 = vmax.bf16 %v38_v45, %v36_v44  ;;  %v43_v49 = vld [vmem:[%s1561_s0 + $0x8c] sm:$0xf]  ;;  %v40_v50 = vld [vmem:[%s1561_s0 + $0x80] sm:$0xf]  ;;  %v42_v51 = vld [vmem:[%s1561_s0 + $0x88] sm:$0xf] }
   0xd   :  { %272 = vrot.lane.b32.xlu0 %v655_v17, %s590_s22  ;;  %v771_v52 = vmax.bf16 %v43_v49, %v41_v48  ;;  %v775_v53 = vmax.bf16 %v42_v51, %v40_v50  ;;  %v45_v54 = vld [vmem:[%s1561_s0 + $0x94] sm:$0xf]  ;;  %v47_v55 = vld [vmem:[%s1561_s0 + $0x9c] sm:$0xf]  ;;  %v44_v56 = vld [vmem:[%s1561_s0 + $0x90] sm:$0xf] }
   0xe   :  { %v46_v57 = vld [vmem:[%s1561_s0 + $0x98] sm:$0xf]  ;;  %v791_v58 = vmax.bf16 %v47_v55, %v45_v54  ;;  %v49_v60 = vld [vmem:[%s1561_s0 + $0xa4] sm:$0xf]  ;;  %v51_v61 = vld [vmem:[%s1561_s0 + $0xac] sm:$0xf] }
   0xf   :  { %v795_v59 = vmax.bf16 %v46_v57, %v44_v56  ;;  %v48_v62 = vld [vmem:[%s1561_s0 + $0xa0] sm:$0xf]  ;;  %v50_v63 = vld [vmem:[%s1561_s0 + $0xa8] sm:$0xf]  ;;  %v811_v0 = vmax.bf16 %v51_v61, %v49_v60  ;;  %v53_v2 = vld [vmem:[%s1561_s0 + $0xb4] sm:$0xf] }
  0x10   :  { %278 = vrot.lane.b32.xlu1 %v671_v22, %s590_s22  ;;  %v815_v1 = vmax.bf16 %v50_v63, %v48_v62  ;;  %v55_v4 = vld [vmem:[%s1561_s0 + $0xbc] sm:$0xf]  ;;  %v52_v5 = vld [vmem:[%s1561_s0 + $0xb0] sm:$0xf]  ;;  %v54_v6 = vld [vmem:[%s1561_s0 + $0xb8] sm:$0xf] }
  0x11   :  { %276 = vrot.lane.b32.xlu0 %v675_v23, %s590_s22  ;;  %v831_v8 = vmax.bf16 %v55_v4, %v53_v2  ;;  %v835_v9 = vmax.bf16 %v54_v6, %v52_v5  ;;  %v57_v12 = vld [vmem:[%s1561_s0 + $0xc4] sm:$0xf]  ;;  %v59_v13 = vld [vmem:[%s1561_s0 + $0xcc] sm:$0xf]  ;;  %v56_v14 = vld [vmem:[%s1561_s0 + $0xc0] sm:$0xf] }
  0x12   :  { %v58_v15 = vld [vmem:[%s1561_s0 + $0xc8] sm:$0xf]  ;;  %v851_v18 = vmax.bf16 %v59_v13, %v57_v12  ;;  %v61_v20 = vld [vmem:[%s1561_s0 + $0xd4] sm:$0xf]  ;;  %v63_v21 = vld [vmem:[%s1561_s0 + $0xdc] sm:$0xf] }
  0x13   :  { %v855_v19 = vmax.bf16 %v58_v15, %v56_v14  ;;  %v60_v24 = vld [vmem:[%s1561_s0 + $0xd0] sm:$0xf]  ;;  %v62_v25 = vld [vmem:[%s1561_s0 + $0xd8] sm:$0xf]  ;;  %v871_v26 = vmax.bf16 %v63_v21, %v61_v20  ;;  %v65_v30 = vld [vmem:[%s1561_s0 + $0xe4] sm:$0xf] }
  0x14   :  { %282 = vrot.lane.b32.xlu1 %v691_v28, %s590_s22  ;;  %v875_v27 = vmax.bf16 %v62_v25, %v60_v24  ;;  %v67_v31 = vld [vmem:[%s1561_s0 + $0xec] sm:$0xf]  ;;  %v64_v32 = vld [vmem:[%s1561_s0 + $0xe0] sm:$0xf]  ;;  %v66_v33 = vld [vmem:[%s1561_s0 + $0xe8] sm:$0xf] }
  0x15   :  { %280 = vrot.lane.b32.xlu0 %v695_v29, %s590_s22  ;;  %v891_v36 = vmax.bf16 %v67_v31, %v65_v30  ;;  %v895_v37 = vmax.bf16 %v66_v33, %v64_v32  ;;  %v69_v38 = vld [vmem:[%s1561_s0 + $0xf4] sm:$0xf]  ;;  %v71_v39 = vld [vmem:[%s1561_s0 + $0xfc] sm:$0xf]  ;;  %v68_v42 = vld [vmem:[%s1561_s0 + $0xf0] sm:$0xf] }
  0x16   :  { %v70_v43 = vld [vmem:[%s1561_s0 + $0xf8] sm:$0xf]  ;;  %v911_v44 = vmax.bf16 %v71_v39, %v69_v38  ;;  %v73_v48 = vld [vmem:[%s1561_s0 + $0x104] sm:$0xf]  ;;  %v75_v49 = vld [vmem:[%s1561_s0 + $0x10c] sm:$0xf] }
  0x17   :  { %v915_v45 = vmax.bf16 %v70_v43, %v68_v42  ;;  %v72_v50 = vld [vmem:[%s1561_s0 + $0x100] sm:$0xf]  ;;  %v74_v51 = vld [vmem:[%s1561_s0 + $0x108] sm:$0xf]  ;;  %v931_v54 = vmax.bf16 %v75_v49, %v73_v48  ;;  %v77_v56 = vld [vmem:[%s1561_s0 + $0x114] sm:$0xf] }
  0x18   :  { %286 = vrot.lane.b32.xlu1 %v711_v34, %s590_s22  ;;  %v935_v55 = vmax.bf16 %v74_v51, %v72_v50  ;;  %v79_v57 = vld [vmem:[%s1561_s0 + $0x11c] sm:$0xf]  ;;  %v76_v60 = vld [vmem:[%s1561_s0 + $0x110] sm:$0xf]  ;;  %v78_v61 = vld [vmem:[%s1561_s0 + $0x118] sm:$0xf] }
  0x19   :  { %284 = vrot.lane.b32.xlu0 %v715_v35, %s590_s22  ;;  %v951_v62 = vmax.bf16 %v79_v57, %v77_v56  ;;  %v955_v63 = vmax.bf16 %v78_v61, %v76_v60  ;;  %v81_v2 = vld [vmem:[%s1561_s0 + $0x124] sm:$0xf]  ;;  %v83_v4 = vld [vmem:[%s1561_s0 + $0x12c] sm:$0xf]  ;;  %v80_v5 = vld [vmem:[%s1561_s0 + $0x120] sm:$0xf] }
  0x1a   :  { %v82_v6 = vld [vmem:[%s1561_s0 + $0x128] sm:$0xf]  ;;  %v971_v12 = vmax.bf16 %v83_v4, %v81_v2  ;;  %v85_v14 = vld [vmem:[%s1561_s0 + $0x134] sm:$0xf]  ;;  %v87_v15 = vld [vmem:[%s1561_s0 + $0x13c] sm:$0xf] }
  0x1b   :  { %v975_v13 = vmax.bf16 %v82_v6, %v80_v5  ;;  %v84_v20 = vld [vmem:[%s1561_s0 + $0x130] sm:$0xf]  ;;  %v86_v21 = vld [vmem:[%s1561_s0 + $0x138] sm:$0xf]  ;;  %v991_v24 = vmax.bf16 %v87_v15, %v85_v14  ;;  %v89_v30 = vld [vmem:[%s1561_s0 + $0x144] sm:$0xf] }
  0x1c   :  { %290 = vrot.lane.b32.xlu1 %v731_v40, %s590_s22  ;;  %v995_v25 = vmax.bf16 %v86_v21, %v84_v20  ;;  %v91_v31 = vld [vmem:[%s1561_s0 + $0x14c] sm:$0xf]  ;;  %v88_v32 = vld [vmem:[%s1561_s0 + $0x140] sm:$0xf]  ;;  %v90_v33 = vld [vmem:[%s1561_s0 + $0x148] sm:$0xf] }
  0x1d   :  { %288 = vrot.lane.b32.xlu0 %v735_v41, %s590_s22  ;;  %v1011_v38 = vmax.bf16 %v91_v31, %v89_v30  ;;  %v1015_v39 = vmax.bf16 %v90_v33, %v88_v32  ;;  %v93_v42 = vld [vmem:[%s1561_s0 + $0x154] sm:$0xf]  ;;  %v95_v43 = vld [vmem:[%s1561_s0 + $0x15c] sm:$0xf]  ;;  %v92_v48 = vld [vmem:[%s1561_s0 + $0x150] sm:$0xf] }
  0x1e   :  { %v94_v49 = vld [vmem:[%s1561_s0 + $0x158] sm:$0xf]  ;;  %v1031_v50 = vmax.bf16 %v95_v43, %v93_v42  ;;  %v97_v56 = vld [vmem:[%s1561_s0 + $0x164] sm:$0xf]  ;;  %v99_v57 = vld [vmem:[%s1561_s0 + $0x16c] sm:$0xf] }
  0x1f   :  { %v1035_v51 = vmax.bf16 %v94_v49, %v92_v48  ;;  %v96_v60 = vld [vmem:[%s1561_s0 + $0x160] sm:$0xf]  ;;  %v98_v61 = vld [vmem:[%s1561_s0 + $0x168] sm:$0xf]  ;;  %v1051_v2 = vmax.bf16 %v99_v57, %v97_v56  ;;  %v101_v5 = vld [vmem:[%s1561_s0 + $0x174] sm:$0xf] }
  0x20   :  { %294 = vrot.lane.b32.xlu1 %v751_v46, %s590_s22  ;;  %v1055_v4 = vmax.bf16 %v98_v61, %v96_v60  ;;  %v103_v6 = vld [vmem:[%s1561_s0 + $0x17c] sm:$0xf]  ;;  %v100_v14 = vld [vmem:[%s1561_s0 + $0x170] sm:$0xf]  ;;  %v102_v15 = vld [vmem:[%s1561_s0 + $0x178] sm:$0xf] }
  0x21   :  { %292 = vrot.lane.b32.xlu0 %v755_v47, %s590_s22  ;;  %v1071_v20 = vmax.bf16 %v103_v6, %v101_v5  ;;  %v1075_v21 = vmax.bf16 %v102_v15, %v100_v14  ;;  %v105_v30 = vld [vmem:[%s1561_s0 + $0x184] sm:$0xf]  ;;  %v107_v31 = vld [vmem:[%s1561_s0 + $0x18c] sm:$0xf]  ;;  %v104_v32 = vld [vmem:[%s1561_s0 + $0x180] sm:$0xf] }
  0x22   :  { %v106_v33 = vld [vmem:[%s1561_s0 + $0x188] sm:$0xf]  ;;  %v1091_v42 = vmax.bf16 %v107_v31, %v105_v30  ;;  %v109_v48 = vld [vmem:[%s1561_s0 + $0x194] sm:$0xf]  ;;  %v111_v49 = vld [vmem:[%s1561_s0 + $0x19c] sm:$0xf] }
  0x23   :  { %v1095_v43 = vmax.bf16 %v106_v33, %v104_v32  ;;  %v108_v56 = vld [vmem:[%s1561_s0 + $0x190] sm:$0xf]  ;;  %v110_v57 = vld [vmem:[%s1561_s0 + $0x198] sm:$0xf]  ;;  %v1111_v60 = vmax.bf16 %v111_v49, %v109_v48  ;;  %v113_v5 = vld [vmem:[%s1561_s0 + $0x1a4] sm:$0xf] }
  0x24   :  { %298 = vrot.lane.b32.xlu1 %v771_v52, %s590_s22  ;;  %v1115_v61 = vmax.bf16 %v110_v57, %v108_v56  ;;  %v115_v6 = vld [vmem:[%s1561_s0 + $0x1ac] sm:$0xf]  ;;  %v112_v14 = vld [vmem:[%s1561_s0 + $0x1a0] sm:$0xf]  ;;  %v114_v15 = vld [vmem:[%s1561_s0 + $0x1a8] sm:$0xf] }
  0x25   :  { %296 = vrot.lane.b32.xlu0 %v775_v53, %s590_s22  ;;  %v1131_v30 = vmax.bf16 %v115_v6, %v113_v5  ;;  %v1135_v31 = vmax.bf16 %v114_v15, %v112_v14  ;;  %v117_v32 = vld [vmem:[%s1561_s0 + $0x1b4] sm:$0xf]  ;;  %v119_v33 = vld [vmem:[%s1561_s0 + $0x1bc] sm:$0xf]  ;;  %v116_v48 = vld [vmem:[%s1561_s0 + $0x1b0] sm:$0xf] }
  0x26   :  { %v118_v49 = vld [vmem:[%s1561_s0 + $0x1b8] sm:$0xf]  ;;  %v1151_v56 = vmax.bf16 %v119_v33, %v117_v32  ;;  %v121_v5 = vld [vmem:[%s1561_s0 + $0x1c4] sm:$0xf]  ;;  %v123_v6 = vld [vmem:[%s1561_s0 + $0x1cc] sm:$0xf] }
  0x27   :  { %1569 = vst [vmem:[#allocation2_spill] sm:$0xff] %v1131_v30  ;;  %1570 = vst [vmem:[#allocation3_spill] sm:$0xff] %v1135_v31  ;;  %v1155_v57 = vmax.bf16 %v118_v49, %v116_v48  ;;  %v120_v14 = vld [vmem:[%s1561_s0 + $0x1c0] sm:$0xf]  ;;  %v122_v15 = vld [vmem:[%s1561_s0 + $0x1c8] sm:$0xf]  ;;  %v1171_v32 = vmax.bf16 %v123_v6, %v121_v5 }
  0x28   :  { %302 = vrot.lane.b32.xlu1 %v791_v58, %s590_s22  ;;  %1571 = vst [vmem:[#allocation4_spill] sm:$0xff] %v1151_v56  ;;  %v1175_v33 = vmax.bf16 %v122_v15, %v120_v14  ;;  %v125_v48 = vld [vmem:[%s1561_s0 + $0x1d4] sm:$0xf]  ;;  %v127_v49 = vld [vmem:[%s1561_s0 + $0x1dc] sm:$0xf] }
  0x29   :  { %300 = vrot.lane.b32.xlu0 %v795_v59, %s590_s22  ;;  %1572 = vst [vmem:[#allocation5_spill] sm:$0xff] %v1155_v57  ;;  %1573 = vst [vmem:[#allocation6_spill] sm:$0xff] %v1171_v32  ;;  %v126_v5 = vld [vmem:[%s1561_s0 + $0x1d8] sm:$0xf]  ;;  %v1191_v6 = vmax.bf16 %v127_v49, %v125_v48  ;;  %v129_v15 = vld [vmem:[%s1561_s0 + $0x1e4] sm:$0xf] }
  0x2a   :  { %1574 = vst [vmem:[#allocation7_spill] sm:$0xff] %v1175_v33  ;;  %v128_v48 = vld [vmem:[%s1561_s0 + $0x1e0] sm:$0xf]  ;;  %v130_v49 = vld [vmem:[%s1561_s0 + $0x1e8] sm:$0xf] }
  0x2c   :  { %306 = vrot.lane.b32.xlu1 %v811_v0, %s590_s22 }
  0x2d   :  { %304 = vrot.lane.b32.xlu0 %v815_v1, %s590_s22 }
  0x30   :  { %310 = vrot.lane.b32.xlu1 %v831_v8, %s590_s22 }
  0x31   :  { %308 = vrot.lane.b32.xlu0 %v835_v9, %s590_s22 }
  0x34   :  { %314 = vrot.lane.b32.xlu1 %v851_v18, %s590_s22 }
  0x35   :  { %312 = vrot.lane.b32.xlu0 %v855_v19, %s590_s22 }
  0x38   :  { %318 = vrot.lane.b32.xlu1 %v871_v26, %s590_s22 }
  0x39   :  { %316 = vrot.lane.b32.xlu0 %v875_v27, %s590_s22 }
  0x3c   :  { %322 = vrot.lane.b32.xlu1 %v891_v36, %s590_s22 }
  0x3d   :  { %320 = vrot.lane.b32.xlu0 %v895_v37, %s590_s22 }
  0x40   :  { %326 = vrot.lane.b32.xlu1 %v911_v44, %s590_s22 }
  0x41   :  { %324 = vrot.lane.b32.xlu0 %v915_v45, %s590_s22 }
  0x44   :  { %330 = vrot.lane.b32.xlu1 %v931_v54, %s590_s22 }
  0x45   :  { %328 = vrot.lane.b32.xlu0 %v935_v55, %s590_s22 }
  0x48   :  { %334 = vrot.lane.b32.xlu1 %v951_v62, %s590_s22 }
  0x49   :  { %332 = vrot.lane.b32.xlu0 %v955_v63, %s590_s22 }
  0x4c   :  { %338 = vrot.lane.b32.xlu1 %v971_v12, %s590_s22 }
  0x4d   :  { %336 = vrot.lane.b32.xlu0 %v975_v13, %s590_s22 }
  0x50   :  { %342 = vrot.lane.b32.xlu1 %v991_v24, %s590_s22 }
  0x51   :  { %340 = vrot.lane.b32.xlu0 %v995_v25, %s590_s22 }
  0x54   :  { %346 = vrot.lane.b32.xlu1 %v1011_v38, %s590_s22 }
  0x55   :  { %344 = vrot.lane.b32.xlu0 %v1015_v39, %s590_s22 }
  0x58   :  { %350 = vrot.lane.b32.xlu1 %v1031_v50, %s590_s22 }
  0x59   :  { %348 = vrot.lane.b32.xlu0 %v1035_v51, %s590_s22 }
  0x5c   :  { %354 = vrot.lane.b32.xlu1 %v1051_v2, %s590_s22 }
  0x5d   :  { %352 = vrot.lane.b32.xlu0 %v1055_v4, %s590_s22 }
  0x60   :  { %358 = vrot.lane.b32.xlu1 %v1071_v20, %s590_s22 }
  0x61   :  { %356 = vrot.lane.b32.xlu0 %v1075_v21, %s590_s22 }
  0x64   :  { %362 = vrot.lane.b32.xlu1 %v1091_v42, %s590_s22 }
  0x65   :  { %360 = vrot.lane.b32.xlu0 %v1095_v43, %s590_s22 }
  0x68   :  { %366 = vrot.lane.b32.xlu1 %v1111_v60, %s590_s22 }
  0x69   :  { %364 = vrot.lane.b32.xlu0 %v1115_v61, %s590_s22 }
  0x6c   :  { %370 = vrot.lane.b32.xlu1 %v1131_v30, %s590_s22  ;;  %v1221_v30 = vmax.bf16 %v130_v49, %v128_v48 }
  0x6d   :  { %368 = vrot.lane.b32.xlu0 %v1135_v31, %s590_s22  ;;  %v124_v31 = vld [vmem:[%s1561_s0 + $0x1d0] sm:$0xf] }
  0x6e   :  { %v1195_v14 = vmax.bf16 %v126_v5, %v124_v31 }
  0x70   :  { %374 = vrot.lane.b32.xlu1 %v1151_v56, %s590_s22 }
  0x71   :  { %372 = vrot.lane.b32.xlu0 %v1155_v57, %s590_s22  ;;  %v131_v57 = vld [vmem:[%s1561_s0 + $0x1ec] sm:$0xf] }
  0x74   :  { %378 = vrot.lane.b32.xlu1 %v1171_v32, %s590_s22  ;;  %v1213_v32 = vmax.bf16 %v131_v57, %v129_v15  ;;  %v132_v57 = vld [vmem:[%s1561_s0 + $0x1f0] sm:$0xf]  ;;  %v134_v15 = vld [vmem:[%s1561_s0 + $0x1f8] sm:$0xf] }
  0x75   :  { %376 = vrot.lane.b32.xlu0 %v1175_v33, %s590_s22 }
  0x76   :  { %v269_v56 = vpop.permute.xlu1 %268 }
  0x77   :  { %v458_v31 = vmax.bf16 %v269_v56, %v610_v3  ;;  %v265_v5 = vpop.permute.xlu0 %264  ;;  %v133_v3 = vld [vmem:[%s1561_s0 + $0x1f4] sm:$0xf] }
  0x78   :  { %v456_v33 = vmax.bf16 %v265_v5, %v621_v7  ;;  %382 = vrot.lane.b32.xlu1 %v1191_v6, %s590_s22  ;;  %v135_v7 = vld [vmem:[%s1561_s0 + $0x1fc] sm:$0xf] }
  0x79   :  { %523 = vst.msk [vmem:[%s1562_s1 + $0x8] sm:$0xf] %vm520_vm0, %v458_v31  ;;  %380 = vrot.lane.b32.xlu0 %v1195_v14, %s590_s22  ;;  %v1243_v5 = vmax.bf16 %v135_v7, %v133_v3 }
  0x7a   :  { %521 = vst.msk [vmem:[%s1562_s1] sm:$0xf] %vm520_vm0, %v456_v33  ;;  %v271_v56 = vpop.permute.xlu1 %270  ;;  %v1251_v33 = vmax.bf16 %v134_v15, %v132_v57 }
  0x7b   :  { %v459_v48 = vmax.bf16 %v271_v56, %v631_v10  ;;  %v267_v49 = vpop.permute.xlu0 %266 }
  0x7c   :  { %v457_v31 = vmax.bf16 %v267_v49, %v635_v11  ;;  %386 = vrot.lane.b32.xlu1 %v1213_v32, %s590_s22 }
  0x7d   :  { %524 = vst.msk [vmem:[%s1562_s1 + $0xc] sm:$0xf] %vm520_vm0, %v459_v48  ;;  %384 = vrot.lane.b32.xlu0 %v1221_v30, %s590_s22 }
  0x7e   :  { %522 = vst.msk [vmem:[%s1562_s1 + $0x4] sm:$0xf] %vm520_vm0, %v457_v31  ;;  %v275_v10 = vpop.permute.xlu1 %274 }
  0x7f   :  { %v461_v11 = vmax.bf16 %v275_v10, %v651_v16  ;;  %v273_v3 = vpop.permute.xlu0 %272 }
  0x80   :  { %v460_v7 = vmax.bf16 %v273_v3, %v655_v17  ;;  %390 = vrot.lane.b32.xlu1 %v1243_v5, %s590_s22 }
  0x81   :  { %526 = vst.msk [vmem:[%s1562_s1 + $0x14] sm:$0xf] %vm520_vm0, %v461_v11  ;;  %388 = vrot.lane.b32.xlu0 %v1251_v33, %s590_s22 }
  0x82   :  { %525 = vst.msk [vmem:[%s1562_s1 + $0x10] sm:$0xf] %vm520_vm0, %v460_v7  ;;  %v279_v16 = vpop.permute.xlu1 %278 }
  0x83   :  { %v463_v56 = vmax.bf16 %v279_v16, %v671_v22  ;;  %v277_v17 = vpop.permute.xlu0 %276 }
  0x84   :  { %v462_v57 = vmax.bf16 %v277_v17, %v675_v23 }
  0x85   :  { %528 = vst.msk [vmem:[%s1562_s1 + $0x1c] sm:$0xf] %vm520_vm0, %v463_v56 }
  0x86   :  { %527 = vst.msk [vmem:[%s1562_s1 + $0x18] sm:$0xf] %vm520_vm0, %v462_v57  ;;  %v283_v15 = vpop.permute.xlu1 %282 }
  0x87   :  { %v465_v48 = vmax.bf16 %v283_v15, %v691_v28  ;;  %v281_v49 = vpop.permute.xlu0 %280 }
  0x88   :  { %v464_v31 = vmax.bf16 %v281_v49, %v695_v29 }
  0x89   :  { %530 = vst.msk [vmem:[%s1562_s1 + $0x24] sm:$0xf] %vm520_vm0, %v465_v48 }
  0x8a   :  { %529 = vst.msk [vmem:[%s1562_s1 + $0x20] sm:$0xf] %vm520_vm0, %v464_v31  ;;  %v287_v22 = vpop.permute.xlu1 %286 }
  0x8b   :  { %v467_v23 = vmax.bf16 %v287_v22, %v711_v34  ;;  %v285_v10 = vpop.permute.xlu0 %284 }
  0x8c   :  { %v466_v11 = vmax.bf16 %v285_v10, %v715_v35 }
  0x8d   :  { %532 = vst.msk [vmem:[%s1562_s1 + $0x2c] sm:$0xf] %vm520_vm0, %v467_v23 }
  0x8e   :  { %531 = vst.msk [vmem:[%s1562_s1 + $0x28] sm:$0xf] %vm520_vm0, %v466_v11  ;;  %v291_v28 = vpop.permute.xlu1 %290 }
  0x8f   :  { %v469_v29 = vmax.bf16 %v291_v28, %v731_v40  ;;  %v289_v3 = vpop.permute.xlu0 %288 }
  0x90   :  { %v468_v7 = vmax.bf16 %v289_v3, %v735_v41 }
  0x91   :  { %534 = vst.msk [vmem:[%s1562_s1 + $0x34] sm:$0xf] %vm520_vm0, %v469_v29 }
  0x92   :  { %533 = vst.msk [vmem:[%s1562_s1 + $0x30] sm:$0xf] %vm520_vm0, %v468_v7  ;;  %v295_v34 = vpop.permute.xlu1 %294 }
  0x93   :  { %v471_v35 = vmax.bf16 %v295_v34, %v751_v46  ;;  %v293_v16 = vpop.permute.xlu0 %292 }
  0x94   :  { %v470_v56 = vmax.bf16 %v293_v16, %v755_v47 }
  0x95   :  { %536 = vst.msk [vmem:[%s1562_s1 + $0x3c] sm:$0xf] %vm520_vm0, %v471_v35 }
  0x96   :  { %535 = vst.msk [vmem:[%s1562_s1 + $0x38] sm:$0xf] %vm520_vm0, %v470_v56  ;;  %v299_v40 = vpop.permute.xlu1 %298 }
  0x97   :  { %v473_v41 = vmax.bf16 %v299_v40, %v771_v52  ;;  %v297_v17 = vpop.permute.xlu0 %296 }
  0x98   :  { %v472_v57 = vmax.bf16 %v297_v17, %v775_v53 }
  0x99   :  { %538 = vst.msk [vmem:[%s1562_s1 + $0x44] sm:$0xf] %vm520_vm0, %v473_v41 }
  0x9a   :  { %537 = vst.msk [vmem:[%s1562_s1 + $0x40] sm:$0xf] %vm520_vm0, %v472_v57  ;;  %v303_v46 = vpop.permute.xlu1 %302 }
  0x9b   :  { %v475_v47 = vmax.bf16 %v303_v46, %v791_v58  ;;  %v301_v15 = vpop.permute.xlu0 %300 }
  0x9c   :  { %v474_v48 = vmax.bf16 %v301_v15, %v795_v59 }
  0x9d   :  { %540 = vst.msk [vmem:[%s1562_s1 + $0x4c] sm:$0xf] %vm520_vm0, %v475_v47 }
  0x9e   :  { %539 = vst.msk [vmem:[%s1562_s1 + $0x48] sm:$0xf] %vm520_vm0, %v474_v48  ;;  %v307_v52 = vpop.permute.xlu1 %306 }
  0x9f   :  { %v477_v53 = vmax.bf16 %v307_v52, %v811_v0  ;;  %v305_v49 = vpop.permute.xlu0 %304 }
  0xa0   :  { %v476_v31 = vmax.bf16 %v305_v49, %v815_v1 }
  0xa1   :  { %542 = vst.msk [vmem:[%s1562_s1 + $0x54] sm:$0xf] %vm520_vm0, %v477_v53 }
  0xa2   :  { %541 = vst.msk [vmem:[%s1562_s1 + $0x50] sm:$0xf] %vm520_vm0, %v476_v31  ;;  %v311_v58 = vpop.permute.xlu1 %310 }
  0xa3   :  { %v479_v59 = vmax.bf16 %v311_v58, %v831_v8  ;;  %v309_v22 = vpop.permute.xlu0 %308 }
  0xa4   :  { %v478_v23 = vmax.bf16 %v309_v22, %v835_v9 }
  0xa5   :  { %544 = vst.msk [vmem:[%s1562_s1 + $0x5c] sm:$0xf] %vm520_vm0, %v479_v59 }
  0xa6   :  { %543 = vst.msk [vmem:[%s1562_s1 + $0x58] sm:$0xf] %vm520_vm0, %v478_v23  ;;  %v315_v0 = vpop.permute.xlu1 %314 }
  0xa7   :  { %v481_v1 = vmax.bf16 %v315_v0, %v851_v18  ;;  %v313_v10 = vpop.permute.xlu0 %312 }
  0xa8   :  { %v480_v11 = vmax.bf16 %v313_v10, %v855_v19 }
  0xa9   :  { %546 = vst.msk [vmem:[%s1562_s1 + $0x64] sm:$0xf] %vm520_vm0, %v481_v1 }
  0xaa   :  { %545 = vst.msk [vmem:[%s1562_s1 + $0x60] sm:$0xf] %vm520_vm0, %v480_v11  ;;  %v319_v8 = vpop.permute.xlu1 %318 }
  0xab   :  { %v483_v9 = vmax.bf16 %v319_v8, %v871_v26  ;;  %v317_v28 = vpop.permute.xlu0 %316  ;;  %v1576_v8 = vld [vmem:[#allocation3_spill] sm:$0xff] }
  0xac   :  { %v482_v29 = vmax.bf16 %v317_v28, %v875_v27 }
  0xad   :  { %548 = vst.msk [vmem:[%s1562_s1 + $0x6c] sm:$0xf] %vm520_vm0, %v483_v9 }
  0xae   :  { %547 = vst.msk [vmem:[%s1562_s1 + $0x68] sm:$0xf] %vm520_vm0, %v482_v29  ;;  %v323_v18 = vpop.permute.xlu1 %322 }
  0xaf   :  { %v485_v19 = vmax.bf16 %v323_v18, %v891_v36  ;;  %v321_v3 = vpop.permute.xlu0 %320  ;;  %v1578_v18 = vld [vmem:[#allocation5_spill] sm:$0xff] }
  0xb0   :  { %v484_v7 = vmax.bf16 %v321_v3, %v895_v37 }
  0xb1   :  { %550 = vst.msk [vmem:[%s1562_s1 + $0x74] sm:$0xf] %vm520_vm0, %v485_v19 }
  0xb2   :  { %549 = vst.msk [vmem:[%s1562_s1 + $0x70] sm:$0xf] %vm520_vm0, %v484_v7  ;;  %v327_v26 = vpop.permute.xlu1 %326  ;;  %v1579_v7 = vld [vmem:[#allocation6_spill] sm:$0xff] }
  0xb3   :  { %v487_v27 = vmax.bf16 %v327_v26, %v911_v44  ;;  %v325_v34 = vpop.permute.xlu0 %324 }
  0xb4   :  { %v486_v35 = vmax.bf16 %v325_v34, %v915_v45  ;;  %v1580_v34 = vld [vmem:[#allocation7_spill] sm:$0xff] }
  0xb5   :  { %552 = vst.msk [vmem:[%s1562_s1 + $0x7c] sm:$0xf] %vm520_vm0, %v487_v27 }
  0xb6   :  { %551 = vst.msk [vmem:[%s1562_s1 + $0x78] sm:$0xf] %vm520_vm0, %v486_v35  ;;  %v331_v36 = vpop.permute.xlu1 %330 }
  0xb7   :  { %v489_v37 = vmax.bf16 %v331_v36, %v931_v54  ;;  %v329_v16 = vpop.permute.xlu0 %328 }
  0xb8   :  { %v488_v56 = vmax.bf16 %v329_v16, %v935_v55 }
  0xb9   :  { %554 = vst.msk [vmem:[%s1562_s1 + $0x84] sm:$0xf] %vm520_vm0, %v489_v37 }
  0xba   :  { %553 = vst.msk [vmem:[%s1562_s1 + $0x80] sm:$0xf] %vm520_vm0, %v488_v56  ;;  %v335_v44 = vpop.permute.xlu1 %334 }
  0xbb   :  { %v491_v45 = vmax.bf16 %v335_v44, %v951_v62  ;;  %v333_v40 = vpop.permute.xlu0 %332 }
  0xbc   :  { %v490_v41 = vmax.bf16 %v333_v40, %v955_v63 }
  0xbd   :  { %556 = vst.msk [vmem:[%s1562_s1 + $0x8c] sm:$0xf] %vm520_vm0, %v491_v45 }
  0xbe   :  { %555 = vst.msk [vmem:[%s1562_s1 + $0x88] sm:$0xf] %vm520_vm0, %v490_v41  ;;  %v339_v54 = vpop.permute.xlu1 %338 }
  0xbf   :  { %v493_v55 = vmax.bf16 %v339_v54, %v971_v12  ;;  %v337_v17 = vpop.permute.xlu0 %336 }
  0xc0   :  { %v492_v57 = vmax.bf16 %v337_v17, %v975_v13 }
  0xc1   :  { %558 = vst.msk [vmem:[%s1562_s1 + $0x94] sm:$0xf] %vm520_vm0, %v493_v55 }
  0xc2   :  { %557 = vst.msk [vmem:[%s1562_s1 + $0x90] sm:$0xf] %vm520_vm0, %v492_v57  ;;  %v343_v62 = vpop.permute.xlu1 %342 }
  0xc3   :  { %v495_v63 = vmax.bf16 %v343_v62, %v991_v24  ;;  %v341_v46 = vpop.permute.xlu0 %340 }
  0xc4   :  { %v494_v47 = vmax.bf16 %v341_v46, %v995_v25 }
  0xc5   :  { %560 = vst.msk [vmem:[%s1562_s1 + $0x9c] sm:$0xf] %vm520_vm0, %v495_v63 }
  0xc6   :  { %559 = vst.msk [vmem:[%s1562_s1 + $0x98] sm:$0xf] %vm520_vm0, %v494_v47  ;;  %v347_v12 = vpop.permute.xlu1 %346 }
  0xc7   :  { %v497_v13 = vmax.bf16 %v347_v12, %v1011_v38  ;;  %v345_v15 = vpop.permute.xlu0 %344 }
  0xc8   :  { %v496_v48 = vmax.bf16 %v345_v15, %v1015_v39 }
  0xc9   :  { %562 = vst.msk [vmem:[%s1562_s1 + $0xa4] sm:$0xf] %vm520_vm0, %v497_v13 }
  0xca   :  { %561 = vst.msk [vmem:[%s1562_s1 + $0xa0] sm:$0xf] %vm520_vm0, %v496_v48  ;;  %v351_v24 = vpop.permute.xlu1 %350 }
  0xcb   :  { %v499_v25 = vmax.bf16 %v351_v24, %v1031_v50  ;;  %v349_v52 = vpop.permute.xlu0 %348 }
  0xcc   :  { %v498_v53 = vmax.bf16 %v349_v52, %v1035_v51 }
  0xcd   :  { %564 = vst.msk [vmem:[%s1562_s1 + $0xac] sm:$0xf] %vm520_vm0, %v499_v25 }
  0xce   :  { %563 = vst.msk [vmem:[%s1562_s1 + $0xa8] sm:$0xf] %vm520_vm0, %v498_v53  ;;  %v355_v38 = vpop.permute.xlu1 %354 }
  0xcf   :  { %v501_v39 = vmax.bf16 %v355_v38, %v1051_v2  ;;  %v353_v49 = vpop.permute.xlu0 %352 }
  0xd0   :  { %v500_v31 = vmax.bf16 %v353_v49, %v1055_v4 }
  0xd1   :  { %566 = vst.msk [vmem:[%s1562_s1 + $0xb4] sm:$0xf] %vm520_vm0, %v501_v39 }
  0xd2   :  { %565 = vst.msk [vmem:[%s1562_s1 + $0xb0] sm:$0xf] %vm520_vm0, %v500_v31  ;;  %v359_v50 = vpop.permute.xlu1 %358 }
  0xd3   :  { %v503_v51 = vmax.bf16 %v359_v50, %v1071_v20  ;;  %v357_v58 = vpop.permute.xlu0 %356 }
  0xd4   :  { %v502_v59 = vmax.bf16 %v357_v58, %v1075_v21 }
  0xd5   :  { %568 = vst.msk [vmem:[%s1562_s1 + $0xbc] sm:$0xf] %vm520_vm0, %v503_v51 }
  0xd6   :  { %567 = vst.msk [vmem:[%s1562_s1 + $0xb8] sm:$0xf] %vm520_vm0, %v502_v59  ;;  %v363_v2 = vpop.permute.xlu1 %362 }
  0xd7   :  { %v505_v4 = vmax.bf16 %v363_v2, %v1091_v42  ;;  %v361_v22 = vpop.permute.xlu0 %360 }
  0xd8   :  { %v504_v23 = vmax.bf16 %v361_v22, %v1095_v43  ;;  %v1575_v43 = vld [vmem:[#allocation2_spill] sm:$0xff] }
  0xd9   :  { %570 = vst.msk [vmem:[%s1562_s1 + $0xc4] sm:$0xf] %vm520_vm0, %v505_v4 }
  0xda   :  { %569 = vst.msk [vmem:[%s1562_s1 + $0xc0] sm:$0xf] %vm520_vm0, %v504_v23  ;;  %v367_v20 = vpop.permute.xlu1 %366 }
  0xdb   :  { %v507_v21 = vmax.bf16 %v367_v20, %v1111_v60  ;;  %v365_v0 = vpop.permute.xlu0 %364 }
  0xdc   :  { %v506_v1 = vmax.bf16 %v365_v0, %v1115_v61  ;;  %v1577_v61 = vld [vmem:[#allocation4_spill] sm:$0xff] }
  0xdd   :  { %572 = vst.msk [vmem:[%s1562_s1 + $0xcc] sm:$0xf] %vm520_vm0, %v507_v21 }
  0xde   :  { %571 = vst.msk [vmem:[%s1562_s1 + $0xc8] sm:$0xf] %vm520_vm0, %v506_v1  ;;  %v371_v42 = vpop.permute.xlu1 %370 }
  0xdf   :  { %v509_v10 = vmax.bf16 %v371_v42, %v1575_v43  ;;  %v369_v11 = vpop.permute.xlu0 %368 }
  0xe0   :  { %v508_v9 = vmax.bf16 %v369_v11, %v1576_v8 }
  0xe1   :  { %574 = vst.msk [vmem:[%s1562_s1 + $0xd4] sm:$0xf] %vm520_vm0, %v509_v10 }
  0xe2   :  { %573 = vst.msk [vmem:[%s1562_s1 + $0xd0] sm:$0xf] %vm520_vm0, %v508_v9  ;;  %v375_v60 = vpop.permute.xlu1 %374 }
  0xe3   :  { %v511_v28 = vmax.bf16 %v375_v60, %v1577_v61  ;;  %v373_v29 = vpop.permute.xlu0 %372 }
  0xe4   :  { %v510_v19 = vmax.bf16 %v373_v29, %v1578_v18 }
  0xe5   :  { %576 = vst.msk [vmem:[%s1562_s1 + $0xdc] sm:$0xf] %vm520_vm0, %v511_v28 }
  0xe6   :  { %575 = vst.msk [vmem:[%s1562_s1 + $0xd8] sm:$0xf] %vm520_vm0, %v510_v19  ;;  %v379_v3 = vpop.permute.xlu1 %378 }
  0xe7   :  { %v513_v26 = vmax.bf16 %v379_v3, %v1579_v7  ;;  %v377_v27 = vpop.permute.xlu0 %376 }
  0xe8   :  { %v512_v35 = vmax.bf16 %v377_v27, %v1580_v34 }
  0xe9   :  { %578 = vst.msk [vmem:[%s1562_s1 + $0xe4] sm:$0xf] %vm520_vm0, %v513_v26 }
  0xea   :  { %577 = vst.msk [vmem:[%s1562_s1 + $0xe0] sm:$0xf] %vm520_vm0, %v512_v35  ;;  %v383_v36 = vpop.permute.xlu1 %382 }
  0xeb   :  { %v515_v37 = vmax.bf16 %v383_v36, %v1191_v6  ;;  %v381_v16 = vpop.permute.xlu0 %380 }
  0xec   :  { %v514_v56 = vmax.bf16 %v381_v16, %v1195_v14 }
  0xed   :  { %580 = vst.msk [vmem:[%s1562_s1 + $0xec] sm:$0xf] %vm520_vm0, %v515_v37 }
  0xee   :  { %579 = vst.msk [vmem:[%s1562_s1 + $0xe8] sm:$0xf] %vm520_vm0, %v514_v56  ;;  %v387_v44 = vpop.permute.xlu1 %386 }
  0xef   :  { %v517_v45 = vmax.bf16 %v387_v44, %v1213_v32  ;;  %v385_v40 = vpop.permute.xlu0 %384 }
  0xf0   :  { %v516_v41 = vmax.bf16 %v385_v40, %v1221_v30 }
  0xf1   :  { %582 = vst.msk [vmem:[%s1562_s1 + $0xf4] sm:$0xf] %vm520_vm0, %v517_v45 }
  0xf2   :  { %581 = vst.msk [vmem:[%s1562_s1 + $0xf0] sm:$0xf] %vm520_vm0, %v516_v41  ;;  %v391_v6 = vpop.permute.xlu1 %390 }
  0xf3   :  { %v519_v14 = vmax.bf16 %v391_v6, %v1243_v5  ;;  %v389_v54 = vpop.permute.xlu0 %388 }
  0xf4   :  { %v518_v55 = vmax.bf16 %v389_v54, %v1251_v33 }
  0xf5   :  { %584 = vst.msk [vmem:[%s1562_s1 + $0xfc] sm:$0xf] %vm520_vm0, %v519_v14 }
  0xf6   :  { %583 = vst.msk [vmem:[%s1562_s1 + $0xf8] sm:$0xf] %vm520_vm0, %v518_v55 }

// kernel: vae_forward.11
= control target key start
LH: loop header
LB: loop body
LE: loop exit
PB: predicated region body
PF: predicated region fallthrough
CT: control target
= control target key end

     0   :  { %s1639_s12 = smov 0   ;;  %s1934_s0 = inlined_call_operand.vmem [shape: bf16[2048,27], index: 0, kind: input, shape index: {}]   ;;  %s1935_s1 = inlined_call_operand.vmem [shape: bf16[27,12], index: 1, kind: input, shape index: {}]   ;;  %s1936_s2 = inlined_call_operand.vmem [shape: f32[1,12], index: 2, kind: input, shape index: {}]   ;;  %s1937_s3 = inlined_call_operand.vmem [shape: bf16[2048,12], index: 3, kind: output, shape index: {}]  }
   0x1 LB: > { %s1255_s13 = sadd.s32 4294967295, %s1616_s12   ;;  %p1259_p0 = scmp.ge.s32.totalorder %s1616_s12, 1  ;;  %s1616_s12 = sphi %s1639_s12, %s13_s12  }
   0x2   : > { %p138_p1 = scmp.lt.s32.totalorder %s1616_s12, 5 }
   0x4   : > { %p139_p2 = pnand %p1259_p0, %p138_p1 }
   0x5   : > { %v1576_v0 = vld [vmem:[%s1935_s1] sm:$0xff] (!%p139_p2)   ;;  %vm518_vm0 = vcmask (!%p139_p2), 1044480   ;;  %v1577_v1 = vld [vmem:[%s1935_s1 + $0x8] sm:$0x3f] (!%p139_p2)   ;;  %vm519_vm1 = vcmask (!%p139_p2), 1045504   ;;  %s1260_s18 = sshll.u32 (!%p139_p2), %s1255_s13, 6 }
   0x6   : > { %142 = sbr.rel (%p139_p2) target bundleno = 297 (0x129), region = 32  ;;  %1495 = vmatprep.subr.bf16.mxu0 (!%p139_p2), %v1576_v0  ;;  %1563 = vmatprep.subr.bf16.mxu1 (!%p139_p2), %v1576_v0  ;;  %v1618_v2 = vmov (!%p139_p2), 65535   ;;  %p163_p3 = scmp.lt.s32.totalorder (!%p139_p2), %s1260_s18, 255  ;;  %vm421_vm2 = vcmask (!%p139_p2), 220160   ;;  %v1730_v38 = vld [vmem:[%s1936_s2] ss:$0 sm:$0xff] (!%p139_p2) }
   0x7   : > { %1496 = vmatpush3.bf16.msra.mxu0 (!%p139_p2), %v1576_v0  ;;  %1565 = vmatpush3.bf16.msra.mxu1 (!%p139_p2), %v1576_v0  ;;  %v520_v3 = vsel (!%p139_p2), %vm518_vm0, 4294967295, %v1618_v2  ;;  %vm1134_vm3 = vcmask (!%p139_p2), 93184  }
   0x8   : > { %v521_v4 = vsel (!%p139_p2), %vm519_vm1, %v520_v3, 0 }
   0x9   : > { %v523_v5 = vand.u32 (!%p139_p2), %v1577_v1, %v521_v4 }
   0xb   : > { %1497 = vmatprep.subr.bf16.mxu0 (!%p139_p2), %v523_v5  ;;  %1564 = vmatprep.subr.bf16.mxu1 (!%p139_p2), %v523_v5 }
   0xc   : > { %1498 = vmatpush3.bf16.msra.mxu0 (!%p139_p2), %v523_v5  ;;  %1566 = vmatpush3.bf16.msra.mxu1 (!%p139_p2), %v523_v5 }
   0xd   : > { %s1939_s18 = smov (!%p163_p3, %s1260_s18), 255 }
   0xe   : > { %s1261_s19 = sshll.u32 %s1939_s18, 2 }
   0xf   : > { %s1661_s22 = scalar_lea.vmem %s1934_s0, %s1261_s19  ;;  %s1742_s27 = scalar_lea.vmem %s1937_s3, %s1261_s19 }
  0x10   : > { %v1578_v6 = vld [vmem:[%s1661_s22] sm:$0xff]   ;;  %v1580_v8 = vld [vmem:[%s1661_s22 + $0x8] sm:$0xff]   ;;  %v1582_v10 = vld [vmem:[%s1661_s22 + $0x10] sm:$0xff]  }
  0x11   : > { %v1579_v7 = vld [vmem:[%s1661_s22 + $0x80] sm:$0xff]   ;;  %1499 = vmatprep.mubr.msk.bf16.mxu0 %vm421_vm2, %v1578_v6  ;;  %v1581_v9 = vld [vmem:[%s1661_s22 + $0x88] sm:$0xff]   ;;  %v1583_v11 = vld [vmem:[%s1661_s22 + $0x90] sm:$0xff]  }
  0x12   : > { %1531 = vmatprep.mubr.msk.bf16.mxu1 %vm421_vm2, %v1579_v7  ;;  %1500 = vmatmul.mubr.msk.bf16.vlgmr.msra.gmra.mrb[0].mxu0 %vm421_vm2, %v1580_v8  ;;  %v1584_v12 = vld [vmem:[%s1661_s22 + $0x18] sm:$0xff]   ;;  %v1586_v14 = vld [vmem:[%s1661_s22 + $0x20] sm:$0xff]   ;;  %v1588_v16 = vld [vmem:[%s1661_s22 + $0x28] sm:$0xff]  }
  0x13   : > { %1532 = vmatmul.mubr.msk.bf16.vlgmr.msra.gmra.mrb[0].mxu1 %vm421_vm2, %v1581_v9  ;;  %1503 = vmatprep.mubr.msk.bf16.mxu0 %vm421_vm2, %v1582_v10  ;;  %v1585_v13 = vld [vmem:[%s1661_s22 + $0x98] sm:$0xff]   ;;  %v1587_v15 = vld [vmem:[%s1661_s22 + $0xa0] sm:$0xff]   ;;  %v1589_v17 = vld [vmem:[%s1661_s22 + $0xa8] sm:$0xff]  }
  0x14   : > { %1535 = vmatprep.mubr.msk.bf16.mxu1 %vm421_vm2, %v1583_v11  ;;  %v1590_v18 = vld [vmem:[%s1661_s22 + $0x30] sm:$0xff]   ;;  %v1592_v20 = vld [vmem:[%s1661_s22 + $0x38] sm:$0xff]   ;;  %v1594_v22 = vld [vmem:[%s1661_s22 + $0x40] sm:$0xff]  }
  0x15   : > { %v1591_v19 = vld [vmem:[%s1661_s22 + $0xb0] sm:$0xff]   ;;  %v1593_v21 = vld [vmem:[%s1661_s22 + $0xb8] sm:$0xff]   ;;  %v1595_v23 = vld [vmem:[%s1661_s22 + $0xc0] sm:$0xff]  }
  0x16   : > { %v1596_v24 = vld [vmem:[%s1661_s22 + $0x48] sm:$0xff]   ;;  %v1598_v26 = vld [vmem:[%s1661_s22 + $0x50] sm:$0xff]   ;;  %v1600_v28 = vld [vmem:[%s1661_s22 + $0x58] sm:$0xff]  }
  0x17   : > { %v1597_v25 = vld [vmem:[%s1661_s22 + $0xc8] sm:$0xff]   ;;  %v1599_v27 = vld [vmem:[%s1661_s22 + $0xd0] sm:$0xff]   ;;  %v1601_v29 = vld [vmem:[%s1661_s22 + $0xd8] sm:$0xff]  }
  0x18   : > { %v1602_v30 = vld [vmem:[%s1661_s22 + $0x60] sm:$0xff]   ;;  %v1604_v32 = vld [vmem:[%s1661_s22 + $0x68] sm:$0xff]   ;;  %v1606_v34 = vld [vmem:[%s1661_s22 + $0x70] sm:$0xff]  }
  0x19   : > { %v1603_v31 = vld [vmem:[%s1661_s22 + $0xe0] sm:$0xff]   ;;  %v1605_v33 = vld [vmem:[%s1661_s22 + $0xe8] sm:$0xff]   ;;  %v1607_v35 = vld [vmem:[%s1661_s22 + $0xf0] sm:$0xff]  }
  0x1a   : > { %1504 = vmatmul.mubr.msk.bf16.gmra.mrb[4].mxu0 %vm421_vm2, %v1584_v12  ;;  %v1608_v36 = vld [vmem:[%s1661_s22 + $0x78] sm:$0xff]  }
  0x1b   : > { %1536 = vmatmul.mubr.msk.bf16.gmra.mrb[4].mxu1 %vm421_vm2, %v1585_v13  ;;  %1507 = vmatprep.mubr.msk.bf16.mxu0 %vm421_vm2, %v1586_v14  ;;  %v1609_v37 = vld [vmem:[%s1661_s22 + $0xf8] sm:$0xff]  }
  0x1c   : > { %1539 = vmatprep.mubr.msk.bf16.mxu1 %vm421_vm2, %v1587_v15 }
  0x22   : > { %1508 = vmatmul.mubr.msk.bf16.gmra.mrb[8].mxu0 %vm421_vm2, %v1588_v16 }
  0x23   : > { %1540 = vmatmul.mubr.msk.bf16.gmra.mrb[8].mxu1 %vm421_vm2, %v1589_v17  ;;  %1511 = vmatprep.mubr.msk.bf16.mxu0 %vm421_vm2, %v1590_v18 }
  0x24   : > { %1543 = vmatprep.mubr.msk.bf16.mxu1 %vm421_vm2, %v1591_v19 }
  0x2a   : > { %1512 = vmatmul.mubr.msk.bf16.gmra.mrb[12].mxu0 %vm421_vm2, %v1592_v20 }
  0x2b   : > { %1544 = vmatmul.mubr.msk.bf16.gmra.mrb[12].mxu1 %vm421_vm2, %v1593_v21  ;;  %1515 = vmatprep.mubr.msk.bf16.mxu0 %vm421_vm2, %v1594_v22 }
  0x2c   : > { %1547 = vmatprep.mubr.msk.bf16.mxu1 %vm421_vm2, %v1595_v23 }
  0x32   : > { %1516 = vmatmul.mubr.msk.bf16.gmra.mrb[16].mxu0 %vm421_vm2, %v1596_v24 }
  0x33   : > { %1548 = vmatmul.mubr.msk.bf16.gmra.mrb[16].mxu1 %vm421_vm2, %v1597_v25  ;;  %1519 = vmatprep.mubr.msk.bf16.mxu0 %vm421_vm2, %v1598_v26 }
  0x34   : > { %1551 = vmatprep.mubr.msk.bf16.mxu1 %vm421_vm2, %v1599_v27 }
  0x3a   : > { %1520 = vmatmul.mubr.msk.bf16.gmra.mrb[20].mxu0 %vm421_vm2, %v1600_v28 }
  0x3b   : > { %1552 = vmatmul.mubr.msk.bf16.gmra.mrb[20].mxu1 %vm421_vm2, %v1601_v29  ;;  %1523 = vmatprep.mubr.msk.bf16.mxu0 %vm421_vm2, %v1602_v30 }
  0x3c   : > { %1555 = vmatprep.mubr.msk.bf16.mxu1 %vm421_vm2, %v1603_v31 }
  0x42   : > { %1524 = vmatmul.mubr.msk.bf16.gmra.mrb[24].mxu0 %vm421_vm2, %v1604_v32 }
  0x43   : > { %1556 = vmatmul.mubr.msk.bf16.gmra.mrb[24].mxu1 %vm421_vm2, %v1605_v33  ;;  %1527 = vmatprep.mubr.msk.bf16.mxu0 %vm421_vm2, %v1606_v34 }
  0x44   : > { %1559 = vmatprep.mubr.msk.bf16.mxu1 %vm421_vm2, %v1607_v35 }
  0x4a   : > { %1528 = vmatmul.mubr.msk.bf16.gmra.mrb[28].mxu0 %vm421_vm2, %v1608_v36 }
  0x4b   : > { %1560 = vmatmul.mubr.msk.bf16.gmra.mrb[28].mxu1 %vm421_vm2, %v1609_v37 }
  0xe5   : > { %v1501_v39 = vpop.f32.mrb[0].mxu0 }
  0xe6   : > { %v568_v40 = vadd.f32 %v1501_v39, %v1730_v38  ;;  %v1533_v41 = vpop.f32.mrb[0].mxu1  ;;  %v559_v42 = vpop.f32.mrb[1].mxu0 }
  0xe7   : > { %v696_v43 = vadd.f32 %v1533_v41, %v1730_v38  ;;  %v560_v44 = vadd.f32 %v1730_v38, %v559_v42  ;;  %v687_v45 = vpop.f32.mrb[1].mxu1  ;;  %v1502_v46 = vpop.f32.mrb[2].mxu0 }
  0xe8   : > { %v816_v47 = vmax.f32 %v568_v40, 0.0  ;;  %v688_v48 = vadd.f32 %v1730_v38, %v687_v45  ;;  %v571_v49 = vadd.f32 %v1502_v46, %v1730_v38  ;;  %v1534_v50 = vpop.f32.mrb[2].mxu1  ;;  %v562_v51 = vpop.f32.mrb[3].mxu0 }
  0xe9   : > { %v848_v52 = vmax.f32 %v696_v43, 0.0  ;;  %v814_v53 = vmax.f32 %v560_v44, 0.0  ;;  %v699_v54 = vadd.f32 %v1534_v50, %v1730_v38  ;;  %v563_v55 = vadd.f32 %v1730_v38, %v562_v51  ;;  %v690_v56 = vpop.f32.mrb[3].mxu1 }
  0xea   : > { %v1399_v57 = vpack.c.bf16 %v816_v47, %v816_v47  ;;  %v846_v58 = vmax.f32 %v688_v48, 0.0  ;;  %v817_v59 = vmax.f32 %v571_v49, 0.0  ;;  %v691_v60 = vadd.f32 %v1730_v38, %v690_v56 }
  0xeb   : > { %v1431_v61 = vpack.c.bf16 %v848_v52, %v848_v52  ;;  %v1397_v62 = vpack.c.bf16 %v814_v53, %v814_v53  ;;  %v849_v63 = vmax.f32 %v699_v54, 0.0  ;;  %v815_v0 = vmax.f32 %v563_v55, 0.0 }
  0xec   : > { %1137 = vst.msk [vmem:[%s1742_s27 + $0x8] sm:$0xf] %vm1134_vm3, %v1399_v57  ;;  %v1429_v1 = vpack.c.bf16 %v846_v58, %v846_v58  ;;  %v1400_v2 = vpack.c.bf16 %v817_v59, %v817_v59  ;;  %v847_v3 = vmax.f32 %v691_v60, 0.0 }
  0xed   : > { %1169 = vst.msk [vmem:[%s1742_s27 + $0x88] sm:$0xf] %vm1134_vm3, %v1431_v61  ;;  %1135 = vst.msk [vmem:[%s1742_s27] sm:$0xf] %vm1134_vm3, %v1397_v62  ;;  %v1432_v4 = vpack.c.bf16 %v849_v63, %v849_v63  ;;  %v1398_v5 = vpack.c.bf16 %v815_v0, %v815_v0  ;;  %v1505_v6 = vpop.f32.mrb[4].mxu0 }
  0xee   : > { %1167 = vst.msk [vmem:[%s1742_s27 + $0x80] sm:$0xf] %vm1134_vm3, %v1429_v1  ;;  %1138 = vst.msk [vmem:[%s1742_s27 + $0xc] sm:$0xf] %vm1134_vm3, %v1400_v2  ;;  %v1430_v7 = vpack.c.bf16 %v847_v3, %v847_v3  ;;  %v584_v8 = vadd.f32 %v1505_v6, %v1730_v38  ;;  %v1537_v9 = vpop.f32.mrb[4].mxu1  ;;  %v575_v10 = vpop.f32.mrb[5].mxu0 }
  0xef   : > { %1170 = vst.msk [vmem:[%s1742_s27 + $0x8c] sm:$0xf] %vm1134_vm3, %v1432_v4  ;;  %1136 = vst.msk [vmem:[%s1742_s27 + $0x4] sm:$0xf] %vm1134_vm3, %v1398_v5  ;;  %v712_v11 = vadd.f32 %v1537_v9, %v1730_v38  ;;  %v576_v12 = vadd.f32 %v1730_v38, %v575_v10  ;;  %v703_v13 = vpop.f32.mrb[5].mxu1  ;;  %v1506_v14 = vpop.f32.mrb[6].mxu0 }
  0xf0   : > { %1168 = vst.msk [vmem:[%s1742_s27 + $0x84] sm:$0xf] %vm1134_vm3, %v1430_v7  ;;  %v820_v15 = vmax.f32 %v584_v8, 0.0  ;;  %v704_v16 = vadd.f32 %v1730_v38, %v703_v13  ;;  %v587_v17 = vadd.f32 %v1506_v14, %v1730_v38  ;;  %v1538_v18 = vpop.f32.mrb[6].mxu1  ;;  %v578_v19 = vpop.f32.mrb[7].mxu0 }
  0xf1   : > { %v852_v20 = vmax.f32 %v712_v11, 0.0  ;;  %v818_v21 = vmax.f32 %v576_v12, 0.0  ;;  %v715_v22 = vadd.f32 %v1538_v18, %v1730_v38  ;;  %v579_v23 = vadd.f32 %v1730_v38, %v578_v19  ;;  %v706_v24 = vpop.f32.mrb[7].mxu1 }
  0xf2   : > { %v1403_v25 = vpack.c.bf16 %v820_v15, %v820_v15  ;;  %v850_v26 = vmax.f32 %v704_v16, 0.0  ;;  %v821_v27 = vmax.f32 %v587_v17, 0.0  ;;  %v707_v28 = vadd.f32 %v1730_v38, %v706_v24 }
  0xf3   : > { %v1435_v29 = vpack.c.bf16 %v852_v20, %v852_v20  ;;  %v1401_v30 = vpack.c.bf16 %v818_v21, %v818_v21  ;;  %v853_v31 = vmax.f32 %v715_v22, 0.0  ;;  %v819_v32 = vmax.f32 %v579_v23, 0.0 }
  0xf4   : > { %1141 = vst.msk [vmem:[%s1742_s27 + $0x18] sm:$0xf] %vm1134_vm3, %v1403_v25  ;;  %v1433_v33 = vpack.c.bf16 %v850_v26, %v850_v26  ;;  %v1404_v34 = vpack.c.bf16 %v821_v27, %v821_v27  ;;  %v851_v35 = vmax.f32 %v707_v28, 0.0 }
  0xf5   : > { %1173 = vst.msk [vmem:[%s1742_s27 + $0x98] sm:$0xf] %vm1134_vm3, %v1435_v29  ;;  %1139 = vst.msk [vmem:[%s1742_s27 + $0x10] sm:$0xf] %vm1134_vm3, %v1401_v30  ;;  %v1436_v36 = vpack.c.bf16 %v853_v31, %v853_v31  ;;  %v1402_v37 = vpack.c.bf16 %v819_v32, %v819_v32  ;;  %v1509_v39 = vpop.f32.mrb[8].mxu0 }
  0xf6   : > { %1171 = vst.msk [vmem:[%s1742_s27 + $0x90] sm:$0xf] %vm1134_vm3, %v1433_v33  ;;  %1142 = vst.msk [vmem:[%s1742_s27 + $0x1c] sm:$0xf] %vm1134_vm3, %v1404_v34  ;;  %v1434_v40 = vpack.c.bf16 %v851_v35, %v851_v35  ;;  %v600_v41 = vadd.f32 %v1509_v39, %v1730_v38  ;;  %v1541_v42 = vpop.f32.mrb[8].mxu1  ;;  %v591_v43 = vpop.f32.mrb[9].mxu0 }
  0xf7   : > { %1174 = vst.msk [vmem:[%s1742_s27 + $0x9c] sm:$0xf] %vm1134_vm3, %v1436_v36  ;;  %1140 = vst.msk [vmem:[%s1742_s27 + $0x14] sm:$0xf] %vm1134_vm3, %v1402_v37  ;;  %v728_v44 = vadd.f32 %v1541_v42, %v1730_v38  ;;  %v592_v45 = vadd.f32 %v1730_v38, %v591_v43  ;;  %v719_v46 = vpop.f32.mrb[9].mxu1  ;;  %v1510_v47 = vpop.f32.mrb[10].mxu0 }
  0xf8   : > { %1172 = vst.msk [vmem:[%s1742_s27 + $0x94] sm:$0xf] %vm1134_vm3, %v1434_v40  ;;  %v824_v48 = vmax.f32 %v600_v41, 0.0  ;;  %v720_v49 = vadd.f32 %v1730_v38, %v719_v46  ;;  %v603_v50 = vadd.f32 %v1510_v47, %v1730_v38  ;;  %v1542_v51 = vpop.f32.mrb[10].mxu1  ;;  %v594_v52 = vpop.f32.mrb[11].mxu0 }
  0xf9   : > { %v856_v53 = vmax.f32 %v728_v44, 0.0  ;;  %v822_v54 = vmax.f32 %v592_v45, 0.0  ;;  %v731_v55 = vadd.f32 %v1542_v51, %v1730_v38  ;;  %v595_v56 = vadd.f32 %v1730_v38, %v594_v52  ;;  %v722_v57 = vpop.f32.mrb[11].mxu1 }
  0xfa   : > { %v1407_v58 = vpack.c.bf16 %v824_v48, %v824_v48  ;;  %v854_v59 = vmax.f32 %v720_v49, 0.0  ;;  %v825_v60 = vmax.f32 %v603_v50, 0.0  ;;  %v723_v61 = vadd.f32 %v1730_v38, %v722_v57 }
  0xfb   : > { %v1439_v62 = vpack.c.bf16 %v856_v53, %v856_v53  ;;  %v1405_v63 = vpack.c.bf16 %v822_v54, %v822_v54  ;;  %v857_v0 = vmax.f32 %v731_v55, 0.0  ;;  %v823_v1 = vmax.f32 %v595_v56, 0.0 }
  0xfc   : > { %1145 = vst.msk [vmem:[%s1742_s27 + $0x28] sm:$0xf] %vm1134_vm3, %v1407_v58  ;;  %v1437_v2 = vpack.c.bf16 %v854_v59, %v854_v59  ;;  %v1408_v3 = vpack.c.bf16 %v825_v60, %v825_v60  ;;  %v855_v4 = vmax.f32 %v723_v61, 0.0 }
  0xfd   : > { %1177 = vst.msk [vmem:[%s1742_s27 + $0xa8] sm:$0xf] %vm1134_vm3, %v1439_v62  ;;  %1143 = vst.msk [vmem:[%s1742_s27 + $0x20] sm:$0xf] %vm1134_vm3, %v1405_v63  ;;  %v1440_v5 = vpack.c.bf16 %v857_v0, %v857_v0  ;;  %v1406_v6 = vpack.c.bf16 %v823_v1, %v823_v1  ;;  %v1513_v7 = vpop.f32.mrb[12].mxu0 }
  0xfe   : > { %1175 = vst.msk [vmem:[%s1742_s27 + $0xa0] sm:$0xf] %vm1134_vm3, %v1437_v2  ;;  %1146 = vst.msk [vmem:[%s1742_s27 + $0x2c] sm:$0xf] %vm1134_vm3, %v1408_v3  ;;  %v1438_v8 = vpack.c.bf16 %v855_v4, %v855_v4  ;;  %v616_v9 = vadd.f32 %v1513_v7, %v1730_v38  ;;  %v1545_v10 = vpop.f32.mrb[12].mxu1  ;;  %v607_v11 = vpop.f32.mrb[13].mxu0 }
  0xff   : > { %1178 = vst.msk [vmem:[%s1742_s27 + $0xac] sm:$0xf] %vm1134_vm3, %v1440_v5  ;;  %1144 = vst.msk [vmem:[%s1742_s27 + $0x24] sm:$0xf] %vm1134_vm3, %v1406_v6  ;;  %v744_v12 = vadd.f32 %v1545_v10, %v1730_v38  ;;  %v608_v13 = vadd.f32 %v1730_v38, %v607_v11  ;;  %v735_v14 = vpop.f32.mrb[13].mxu1  ;;  %v1514_v15 = vpop.f32.mrb[14].mxu0 }
 0x100   : > { %1176 = vst.msk [vmem:[%s1742_s27 + $0xa4] sm:$0xf] %vm1134_vm3, %v1438_v8  ;;  %v828_v16 = vmax.f32 %v616_v9, 0.0  ;;  %v736_v17 = vadd.f32 %v1730_v38, %v735_v14  ;;  %v619_v18 = vadd.f32 %v1514_v15, %v1730_v38  ;;  %v1546_v19 = vpop.f32.mrb[14].mxu1  ;;  %v610_v20 = vpop.f32.mrb[15].mxu0 }
 0x101   : > { %v860_v21 = vmax.f32 %v744_v12, 0.0  ;;  %v826_v22 = vmax.f32 %v608_v13, 0.0  ;;  %v747_v23 = vadd.f32 %v1546_v19, %v1730_v38  ;;  %v611_v24 = vadd.f32 %v1730_v38, %v610_v20  ;;  %v738_v25 = vpop.f32.mrb[15].mxu1 }
 0x102   : > { %v1411_v26 = vpack.c.bf16 %v828_v16, %v828_v16  ;;  %v858_v27 = vmax.f32 %v736_v17, 0.0  ;;  %v829_v28 = vmax.f32 %v619_v18, 0.0  ;;  %v739_v29 = vadd.f32 %v1730_v38, %v738_v25 }
 0x103   : > { %v1443_v30 = vpack.c.bf16 %v860_v21, %v860_v21  ;;  %v1409_v31 = vpack.c.bf16 %v826_v22, %v826_v22  ;;  %v861_v32 = vmax.f32 %v747_v23, 0.0  ;;  %v827_v33 = vmax.f32 %v611_v24, 0.0 }
 0x104   : > { %1149 = vst.msk [vmem:[%s1742_s27 + $0x38] sm:$0xf] %vm1134_vm3, %v1411_v26  ;;  %v1441_v34 = vpack.c.bf16 %v858_v27, %v858_v27  ;;  %v1412_v35 = vpack.c.bf16 %v829_v28, %v829_v28  ;;  %v859_v36 = vmax.f32 %v739_v29, 0.0 }
 0x105   : > { %1181 = vst.msk [vmem:[%s1742_s27 + $0xb8] sm:$0xf] %vm1134_vm3, %v1443_v30  ;;  %1147 = vst.msk [vmem:[%s1742_s27 + $0x30] sm:$0xf] %vm1134_vm3, %v1409_v31  ;;  %v1444_v37 = vpack.c.bf16 %v861_v32, %v861_v32  ;;  %v1410_v39 = vpack.c.bf16 %v827_v33, %v827_v33  ;;  %v1517_v40 = vpop.f32.mrb[16].mxu0 }
 0x106   : > { %1179 = vst.msk [vmem:[%s1742_s27 + $0xb0] sm:$0xf] %vm1134_vm3, %v1441_v34  ;;  %1150 = vst.msk [vmem:[%s1742_s27 + $0x3c] sm:$0xf] %vm1134_vm3, %v1412_v35  ;;  %v1442_v41 = vpack.c.bf16 %v859_v36, %v859_v36  ;;  %v632_v42 = vadd.f32 %v1517_v40, %v1730_v38  ;;  %v1549_v43 = vpop.f32.mrb[16].mxu1  ;;  %v623_v44 = vpop.f32.mrb[17].mxu0 }
 0x107   : > { %1182 = vst.msk [vmem:[%s1742_s27 + $0xbc] sm:$0xf] %vm1134_vm3, %v1444_v37  ;;  %1148 = vst.msk [vmem:[%s1742_s27 + $0x34] sm:$0xf] %vm1134_vm3, %v1410_v39  ;;  %v760_v45 = vadd.f32 %v1549_v43, %v1730_v38  ;;  %v624_v46 = vadd.f32 %v1730_v38, %v623_v44  ;;  %v751_v47 = vpop.f32.mrb[17].mxu1  ;;  %v1518_v48 = vpop.f32.mrb[18].mxu0 }
 0x108   : > { %1180 = vst.msk [vmem:[%s1742_s27 + $0xb4] sm:$0xf] %vm1134_vm3, %v1442_v41  ;;  %v832_v49 = vmax.f32 %v632_v42, 0.0  ;;  %v752_v50 = vadd.f32 %v1730_v38, %v751_v47  ;;  %v635_v51 = vadd.f32 %v1518_v48, %v1730_v38  ;;  %v1550_v52 = vpop.f32.mrb[18].mxu1  ;;  %v626_v53 = vpop.f32.mrb[19].mxu0 }
 0x109   : > { %v864_v54 = vmax.f32 %v760_v45, 0.0  ;;  %v830_v55 = vmax.f32 %v624_v46, 0.0  ;;  %v763_v56 = vadd.f32 %v1550_v52, %v1730_v38  ;;  %v627_v57 = vadd.f32 %v1730_v38, %v626_v53  ;;  %v754_v58 = vpop.f32.mrb[19].mxu1 }
 0x10a   : > { %v1415_v59 = vpack.c.bf16 %v832_v49, %v832_v49  ;;  %v862_v60 = vmax.f32 %v752_v50, 0.0  ;;  %v833_v61 = vmax.f32 %v635_v51, 0.0  ;;  %v755_v62 = vadd.f32 %v1730_v38, %v754_v58 }
 0x10b   : > { %v1447_v63 = vpack.c.bf16 %v864_v54, %v864_v54  ;;  %v1413_v0 = vpack.c.bf16 %v830_v55, %v830_v55  ;;  %v865_v1 = vmax.f32 %v763_v56, 0.0  ;;  %v831_v2 = vmax.f32 %v627_v57, 0.0 }
 0x10c   : > { %1153 = vst.msk [vmem:[%s1742_s27 + $0x48] sm:$0xf] %vm1134_vm3, %v1415_v59  ;;  %v1445_v3 = vpack.c.bf16 %v862_v60, %v862_v60  ;;  %v1416_v4 = vpack.c.bf16 %v833_v61, %v833_v61  ;;  %v863_v5 = vmax.f32 %v755_v62, 0.0 }
 0x10d   : > { %1185 = vst.msk [vmem:[%s1742_s27 + $0xc8] sm:$0xf] %vm1134_vm3, %v1447_v63  ;;  %1151 = vst.msk [vmem:[%s1742_s27 + $0x40] sm:$0xf] %vm1134_vm3, %v1413_v0  ;;  %v1448_v6 = vpack.c.bf16 %v865_v1, %v865_v1  ;;  %v1414_v7 = vpack.c.bf16 %v831_v2, %v831_v2  ;;  %v1521_v8 = vpop.f32.mrb[20].mxu0 }
 0x10e   : > { %1183 = vst.msk [vmem:[%s1742_s27 + $0xc0] sm:$0xf] %vm1134_vm3, %v1445_v3  ;;  %1154 = vst.msk [vmem:[%s1742_s27 + $0x4c] sm:$0xf] %vm1134_vm3, %v1416_v4  ;;  %v1446_v9 = vpack.c.bf16 %v863_v5, %v863_v5  ;;  %v648_v10 = vadd.f32 %v1521_v8, %v1730_v38  ;;  %v1553_v11 = vpop.f32.mrb[20].mxu1  ;;  %v639_v12 = vpop.f32.mrb[21].mxu0 }
 0x10f   : > { %1186 = vst.msk [vmem:[%s1742_s27 + $0xcc] sm:$0xf] %vm1134_vm3, %v1448_v6  ;;  %1152 = vst.msk [vmem:[%s1742_s27 + $0x44] sm:$0xf] %vm1134_vm3, %v1414_v7  ;;  %v776_v13 = vadd.f32 %v1553_v11, %v1730_v38  ;;  %v640_v14 = vadd.f32 %v1730_v38, %v639_v12  ;;  %v767_v15 = vpop.f32.mrb[21].mxu1  ;;  %v1522_v16 = vpop.f32.mrb[22].mxu0 }
 0x110   : > { %1184 = vst.msk [vmem:[%s1742_s27 + $0xc4] sm:$0xf] %vm1134_vm3, %v1446_v9  ;;  %v836_v17 = vmax.f32 %v648_v10, 0.0  ;;  %v768_v18 = vadd.f32 %v1730_v38, %v767_v15  ;;  %v651_v19 = vadd.f32 %v1522_v16, %v1730_v38  ;;  %v1554_v20 = vpop.f32.mrb[22].mxu1  ;;  %v642_v21 = vpop.f32.mrb[23].mxu0 }
 0x111   : > { %v868_v22 = vmax.f32 %v776_v13, 0.0  ;;  %v834_v23 = vmax.f32 %v640_v14, 0.0  ;;  %v779_v24 = vadd.f32 %v1554_v20, %v1730_v38  ;;  %v643_v25 = vadd.f32 %v1730_v38, %v642_v21  ;;  %v770_v26 = vpop.f32.mrb[23].mxu1 }
 0x112   : > { %v1419_v27 = vpack.c.bf16 %v836_v17, %v836_v17  ;;  %v866_v28 = vmax.f32 %v768_v18, 0.0  ;;  %v837_v29 = vmax.f32 %v651_v19, 0.0  ;;  %v771_v30 = vadd.f32 %v1730_v38, %v770_v26 }
 0x113   : > { %v1451_v31 = vpack.c.bf16 %v868_v22, %v868_v22  ;;  %v1417_v32 = vpack.c.bf16 %v834_v23, %v834_v23  ;;  %v869_v33 = vmax.f32 %v779_v24, 0.0  ;;  %v835_v34 = vmax.f32 %v643_v25, 0.0 }
 0x114   : > { %1157 = vst.msk [vmem:[%s1742_s27 + $0x58] sm:$0xf] %vm1134_vm3, %v1419_v27  ;;  %v1449_v35 = vpack.c.bf16 %v866_v28, %v866_v28  ;;  %v1420_v36 = vpack.c.bf16 %v837_v29, %v837_v29  ;;  %v867_v37 = vmax.f32 %v771_v30, 0.0 }
 0x115   : > { %1189 = vst.msk [vmem:[%s1742_s27 + $0xd8] sm:$0xf] %vm1134_vm3, %v1451_v31  ;;  %1155 = vst.msk [vmem:[%s1742_s27 + $0x50] sm:$0xf] %vm1134_vm3, %v1417_v32  ;;  %v1452_v39 = vpack.c.bf16 %v869_v33, %v869_v33  ;;  %v1418_v40 = vpack.c.bf16 %v835_v34, %v835_v34  ;;  %v1525_v41 = vpop.f32.mrb[24].mxu0 }
 0x116   : > { %1187 = vst.msk [vmem:[%s1742_s27 + $0xd0] sm:$0xf] %vm1134_vm3, %v1449_v35  ;;  %1158 = vst.msk [vmem:[%s1742_s27 + $0x5c] sm:$0xf] %vm1134_vm3, %v1420_v36  ;;  %v1450_v42 = vpack.c.bf16 %v867_v37, %v867_v37  ;;  %v664_v43 = vadd.f32 %v1525_v41, %v1730_v38  ;;  %v1557_v44 = vpop.f32.mrb[24].mxu1  ;;  %v655_v45 = vpop.f32.mrb[25].mxu0 }
 0x117   : > { %1190 = vst.msk [vmem:[%s1742_s27 + $0xdc] sm:$0xf] %vm1134_vm3, %v1452_v39  ;;  %1156 = vst.msk [vmem:[%s1742_s27 + $0x54] sm:$0xf] %vm1134_vm3, %v1418_v40  ;;  %v792_v46 = vadd.f32 %v1557_v44, %v1730_v38  ;;  %v656_v47 = vadd.f32 %v1730_v38, %v655_v45  ;;  %v783_v48 = vpop.f32.mrb[25].mxu1  ;;  %v1526_v49 = vpop.f32.mrb[26].mxu0 }
 0x118   : > { %1188 = vst.msk [vmem:[%s1742_s27 + $0xd4] sm:$0xf] %vm1134_vm3, %v1450_v42  ;;  %v840_v50 = vmax.f32 %v664_v43, 0.0  ;;  %v784_v51 = vadd.f32 %v1730_v38, %v783_v48  ;;  %v667_v52 = vadd.f32 %v1526_v49, %v1730_v38  ;;  %v1558_v53 = vpop.f32.mrb[26].mxu1  ;;  %v658_v54 = vpop.f32.mrb[27].mxu0 }
 0x119   : > { %v872_v55 = vmax.f32 %v792_v46, 0.0  ;;  %v838_v56 = vmax.f32 %v656_v47, 0.0  ;;  %v795_v57 = vadd.f32 %v1558_v53, %v1730_v38  ;;  %v659_v58 = vadd.f32 %v1730_v38, %v658_v54  ;;  %v786_v59 = vpop.f32.mrb[27].mxu1 }
 0x11a   : > { %v1423_v60 = vpack.c.bf16 %v840_v50, %v840_v50  ;;  %v870_v61 = vmax.f32 %v784_v51, 0.0  ;;  %v841_v62 = vmax.f32 %v667_v52, 0.0  ;;  %v787_v63 = vadd.f32 %v1730_v38, %v786_v59 }
 0x11b   : > { %v1455_v0 = vpack.c.bf16 %v872_v55, %v872_v55  ;;  %v1421_v1 = vpack.c.bf16 %v838_v56, %v838_v56  ;;  %v873_v2 = vmax.f32 %v795_v57, 0.0  ;;  %v839_v3 = vmax.f32 %v659_v58, 0.0 }
 0x11c   : > { %1161 = vst.msk [vmem:[%s1742_s27 + $0x68] sm:$0xf] %vm1134_vm3, %v1423_v60  ;;  %v1453_v4 = vpack.c.bf16 %v870_v61, %v870_v61  ;;  %v1424_v5 = vpack.c.bf16 %v841_v62, %v841_v62  ;;  %v871_v6 = vmax.f32 %v787_v63, 0.0 }
 0x11d   : > { %1193 = vst.msk [vmem:[%s1742_s27 + $0xe8] sm:$0xf] %vm1134_vm3, %v1455_v0  ;;  %1159 = vst.msk [vmem:[%s1742_s27 + $0x60] sm:$0xf] %vm1134_vm3, %v1421_v1  ;;  %v1456_v7 = vpack.c.bf16 %v873_v2, %v873_v2  ;;  %v1422_v8 = vpack.c.bf16 %v839_v3, %v839_v3  ;;  %v1529_v9 = vpop.f32.mrb[28].mxu0 }
 0x11e   : > { %1191 = vst.msk [vmem:[%s1742_s27 + $0xe0] sm:$0xf] %vm1134_vm3, %v1453_v4  ;;  %1162 = vst.msk [vmem:[%s1742_s27 + $0x6c] sm:$0xf] %vm1134_vm3, %v1424_v5  ;;  %v1454_v10 = vpack.c.bf16 %v871_v6, %v871_v6  ;;  %v680_v11 = vadd.f32 %v1529_v9, %v1730_v38  ;;  %v1561_v12 = vpop.f32.mrb[28].mxu1  ;;  %v671_v13 = vpop.f32.mrb[29].mxu0 }
 0x11f   : > { %1194 = vst.msk [vmem:[%s1742_s27 + $0xec] sm:$0xf] %vm1134_vm3, %v1456_v7  ;;  %1160 = vst.msk [vmem:[%s1742_s27 + $0x64] sm:$0xf] %vm1134_vm3, %v1422_v8  ;;  %v808_v14 = vadd.f32 %v1561_v12, %v1730_v38  ;;  %v672_v15 = vadd.f32 %v1730_v38, %v671_v13  ;;  %v799_v16 = vpop.f32.mrb[29].mxu1  ;;  %v1530_v17 = vpop.f32.mrb[30].mxu0 }
 0x120   : > { %1192 = vst.msk [vmem:[%s1742_s27 + $0xe4] sm:$0xf] %vm1134_vm3, %v1454_v10  ;;  %v844_v18 = vmax.f32 %v680_v11, 0.0  ;;  %v800_v19 = vadd.f32 %v1730_v38, %v799_v16  ;;  %v683_v20 = vadd.f32 %v1530_v17, %v1730_v38  ;;  %v1562_v21 = vpop.f32.mrb[30].mxu1  ;;  %v674_v22 = vpop.f32.mrb[31].mxu0 }
 0x121   : > { %v876_v23 = vmax.f32 %v808_v14, 0.0  ;;  %v842_v24 = vmax.f32 %v672_v15, 0.0  ;;  %v811_v25 = vadd.f32 %v1562_v21, %v1730_v38  ;;  %v675_v26 = vadd.f32 %v1730_v38, %v674_v22  ;;  %v802_v27 = vpop.f32.mrb[31].mxu1 }
 0x122   : > { %v1427_v28 = vpack.c.bf16 %v844_v18, %v844_v18  ;;  %v874_v29 = vmax.f32 %v800_v19, 0.0  ;;  %v845_v30 = vmax.f32 %v683_v20, 0.0  ;;  %v803_v31 = vadd.f32 %v1730_v38, %v802_v27 }
 0x123   : > { %v1459_v32 = vpack.c.bf16 %v876_v23, %v876_v23  ;;  %v1425_v33 = vpack.c.bf16 %v842_v24, %v842_v24  ;;  %v877_v34 = vmax.f32 %v811_v25, 0.0  ;;  %v843_v35 = vmax.f32 %v675_v26, 0.0 }
 0x124   : > { %1165 = vst.msk [vmem:[%s1742_s27 + $0x78] sm:$0xf] %vm1134_vm3, %v1427_v28  ;;  %v1457_v36 = vpack.c.bf16 %v874_v29, %v874_v29  ;;  %v1428_v37 = vpack.c.bf16 %v845_v30, %v845_v30  ;;  %v875_v39 = vmax.f32 %v803_v31, 0.0 }
 0x125   : > { %1197 = vst.msk [vmem:[%s1742_s27 + $0xf8] sm:$0xf] %vm1134_vm3, %v1459_v32  ;;  %1163 = vst.msk [vmem:[%s1742_s27 + $0x70] sm:$0xf] %vm1134_vm3, %v1425_v33  ;;  %v1460_v40 = vpack.c.bf16 %v877_v34, %v877_v34  ;;  %v1426_v41 = vpack.c.bf16 %v843_v35, %v843_v35 }
 0x126   : > { %1195 = vst.msk [vmem:[%s1742_s27 + $0xf0] sm:$0xf] %vm1134_vm3, %v1457_v36  ;;  %1166 = vst.msk [vmem:[%s1742_s27 + $0x7c] sm:$0xf] %vm1134_vm3, %v1428_v37  ;;  %v1458_v38 = vpack.c.bf16 %v875_v39, %v875_v39 }
 0x127   : > { %1198 = vst.msk [vmem:[%s1742_s27 + $0xfc] sm:$0xf] %vm1134_vm3, %v1460_v40  ;;  %1164 = vst.msk [vmem:[%s1742_s27 + $0x74] sm:$0xf] %vm1134_vm3, %v1426_v41 }
 0x128   : > { %1196 = vst.msk [vmem:[%s1742_s27 + $0xf4] sm:$0xf] %vm1134_vm3, %v1458_v38 }
 0x129 PF: > { %s13_s12 = sadd.s32 1, %s1616_s12  }
 0x12a   : > { %p10_p4 = scmp.ge.s32.totalorder %s13_s12, 6  }
 0x12c   :  { %12 = sbr.rel (!%p10_p4) target bundleno = 1 (0x1), region = 62 }

// kernel: vae_forward.13
= control target key start
LH: loop header
LB: loop body
LE: loop exit
PB: predicated region body
PF: predicated region fallthrough
CT: control target
= control target key end

     0   :  { %vm301_vm0 = vcmask 883712   ;;  %vm398_vm1 = vcmask 1045504   ;;  %vm1011_vm2 = vcmask 191488   ;;  %s1946_s1 = inlined_call_operand.vmem [shape: bf16[108,24], index: 1, kind: input, shape index: {}]   ;;  %s1947_s0 = inlined_call_operand.vmem [shape: bf16[512,108], index: 0, kind: input, shape index: {}]   ;;  %s1948_s2 = inlined_call_operand.vmem [shape: f32[1,24], index: 2, kind: input, shape index: {}]   ;;  %s1949_s3 = inlined_call_operand.vmem [shape: bf16[512,24], index: 3, kind: output, shape index: {}]  }
   0x1   :  { %v1413_v0 = vld [vmem:[%s1946_s1] sm:$0xff]   ;;  %v1414_v1 = vld [vmem:[%s1946_s1 + $0x8] sm:$0xff]   ;;  %v1415_v2 = vld [vmem:[%s1946_s1 + $0x10] sm:$0xff]  }
   0x2   :  { %1319 = vmatprep.subr.bf16.mxu0 %v1413_v0  ;;  %1397 = vmatprep.subr.bf16.mxu1 %v1413_v0  ;;  %v1416_v3 = vld [vmem:[%s1946_s1 + $0x18] sm:$0xff]   ;;  %v1420_v4 = vld [vmem:[%s1947_s0] sm:$0xff]   ;;  %v1418_v7 = vld [vmem:[%s1946_s1 + $0x28] sm:$0xff]  }
   0x3   :  { %1320 = vmatpush3.bf16.msra.mxu0 %v1413_v0  ;;  %1404 = vmatpush3.bf16.msra.mxu1 %v1413_v0  ;;  %v1421_v5 = vld [vmem:[%s1947_s0 + $0x80] sm:$0xff]   ;;  %v1419_v8 = vld [vmem:[%s1946_s1 + $0x30] sm:$0x3f]   ;;  %v1422_v10 = vld [vmem:[%s1947_s0 + $0x8] sm:$0xff]  }
   0x4   :  { %1321 = vmatprep.subr.bf16.mxu0 %v1414_v1  ;;  %1398 = vmatprep.subr.bf16.mxu1 %v1414_v1  ;;  %v1417_v6 = vld [vmem:[%s1946_s1 + $0x20] sm:$0xff]   ;;  %v400_v9 = vsel %vm398_vm1, %v1419_v8, 0  ;;  %v1423_v11 = vld [vmem:[%s1947_s0 + $0x88] sm:$0xff]   ;;  %v1424_v12 = vld [vmem:[%s1947_s0 + $0x10] sm:$0xff]  }
   0x5   :  { %1333 = vmatprep.mubr.msk.bf16.mxu0 %vm301_vm0, %v1420_v4  ;;  %1365 = vmatprep.mubr.msk.bf16.mxu1 %vm301_vm0, %v1421_v5  ;;  %v1425_v13 = vld [vmem:[%s1947_s0 + $0x90] sm:$0xff]   ;;  %v1426_v14 = vld [vmem:[%s1947_s0 + $0x18] sm:$0xff]   ;;  %v1428_v16 = vld [vmem:[%s1947_s0 + $0x20] sm:$0xff]  }
   0x6   :  { %v1427_v15 = vld [vmem:[%s1947_s0 + $0x98] sm:$0xff]   ;;  %v1429_v17 = vld [vmem:[%s1947_s0 + $0xa0] sm:$0xff]   ;;  %v1430_v18 = vld [vmem:[%s1947_s0 + $0x28] sm:$0xff]  }
   0x7   :  { %1322 = vmatpush3.bf16.msra.mxu0 %v1414_v1  ;;  %1405 = vmatpush3.bf16.msra.mxu1 %v1414_v1  ;;  %v1431_v19 = vld [vmem:[%s1947_s0 + $0xa8] sm:$0xff]   ;;  %v1432_v20 = vld [vmem:[%s1947_s0 + $0x30] sm:$0xff]   ;;  %v1434_v22 = vld [vmem:[%s1947_s0 + $0x38] sm:$0xff]  }
   0x8   :  { %1323 = vmatprep.subr.bf16.mxu0 %v1415_v2  ;;  %1399 = vmatprep.subr.bf16.mxu1 %v1415_v2  ;;  %v1433_v21 = vld [vmem:[%s1947_s0 + $0xb0] sm:$0xff]   ;;  %v1435_v23 = vld [vmem:[%s1947_s0 + $0xb8] sm:$0xff]   ;;  %v1436_v24 = vld [vmem:[%s1947_s0 + $0x40] sm:$0xff]  }
   0x9   :  { %v1437_v25 = vld [vmem:[%s1947_s0 + $0xc0] sm:$0xff]   ;;  %v1438_v26 = vld [vmem:[%s1947_s0 + $0x48] sm:$0xff]   ;;  %v1440_v28 = vld [vmem:[%s1947_s0 + $0x50] sm:$0xff]  }
   0xa   :  { %v1439_v27 = vld [vmem:[%s1947_s0 + $0xc8] sm:$0xff]   ;;  %v1441_v29 = vld [vmem:[%s1947_s0 + $0xd0] sm:$0xff]   ;;  %v1442_v30 = vld [vmem:[%s1947_s0 + $0x58] sm:$0xff]  }
   0xb   :  { %1324 = vmatpush3.bf16.msra.mxu0 %v1415_v2  ;;  %1406 = vmatpush3.bf16.msra.mxu1 %v1415_v2  ;;  %v1443_v31 = vld [vmem:[%s1947_s0 + $0xd8] sm:$0xff]   ;;  %v1444_v32 = vld [vmem:[%s1947_s0 + $0x60] sm:$0xff]   ;;  %v1446_v34 = vld [vmem:[%s1947_s0 + $0x68] sm:$0xff]  }
   0xc   :  { %1325 = vmatprep.subr.bf16.mxu0 %v1416_v3  ;;  %1400 = vmatprep.subr.bf16.mxu1 %v1416_v3  ;;  %v1445_v33 = vld [vmem:[%s1947_s0 + $0xe0] sm:$0xff]   ;;  %v1447_v35 = vld [vmem:[%s1947_s0 + $0xe8] sm:$0xff]   ;;  %v1448_v36 = vld [vmem:[%s1947_s0 + $0x70] sm:$0xff]  }
   0xd   :  { %v1449_v37 = vld [vmem:[%s1947_s0 + $0xf0] sm:$0xff]   ;;  %v1450_v38 = vld [vmem:[%s1947_s0 + $0x78] sm:$0xff]   ;;  %v1624_v40 = vld [vmem:[%s1948_s2] ss:$0 sm:$0xff] }
   0xe   :  { %v1451_v39 = vld [vmem:[%s1947_s0 + $0xf8] sm:$0xff]  }
   0xf   :  { %1326 = vmatpush3.bf16.msra.mxu0 %v1416_v3  ;;  %1407 = vmatpush3.bf16.msra.mxu1 %v1416_v3 }
  0x10   :  { %1327 = vmatprep.subr.bf16.mxu0 %v1417_v6  ;;  %1401 = vmatprep.subr.bf16.mxu1 %v1417_v6 }
  0x13   :  { %1328 = vmatpush3.bf16.msra.mxu0 %v1417_v6  ;;  %1408 = vmatpush3.bf16.msra.mxu1 %v1417_v6 }
  0x14   :  { %1329 = vmatprep.subr.bf16.mxu0 %v1418_v7  ;;  %1402 = vmatprep.subr.bf16.mxu1 %v1418_v7 }
  0x17   :  { %1330 = vmatpush3.bf16.msra.mxu0 %v1418_v7  ;;  %1409 = vmatpush3.bf16.msra.mxu1 %v1418_v7 }
  0x18   :  { %1411 = vmatprep.subr.msk.bf16.mxu0 %vm398_vm1, %v1419_v8  ;;  %1412 = vmatprep.subr.msk.bf16.mxu1 %vm398_vm1, %v1419_v8 }
  0x1b   :  { %1332 = vmatpush3.bf16.msra.mxu0 %v400_v9  ;;  %1410 = vmatpush3.bf16.msra.mxu1 %v400_v9 }
  0x1e   :  { %1334 = vmatmul.mubr.msk.bf16.vlgmr.msra.gmra.mrb[0].mxu0 %vm301_vm0, %v1422_v10  ;;  %1366 = vmatmul.mubr.msk.bf16.vlgmr.msra.gmra.mrb[0].mxu1 %vm301_vm0, %v1423_v11 }
  0x1f   :  { %1337 = vmatprep.mubr.msk.bf16.mxu0 %vm301_vm0, %v1424_v12  ;;  %1369 = vmatprep.mubr.msk.bf16.mxu1 %vm301_vm0, %v1425_v13 }
  0x26   :  { %1338 = vmatmul.mubr.msk.bf16.gmra.mrb[4].mxu0 %vm301_vm0, %v1426_v14  ;;  %1370 = vmatmul.mubr.msk.bf16.gmra.mrb[4].mxu1 %vm301_vm0, %v1427_v15 }
  0x27   :  { %1341 = vmatprep.mubr.msk.bf16.mxu0 %vm301_vm0, %v1428_v16  ;;  %1373 = vmatprep.mubr.msk.bf16.mxu1 %vm301_vm0, %v1429_v17 }
  0x2e   :  { %1342 = vmatmul.mubr.msk.bf16.gmra.mrb[8].mxu0 %vm301_vm0, %v1430_v18  ;;  %1374 = vmatmul.mubr.msk.bf16.gmra.mrb[8].mxu1 %vm301_vm0, %v1431_v19 }
  0x2f   :  { %1345 = vmatprep.mubr.msk.bf16.mxu0 %vm301_vm0, %v1432_v20  ;;  %1377 = vmatprep.mubr.msk.bf16.mxu1 %vm301_vm0, %v1433_v21 }
  0x36   :  { %1346 = vmatmul.mubr.msk.bf16.gmra.mrb[12].mxu0 %vm301_vm0, %v1434_v22  ;;  %1378 = vmatmul.mubr.msk.bf16.gmra.mrb[12].mxu1 %vm301_vm0, %v1435_v23 }
  0x37   :  { %1349 = vmatprep.mubr.msk.bf16.mxu0 %vm301_vm0, %v1436_v24  ;;  %1381 = vmatprep.mubr.msk.bf16.mxu1 %vm301_vm0, %v1437_v25 }
  0x3e   :  { %1350 = vmatmul.mubr.msk.bf16.gmra.mrb[16].mxu0 %vm301_vm0, %v1438_v26  ;;  %1382 = vmatmul.mubr.msk.bf16.gmra.mrb[16].mxu1 %vm301_vm0, %v1439_v27 }
  0x3f   :  { %1353 = vmatprep.mubr.msk.bf16.mxu0 %vm301_vm0, %v1440_v28  ;;  %1385 = vmatprep.mubr.msk.bf16.mxu1 %vm301_vm0, %v1441_v29 }
  0x46   :  { %1354 = vmatmul.mubr.msk.bf16.gmra.mrb[20].mxu0 %vm301_vm0, %v1442_v30  ;;  %1386 = vmatmul.mubr.msk.bf16.gmra.mrb[20].mxu1 %vm301_vm0, %v1443_v31 }
  0x47   :  { %1357 = vmatprep.mubr.msk.bf16.mxu0 %vm301_vm0, %v1444_v32  ;;  %1389 = vmatprep.mubr.msk.bf16.mxu1 %vm301_vm0, %v1445_v33 }
  0x4e   :  { %1358 = vmatmul.mubr.msk.bf16.gmra.mrb[24].mxu0 %vm301_vm0, %v1446_v34  ;;  %1390 = vmatmul.mubr.msk.bf16.gmra.mrb[24].mxu1 %vm301_vm0, %v1447_v35 }
  0x4f   :  { %1361 = vmatprep.mubr.msk.bf16.mxu0 %vm301_vm0, %v1448_v36  ;;  %1393 = vmatprep.mubr.msk.bf16.mxu1 %vm301_vm0, %v1449_v37 }
  0x56   :  { %1362 = vmatmul.mubr.msk.bf16.gmra.mrb[28].mxu0 %vm301_vm0, %v1450_v38  ;;  %1394 = vmatmul.mubr.msk.bf16.gmra.mrb[28].mxu1 %vm301_vm0, %v1451_v39 }
  0xf1   :  { %v1335_v41 = vpop.f32.mrb[0].mxu0  ;;  %v1367_v42 = vpop.f32.mrb[0].mxu1 }
  0xf2   :  { %v445_v43 = vadd.f32 %v1335_v41, %v1624_v40  ;;  %v573_v44 = vadd.f32 %v1367_v42, %v1624_v40  ;;  %v436_v45 = vpop.f32.mrb[1].mxu0  ;;  %v564_v46 = vpop.f32.mrb[1].mxu1 }
  0xf3   :  { %v437_v47 = vadd.f32 %v1624_v40, %v436_v45  ;;  %v565_v48 = vadd.f32 %v1624_v40, %v564_v46  ;;  %v1336_v49 = vpop.f32.mrb[2].mxu0  ;;  %v1368_v50 = vpop.f32.mrb[2].mxu1 }
  0xf4   :  { %v693_v51 = vmax.f32 %v445_v43, 0.0  ;;  %v725_v52 = vmax.f32 %v573_v44, 0.0  ;;  %v448_v53 = vadd.f32 %v1336_v49, %v1624_v40  ;;  %v576_v54 = vadd.f32 %v1368_v50, %v1624_v40  ;;  %v439_v55 = vpop.f32.mrb[3].mxu0  ;;  %v567_v56 = vpop.f32.mrb[3].mxu1 }
  0xf5   :  { %v691_v57 = vmax.f32 %v437_v47, 0.0  ;;  %v723_v58 = vmax.f32 %v565_v48, 0.0  ;;  %v440_v59 = vadd.f32 %v1624_v40, %v439_v55  ;;  %v568_v60 = vadd.f32 %v1624_v40, %v567_v56 }
  0xf6   :  { %v1218_v61 = vpack.c.bf16 %v693_v51, %v693_v51  ;;  %v1250_v62 = vpack.c.bf16 %v725_v52, %v725_v52  ;;  %v694_v63 = vmax.f32 %v448_v53, 0.0  ;;  %v726_v0 = vmax.f32 %v576_v54, 0.0 }
  0xf7   :  { %v1216_v1 = vpack.c.bf16 %v691_v57, %v691_v57  ;;  %v1248_v2 = vpack.c.bf16 %v723_v58, %v723_v58  ;;  %v692_v3 = vmax.f32 %v440_v59, 0.0  ;;  %v724_v4 = vmax.f32 %v568_v60, 0.0 }
  0xf8   :  { %1014 = vst.msk [vmem:[%s1949_s3 + $0x8] sm:$0xf] %vm1011_vm2, %v1218_v61  ;;  %1046 = vst.msk [vmem:[%s1949_s3 + $0x88] sm:$0xf] %vm1011_vm2, %v1250_v62  ;;  %v1219_v5 = vpack.c.bf16 %v694_v63, %v694_v63  ;;  %v1251_v6 = vpack.c.bf16 %v726_v0, %v726_v0 }
  0xf9   :  { %1012 = vst.msk [vmem:[%s1949_s3] sm:$0xf] %vm1011_vm2, %v1216_v1  ;;  %1044 = vst.msk [vmem:[%s1949_s3 + $0x80] sm:$0xf] %vm1011_vm2, %v1248_v2  ;;  %v1217_v7 = vpack.c.bf16 %v692_v3, %v692_v3  ;;  %v1249_v8 = vpack.c.bf16 %v724_v4, %v724_v4  ;;  %v1339_v9 = vpop.f32.mrb[4].mxu0  ;;  %v1371_v10 = vpop.f32.mrb[4].mxu1 }
  0xfa   :  { %1015 = vst.msk [vmem:[%s1949_s3 + $0xc] sm:$0xf] %vm1011_vm2, %v1219_v5  ;;  %1047 = vst.msk [vmem:[%s1949_s3 + $0x8c] sm:$0xf] %vm1011_vm2, %v1251_v6  ;;  %v461_v11 = vadd.f32 %v1339_v9, %v1624_v40  ;;  %v589_v12 = vadd.f32 %v1371_v10, %v1624_v40  ;;  %v452_v13 = vpop.f32.mrb[5].mxu0  ;;  %v580_v14 = vpop.f32.mrb[5].mxu1 }
  0xfb   :  { %1013 = vst.msk [vmem:[%s1949_s3 + $0x4] sm:$0xf] %vm1011_vm2, %v1217_v7  ;;  %1045 = vst.msk [vmem:[%s1949_s3 + $0x84] sm:$0xf] %vm1011_vm2, %v1249_v8  ;;  %v453_v15 = vadd.f32 %v1624_v40, %v452_v13  ;;  %v581_v16 = vadd.f32 %v1624_v40, %v580_v14  ;;  %v1340_v17 = vpop.f32.mrb[6].mxu0  ;;  %v1372_v18 = vpop.f32.mrb[6].mxu1 }
  0xfc   :  { %v697_v19 = vmax.f32 %v461_v11, 0.0  ;;  %v729_v20 = vmax.f32 %v589_v12, 0.0  ;;  %v464_v21 = vadd.f32 %v1340_v17, %v1624_v40  ;;  %v592_v22 = vadd.f32 %v1372_v18, %v1624_v40  ;;  %v455_v23 = vpop.f32.mrb[7].mxu0  ;;  %v583_v24 = vpop.f32.mrb[7].mxu1 }
  0xfd   :  { %v695_v25 = vmax.f32 %v453_v15, 0.0  ;;  %v727_v26 = vmax.f32 %v581_v16, 0.0  ;;  %v456_v27 = vadd.f32 %v1624_v40, %v455_v23  ;;  %v584_v28 = vadd.f32 %v1624_v40, %v583_v24 }
  0xfe   :  { %v1222_v29 = vpack.c.bf16 %v697_v19, %v697_v19  ;;  %v1254_v30 = vpack.c.bf16 %v729_v20, %v729_v20  ;;  %v698_v31 = vmax.f32 %v464_v21, 0.0  ;;  %v730_v32 = vmax.f32 %v592_v22, 0.0 }
  0xff   :  { %v1220_v33 = vpack.c.bf16 %v695_v25, %v695_v25  ;;  %v1252_v34 = vpack.c.bf16 %v727_v26, %v727_v26  ;;  %v696_v35 = vmax.f32 %v456_v27, 0.0  ;;  %v728_v36 = vmax.f32 %v584_v28, 0.0 }
 0x100   :  { %1018 = vst.msk [vmem:[%s1949_s3 + $0x18] sm:$0xf] %vm1011_vm2, %v1222_v29  ;;  %1050 = vst.msk [vmem:[%s1949_s3 + $0x98] sm:$0xf] %vm1011_vm2, %v1254_v30  ;;  %v1223_v37 = vpack.c.bf16 %v698_v31, %v698_v31  ;;  %v1255_v38 = vpack.c.bf16 %v730_v32, %v730_v32 }
 0x101   :  { %1016 = vst.msk [vmem:[%s1949_s3 + $0x10] sm:$0xf] %vm1011_vm2, %v1220_v33  ;;  %1048 = vst.msk [vmem:[%s1949_s3 + $0x90] sm:$0xf] %vm1011_vm2, %v1252_v34  ;;  %v1221_v39 = vpack.c.bf16 %v696_v35, %v696_v35  ;;  %v1253_v41 = vpack.c.bf16 %v728_v36, %v728_v36  ;;  %v1343_v42 = vpop.f32.mrb[8].mxu0  ;;  %v1375_v43 = vpop.f32.mrb[8].mxu1 }
 0x102   :  { %1019 = vst.msk [vmem:[%s1949_s3 + $0x1c] sm:$0xf] %vm1011_vm2, %v1223_v37  ;;  %1051 = vst.msk [vmem:[%s1949_s3 + $0x9c] sm:$0xf] %vm1011_vm2, %v1255_v38  ;;  %v477_v44 = vadd.f32 %v1343_v42, %v1624_v40  ;;  %v605_v45 = vadd.f32 %v1375_v43, %v1624_v40  ;;  %v468_v46 = vpop.f32.mrb[9].mxu0  ;;  %v596_v47 = vpop.f32.mrb[9].mxu1 }
 0x103   :  { %1017 = vst.msk [vmem:[%s1949_s3 + $0x14] sm:$0xf] %vm1011_vm2, %v1221_v39  ;;  %1049 = vst.msk [vmem:[%s1949_s3 + $0x94] sm:$0xf] %vm1011_vm2, %v1253_v41  ;;  %v469_v48 = vadd.f32 %v1624_v40, %v468_v46  ;;  %v597_v49 = vadd.f32 %v1624_v40, %v596_v47  ;;  %v1344_v50 = vpop.f32.mrb[10].mxu0  ;;  %v1376_v51 = vpop.f32.mrb[10].mxu1 }
 0x104   :  { %v701_v52 = vmax.f32 %v477_v44, 0.0  ;;  %v733_v53 = vmax.f32 %v605_v45, 0.0  ;;  %v480_v54 = vadd.f32 %v1344_v50, %v1624_v40  ;;  %v608_v55 = vadd.f32 %v1376_v51, %v1624_v40  ;;  %v471_v56 = vpop.f32.mrb[11].mxu0  ;;  %v599_v57 = vpop.f32.mrb[11].mxu1 }
 0x105   :  { %v699_v58 = vmax.f32 %v469_v48, 0.0  ;;  %v731_v59 = vmax.f32 %v597_v49, 0.0  ;;  %v472_v60 = vadd.f32 %v1624_v40, %v471_v56  ;;  %v600_v61 = vadd.f32 %v1624_v40, %v599_v57 }
 0x106   :  { %v1226_v62 = vpack.c.bf16 %v701_v52, %v701_v52  ;;  %v1258_v63 = vpack.c.bf16 %v733_v53, %v733_v53  ;;  %v702_v0 = vmax.f32 %v480_v54, 0.0  ;;  %v734_v1 = vmax.f32 %v608_v55, 0.0 }
 0x107   :  { %v1224_v2 = vpack.c.bf16 %v699_v58, %v699_v58  ;;  %v1256_v3 = vpack.c.bf16 %v731_v59, %v731_v59  ;;  %v700_v4 = vmax.f32 %v472_v60, 0.0  ;;  %v732_v5 = vmax.f32 %v600_v61, 0.0 }
 0x108   :  { %1022 = vst.msk [vmem:[%s1949_s3 + $0x28] sm:$0xf] %vm1011_vm2, %v1226_v62  ;;  %1054 = vst.msk [vmem:[%s1949_s3 + $0xa8] sm:$0xf] %vm1011_vm2, %v1258_v63  ;;  %v1227_v6 = vpack.c.bf16 %v702_v0, %v702_v0  ;;  %v1259_v7 = vpack.c.bf16 %v734_v1, %v734_v1 }
 0x109   :  { %1020 = vst.msk [vmem:[%s1949_s3 + $0x20] sm:$0xf] %vm1011_vm2, %v1224_v2  ;;  %1052 = vst.msk [vmem:[%s1949_s3 + $0xa0] sm:$0xf] %vm1011_vm2, %v1256_v3  ;;  %v1225_v8 = vpack.c.bf16 %v700_v4, %v700_v4  ;;  %v1257_v9 = vpack.c.bf16 %v732_v5, %v732_v5  ;;  %v1347_v10 = vpop.f32.mrb[12].mxu0  ;;  %v1379_v11 = vpop.f32.mrb[12].mxu1 }
 0x10a   :  { %1023 = vst.msk [vmem:[%s1949_s3 + $0x2c] sm:$0xf] %vm1011_vm2, %v1227_v6  ;;  %1055 = vst.msk [vmem:[%s1949_s3 + $0xac] sm:$0xf] %vm1011_vm2, %v1259_v7  ;;  %v493_v12 = vadd.f32 %v1347_v10, %v1624_v40  ;;  %v621_v13 = vadd.f32 %v1379_v11, %v1624_v40  ;;  %v484_v14 = vpop.f32.mrb[13].mxu0  ;;  %v612_v15 = vpop.f32.mrb[13].mxu1 }
 0x10b   :  { %1021 = vst.msk [vmem:[%s1949_s3 + $0x24] sm:$0xf] %vm1011_vm2, %v1225_v8  ;;  %1053 = vst.msk [vmem:[%s1949_s3 + $0xa4] sm:$0xf] %vm1011_vm2, %v1257_v9  ;;  %v485_v16 = vadd.f32 %v1624_v40, %v484_v14  ;;  %v613_v17 = vadd.f32 %v1624_v40, %v612_v15  ;;  %v1348_v18 = vpop.f32.mrb[14].mxu0  ;;  %v1380_v19 = vpop.f32.mrb[14].mxu1 }
 0x10c   :  { %v705_v20 = vmax.f32 %v493_v12, 0.0  ;;  %v737_v21 = vmax.f32 %v621_v13, 0.0  ;;  %v496_v22 = vadd.f32 %v1348_v18, %v1624_v40  ;;  %v624_v23 = vadd.f32 %v1380_v19, %v1624_v40  ;;  %v487_v24 = vpop.f32.mrb[15].mxu0  ;;  %v615_v25 = vpop.f32.mrb[15].mxu1 }
 0x10d   :  { %v703_v26 = vmax.f32 %v485_v16, 0.0  ;;  %v735_v27 = vmax.f32 %v613_v17, 0.0  ;;  %v488_v28 = vadd.f32 %v1624_v40, %v487_v24  ;;  %v616_v29 = vadd.f32 %v1624_v40, %v615_v25 }
 0x10e   :  { %v1230_v30 = vpack.c.bf16 %v705_v20, %v705_v20  ;;  %v1262_v31 = vpack.c.bf16 %v737_v21, %v737_v21  ;;  %v706_v32 = vmax.f32 %v496_v22, 0.0  ;;  %v738_v33 = vmax.f32 %v624_v23, 0.0 }
 0x10f   :  { %v1228_v34 = vpack.c.bf16 %v703_v26, %v703_v26  ;;  %v1260_v35 = vpack.c.bf16 %v735_v27, %v735_v27  ;;  %v704_v36 = vmax.f32 %v488_v28, 0.0  ;;  %v736_v37 = vmax.f32 %v616_v29, 0.0 }
 0x110   :  { %1026 = vst.msk [vmem:[%s1949_s3 + $0x38] sm:$0xf] %vm1011_vm2, %v1230_v30  ;;  %1058 = vst.msk [vmem:[%s1949_s3 + $0xb8] sm:$0xf] %vm1011_vm2, %v1262_v31  ;;  %v1231_v38 = vpack.c.bf16 %v706_v32, %v706_v32  ;;  %v1263_v39 = vpack.c.bf16 %v738_v33, %v738_v33 }
 0x111   :  { %1024 = vst.msk [vmem:[%s1949_s3 + $0x30] sm:$0xf] %vm1011_vm2, %v1228_v34  ;;  %1056 = vst.msk [vmem:[%s1949_s3 + $0xb0] sm:$0xf] %vm1011_vm2, %v1260_v35  ;;  %v1229_v41 = vpack.c.bf16 %v704_v36, %v704_v36  ;;  %v1261_v42 = vpack.c.bf16 %v736_v37, %v736_v37  ;;  %v1351_v43 = vpop.f32.mrb[16].mxu0  ;;  %v1383_v44 = vpop.f32.mrb[16].mxu1 }
 0x112   :  { %1027 = vst.msk [vmem:[%s1949_s3 + $0x3c] sm:$0xf] %vm1011_vm2, %v1231_v38  ;;  %1059 = vst.msk [vmem:[%s1949_s3 + $0xbc] sm:$0xf] %vm1011_vm2, %v1263_v39  ;;  %v509_v45 = vadd.f32 %v1351_v43, %v1624_v40  ;;  %v637_v46 = vadd.f32 %v1383_v44, %v1624_v40  ;;  %v500_v47 = vpop.f32.mrb[17].mxu0  ;;  %v628_v48 = vpop.f32.mrb[17].mxu1 }
 0x113   :  { %1025 = vst.msk [vmem:[%s1949_s3 + $0x34] sm:$0xf] %vm1011_vm2, %v1229_v41  ;;  %1057 = vst.msk [vmem:[%s1949_s3 + $0xb4] sm:$0xf] %vm1011_vm2, %v1261_v42  ;;  %v501_v49 = vadd.f32 %v1624_v40, %v500_v47  ;;  %v629_v50 = vadd.f32 %v1624_v40, %v628_v48  ;;  %v1352_v51 = vpop.f32.mrb[18].mxu0  ;;  %v1384_v52 = vpop.f32.mrb[18].mxu1 }
 0x114   :  { %v709_v53 = vmax.f32 %v509_v45, 0.0  ;;  %v741_v54 = vmax.f32 %v637_v46, 0.0  ;;  %v512_v55 = vadd.f32 %v1352_v51, %v1624_v40  ;;  %v640_v56 = vadd.f32 %v1384_v52, %v1624_v40  ;;  %v503_v57 = vpop.f32.mrb[19].mxu0  ;;  %v631_v58 = vpop.f32.mrb[19].mxu1 }
 0x115   :  { %v707_v59 = vmax.f32 %v501_v49, 0.0  ;;  %v739_v60 = vmax.f32 %v629_v50, 0.0  ;;  %v504_v61 = vadd.f32 %v1624_v40, %v503_v57  ;;  %v632_v62 = vadd.f32 %v1624_v40, %v631_v58 }
 0x116   :  { %v1234_v63 = vpack.c.bf16 %v709_v53, %v709_v53  ;;  %v1266_v0 = vpack.c.bf16 %v741_v54, %v741_v54  ;;  %v710_v1 = vmax.f32 %v512_v55, 0.0  ;;  %v742_v2 = vmax.f32 %v640_v56, 0.0 }
 0x117   :  { %v1232_v3 = vpack.c.bf16 %v707_v59, %v707_v59  ;;  %v1264_v4 = vpack.c.bf16 %v739_v60, %v739_v60  ;;  %v708_v5 = vmax.f32 %v504_v61, 0.0  ;;  %v740_v6 = vmax.f32 %v632_v62, 0.0 }
 0x118   :  { %1030 = vst.msk [vmem:[%s1949_s3 + $0x48] sm:$0xf] %vm1011_vm2, %v1234_v63  ;;  %1062 = vst.msk [vmem:[%s1949_s3 + $0xc8] sm:$0xf] %vm1011_vm2, %v1266_v0  ;;  %v1235_v7 = vpack.c.bf16 %v710_v1, %v710_v1  ;;  %v1267_v8 = vpack.c.bf16 %v742_v2, %v742_v2 }
 0x119   :  { %1028 = vst.msk [vmem:[%s1949_s3 + $0x40] sm:$0xf] %vm1011_vm2, %v1232_v3  ;;  %1060 = vst.msk [vmem:[%s1949_s3 + $0xc0] sm:$0xf] %vm1011_vm2, %v1264_v4  ;;  %v1233_v9 = vpack.c.bf16 %v708_v5, %v708_v5  ;;  %v1265_v10 = vpack.c.bf16 %v740_v6, %v740_v6  ;;  %v1355_v11 = vpop.f32.mrb[20].mxu0  ;;  %v1387_v12 = vpop.f32.mrb[20].mxu1 }
 0x11a   :  { %1031 = vst.msk [vmem:[%s1949_s3 + $0x4c] sm:$0xf] %vm1011_vm2, %v1235_v7  ;;  %1063 = vst.msk [vmem:[%s1949_s3 + $0xcc] sm:$0xf] %vm1011_vm2, %v1267_v8  ;;  %v525_v13 = vadd.f32 %v1355_v11, %v1624_v40  ;;  %v653_v14 = vadd.f32 %v1387_v12, %v1624_v40  ;;  %v516_v15 = vpop.f32.mrb[21].mxu0  ;;  %v644_v16 = vpop.f32.mrb[21].mxu1 }
 0x11b   :  { %1029 = vst.msk [vmem:[%s1949_s3 + $0x44] sm:$0xf] %vm1011_vm2, %v1233_v9  ;;  %1061 = vst.msk [vmem:[%s1949_s3 + $0xc4] sm:$0xf] %vm1011_vm2, %v1265_v10  ;;  %v517_v17 = vadd.f32 %v1624_v40, %v516_v15  ;;  %v645_v18 = vadd.f32 %v1624_v40, %v644_v16  ;;  %v1356_v19 = vpop.f32.mrb[22].mxu0  ;;  %v1388_v20 = vpop.f32.mrb[22].mxu1 }
 0x11c   :  { %v713_v21 = vmax.f32 %v525_v13, 0.0  ;;  %v745_v22 = vmax.f32 %v653_v14, 0.0  ;;  %v528_v23 = vadd.f32 %v1356_v19, %v1624_v40  ;;  %v656_v24 = vadd.f32 %v1388_v20, %v1624_v40  ;;  %v519_v25 = vpop.f32.mrb[23].mxu0  ;;  %v647_v26 = vpop.f32.mrb[23].mxu1 }
 0x11d   :  { %v711_v27 = vmax.f32 %v517_v17, 0.0  ;;  %v743_v28 = vmax.f32 %v645_v18, 0.0  ;;  %v520_v29 = vadd.f32 %v1624_v40, %v519_v25  ;;  %v648_v30 = vadd.f32 %v1624_v40, %v647_v26 }
 0x11e   :  { %v1238_v31 = vpack.c.bf16 %v713_v21, %v713_v21  ;;  %v1270_v32 = vpack.c.bf16 %v745_v22, %v745_v22  ;;  %v714_v33 = vmax.f32 %v528_v23, 0.0  ;;  %v746_v34 = vmax.f32 %v656_v24, 0.0 }
 0x11f   :  { %v1236_v35 = vpack.c.bf16 %v711_v27, %v711_v27  ;;  %v1268_v36 = vpack.c.bf16 %v743_v28, %v743_v28  ;;  %v712_v37 = vmax.f32 %v520_v29, 0.0  ;;  %v744_v38 = vmax.f32 %v648_v30, 0.0 }
 0x120   :  { %1034 = vst.msk [vmem:[%s1949_s3 + $0x58] sm:$0xf] %vm1011_vm2, %v1238_v31  ;;  %1066 = vst.msk [vmem:[%s1949_s3 + $0xd8] sm:$0xf] %vm1011_vm2, %v1270_v32  ;;  %v1239_v39 = vpack.c.bf16 %v714_v33, %v714_v33  ;;  %v1271_v41 = vpack.c.bf16 %v746_v34, %v746_v34 }
 0x121   :  { %1032 = vst.msk [vmem:[%s1949_s3 + $0x50] sm:$0xf] %vm1011_vm2, %v1236_v35  ;;  %1064 = vst.msk [vmem:[%s1949_s3 + $0xd0] sm:$0xf] %vm1011_vm2, %v1268_v36  ;;  %v1237_v42 = vpack.c.bf16 %v712_v37, %v712_v37  ;;  %v1269_v43 = vpack.c.bf16 %v744_v38, %v744_v38  ;;  %v1359_v44 = vpop.f32.mrb[24].mxu0  ;;  %v1391_v45 = vpop.f32.mrb[24].mxu1 }
 0x122   :  { %1035 = vst.msk [vmem:[%s1949_s3 + $0x5c] sm:$0xf] %vm1011_vm2, %v1239_v39  ;;  %1067 = vst.msk [vmem:[%s1949_s3 + $0xdc] sm:$0xf] %vm1011_vm2, %v1271_v41  ;;  %v541_v46 = vadd.f32 %v1359_v44, %v1624_v40  ;;  %v669_v47 = vadd.f32 %v1391_v45, %v1624_v40  ;;  %v532_v48 = vpop.f32.mrb[25].mxu0  ;;  %v660_v49 = vpop.f32.mrb[25].mxu1 }
 0x123   :  { %1033 = vst.msk [vmem:[%s1949_s3 + $0x54] sm:$0xf] %vm1011_vm2, %v1237_v42  ;;  %1065 = vst.msk [vmem:[%s1949_s3 + $0xd4] sm:$0xf] %vm1011_vm2, %v1269_v43  ;;  %v533_v50 = vadd.f32 %v1624_v40, %v532_v48  ;;  %v661_v51 = vadd.f32 %v1624_v40, %v660_v49  ;;  %v1360_v52 = vpop.f32.mrb[26].mxu0  ;;  %v1392_v53 = vpop.f32.mrb[26].mxu1 }
 0x124   :  { %v717_v54 = vmax.f32 %v541_v46, 0.0  ;;  %v749_v55 = vmax.f32 %v669_v47, 0.0  ;;  %v544_v56 = vadd.f32 %v1360_v52, %v1624_v40  ;;  %v672_v57 = vadd.f32 %v1392_v53, %v1624_v40  ;;  %v535_v58 = vpop.f32.mrb[27].mxu0  ;;  %v663_v59 = vpop.f32.mrb[27].mxu1 }
 0x125   :  { %v715_v60 = vmax.f32 %v533_v50, 0.0  ;;  %v747_v61 = vmax.f32 %v661_v51, 0.0  ;;  %v536_v62 = vadd.f32 %v1624_v40, %v535_v58  ;;  %v664_v63 = vadd.f32 %v1624_v40, %v663_v59 }
 0x126   :  { %v1242_v0 = vpack.c.bf16 %v717_v54, %v717_v54  ;;  %v1274_v1 = vpack.c.bf16 %v749_v55, %v749_v55  ;;  %v718_v2 = vmax.f32 %v544_v56, 0.0  ;;  %v750_v3 = vmax.f32 %v672_v57, 0.0 }
 0x127   :  { %v1240_v4 = vpack.c.bf16 %v715_v60, %v715_v60  ;;  %v1272_v5 = vpack.c.bf16 %v747_v61, %v747_v61  ;;  %v716_v6 = vmax.f32 %v536_v62, 0.0  ;;  %v748_v7 = vmax.f32 %v664_v63, 0.0 }
 0x128   :  { %1038 = vst.msk [vmem:[%s1949_s3 + $0x68] sm:$0xf] %vm1011_vm2, %v1242_v0  ;;  %1070 = vst.msk [vmem:[%s1949_s3 + $0xe8] sm:$0xf] %vm1011_vm2, %v1274_v1  ;;  %v1243_v8 = vpack.c.bf16 %v718_v2, %v718_v2  ;;  %v1275_v9 = vpack.c.bf16 %v750_v3, %v750_v3 }
 0x129   :  { %1036 = vst.msk [vmem:[%s1949_s3 + $0x60] sm:$0xf] %vm1011_vm2, %v1240_v4  ;;  %1068 = vst.msk [vmem:[%s1949_s3 + $0xe0] sm:$0xf] %vm1011_vm2, %v1272_v5  ;;  %v1241_v10 = vpack.c.bf16 %v716_v6, %v716_v6  ;;  %v1273_v11 = vpack.c.bf16 %v748_v7, %v748_v7  ;;  %v1363_v12 = vpop.f32.mrb[28].mxu0  ;;  %v1395_v13 = vpop.f32.mrb[28].mxu1 }
 0x12a   :  { %1039 = vst.msk [vmem:[%s1949_s3 + $0x6c] sm:$0xf] %vm1011_vm2, %v1243_v8  ;;  %1071 = vst.msk [vmem:[%s1949_s3 + $0xec] sm:$0xf] %vm1011_vm2, %v1275_v9  ;;  %v557_v14 = vadd.f32 %v1363_v12, %v1624_v40  ;;  %v685_v15 = vadd.f32 %v1395_v13, %v1624_v40  ;;  %v548_v16 = vpop.f32.mrb[29].mxu0  ;;  %v676_v17 = vpop.f32.mrb[29].mxu1 }
 0x12b   :  { %1037 = vst.msk [vmem:[%s1949_s3 + $0x64] sm:$0xf] %vm1011_vm2, %v1241_v10  ;;  %1069 = vst.msk [vmem:[%s1949_s3 + $0xe4] sm:$0xf] %vm1011_vm2, %v1273_v11  ;;  %v549_v18 = vadd.f32 %v1624_v40, %v548_v16  ;;  %v677_v19 = vadd.f32 %v1624_v40, %v676_v17  ;;  %v1364_v20 = vpop.f32.mrb[30].mxu0  ;;  %v1396_v21 = vpop.f32.mrb[30].mxu1 }
 0x12c   :  { %v721_v22 = vmax.f32 %v557_v14, 0.0  ;;  %v753_v23 = vmax.f32 %v685_v15, 0.0  ;;  %v560_v24 = vadd.f32 %v1364_v20, %v1624_v40  ;;  %v688_v25 = vadd.f32 %v1396_v21, %v1624_v40  ;;  %v551_v26 = vpop.f32.mrb[31].mxu0  ;;  %v679_v27 = vpop.f32.mrb[31].mxu1 }
 0x12d   :  { %v719_v28 = vmax.f32 %v549_v18, 0.0  ;;  %v751_v29 = vmax.f32 %v677_v19, 0.0  ;;  %v552_v30 = vadd.f32 %v1624_v40, %v551_v26  ;;  %v680_v31 = vadd.f32 %v1624_v40, %v679_v27 }
 0x12e   :  { %v1246_v32 = vpack.c.bf16 %v721_v22, %v721_v22  ;;  %v1278_v33 = vpack.c.bf16 %v753_v23, %v753_v23  ;;  %v722_v34 = vmax.f32 %v560_v24, 0.0  ;;  %v754_v35 = vmax.f32 %v688_v25, 0.0 }
 0x12f   :  { %v1244_v36 = vpack.c.bf16 %v719_v28, %v719_v28  ;;  %v1276_v37 = vpack.c.bf16 %v751_v29, %v751_v29  ;;  %v720_v38 = vmax.f32 %v552_v30, 0.0  ;;  %v752_v39 = vmax.f32 %v680_v31, 0.0 }
 0x130   :  { %1042 = vst.msk [vmem:[%s1949_s3 + $0x78] sm:$0xf] %vm1011_vm2, %v1246_v32  ;;  %1074 = vst.msk [vmem:[%s1949_s3 + $0xf8] sm:$0xf] %vm1011_vm2, %v1278_v33  ;;  %v1247_v41 = vpack.c.bf16 %v722_v34, %v722_v34  ;;  %v1279_v40 = vpack.c.bf16 %v754_v35, %v754_v35 }
 0x131   :  { %1040 = vst.msk [vmem:[%s1949_s3 + $0x70] sm:$0xf] %vm1011_vm2, %v1244_v36  ;;  %1072 = vst.msk [vmem:[%s1949_s3 + $0xf0] sm:$0xf] %vm1011_vm2, %v1276_v37  ;;  %v1245_v42 = vpack.c.bf16 %v720_v38, %v720_v38  ;;  %v1277_v43 = vpack.c.bf16 %v752_v39, %v752_v39 }
 0x132   :  { %1043 = vst.msk [vmem:[%s1949_s3 + $0x7c] sm:$0xf] %vm1011_vm2, %v1247_v41  ;;  %1075 = vst.msk [vmem:[%s1949_s3 + $0xfc] sm:$0xf] %vm1011_vm2, %v1279_v40 }
 0x133   :  { %1041 = vst.msk [vmem:[%s1949_s3 + $0x74] sm:$0xf] %vm1011_vm2, %v1245_v42  ;;  %1073 = vst.msk [vmem:[%s1949_s3 + $0xf4] sm:$0xf] %vm1011_vm2, %v1277_v43 }

// kernel: vae_forward.14
= control target key start
LH: loop header
LB: loop body
LE: loop exit
PB: predicated region body
PF: predicated region fallthrough
CT: control target
= control target key end

     0   :  { %s158_s22 = smov 104   ;;  %vm136_vm0 = vcmask 191488   ;;  %s369_s0 = inlined_call_operand.vmem [shape: bf16[16,2,8,48], index: 0, kind: input, shape index: {}]   ;;  %s370_s1 = inlined_call_operand.vmem [shape: bf16[16,8,24], index: 1, kind: output, shape index: {}]  }
   0x1   :  { %v12_v0 = vld [vmem:[%s369_s0 + $0x10] sm:$0xf]  ;;  %v13_v1 = vld [vmem:[%s369_s0 + $0x14] sm:$0xf]  ;;  %v8_v2 = vld [vmem:[%s369_s0] sm:$0xf] }
   0x2   :  { %v178_v3 = vmax.bf16 %v13_v1, %v12_v0  ;;  %v9_v4 = vld [vmem:[%s369_s0 + $0x4] sm:$0xf]  ;;  %v14_v5 = vld [vmem:[%s369_s0 + $0x18] sm:$0xf]  ;;  %v15_v6 = vld [vmem:[%s369_s0 + $0x1c] sm:$0xf] }
   0x3   :  { %v189_v7 = vmax.bf16 %v9_v4, %v8_v2  ;;  %v10_v8 = vld [vmem:[%s369_s0 + $0x8] sm:$0xf]  ;;  %v11_v9 = vld [vmem:[%s369_s0 + $0xc] sm:$0xf]  ;;  %v199_v10 = vmax.bf16 %v15_v6, %v14_v5  ;;  %v16_v14 = vld [vmem:[%s369_s0 + $0x20] sm:$0xf] }
   0x4   :  { %76 = vrot.lane.b32.xlu1 %v178_v3, %s158_s22  ;;  %v203_v11 = vmax.bf16 %v11_v9, %v10_v8  ;;  %v18_v12 = vld [vmem:[%s369_s0 + $0x28] sm:$0xf]  ;;  %v19_v13 = vld [vmem:[%s369_s0 + $0x2c] sm:$0xf]  ;;  %v17_v15 = vld [vmem:[%s369_s0 + $0x24] sm:$0xf] }
   0x5   :  { %72 = vrot.lane.b32.xlu0 %v189_v7, %s158_s22  ;;  %v219_v16 = vmax.bf16 %v19_v13, %v18_v12  ;;  %v223_v17 = vmax.bf16 %v17_v15, %v16_v14  ;;  %v22_v18 = vld [vmem:[%s369_s0 + $0x38] sm:$0xf]  ;;  %v23_v19 = vld [vmem:[%s369_s0 + $0x3c] sm:$0xf]  ;;  %v20_v20 = vld [vmem:[%s369_s0 + $0x30] sm:$0xf] }
   0x6   :  { %v21_v21 = vld [vmem:[%s369_s0 + $0x34] sm:$0xf]  ;;  %v47_v22 = vmax.bf16 %v23_v19, %v22_v18  ;;  %v26_v24 = vld [vmem:[%s369_s0 + $0x48] sm:$0xf]  ;;  %v27_v25 = vld [vmem:[%s369_s0 + $0x4c] sm:$0xf] }
   0x7   :  { %v46_v23 = vmax.bf16 %v21_v21, %v20_v20  ;;  %v24_v26 = vld [vmem:[%s369_s0 + $0x40] sm:$0xf]  ;;  %v25_v27 = vld [vmem:[%s369_s0 + $0x44] sm:$0xf]  ;;  %v49_v28 = vmax.bf16 %v27_v25, %v26_v24  ;;  %v30_v30 = vld [vmem:[%s369_s0 + $0x58] sm:$0xf] }
   0x8   :  { %78 = vrot.lane.b32.xlu1 %v199_v10, %s158_s22  ;;  %v48_v29 = vmax.bf16 %v25_v27, %v24_v26  ;;  %v31_v31 = vld [vmem:[%s369_s0 + $0x5c] sm:$0xf]  ;;  %v28_v32 = vld [vmem:[%s369_s0 + $0x50] sm:$0xf]  ;;  %v29_v33 = vld [vmem:[%s369_s0 + $0x54] sm:$0xf] }
   0x9   :  { %74 = vrot.lane.b32.xlu0 %v203_v11, %s158_s22  ;;  %v51_v34 = vmax.bf16 %v31_v31, %v30_v30  ;;  %v50_v35 = vmax.bf16 %v29_v33, %v28_v32  ;;  %v34_v36 = vld [vmem:[%s369_s0 + $0x68] sm:$0xf]  ;;  %v35_v37 = vld [vmem:[%s369_s0 + $0x6c] sm:$0xf]  ;;  %v32_v38 = vld [vmem:[%s369_s0 + $0x60] sm:$0xf] }
   0xa   :  { %v33_v39 = vld [vmem:[%s369_s0 + $0x64] sm:$0xf]  ;;  %v53_v40 = vmax.bf16 %v35_v37, %v34_v36  ;;  %v38_v42 = vld [vmem:[%s369_s0 + $0x78] sm:$0xf]  ;;  %v39_v43 = vld [vmem:[%s369_s0 + $0x7c] sm:$0xf] }
   0xb   :  { %v52_v41 = vmax.bf16 %v33_v39, %v32_v38  ;;  %v36_v44 = vld [vmem:[%s369_s0 + $0x70] sm:$0xf]  ;;  %v37_v45 = vld [vmem:[%s369_s0 + $0x74] sm:$0xf]  ;;  %v55_v46 = vmax.bf16 %v39_v43, %v38_v42 }
   0xc   :  { %82 = vrot.lane.b32.xlu1 %v219_v16, %s158_s22  ;;  %v54_v47 = vmax.bf16 %v37_v45, %v36_v44 }
   0xd   :  { %80 = vrot.lane.b32.xlu0 %v223_v17, %s158_s22 }
  0x10   :  { %86 = vrot.lane.b32.xlu1 %v47_v22, %s158_s22 }
  0x11   :  { %84 = vrot.lane.b32.xlu0 %v46_v23, %s158_s22 }
  0x14   :  { %90 = vrot.lane.b32.xlu1 %v49_v28, %s158_s22 }
  0x15   :  { %88 = vrot.lane.b32.xlu0 %v48_v29, %s158_s22 }
  0x18   :  { %94 = vrot.lane.b32.xlu1 %v51_v34, %s158_s22 }
  0x19   :  { %92 = vrot.lane.b32.xlu0 %v50_v35, %s158_s22 }
  0x1c   :  { %98 = vrot.lane.b32.xlu1 %v53_v40, %s158_s22 }
  0x1d   :  { %96 = vrot.lane.b32.xlu0 %v52_v41, %s158_s22 }
  0x20   :  { %102 = vrot.lane.b32.xlu1 %v55_v46, %s158_s22 }
  0x21   :  { %100 = vrot.lane.b32.xlu0 %v54_v47, %s158_s22 }
  0x76   :  { %v77_v48 = vpop.permute.xlu1 %76 }
  0x77   :  { %v122_v49 = vmax.bf16 %v77_v48, %v178_v3  ;;  %v73_v50 = vpop.permute.xlu0 %72 }
  0x78   :  { %v120_v51 = vmax.bf16 %v73_v50, %v189_v7 }
  0x79   :  { %139 = vst.msk [vmem:[%s370_s1 + $0x8] sm:$0xf] %vm136_vm0, %v122_v49 }
  0x7a   :  { %137 = vst.msk [vmem:[%s370_s1] sm:$0xf] %vm136_vm0, %v120_v51  ;;  %v79_v52 = vpop.permute.xlu1 %78 }
  0x7b   :  { %v123_v53 = vmax.bf16 %v79_v52, %v199_v10  ;;  %v75_v54 = vpop.permute.xlu0 %74 }
  0x7c   :  { %v121_v55 = vmax.bf16 %v75_v54, %v203_v11 }
  0x7d   :  { %140 = vst.msk [vmem:[%s370_s1 + $0xc] sm:$0xf] %vm136_vm0, %v123_v53 }
  0x7e   :  { %138 = vst.msk [vmem:[%s370_s1 + $0x4] sm:$0xf] %vm136_vm0, %v121_v55  ;;  %v83_v56 = vpop.permute.xlu1 %82 }
  0x7f   :  { %v125_v57 = vmax.bf16 %v83_v56, %v219_v16  ;;  %v81_v58 = vpop.permute.xlu0 %80 }
  0x80   :  { %v124_v59 = vmax.bf16 %v81_v58, %v223_v17 }
  0x81   :  { %142 = vst.msk [vmem:[%s370_s1 + $0x14] sm:$0xf] %vm136_vm0, %v125_v57 }
  0x82   :  { %141 = vst.msk [vmem:[%s370_s1 + $0x10] sm:$0xf] %vm136_vm0, %v124_v59  ;;  %v87_v60 = vpop.permute.xlu1 %86 }
  0x83   :  { %v127_v61 = vmax.bf16 %v87_v60, %v47_v22  ;;  %v85_v62 = vpop.permute.xlu0 %84 }
  0x84   :  { %v126_v63 = vmax.bf16 %v85_v62, %v46_v23 }
  0x85   :  { %144 = vst.msk [vmem:[%s370_s1 + $0x1c] sm:$0xf] %vm136_vm0, %v127_v61 }
  0x86   :  { %143 = vst.msk [vmem:[%s370_s1 + $0x18] sm:$0xf] %vm136_vm0, %v126_v63  ;;  %v91_v0 = vpop.permute.xlu1 %90 }
  0x87   :  { %v129_v1 = vmax.bf16 %v91_v0, %v49_v28  ;;  %v89_v2 = vpop.permute.xlu0 %88 }
  0x88   :  { %v128_v3 = vmax.bf16 %v89_v2, %v48_v29 }
  0x89   :  { %146 = vst.msk [vmem:[%s370_s1 + $0x24] sm:$0xf] %vm136_vm0, %v129_v1 }
  0x8a   :  { %145 = vst.msk [vmem:[%s370_s1 + $0x20] sm:$0xf] %vm136_vm0, %v128_v3  ;;  %v95_v4 = vpop.permute.xlu1 %94 }
  0x8b   :  { %v131_v5 = vmax.bf16 %v95_v4, %v51_v34  ;;  %v93_v6 = vpop.permute.xlu0 %92 }
  0x8c   :  { %v130_v7 = vmax.bf16 %v93_v6, %v50_v35 }
  0x8d   :  { %148 = vst.msk [vmem:[%s370_s1 + $0x2c] sm:$0xf] %vm136_vm0, %v131_v5 }
  0x8e   :  { %147 = vst.msk [vmem:[%s370_s1 + $0x28] sm:$0xf] %vm136_vm0, %v130_v7  ;;  %v99_v8 = vpop.permute.xlu1 %98 }
  0x8f   :  { %v133_v9 = vmax.bf16 %v99_v8, %v53_v40  ;;  %v97_v10 = vpop.permute.xlu0 %96 }
  0x90   :  { %v132_v11 = vmax.bf16 %v97_v10, %v52_v41 }
  0x91   :  { %150 = vst.msk [vmem:[%s370_s1 + $0x34] sm:$0xf] %vm136_vm0, %v133_v9 }
  0x92   :  { %149 = vst.msk [vmem:[%s370_s1 + $0x30] sm:$0xf] %vm136_vm0, %v132_v11  ;;  %v103_v12 = vpop.permute.xlu1 %102 }
  0x93   :  { %v135_v13 = vmax.bf16 %v103_v12, %v55_v46  ;;  %v101_v14 = vpop.permute.xlu0 %100 }
  0x94   :  { %v134_v15 = vmax.bf16 %v101_v14, %v54_v47 }
  0x95   :  { %152 = vst.msk [vmem:[%s370_s1 + $0x3c] sm:$0xf] %vm136_vm0, %v135_v13 }
  0x96   :  { %151 = vst.msk [vmem:[%s370_s1 + $0x38] sm:$0xf] %vm136_vm0, %v134_v15 }

// kernel: vae_forward.15
= control target key start
LH: loop header
LB: loop body
LE: loop exit
PB: predicated region body
PF: predicated region fallthrough
CT: control target
= control target key end

     0   :  { %v583_v0 = vmov 0   ;;  %vm218_vm0 = vcmask 719872   ;;  %vm243_vm1 = vcmask 1043456   ;;  %vm424_vm2 = vcmask 191488   ;;  %s815_s1 = inlined_call_operand.vmem [shape: bf16[216,24], index: 1, kind: input, shape index: {}]   ;;  %s816_s0 = inlined_call_operand.vmem [shape: bf16[128,216], index: 0, kind: input, shape index: {}]   ;;  %s817_s2 = inlined_call_operand.vmem [shape: f32[1,24], index: 2, kind: input, shape index: {}]   ;;  %s818_s3 = inlined_call_operand.vmem [shape: bf16[128,24], index: 3, kind: output, shape index: {}]  }
   0x1   :  { %247 = vmatprep.subr.bf16.mxu0 %v583_v0  ;;  %516 = vmatprep.subr.bf16.mxu1 %v583_v0  ;;  %v545_v1 = vld [vmem:[%s815_s1] sm:$0xff]   ;;  %v546_v2 = vld [vmem:[%s815_s1 + $0x8] sm:$0xff]   ;;  %v547_v3 = vld [vmem:[%s815_s1 + $0x10] sm:$0xff]  }
   0x2   :  { %248 = vmatpush1.bf16.msra.mxu0 %v545_v1  ;;  %530 = vmatpush1.bf16.msra.mxu1 %v545_v1  ;;  %v548_v4 = vld [vmem:[%s815_s1 + $0x18] sm:$0xff]   ;;  %v549_v5 = vld [vmem:[%s815_s1 + $0x20] sm:$0xff]   ;;  %v550_v8 = vld [vmem:[%s815_s1 + $0x28] sm:$0xff]  }
   0x3   :  { %249 = vmatprep.subr.bf16.mxu0 %v583_v0  ;;  %517 = vmatprep.subr.bf16.mxu1 %v583_v0  ;;  %v561_v6 = vld [vmem:[%s816_s0 + $0x4] ss:$8 sps:$4 sm:$0xff]   ;;  %v551_v9 = vld [vmem:[%s815_s1 + $0x30] sm:$0xff]   ;;  %v552_v10 = vld [vmem:[%s815_s1 + $0x38] sm:$0xff]  }
   0x4   :  { %476 = vmatprep.mubr.msk.bf16.mxu0 %vm218_vm0, %v561_v6  ;;  %v564_v7 = vld [vmem:[%s816_s0 + $0x44] ss:$8 sps:$4 sm:$0xff]   ;;  %v555_v13 = vld [vmem:[%s815_s1 + $0x50] sm:$0xff]   ;;  %v556_v14 = vld [vmem:[%s815_s1 + $0x58] sm:$0xff]  }
   0x5   :  { %480 = vmatprep.mubr.msk.bf16.mxu1 %vm218_vm0, %v564_v7  ;;  %v553_v11 = vld [vmem:[%s815_s1 + $0x40] sm:$0xff]   ;;  %v554_v12 = vld [vmem:[%s815_s1 + $0x48] sm:$0xff]   ;;  %v565_v20 = vld [vmem:[%s816_s0 + $0x14] ss:$8 sps:$4 sm:$0xff]  }
   0x6   :  { %250 = vmatpush1.bf16.msra.mxu0 %v546_v2  ;;  %531 = vmatpush1.bf16.msra.mxu1 %v546_v2  ;;  %v557_v15 = vld [vmem:[%s815_s1 + $0x60] sm:$0xff]   ;;  %v558_v16 = vld [vmem:[%s815_s1 + $0x68] ss:$0 sps:$4 sm:$0xff]   ;;  %v567_v21 = vld [vmem:[%s816_s0 + $0x54] ss:$8 sps:$4 sm:$0xff]  }
   0x7   :  { %251 = vmatprep.subr.bf16.mxu0 %v583_v0  ;;  %518 = vmatprep.subr.bf16.mxu1 %v583_v0  ;;  %v245_v17 = vsel %vm243_vm1, %v558_v16, 0  ;;  %v559_v18 = vld [vmem:[%s816_s0] ss:$8 sps:$4 sm:$0xff]   ;;  %v569_v22 = vld [vmem:[%s816_s0 + $0x10] ss:$8 sps:$4 sm:$0xff]  }
   0x8   :  { %v562_v19 = vld [vmem:[%s816_s0 + $0x40] ss:$8 sps:$4 sm:$0xff]   ;;  %v570_v23 = vld [vmem:[%s816_s0 + $0x50] ss:$8 sps:$4 sm:$0xff]   ;;  %v571_v24 = vld [vmem:[%s816_s0 + $0x24] ss:$8 sps:$4 sm:$0xff]  }
   0x9   :  { %v573_v25 = vld [vmem:[%s816_s0 + $0x64] ss:$8 sps:$4 sm:$0xff]   ;;  %v575_v26 = vld [vmem:[%s816_s0 + $0x20] ss:$8 sps:$4 sm:$0xff]   ;;  %v577_v28 = vld [vmem:[%s816_s0 + $0x34] ss:$8 sps:$4 sm:$0xff]  }
   0xa   :  { %252 = vmatpush1.bf16.msra.mxu0 %v547_v3  ;;  %532 = vmatpush1.bf16.msra.mxu1 %v547_v3  ;;  %v576_v27 = vld [vmem:[%s816_s0 + $0x60] ss:$8 sps:$4 sm:$0xff]   ;;  %v579_v29 = vld [vmem:[%s816_s0 + $0x74] ss:$8 sps:$4 sm:$0xff]   ;;  %v581_v30 = vld [vmem:[%s816_s0 + $0x30] ss:$8 sps:$4 sm:$0xff]  }
   0xb   :  { %253 = vmatprep.subr.bf16.mxu0 %v583_v0  ;;  %519 = vmatprep.subr.bf16.mxu1 %v583_v0  ;;  %v582_v31 = vld [vmem:[%s816_s0 + $0x70] ss:$8 sps:$4 sm:$0xff]   ;;  %v733_v32 = vld [vmem:[%s817_s2] ss:$0 sm:$0xff] }
   0xe   :  { %254 = vmatpush1.bf16.msra.mxu0 %v548_v4  ;;  %533 = vmatpush1.bf16.msra.mxu1 %v548_v4 }
   0xf   :  { %255 = vmatprep.subr.bf16.mxu0 %v583_v0  ;;  %520 = vmatprep.subr.bf16.mxu1 %v583_v0 }
  0x12   :  { %256 = vmatpush1.bf16.msra.mxu0 %v549_v5  ;;  %534 = vmatpush1.bf16.msra.mxu1 %v549_v5 }
  0x13   :  { %257 = vmatprep.subr.bf16.mxu0 %v583_v0  ;;  %521 = vmatprep.subr.bf16.mxu1 %v583_v0 }
  0x16   :  { %258 = vmatpush1.bf16.msra.mxu0 %v550_v8  ;;  %535 = vmatpush1.bf16.msra.mxu1 %v550_v8 }
  0x17   :  { %259 = vmatprep.subr.bf16.mxu0 %v583_v0  ;;  %522 = vmatprep.subr.bf16.mxu1 %v583_v0 }
  0x1a   :  { %260 = vmatpush1.bf16.msra.mxu0 %v551_v9  ;;  %536 = vmatpush1.bf16.msra.mxu1 %v551_v9 }
  0x1b   :  { %261 = vmatprep.subr.bf16.mxu0 %v583_v0  ;;  %523 = vmatprep.subr.bf16.mxu1 %v583_v0 }
  0x1e   :  { %262 = vmatpush1.bf16.msra.mxu0 %v552_v10  ;;  %537 = vmatpush1.bf16.msra.mxu1 %v552_v10 }
  0x1f   :  { %263 = vmatprep.subr.bf16.mxu0 %v583_v0  ;;  %524 = vmatprep.subr.bf16.mxu1 %v583_v0 }
  0x22   :  { %264 = vmatpush1.bf16.msra.mxu0 %v553_v11  ;;  %538 = vmatpush1.bf16.msra.mxu1 %v553_v11 }
  0x23   :  { %265 = vmatprep.subr.bf16.mxu0 %v583_v0  ;;  %525 = vmatprep.subr.bf16.mxu1 %v583_v0 }
  0x26   :  { %266 = vmatpush1.bf16.msra.mxu0 %v554_v12  ;;  %539 = vmatpush1.bf16.msra.mxu1 %v554_v12 }
  0x27   :  { %267 = vmatprep.subr.bf16.mxu0 %v583_v0  ;;  %526 = vmatprep.subr.bf16.mxu1 %v583_v0 }
  0x2a   :  { %268 = vmatpush1.bf16.msra.mxu0 %v555_v13  ;;  %540 = vmatpush1.bf16.msra.mxu1 %v555_v13 }
  0x2b   :  { %269 = vmatprep.subr.bf16.mxu0 %v583_v0  ;;  %527 = vmatprep.subr.bf16.mxu1 %v583_v0 }
  0x2e   :  { %270 = vmatpush1.bf16.msra.mxu0 %v556_v14  ;;  %541 = vmatpush1.bf16.msra.mxu1 %v556_v14 }
  0x2f   :  { %271 = vmatprep.subr.bf16.mxu0 %v583_v0  ;;  %528 = vmatprep.subr.bf16.mxu1 %v583_v0 }
  0x32   :  { %272 = vmatpush1.bf16.msra.mxu0 %v557_v15  ;;  %542 = vmatpush1.bf16.msra.mxu1 %v557_v15 }
  0x33   :  { %273 = vmatprep.subr.bf16.mxu0 %v583_v0  ;;  %529 = vmatprep.subr.bf16.mxu1 %v583_v0 }
  0x36   :  { %274 = vmatpush1.bf16.msra.mxu0 %v245_v17  ;;  %543 = vmatpush1.bf16.msra.mxu1 %v245_v17 }
  0x39   :  { %280 = vmatmul.mubr.bf16.vlgmr.msra.gmra.mrb[0].mxu0 %v559_v18  ;;  %312 = vmatmul.mubr.bf16.vlgmr.msra.gmra.mrb[0].mxu1 %v562_v19 }
  0x3a   :  { %477 = vmatprep.mubr.msk.bf16.mxu0 %vm218_vm0, %v565_v20  ;;  %481 = vmatprep.mubr.msk.bf16.mxu1 %vm218_vm0, %v567_v21 }
  0x41   :  { %288 = vmatmul.mubr.bf16.gmra.mrb[4].mxu0 %v569_v22  ;;  %320 = vmatmul.mubr.bf16.gmra.mrb[4].mxu1 %v570_v23 }
  0x42   :  { %478 = vmatprep.mubr.msk.bf16.mxu0 %vm218_vm0, %v571_v24  ;;  %482 = vmatprep.mubr.msk.bf16.mxu1 %vm218_vm0, %v573_v25 }
  0x49   :  { %296 = vmatmul.mubr.bf16.gmra.mrb[8].mxu0 %v575_v26  ;;  %328 = vmatmul.mubr.bf16.gmra.mrb[8].mxu1 %v576_v27 }
  0x4a   :  { %479 = vmatprep.mubr.msk.bf16.mxu0 %vm218_vm0, %v577_v28  ;;  %483 = vmatprep.mubr.msk.bf16.mxu1 %vm218_vm0, %v579_v29 }
  0x51   :  { %304 = vmatmul.mubr.bf16.gmra.mrb[12].mxu0 %v581_v30  ;;  %336 = vmatmul.mubr.bf16.gmra.mrb[12].mxu1 %v582_v31 }
 0x10c   :  { %v281_v33 = vpop.f32.mrb[0].mxu0  ;;  %v313_v34 = vpop.f32.mrb[0].mxu1 }
 0x10d   :  { %v282_v35 = vadd.f32 %v733_v32, %v281_v33  ;;  %v314_v36 = vadd.f32 %v733_v32, %v313_v34  ;;  %v283_v37 = vpop.f32.mrb[1].mxu0  ;;  %v315_v38 = vpop.f32.mrb[1].mxu1 }
 0x10e   :  { %v284_v39 = vpop.f32.mrb[2].mxu0  ;;  %v316_v40 = vpop.f32.mrb[2].mxu1 }
 0x10f   :  { %v344_v41 = vmax.f32 %v282_v35, 0.0  ;;  %v352_v42 = vmax.f32 %v314_v36, 0.0  ;;  %v285_v43 = vadd.f32 %v733_v32, %v284_v39  ;;  %v317_v44 = vadd.f32 %v733_v32, %v316_v40  ;;  %v286_v45 = vpop.f32.mrb[3].mxu0  ;;  %v318_v46 = vpop.f32.mrb[3].mxu1 }
 0x111   :  { %v500_v47 = vpack.c.bf16 %v344_v41, %v344_v41  ;;  %v508_v48 = vpack.c.bf16 %v352_v42, %v352_v42  ;;  %v345_v49 = vmax.f32 %v285_v43, 0.0  ;;  %v353_v50 = vmax.f32 %v317_v44, 0.0 }
 0x113   :  { %425 = vst.msk [vmem:[%s818_s3] sm:$0xf] %vm424_vm2, %v500_v47  ;;  %433 = vst.msk [vmem:[%s818_s3 + $0x20] sm:$0xf] %vm424_vm2, %v508_v48  ;;  %v501_v51 = vpack.c.bf16 %v345_v49, %v345_v49  ;;  %v509_v52 = vpack.c.bf16 %v353_v50, %v353_v50 }
 0x114   :  { %v289_v53 = vpop.f32.mrb[4].mxu0  ;;  %v321_v54 = vpop.f32.mrb[4].mxu1 }
 0x115   :  { %426 = vst.msk [vmem:[%s818_s3 + $0x4] sm:$0xf] %vm424_vm2, %v501_v51  ;;  %434 = vst.msk [vmem:[%s818_s3 + $0x24] sm:$0xf] %vm424_vm2, %v509_v52  ;;  %v290_v55 = vadd.f32 %v733_v32, %v289_v53  ;;  %v322_v56 = vadd.f32 %v733_v32, %v321_v54  ;;  %v291_v57 = vpop.f32.mrb[5].mxu0  ;;  %v323_v58 = vpop.f32.mrb[5].mxu1 }
 0x116   :  { %v292_v59 = vpop.f32.mrb[6].mxu0  ;;  %v324_v60 = vpop.f32.mrb[6].mxu1 }
 0x117   :  { %v346_v61 = vmax.f32 %v290_v55, 0.0  ;;  %v354_v62 = vmax.f32 %v322_v56, 0.0  ;;  %v293_v63 = vadd.f32 %v733_v32, %v292_v59  ;;  %v325_v0 = vadd.f32 %v733_v32, %v324_v60  ;;  %v294_v1 = vpop.f32.mrb[7].mxu0  ;;  %v326_v2 = vpop.f32.mrb[7].mxu1 }
 0x119   :  { %v502_v3 = vpack.c.bf16 %v346_v61, %v346_v61  ;;  %v510_v4 = vpack.c.bf16 %v354_v62, %v354_v62  ;;  %v347_v5 = vmax.f32 %v293_v63, 0.0  ;;  %v355_v6 = vmax.f32 %v325_v0, 0.0 }
 0x11b   :  { %427 = vst.msk [vmem:[%s818_s3 + $0x8] sm:$0xf] %vm424_vm2, %v502_v3  ;;  %435 = vst.msk [vmem:[%s818_s3 + $0x28] sm:$0xf] %vm424_vm2, %v510_v4  ;;  %v503_v7 = vpack.c.bf16 %v347_v5, %v347_v5  ;;  %v511_v8 = vpack.c.bf16 %v355_v6, %v355_v6 }
 0x11c   :  { %v297_v9 = vpop.f32.mrb[8].mxu0  ;;  %v329_v10 = vpop.f32.mrb[8].mxu1 }
 0x11d   :  { %428 = vst.msk [vmem:[%s818_s3 + $0xc] sm:$0xf] %vm424_vm2, %v503_v7  ;;  %436 = vst.msk [vmem:[%s818_s3 + $0x2c] sm:$0xf] %vm424_vm2, %v511_v8  ;;  %v298_v11 = vadd.f32 %v733_v32, %v297_v9  ;;  %v330_v12 = vadd.f32 %v733_v32, %v329_v10  ;;  %v299_v13 = vpop.f32.mrb[9].mxu0  ;;  %v331_v14 = vpop.f32.mrb[9].mxu1 }
 0x11e   :  { %v300_v15 = vpop.f32.mrb[10].mxu0  ;;  %v332_v16 = vpop.f32.mrb[10].mxu1 }
 0x11f   :  { %v348_v17 = vmax.f32 %v298_v11, 0.0  ;;  %v356_v18 = vmax.f32 %v330_v12, 0.0  ;;  %v301_v19 = vadd.f32 %v733_v32, %v300_v15  ;;  %v333_v20 = vadd.f32 %v733_v32, %v332_v16  ;;  %v302_v21 = vpop.f32.mrb[11].mxu0  ;;  %v334_v22 = vpop.f32.mrb[11].mxu1 }
 0x121   :  { %v504_v23 = vpack.c.bf16 %v348_v17, %v348_v17  ;;  %v512_v24 = vpack.c.bf16 %v356_v18, %v356_v18  ;;  %v349_v25 = vmax.f32 %v301_v19, 0.0  ;;  %v357_v26 = vmax.f32 %v333_v20, 0.0 }
 0x123   :  { %429 = vst.msk [vmem:[%s818_s3 + $0x10] sm:$0xf] %vm424_vm2, %v504_v23  ;;  %437 = vst.msk [vmem:[%s818_s3 + $0x30] sm:$0xf] %vm424_vm2, %v512_v24  ;;  %v505_v27 = vpack.c.bf16 %v349_v25, %v349_v25  ;;  %v513_v28 = vpack.c.bf16 %v357_v26, %v357_v26 }
 0x124   :  { %v305_v29 = vpop.f32.mrb[12].mxu0  ;;  %v337_v30 = vpop.f32.mrb[12].mxu1 }
 0x125   :  { %430 = vst.msk [vmem:[%s818_s3 + $0x14] sm:$0xf] %vm424_vm2, %v505_v27  ;;  %438 = vst.msk [vmem:[%s818_s3 + $0x34] sm:$0xf] %vm424_vm2, %v513_v28  ;;  %v306_v31 = vadd.f32 %v733_v32, %v305_v29  ;;  %v338_v33 = vadd.f32 %v733_v32, %v337_v30  ;;  %v307_v34 = vpop.f32.mrb[13].mxu0  ;;  %v339_v35 = vpop.f32.mrb[13].mxu1 }
 0x126   :  { %v308_v36 = vpop.f32.mrb[14].mxu0  ;;  %v340_v37 = vpop.f32.mrb[14].mxu1 }
 0x127   :  { %v350_v38 = vmax.f32 %v306_v31, 0.0  ;;  %v358_v39 = vmax.f32 %v338_v33, 0.0  ;;  %v309_v40 = vadd.f32 %v733_v32, %v308_v36  ;;  %v341_v41 = vadd.f32 %v733_v32, %v340_v37  ;;  %v310_v42 = vpop.f32.mrb[15].mxu0  ;;  %v342_v43 = vpop.f32.mrb[15].mxu1 }
 0x129   :  { %v506_v44 = vpack.c.bf16 %v350_v38, %v350_v38  ;;  %v514_v45 = vpack.c.bf16 %v358_v39, %v358_v39  ;;  %v351_v46 = vmax.f32 %v309_v40, 0.0  ;;  %v359_v47 = vmax.f32 %v341_v41, 0.0 }
 0x12b   :  { %431 = vst.msk [vmem:[%s818_s3 + $0x18] sm:$0xf] %vm424_vm2, %v506_v44  ;;  %439 = vst.msk [vmem:[%s818_s3 + $0x38] sm:$0xf] %vm424_vm2, %v514_v45  ;;  %v507_v48 = vpack.c.bf16 %v351_v46, %v351_v46  ;;  %v515_v49 = vpack.c.bf16 %v359_v47, %v359_v47 }
 0x12d   :  { %432 = vst.msk [vmem:[%s818_s3 + $0x1c] sm:$0xf] %vm424_vm2, %v507_v48  ;;  %440 = vst.msk [vmem:[%s818_s3 + $0x3c] sm:$0xf] %vm424_vm2, %v515_v49 }

// kernel: vae_forward.16
= control target key start
LH: loop header
LB: loop body
LE: loop exit
PB: predicated region body
PF: predicated region fallthrough
CT: control target
= control target key end

     0   :  { %v583_v0 = vmov 0   ;;  %vm218_vm0 = vcmask 719872   ;;  %vm243_vm1 = vcmask 1043456   ;;  %vm424_vm2 = vcmask 388096   ;;  %s815_s1 = inlined_call_operand.vmem [shape: bf16[216,48], index: 1, kind: input, shape index: {}]   ;;  %s816_s0 = inlined_call_operand.vmem [shape: bf16[128,216], index: 0, kind: input, shape index: {}]   ;;  %s817_s2 = inlined_call_operand.vmem [shape: f32[1,48], index: 2, kind: input, shape index: {}]   ;;  %s818_s3 = inlined_call_operand.vmem [shape: bf16[128,48], index: 3, kind: output, shape index: {}]  }
   0x1   :  { %247 = vmatprep.subr.bf16.mxu0 %v583_v0  ;;  %516 = vmatprep.subr.bf16.mxu1 %v583_v0  ;;  %v545_v1 = vld [vmem:[%s815_s1] sm:$0xff]   ;;  %v546_v2 = vld [vmem:[%s815_s1 + $0x8] sm:$0xff]   ;;  %v547_v3 = vld [vmem:[%s815_s1 + $0x10] sm:$0xff]  }
   0x2   :  { %248 = vmatpush1.bf16.msra.mxu0 %v545_v1  ;;  %530 = vmatpush1.bf16.msra.mxu1 %v545_v1  ;;  %v548_v4 = vld [vmem:[%s815_s1 + $0x18] sm:$0xff]   ;;  %v549_v5 = vld [vmem:[%s815_s1 + $0x20] sm:$0xff]   ;;  %v550_v8 = vld [vmem:[%s815_s1 + $0x28] sm:$0xff]  }
   0x3   :  { %249 = vmatprep.subr.bf16.mxu0 %v583_v0  ;;  %517 = vmatprep.subr.bf16.mxu1 %v583_v0  ;;  %v561_v6 = vld [vmem:[%s816_s0 + $0x4] ss:$8 sps:$4 sm:$0xff]   ;;  %v551_v9 = vld [vmem:[%s815_s1 + $0x30] sm:$0xff]   ;;  %v552_v10 = vld [vmem:[%s815_s1 + $0x38] sm:$0xff]  }
   0x4   :  { %476 = vmatprep.mubr.msk.bf16.mxu0 %vm218_vm0, %v561_v6  ;;  %v564_v7 = vld [vmem:[%s816_s0 + $0x44] ss:$8 sps:$4 sm:$0xff]   ;;  %v555_v13 = vld [vmem:[%s815_s1 + $0x50] sm:$0xff]   ;;  %v556_v14 = vld [vmem:[%s815_s1 + $0x58] sm:$0xff]  }
   0x5   :  { %480 = vmatprep.mubr.msk.bf16.mxu1 %vm218_vm0, %v564_v7  ;;  %v553_v11 = vld [vmem:[%s815_s1 + $0x40] sm:$0xff]   ;;  %v554_v12 = vld [vmem:[%s815_s1 + $0x48] sm:$0xff]   ;;  %v565_v20 = vld [vmem:[%s816_s0 + $0x14] ss:$8 sps:$4 sm:$0xff]  }
   0x6   :  { %250 = vmatpush1.bf16.msra.mxu0 %v546_v2  ;;  %531 = vmatpush1.bf16.msra.mxu1 %v546_v2  ;;  %v557_v15 = vld [vmem:[%s815_s1 + $0x60] sm:$0xff]   ;;  %v558_v16 = vld [vmem:[%s815_s1 + $0x68] ss:$0 sps:$4 sm:$0xff]   ;;  %v567_v21 = vld [vmem:[%s816_s0 + $0x54] ss:$8 sps:$4 sm:$0xff]  }
   0x7   :  { %251 = vmatprep.subr.bf16.mxu0 %v583_v0  ;;  %518 = vmatprep.subr.bf16.mxu1 %v583_v0  ;;  %v245_v17 = vsel %vm243_vm1, %v558_v16, 0  ;;  %v559_v18 = vld [vmem:[%s816_s0] ss:$8 sps:$4 sm:$0xff]   ;;  %v569_v22 = vld [vmem:[%s816_s0 + $0x10] ss:$8 sps:$4 sm:$0xff]  }
   0x8   :  { %v562_v19 = vld [vmem:[%s816_s0 + $0x40] ss:$8 sps:$4 sm:$0xff]   ;;  %v570_v23 = vld [vmem:[%s816_s0 + $0x50] ss:$8 sps:$4 sm:$0xff]   ;;  %v571_v24 = vld [vmem:[%s816_s0 + $0x24] ss:$8 sps:$4 sm:$0xff]  }
   0x9   :  { %v573_v25 = vld [vmem:[%s816_s0 + $0x64] ss:$8 sps:$4 sm:$0xff]   ;;  %v575_v26 = vld [vmem:[%s816_s0 + $0x20] ss:$8 sps:$4 sm:$0xff]   ;;  %v577_v28 = vld [vmem:[%s816_s0 + $0x34] ss:$8 sps:$4 sm:$0xff]  }
   0xa   :  { %252 = vmatpush1.bf16.msra.mxu0 %v547_v3  ;;  %532 = vmatpush1.bf16.msra.mxu1 %v547_v3  ;;  %v576_v27 = vld [vmem:[%s816_s0 + $0x60] ss:$8 sps:$4 sm:$0xff]   ;;  %v579_v29 = vld [vmem:[%s816_s0 + $0x74] ss:$8 sps:$4 sm:$0xff]   ;;  %v581_v30 = vld [vmem:[%s816_s0 + $0x30] ss:$8 sps:$4 sm:$0xff]  }
   0xb   :  { %253 = vmatprep.subr.bf16.mxu0 %v583_v0  ;;  %519 = vmatprep.subr.bf16.mxu1 %v583_v0  ;;  %v582_v31 = vld [vmem:[%s816_s0 + $0x70] ss:$8 sps:$4 sm:$0xff]   ;;  %v733_v32 = vld [vmem:[%s817_s2] ss:$0 sm:$0xff] }
   0xe   :  { %254 = vmatpush1.bf16.msra.mxu0 %v548_v4  ;;  %533 = vmatpush1.bf16.msra.mxu1 %v548_v4 }
   0xf   :  { %255 = vmatprep.subr.bf16.mxu0 %v583_v0  ;;  %520 = vmatprep.subr.bf16.mxu1 %v583_v0 }
  0x12   :  { %256 = vmatpush1.bf16.msra.mxu0 %v549_v5  ;;  %534 = vmatpush1.bf16.msra.mxu1 %v549_v5 }
  0x13   :  { %257 = vmatprep.subr.bf16.mxu0 %v583_v0  ;;  %521 = vmatprep.subr.bf16.mxu1 %v583_v0 }
  0x16   :  { %258 = vmatpush1.bf16.msra.mxu0 %v550_v8  ;;  %535 = vmatpush1.bf16.msra.mxu1 %v550_v8 }
  0x17   :  { %259 = vmatprep.subr.bf16.mxu0 %v583_v0  ;;  %522 = vmatprep.subr.bf16.mxu1 %v583_v0 }
  0x1a   :  { %260 = vmatpush1.bf16.msra.mxu0 %v551_v9  ;;  %536 = vmatpush1.bf16.msra.mxu1 %v551_v9 }
  0x1b   :  { %261 = vmatprep.subr.bf16.mxu0 %v583_v0  ;;  %523 = vmatprep.subr.bf16.mxu1 %v583_v0 }
  0x1e   :  { %262 = vmatpush1.bf16.msra.mxu0 %v552_v10  ;;  %537 = vmatpush1.bf16.msra.mxu1 %v552_v10 }
  0x1f   :  { %263 = vmatprep.subr.bf16.mxu0 %v583_v0  ;;  %524 = vmatprep.subr.bf16.mxu1 %v583_v0 }
  0x22   :  { %264 = vmatpush1.bf16.msra.mxu0 %v553_v11  ;;  %538 = vmatpush1.bf16.msra.mxu1 %v553_v11 }
  0x23   :  { %265 = vmatprep.subr.bf16.mxu0 %v583_v0  ;;  %525 = vmatprep.subr.bf16.mxu1 %v583_v0 }
  0x26   :  { %266 = vmatpush1.bf16.msra.mxu0 %v554_v12  ;;  %539 = vmatpush1.bf16.msra.mxu1 %v554_v12 }
  0x27   :  { %267 = vmatprep.subr.bf16.mxu0 %v583_v0  ;;  %526 = vmatprep.subr.bf16.mxu1 %v583_v0 }
  0x2a   :  { %268 = vmatpush1.bf16.msra.mxu0 %v555_v13  ;;  %540 = vmatpush1.bf16.msra.mxu1 %v555_v13 }
  0x2b   :  { %269 = vmatprep.subr.bf16.mxu0 %v583_v0  ;;  %527 = vmatprep.subr.bf16.mxu1 %v583_v0 }
  0x2e   :  { %270 = vmatpush1.bf16.msra.mxu0 %v556_v14  ;;  %541 = vmatpush1.bf16.msra.mxu1 %v556_v14 }
  0x2f   :  { %271 = vmatprep.subr.bf16.mxu0 %v583_v0  ;;  %528 = vmatprep.subr.bf16.mxu1 %v583_v0 }
  0x32   :  { %272 = vmatpush1.bf16.msra.mxu0 %v557_v15  ;;  %542 = vmatpush1.bf16.msra.mxu1 %v557_v15 }
  0x33   :  { %273 = vmatprep.subr.bf16.mxu0 %v583_v0  ;;  %529 = vmatprep.subr.bf16.mxu1 %v583_v0 }
  0x36   :  { %274 = vmatpush1.bf16.msra.mxu0 %v245_v17  ;;  %543 = vmatpush1.bf16.msra.mxu1 %v245_v17 }
  0x39   :  { %280 = vmatmul.mubr.bf16.vlgmr.msra.gmra.mrb[0].mxu0 %v559_v18  ;;  %312 = vmatmul.mubr.bf16.vlgmr.msra.gmra.mrb[0].mxu1 %v562_v19 }
  0x3a   :  { %477 = vmatprep.mubr.msk.bf16.mxu0 %vm218_vm0, %v565_v20  ;;  %481 = vmatprep.mubr.msk.bf16.mxu1 %vm218_vm0, %v567_v21 }
  0x41   :  { %288 = vmatmul.mubr.bf16.gmra.mrb[4].mxu0 %v569_v22  ;;  %320 = vmatmul.mubr.bf16.gmra.mrb[4].mxu1 %v570_v23 }
  0x42   :  { %478 = vmatprep.mubr.msk.bf16.mxu0 %vm218_vm0, %v571_v24  ;;  %482 = vmatprep.mubr.msk.bf16.mxu1 %vm218_vm0, %v573_v25 }
  0x49   :  { %296 = vmatmul.mubr.bf16.gmra.mrb[8].mxu0 %v575_v26  ;;  %328 = vmatmul.mubr.bf16.gmra.mrb[8].mxu1 %v576_v27 }
  0x4a   :  { %479 = vmatprep.mubr.msk.bf16.mxu0 %vm218_vm0, %v577_v28  ;;  %483 = vmatprep.mubr.msk.bf16.mxu1 %vm218_vm0, %v579_v29 }
  0x51   :  { %304 = vmatmul.mubr.bf16.gmra.mrb[12].mxu0 %v581_v30  ;;  %336 = vmatmul.mubr.bf16.gmra.mrb[12].mxu1 %v582_v31 }
 0x10c   :  { %v281_v33 = vpop.f32.mrb[0].mxu0  ;;  %v313_v34 = vpop.f32.mrb[0].mxu1 }
 0x10d   :  { %v282_v35 = vadd.f32 %v733_v32, %v281_v33  ;;  %v314_v36 = vadd.f32 %v733_v32, %v313_v34  ;;  %v283_v37 = vpop.f32.mrb[1].mxu0  ;;  %v315_v38 = vpop.f32.mrb[1].mxu1 }
 0x10e   :  { %v284_v39 = vpop.f32.mrb[2].mxu0  ;;  %v316_v40 = vpop.f32.mrb[2].mxu1 }
 0x10f   :  { %v344_v41 = vmax.f32 %v282_v35, 0.0  ;;  %v352_v42 = vmax.f32 %v314_v36, 0.0  ;;  %v285_v43 = vadd.f32 %v733_v32, %v284_v39  ;;  %v317_v44 = vadd.f32 %v733_v32, %v316_v40  ;;  %v286_v45 = vpop.f32.mrb[3].mxu0  ;;  %v318_v46 = vpop.f32.mrb[3].mxu1 }
 0x111   :  { %v500_v47 = vpack.c.bf16 %v344_v41, %v344_v41  ;;  %v508_v48 = vpack.c.bf16 %v352_v42, %v352_v42  ;;  %v345_v49 = vmax.f32 %v285_v43, 0.0  ;;  %v353_v50 = vmax.f32 %v317_v44, 0.0 }
 0x113   :  { %425 = vst.msk [vmem:[%s818_s3] sm:$0xf] %vm424_vm2, %v500_v47  ;;  %433 = vst.msk [vmem:[%s818_s3 + $0x20] sm:$0xf] %vm424_vm2, %v508_v48  ;;  %v501_v51 = vpack.c.bf16 %v345_v49, %v345_v49  ;;  %v509_v52 = vpack.c.bf16 %v353_v50, %v353_v50 }
 0x114   :  { %v289_v53 = vpop.f32.mrb[4].mxu0  ;;  %v321_v54 = vpop.f32.mrb[4].mxu1 }
 0x115   :  { %426 = vst.msk [vmem:[%s818_s3 + $0x4] sm:$0xf] %vm424_vm2, %v501_v51  ;;  %434 = vst.msk [vmem:[%s818_s3 + $0x24] sm:$0xf] %vm424_vm2, %v509_v52  ;;  %v290_v55 = vadd.f32 %v733_v32, %v289_v53  ;;  %v322_v56 = vadd.f32 %v733_v32, %v321_v54  ;;  %v291_v57 = vpop.f32.mrb[5].mxu0  ;;  %v323_v58 = vpop.f32.mrb[5].mxu1 }
 0x116   :  { %v292_v59 = vpop.f32.mrb[6].mxu0  ;;  %v324_v60 = vpop.f32.mrb[6].mxu1 }
 0x117   :  { %v346_v61 = vmax.f32 %v290_v55, 0.0  ;;  %v354_v62 = vmax.f32 %v322_v56, 0.0  ;;  %v293_v63 = vadd.f32 %v733_v32, %v292_v59  ;;  %v325_v0 = vadd.f32 %v733_v32, %v324_v60  ;;  %v294_v1 = vpop.f32.mrb[7].mxu0  ;;  %v326_v2 = vpop.f32.mrb[7].mxu1 }
 0x119   :  { %v502_v3 = vpack.c.bf16 %v346_v61, %v346_v61  ;;  %v510_v4 = vpack.c.bf16 %v354_v62, %v354_v62  ;;  %v347_v5 = vmax.f32 %v293_v63, 0.0  ;;  %v355_v6 = vmax.f32 %v325_v0, 0.0 }
 0x11b   :  { %427 = vst.msk [vmem:[%s818_s3 + $0x8] sm:$0xf] %vm424_vm2, %v502_v3  ;;  %435 = vst.msk [vmem:[%s818_s3 + $0x28] sm:$0xf] %vm424_vm2, %v510_v4  ;;  %v503_v7 = vpack.c.bf16 %v347_v5, %v347_v5  ;;  %v511_v8 = vpack.c.bf16 %v355_v6, %v355_v6 }
 0x11c   :  { %v297_v9 = vpop.f32.mrb[8].mxu0  ;;  %v329_v10 = vpop.f32.mrb[8].mxu1 }
 0x11d   :  { %428 = vst.msk [vmem:[%s818_s3 + $0xc] sm:$0xf] %vm424_vm2, %v503_v7  ;;  %436 = vst.msk [vmem:[%s818_s3 + $0x2c] sm:$0xf] %vm424_vm2, %v511_v8  ;;  %v298_v11 = vadd.f32 %v733_v32, %v297_v9  ;;  %v330_v12 = vadd.f32 %v733_v32, %v329_v10  ;;  %v299_v13 = vpop.f32.mrb[9].mxu0  ;;  %v331_v14 = vpop.f32.mrb[9].mxu1 }
 0x11e   :  { %v300_v15 = vpop.f32.mrb[10].mxu0  ;;  %v332_v16 = vpop.f32.mrb[10].mxu1 }
 0x11f   :  { %v348_v17 = vmax.f32 %v298_v11, 0.0  ;;  %v356_v18 = vmax.f32 %v330_v12, 0.0  ;;  %v301_v19 = vadd.f32 %v733_v32, %v300_v15  ;;  %v333_v20 = vadd.f32 %v733_v32, %v332_v16  ;;  %v302_v21 = vpop.f32.mrb[11].mxu0  ;;  %v334_v22 = vpop.f32.mrb[11].mxu1 }
 0x121   :  { %v504_v23 = vpack.c.bf16 %v348_v17, %v348_v17  ;;  %v512_v24 = vpack.c.bf16 %v356_v18, %v356_v18  ;;  %v349_v25 = vmax.f32 %v301_v19, 0.0  ;;  %v357_v26 = vmax.f32 %v333_v20, 0.0 }
 0x123   :  { %429 = vst.msk [vmem:[%s818_s3 + $0x10] sm:$0xf] %vm424_vm2, %v504_v23  ;;  %437 = vst.msk [vmem:[%s818_s3 + $0x30] sm:$0xf] %vm424_vm2, %v512_v24  ;;  %v505_v27 = vpack.c.bf16 %v349_v25, %v349_v25  ;;  %v513_v28 = vpack.c.bf16 %v357_v26, %v357_v26 }
 0x124   :  { %v305_v29 = vpop.f32.mrb[12].mxu0  ;;  %v337_v30 = vpop.f32.mrb[12].mxu1 }
 0x125   :  { %430 = vst.msk [vmem:[%s818_s3 + $0x14] sm:$0xf] %vm424_vm2, %v505_v27  ;;  %438 = vst.msk [vmem:[%s818_s3 + $0x34] sm:$0xf] %vm424_vm2, %v513_v28  ;;  %v306_v31 = vadd.f32 %v733_v32, %v305_v29  ;;  %v338_v33 = vadd.f32 %v733_v32, %v337_v30  ;;  %v307_v34 = vpop.f32.mrb[13].mxu0  ;;  %v339_v35 = vpop.f32.mrb[13].mxu1 }
 0x126   :  { %v308_v36 = vpop.f32.mrb[14].mxu0  ;;  %v340_v37 = vpop.f32.mrb[14].mxu1 }
 0x127   :  { %v350_v38 = vmax.f32 %v306_v31, 0.0  ;;  %v358_v39 = vmax.f32 %v338_v33, 0.0  ;;  %v309_v40 = vadd.f32 %v733_v32, %v308_v36  ;;  %v341_v41 = vadd.f32 %v733_v32, %v340_v37  ;;  %v310_v42 = vpop.f32.mrb[15].mxu0  ;;  %v342_v43 = vpop.f32.mrb[15].mxu1 }
 0x129   :  { %v506_v44 = vpack.c.bf16 %v350_v38, %v350_v38  ;;  %v514_v45 = vpack.c.bf16 %v358_v39, %v358_v39  ;;  %v351_v46 = vmax.f32 %v309_v40, 0.0  ;;  %v359_v47 = vmax.f32 %v341_v41, 0.0 }
 0x12b   :  { %431 = vst.msk [vmem:[%s818_s3 + $0x18] sm:$0xf] %vm424_vm2, %v506_v44  ;;  %439 = vst.msk [vmem:[%s818_s3 + $0x38] sm:$0xf] %vm424_vm2, %v514_v45  ;;  %v507_v48 = vpack.c.bf16 %v351_v46, %v351_v46  ;;  %v515_v49 = vpack.c.bf16 %v359_v47, %v359_v47 }
 0x12d   :  { %432 = vst.msk [vmem:[%s818_s3 + $0x1c] sm:$0xf] %vm424_vm2, %v507_v48  ;;  %440 = vst.msk [vmem:[%s818_s3 + $0x3c] sm:$0xf] %vm424_vm2, %v515_v49 }

// kernel: vae_forward.17
= control target key start
LH: loop header
LB: loop body
LE: loop exit
PB: predicated region body
PF: predicated region fallthrough
CT: control target
= control target key end

     0   :  { %s86_s22 = smov 80   ;;  %vm72_vm0 = vcmask 386048   ;;  %s177_s0 = inlined_call_operand.vmem [shape: bf16[8,2,4,96], index: 0, kind: input, shape index: {}]   ;;  %s178_s1 = inlined_call_operand.vmem [shape: bf16[8,4,48], index: 1, kind: output, shape index: {}]  }
   0x1   :  { %v12_v0 = vld [vmem:[%s177_s0 + $0x8] sm:$0x3]  ;;  %v13_v1 = vld [vmem:[%s177_s0 + $0xa] sm:$0x3]  ;;  %v8_v2 = vld [vmem:[%s177_s0] sm:$0x3] }
   0x2   :  { %v26_v3 = vmax.bf16 %v13_v1, %v12_v0  ;;  %v9_v4 = vld [vmem:[%s177_s0 + $0x2] sm:$0x3]  ;;  %v14_v5 = vld [vmem:[%s177_s0 + $0xc] sm:$0x3]  ;;  %v15_v6 = vld [vmem:[%s177_s0 + $0xe] sm:$0x3] }
   0x3   :  { %v24_v7 = vmax.bf16 %v9_v4, %v8_v2  ;;  %v10_v8 = vld [vmem:[%s177_s0 + $0x4] sm:$0x3]  ;;  %v11_v9 = vld [vmem:[%s177_s0 + $0x6] sm:$0x3]  ;;  %v27_v10 = vmax.bf16 %v15_v6, %v14_v5  ;;  %v18_v12 = vld [vmem:[%s177_s0 + $0x14] sm:$0x3] }
   0x4   :  { %44 = vrot.lane.b32.xlu1 %v26_v3, %s86_s22  ;;  %v25_v11 = vmax.bf16 %v11_v9, %v10_v8  ;;  %v19_v13 = vld [vmem:[%s177_s0 + $0x16] sm:$0x3]  ;;  %v16_v14 = vld [vmem:[%s177_s0 + $0x10] sm:$0x3]  ;;  %v17_v15 = vld [vmem:[%s177_s0 + $0x12] sm:$0x3] }
   0x5   :  { %40 = vrot.lane.b32.xlu0 %v24_v7, %s86_s22  ;;  %v29_v16 = vmax.bf16 %v19_v13, %v18_v12  ;;  %v28_v17 = vmax.bf16 %v17_v15, %v16_v14  ;;  %v22_v18 = vld [vmem:[%s177_s0 + $0x1c] sm:$0x3]  ;;  %v23_v19 = vld [vmem:[%s177_s0 + $0x1e] sm:$0x3]  ;;  %v20_v20 = vld [vmem:[%s177_s0 + $0x18] sm:$0x3] }
   0x6   :  { %v21_v21 = vld [vmem:[%s177_s0 + $0x1a] sm:$0x3]  ;;  %v31_v22 = vmax.bf16 %v23_v19, %v22_v18 }
   0x7   :  { %v30_v23 = vmax.bf16 %v21_v21, %v20_v20 }
   0x8   :  { %46 = vrot.lane.b32.xlu1 %v27_v10, %s86_s22 }
   0x9   :  { %42 = vrot.lane.b32.xlu0 %v25_v11, %s86_s22 }
   0xc   :  { %50 = vrot.lane.b32.xlu1 %v29_v16, %s86_s22 }
   0xd   :  { %48 = vrot.lane.b32.xlu0 %v28_v17, %s86_s22 }
  0x10   :  { %54 = vrot.lane.b32.xlu1 %v31_v22, %s86_s22 }
  0x11   :  { %52 = vrot.lane.b32.xlu0 %v30_v23, %s86_s22 }
  0x76   :  { %v45_v24 = vpop.permute.xlu1 %44 }
  0x77   :  { %v66_v25 = vmax.bf16 %v45_v24, %v26_v3  ;;  %v41_v26 = vpop.permute.xlu0 %40 }
  0x78   :  { %v64_v27 = vmax.bf16 %v41_v26, %v24_v7 }
  0x79   :  { %75 = vst.msk [vmem:[%s178_s1 + $0x4] sm:$0x3] %vm72_vm0, %v66_v25 }
  0x7a   :  { %73 = vst.msk [vmem:[%s178_s1] sm:$0x3] %vm72_vm0, %v64_v27  ;;  %v47_v28 = vpop.permute.xlu1 %46 }
  0x7b   :  { %v67_v29 = vmax.bf16 %v47_v28, %v27_v10  ;;  %v43_v30 = vpop.permute.xlu0 %42 }
  0x7c   :  { %v65_v31 = vmax.bf16 %v43_v30, %v25_v11 }
  0x7d   :  { %76 = vst.msk [vmem:[%s178_s1 + $0x6] sm:$0x3] %vm72_vm0, %v67_v29 }
  0x7e   :  { %74 = vst.msk [vmem:[%s178_s1 + $0x2] sm:$0x3] %vm72_vm0, %v65_v31  ;;  %v51_v32 = vpop.permute.xlu1 %50 }
  0x7f   :  { %v69_v33 = vmax.bf16 %v51_v32, %v29_v16  ;;  %v49_v34 = vpop.permute.xlu0 %48 }
  0x80   :  { %v68_v35 = vmax.bf16 %v49_v34, %v28_v17 }
  0x81   :  { %78 = vst.msk [vmem:[%s178_s1 + $0xa] sm:$0x3] %vm72_vm0, %v69_v33 }
  0x82   :  { %77 = vst.msk [vmem:[%s178_s1 + $0x8] sm:$0x3] %vm72_vm0, %v68_v35  ;;  %v55_v36 = vpop.permute.xlu1 %54 }
  0x83   :  { %v71_v37 = vmax.bf16 %v55_v36, %v31_v22  ;;  %v53_v38 = vpop.permute.xlu0 %52 }
  0x84   :  { %v70_v39 = vmax.bf16 %v53_v38, %v30_v23 }
  0x85   :  { %80 = vst.msk [vmem:[%s178_s1 + $0xe] sm:$0x3] %vm72_vm0, %v71_v37 }
  0x86   :  { %79 = vst.msk [vmem:[%s178_s1 + $0xc] sm:$0x3] %vm72_vm0, %v70_v39 }

// kernel: vae_forward.19
= control target key start
LH: loop header
LB: loop body
LE: loop exit
PB: predicated region body
PF: predicated region fallthrough
CT: control target
= control target key end

     0   :  { %v532_v0 = vmov 0   ;;  %vm284_vm0 = vcmask 392192   ;;  %vm409_vm1 = vcmask 781312   ;;  %s690_s1 = inlined_call_operand.vmem [shape: bf16[432,96], index: 1, kind: input, shape index: {}]   ;;  %s691_s0 = inlined_call_operand.vmem [shape: bf16[32,432], index: 0, kind: input, shape index: {}]   ;;  %s692_s2 = inlined_call_operand.vmem [shape: f32[1,96], index: 2, kind: input, shape index: {}]   ;;  %s693_s3 = inlined_call_operand.vmem [shape: bf16[32,96], index: 3, kind: output, shape index: {}]  }
   0x1   :  { %340 = vmatprep.subr.bf16.mxu1 %v532_v0  ;;  %v493_v1 = vld [vmem:[%s690_s1 + $0x80] sm:$0xff]   ;;  %v496_v4 = vld [vmem:[%s690_s1 + $0x88] sm:$0xff]   ;;  %v499_v7 = vld [vmem:[%s690_s1 + $0x90] sm:$0xff]  }
   0x2   :  { %v494_v2 = vld [vmem:[%s690_s1 + $0x40] sm:$0xff]   ;;  %341 = vmatpush1.bf16.msra.mxu1 %v493_v1  ;;  %v497_v5 = vld [vmem:[%s690_s1 + $0x48] sm:$0xff]   ;;  %v500_v8 = vld [vmem:[%s690_s1 + $0x50] sm:$0xff]  }
   0x3   :  { %v495_v3 = vld [vmem:[%s690_s1] sm:$0xff]   ;;  %464 = vmatprep.subr.bf16.mxu0 %v494_v2  ;;  %342 = vmatprep.subr.bf16.mxu1 %v532_v0  ;;  %v498_v6 = vld [vmem:[%s690_s1 + $0x8] sm:$0xff]   ;;  %v501_v9 = vld [vmem:[%s690_s1 + $0x10] sm:$0xff]  }
   0x4   :  { %465 = vmatpush3.bf16.msra.mxu0 %v495_v3  ;;  %v502_v10 = vld [vmem:[%s690_s1 + $0x98] sm:$0xff]   ;;  %v506_v13 = vld [vmem:[%s690_s1 + $0x60] sm:$0xff]   ;;  %v509_v16 = vld [vmem:[%s690_s1 + $0x68] sm:$0xff]  }
   0x5   :  { %466 = vmatprep.subr.bf16.mxu0 %v497_v5  ;;  %v503_v11 = vld [vmem:[%s690_s1 + $0x58] sm:$0xff]   ;;  %v505_v14 = vld [vmem:[%s690_s1 + $0xa0] sm:$0xff]   ;;  %v508_v17 = vld [vmem:[%s690_s1 + $0xa8] sm:$0xff]  }
   0x6   :  { %343 = vmatpush1.bf16.msra.mxu1 %v496_v4  ;;  %v504_v12 = vld [vmem:[%s690_s1 + $0x18] sm:$0xff]   ;;  %v507_v15 = vld [vmem:[%s690_s1 + $0x20] sm:$0xff]   ;;  %v510_v18 = vld [vmem:[%s690_s1 + $0x28] sm:$0xff]  }
   0x7   :  { %344 = vmatprep.subr.bf16.mxu1 %v532_v0  ;;  %v512_v19 = vld [vmem:[%s690_s1 + $0x70] sm:$0xff]   ;;  %v514_v22 = vld [vmem:[%s690_s1 + $0xb8] sm:$0xff]   ;;  %v517_v26 = vld [vmem:[%s690_s1 + $0xc0] sm:$0xff]  }
   0x8   :  { %467 = vmatpush3.bf16.msra.mxu0 %v498_v6  ;;  %v511_v20 = vld [vmem:[%s690_s1 + $0xb0] sm:$0xff]   ;;  %v515_v23 = vld [vmem:[%s690_s1 + $0x78] sm:$0xff]   ;;  %v521_v30 = vld [vmem:[%s690_s1 + $0xc8] sm:$0xff]  }
   0x9   :  { %468 = vmatprep.subr.bf16.mxu0 %v500_v8  ;;  %v513_v21 = vld [vmem:[%s690_s1 + $0x30] sm:$0xff]   ;;  %v516_v25 = vld [vmem:[%s690_s1 + $0x38] sm:$0xff]   ;;  %v418_v42 = vld [vmem:[%s692_s2] ss:$0 sm:$0xff] }
   0xa   :  { %345 = vmatpush1.bf16.msra.mxu1 %v499_v7  ;;  %v520_v24 = vld [vmem:[%s691_s0 + $0x4] ss:$16 sps:$4 sm:$0xff]   ;;  %v527_v27 = vld [vmem:[%s691_s0 + $0xc] ss:$16 sps:$4 sm:$0xff]   ;;  %v518_v28 = vld [vmem:[%s691_s0] ss:$16 sps:$4 sm:$0xff]  }
   0xb   :  { %346 = vmatprep.subr.bf16.mxu1 %v532_v0  ;;  %323 = vmatprep.mubr.bf16.mxu0 %v520_v24  ;;  %v523_v29 = vld [vmem:[%s691_s0 + $0x24] ss:$16 sps:$4 sm:$0xff]   ;;  %v528_v32 = vld [vmem:[%s691_s0 + $0x20] ss:$16 sps:$4 sm:$0xff]   ;;  %v525_v33 = vld [vmem:[%s691_s0 + $0x8] ss:$16 sps:$4 sm:$0xff]  }
   0xc   :  { %469 = vmatpush3.bf16.msra.mxu0 %v501_v9  ;;  %454 = vmatprep.mubr.msk.bf16.mxu1 %vm284_vm0, %v527_v27  ;;  %v522_v31 = vld [vmem:[%s690_s1 + $0xd0] sm:$0xff]   ;;  %v529_v34 = vld [vmem:[%s691_s0 + $0x2c] ss:$16 sps:$4 sm:$0xff]   ;;  %v531_v35 = vld [vmem:[%s691_s0 + $0x28] ss:$16 sps:$4 sm:$0xff]  }
   0xd   :  { %470 = vmatprep.subr.bf16.mxu0 %v503_v11 }
   0xe   :  { %347 = vmatpush1.bf16.msra.mxu1 %v502_v10 }
   0xf   :  { %348 = vmatprep.subr.bf16.mxu1 %v532_v0 }
  0x10   :  { %471 = vmatpush3.bf16.msra.mxu0 %v504_v12 }
  0x11   :  { %472 = vmatprep.subr.bf16.mxu0 %v506_v13 }
  0x12   :  { %349 = vmatpush1.bf16.msra.mxu1 %v505_v14 }
  0x13   :  { %350 = vmatprep.subr.bf16.mxu1 %v532_v0 }
  0x14   :  { %473 = vmatpush3.bf16.msra.mxu0 %v507_v15 }
  0x15   :  { %474 = vmatprep.subr.bf16.mxu0 %v509_v16 }
  0x16   :  { %351 = vmatpush1.bf16.msra.mxu1 %v508_v17 }
  0x17   :  { %352 = vmatprep.subr.bf16.mxu1 %v532_v0 }
  0x18   :  { %475 = vmatpush3.bf16.msra.mxu0 %v510_v18 }
  0x19   :  { %476 = vmatprep.subr.bf16.mxu0 %v512_v19 }
  0x1a   :  { %353 = vmatpush1.bf16.msra.mxu1 %v511_v20 }
  0x1b   :  { %354 = vmatprep.subr.bf16.mxu1 %v532_v0 }
  0x1c   :  { %477 = vmatpush3.bf16.msra.mxu0 %v513_v21 }
  0x1d   :  { %478 = vmatprep.subr.bf16.mxu0 %v515_v23 }
  0x1e   :  { %355 = vmatpush1.bf16.msra.mxu1 %v514_v22 }
  0x1f   :  { %356 = vmatprep.subr.bf16.mxu1 %v532_v0 }
  0x20   :  { %479 = vmatpush3.bf16.msra.mxu0 %v516_v25 }
  0x22   :  { %357 = vmatpush1.bf16.msra.mxu1 %v517_v26 }
  0x23   :  { %324 = vmatmul.mubr.bf16.vlgmr.msra.gmra.mrb[0].mxu0 %v518_v28  ;;  %358 = vmatprep.subr.bf16.mxu1 %v532_v0 }
  0x24   :  { %331 = vmatprep.mubr.bf16.mxu0 %v523_v29 }
  0x26   :  { %359 = vmatpush1.bf16.msra.mxu1 %v521_v30 }
  0x27   :  { %360 = vmatprep.subr.bf16.mxu1 %v532_v0 }
  0x2a   :  { %361 = vmatpush1.bf16.msra.mxu1 %v522_v31 }
  0x2b   :  { %332 = vmatmul.mubr.bf16.gmra.mrb[4].mxu0 %v528_v32 }
  0x2d   :  { %373 = vmatmul.mubr.bf16.vlgmr.msra.gmra.mrb[0].mxu1 %v525_v33 }
  0x2e   :  { %455 = vmatprep.mubr.msk.bf16.mxu1 %vm284_vm0, %v529_v34 }
  0x35   :  { %381 = vmatmul.mubr.bf16.gmra.mrb[4].mxu1 %v531_v35 }
  0xf6   :  { %v480_v36 = vpop.f32.mrb[0].mxu0 }
  0xf7   :  { %v481_v37 = vpop.f32.mrb[1].mxu0 }
  0xf8   :  { %v482_v38 = vadd.f32 %v481_v37, %v480_v36  ;;  %v483_v39 = vpop.f32.mrb[2].mxu0 }
  0xf9   :  { %v484_v40 = vpop.f32.mrb[3].mxu0 }
  0xfa   :  { %v485_v41 = vadd.f32 %v484_v40, %v483_v39  ;;  %v326_v43 = vadd.f32 %v482_v38, %v418_v42 }
  0xfc   :  { %v329_v51 = vadd.f32 %v485_v41, %v418_v42 }
  0xfe   :  { %v486_v44 = vpop.f32.mrb[4].mxu0 }
  0xff   :  { %v487_v45 = vpop.f32.mrb[5].mxu0 }
 0x100   :  { %v374_v46 = vpop.f32.mrb[0].mxu1  ;;  %v488_v47 = vadd.f32 %v487_v45, %v486_v44  ;;  %v489_v48 = vpop.f32.mrb[6].mxu0 }
 0x101   :  { %v375_v49 = vadd.f32 %v374_v46, %v326_v43  ;;  %v376_v50 = vpop.f32.mrb[1].mxu1  ;;  %v490_v52 = vpop.f32.mrb[7].mxu0 }
 0x102   :  { %v377_v53 = vpop.f32.mrb[2].mxu1  ;;  %v491_v54 = vadd.f32 %v490_v52, %v489_v48  ;;  %v334_v60 = vadd.f32 %v488_v47, %v418_v42 }
 0x103   :  { %v389_v55 = vmax.f32 %v375_v49, 0.0  ;;  %v378_v56 = vadd.f32 %v377_v53, %v329_v51  ;;  %v379_v57 = vpop.f32.mrb[3].mxu1 }
 0x104   :  { %v337_v1 = vadd.f32 %v491_v54, %v418_v42 }
 0x105   :  { %v460_v58 = vpack.c.bf16 %v389_v55, %v389_v55  ;;  %v390_v59 = vmax.f32 %v378_v56, 0.0 }
 0x107   :  { %410 = vst.msk [vmem:[%s693_s3] sm:$0xf] %vm409_vm1, %v460_v58  ;;  %v461_v61 = vpack.c.bf16 %v390_v59, %v390_v59 }
 0x108   :  { %v382_v62 = vpop.f32.mrb[4].mxu1 }
 0x109   :  { %411 = vst.msk [vmem:[%s693_s3 + $0x4] sm:$0xf] %vm409_vm1, %v461_v61  ;;  %v383_v63 = vadd.f32 %v382_v62, %v334_v60  ;;  %v384_v0 = vpop.f32.mrb[5].mxu1 }
 0x10a   :  { %v385_v2 = vpop.f32.mrb[6].mxu1 }
 0x10b   :  { %v391_v3 = vmax.f32 %v383_v63, 0.0  ;;  %v386_v4 = vadd.f32 %v385_v2, %v337_v1  ;;  %v387_v5 = vpop.f32.mrb[7].mxu1 }
 0x10d   :  { %v462_v6 = vpack.c.bf16 %v391_v3, %v391_v3  ;;  %v392_v7 = vmax.f32 %v386_v4, 0.0 }
 0x10f   :  { %412 = vst.msk [vmem:[%s693_s3 + $0x8] sm:$0xf] %vm409_vm1, %v462_v6  ;;  %v463_v8 = vpack.c.bf16 %v392_v7, %v392_v7 }
 0x111   :  { %413 = vst.msk [vmem:[%s693_s3 + $0xc] sm:$0xf] %vm409_vm1, %v463_v8 }

// kernel: vae_forward.21
= control target key start
LH: loop header
LB: loop body
LE: loop exit
PB: predicated region body
PF: predicated region fallthrough
CT: control target
= control target key end

     0   :  { %vm301_vm0 = vcmask 883712   ;;  %vm398_vm1 = vcmask 1045504   ;;  %vm755_vm2 = vcmask 97280   ;;  %s1690_s1 = inlined_call_operand.vmem [shape: bf16[108,12], index: 1, kind: input, shape index: {}]   ;;  %s1691_s0 = inlined_call_operand.vmem [shape: bf16[512,108], index: 0, kind: input, shape index: {}]   ;;  %s1692_s2 = inlined_call_operand.vmem [shape: f32[1,12], index: 2, kind: input, shape index: {}]   ;;  %s1693_s3 = inlined_call_operand.vmem [shape: f32[512,12], index: 3, kind: output, shape index: {}]  }
   0x1   :  { %v1029_v0 = vld [vmem:[%s1690_s1] sm:$0xff]   ;;  %v1030_v1 = vld [vmem:[%s1690_s1 + $0x8] sm:$0xff]   ;;  %v1031_v2 = vld [vmem:[%s1690_s1 + $0x10] sm:$0xff]  }
   0x2   :  { %935 = vmatprep.subr.bf16.mxu0 %v1029_v0  ;;  %1013 = vmatprep.subr.bf16.mxu1 %v1029_v0  ;;  %v1032_v3 = vld [vmem:[%s1690_s1 + $0x18] sm:$0xff]   ;;  %v1036_v4 = vld [vmem:[%s1691_s0] sm:$0xff]   ;;  %v1034_v7 = vld [vmem:[%s1690_s1 + $0x28] sm:$0xff]  }
   0x3   :  { %936 = vmatpush3.bf16.msra.mxu0 %v1029_v0  ;;  %1020 = vmatpush3.bf16.msra.mxu1 %v1029_v0  ;;  %v1037_v5 = vld [vmem:[%s1691_s0 + $0x80] sm:$0xff]   ;;  %v1035_v8 = vld [vmem:[%s1690_s1 + $0x30] sm:$0x3f]   ;;  %v1038_v10 = vld [vmem:[%s1691_s0 + $0x8] sm:$0xff]  }
   0x4   :  { %937 = vmatprep.subr.bf16.mxu0 %v1030_v1  ;;  %1014 = vmatprep.subr.bf16.mxu1 %v1030_v1  ;;  %v1033_v6 = vld [vmem:[%s1690_s1 + $0x20] sm:$0xff]   ;;  %v400_v9 = vsel %vm398_vm1, %v1035_v8, 0  ;;  %v1039_v11 = vld [vmem:[%s1691_s0 + $0x88] sm:$0xff]   ;;  %v1040_v12 = vld [vmem:[%s1691_s0 + $0x10] sm:$0xff]  }
   0x5   :  { %949 = vmatprep.mubr.msk.bf16.mxu0 %vm301_vm0, %v1036_v4  ;;  %981 = vmatprep.mubr.msk.bf16.mxu1 %vm301_vm0, %v1037_v5  ;;  %v1041_v13 = vld [vmem:[%s1691_s0 + $0x90] sm:$0xff]   ;;  %v1042_v14 = vld [vmem:[%s1691_s0 + $0x18] sm:$0xff]   ;;  %v1044_v16 = vld [vmem:[%s1691_s0 + $0x20] sm:$0xff]  }
   0x6   :  { %v1043_v15 = vld [vmem:[%s1691_s0 + $0x98] sm:$0xff]   ;;  %v1045_v17 = vld [vmem:[%s1691_s0 + $0xa0] sm:$0xff]   ;;  %v1046_v18 = vld [vmem:[%s1691_s0 + $0x28] sm:$0xff]  }
   0x7   :  { %938 = vmatpush3.bf16.msra.mxu0 %v1030_v1  ;;  %1021 = vmatpush3.bf16.msra.mxu1 %v1030_v1  ;;  %v1047_v19 = vld [vmem:[%s1691_s0 + $0xa8] sm:$0xff]   ;;  %v1048_v20 = vld [vmem:[%s1691_s0 + $0x30] sm:$0xff]   ;;  %v1050_v22 = vld [vmem:[%s1691_s0 + $0x38] sm:$0xff]  }
   0x8   :  { %939 = vmatprep.subr.bf16.mxu0 %v1031_v2  ;;  %1015 = vmatprep.subr.bf16.mxu1 %v1031_v2  ;;  %v1049_v21 = vld [vmem:[%s1691_s0 + $0xb0] sm:$0xff]   ;;  %v1051_v23 = vld [vmem:[%s1691_s0 + $0xb8] sm:$0xff]   ;;  %v1052_v24 = vld [vmem:[%s1691_s0 + $0x40] sm:$0xff]  }
   0x9   :  { %v1053_v25 = vld [vmem:[%s1691_s0 + $0xc0] sm:$0xff]   ;;  %v1054_v26 = vld [vmem:[%s1691_s0 + $0x48] sm:$0xff]   ;;  %v1056_v28 = vld [vmem:[%s1691_s0 + $0x50] sm:$0xff]  }
   0xa   :  { %v1055_v27 = vld [vmem:[%s1691_s0 + $0xc8] sm:$0xff]   ;;  %v1057_v29 = vld [vmem:[%s1691_s0 + $0xd0] sm:$0xff]   ;;  %v1058_v30 = vld [vmem:[%s1691_s0 + $0x58] sm:$0xff]  }
   0xb   :  { %940 = vmatpush3.bf16.msra.mxu0 %v1031_v2  ;;  %1022 = vmatpush3.bf16.msra.mxu1 %v1031_v2  ;;  %v1059_v31 = vld [vmem:[%s1691_s0 + $0xd8] sm:$0xff]   ;;  %v1060_v32 = vld [vmem:[%s1691_s0 + $0x60] sm:$0xff]   ;;  %v1062_v34 = vld [vmem:[%s1691_s0 + $0x68] sm:$0xff]  }
   0xc   :  { %941 = vmatprep.subr.bf16.mxu0 %v1032_v3  ;;  %1016 = vmatprep.subr.bf16.mxu1 %v1032_v3  ;;  %v1061_v33 = vld [vmem:[%s1691_s0 + $0xe0] sm:$0xff]   ;;  %v1063_v35 = vld [vmem:[%s1691_s0 + $0xe8] sm:$0xff]   ;;  %v1064_v36 = vld [vmem:[%s1691_s0 + $0x70] sm:$0xff]  }
   0xd   :  { %v1065_v37 = vld [vmem:[%s1691_s0 + $0xf0] sm:$0xff]   ;;  %v1066_v38 = vld [vmem:[%s1691_s0 + $0x78] sm:$0xff]   ;;  %v1368_v40 = vld [vmem:[%s1692_s2] ss:$0 sm:$0xff] }
   0xe   :  { %v1067_v39 = vld [vmem:[%s1691_s0 + $0xf8] sm:$0xff]  }
   0xf   :  { %942 = vmatpush3.bf16.msra.mxu0 %v1032_v3  ;;  %1023 = vmatpush3.bf16.msra.mxu1 %v1032_v3 }
  0x10   :  { %943 = vmatprep.subr.bf16.mxu0 %v1033_v6  ;;  %1017 = vmatprep.subr.bf16.mxu1 %v1033_v6 }
  0x13   :  { %944 = vmatpush3.bf16.msra.mxu0 %v1033_v6  ;;  %1024 = vmatpush3.bf16.msra.mxu1 %v1033_v6 }
  0x14   :  { %945 = vmatprep.subr.bf16.mxu0 %v1034_v7  ;;  %1018 = vmatprep.subr.bf16.mxu1 %v1034_v7 }
  0x17   :  { %946 = vmatpush3.bf16.msra.mxu0 %v1034_v7  ;;  %1025 = vmatpush3.bf16.msra.mxu1 %v1034_v7 }
  0x18   :  { %1027 = vmatprep.subr.msk.bf16.mxu0 %vm398_vm1, %v1035_v8  ;;  %1028 = vmatprep.subr.msk.bf16.mxu1 %vm398_vm1, %v1035_v8 }
  0x1b   :  { %948 = vmatpush3.bf16.msra.mxu0 %v400_v9  ;;  %1026 = vmatpush3.bf16.msra.mxu1 %v400_v9 }
  0x1e   :  { %950 = vmatmul.mubr.msk.bf16.vlgmr.msra.gmra.mrb[0].mxu0 %vm301_vm0, %v1038_v10  ;;  %982 = vmatmul.mubr.msk.bf16.vlgmr.msra.gmra.mrb[0].mxu1 %vm301_vm0, %v1039_v11 }
  0x1f   :  { %953 = vmatprep.mubr.msk.bf16.mxu0 %vm301_vm0, %v1040_v12  ;;  %985 = vmatprep.mubr.msk.bf16.mxu1 %vm301_vm0, %v1041_v13 }
  0x26   :  { %954 = vmatmul.mubr.msk.bf16.gmra.mrb[4].mxu0 %vm301_vm0, %v1042_v14  ;;  %986 = vmatmul.mubr.msk.bf16.gmra.mrb[4].mxu1 %vm301_vm0, %v1043_v15 }
  0x27   :  { %957 = vmatprep.mubr.msk.bf16.mxu0 %vm301_vm0, %v1044_v16  ;;  %989 = vmatprep.mubr.msk.bf16.mxu1 %vm301_vm0, %v1045_v17 }
  0x2e   :  { %958 = vmatmul.mubr.msk.bf16.gmra.mrb[8].mxu0 %vm301_vm0, %v1046_v18  ;;  %990 = vmatmul.mubr.msk.bf16.gmra.mrb[8].mxu1 %vm301_vm0, %v1047_v19 }
  0x2f   :  { %961 = vmatprep.mubr.msk.bf16.mxu0 %vm301_vm0, %v1048_v20  ;;  %993 = vmatprep.mubr.msk.bf16.mxu1 %vm301_vm0, %v1049_v21 }
  0x36   :  { %962 = vmatmul.mubr.msk.bf16.gmra.mrb[12].mxu0 %vm301_vm0, %v1050_v22  ;;  %994 = vmatmul.mubr.msk.bf16.gmra.mrb[12].mxu1 %vm301_vm0, %v1051_v23 }
  0x37   :  { %965 = vmatprep.mubr.msk.bf16.mxu0 %vm301_vm0, %v1052_v24  ;;  %997 = vmatprep.mubr.msk.bf16.mxu1 %vm301_vm0, %v1053_v25 }
  0x3e   :  { %966 = vmatmul.mubr.msk.bf16.gmra.mrb[16].mxu0 %vm301_vm0, %v1054_v26  ;;  %998 = vmatmul.mubr.msk.bf16.gmra.mrb[16].mxu1 %vm301_vm0, %v1055_v27 }
  0x3f   :  { %969 = vmatprep.mubr.msk.bf16.mxu0 %vm301_vm0, %v1056_v28  ;;  %1001 = vmatprep.mubr.msk.bf16.mxu1 %vm301_vm0, %v1057_v29 }
  0x46   :  { %970 = vmatmul.mubr.msk.bf16.gmra.mrb[20].mxu0 %vm301_vm0, %v1058_v30  ;;  %1002 = vmatmul.mubr.msk.bf16.gmra.mrb[20].mxu1 %vm301_vm0, %v1059_v31 }
  0x47   :  { %973 = vmatprep.mubr.msk.bf16.mxu0 %vm301_vm0, %v1060_v32  ;;  %1005 = vmatprep.mubr.msk.bf16.mxu1 %vm301_vm0, %v1061_v33 }
  0x4e   :  { %974 = vmatmul.mubr.msk.bf16.gmra.mrb[24].mxu0 %vm301_vm0, %v1062_v34  ;;  %1006 = vmatmul.mubr.msk.bf16.gmra.mrb[24].mxu1 %vm301_vm0, %v1063_v35 }
  0x4f   :  { %977 = vmatprep.mubr.msk.bf16.mxu0 %vm301_vm0, %v1064_v36  ;;  %1009 = vmatprep.mubr.msk.bf16.mxu1 %vm301_vm0, %v1065_v37 }
  0x56   :  { %978 = vmatmul.mubr.msk.bf16.gmra.mrb[28].mxu0 %vm301_vm0, %v1066_v38  ;;  %1010 = vmatmul.mubr.msk.bf16.gmra.mrb[28].mxu1 %vm301_vm0, %v1067_v39 }
  0xf1   :  { %v951_v41 = vpop.f32.mrb[0].mxu0  ;;  %v983_v42 = vpop.f32.mrb[0].mxu1 }
  0xf2   :  { %v445_v43 = vadd.f32 %v951_v41, %v1368_v40  ;;  %v573_v44 = vadd.f32 %v983_v42, %v1368_v40  ;;  %v436_v45 = vpop.f32.mrb[1].mxu0  ;;  %v564_v46 = vpop.f32.mrb[1].mxu1 }
  0xf3   :  { %v437_v47 = vadd.f32 %v1368_v40, %v436_v45  ;;  %v565_v48 = vadd.f32 %v1368_v40, %v564_v46  ;;  %v952_v49 = vpop.f32.mrb[2].mxu0  ;;  %v984_v50 = vpop.f32.mrb[2].mxu1 }
  0xf4   :  { %1068 = vtanh.f32 %v445_v43  ;;  %v448_v51 = vadd.f32 %v952_v49, %v1368_v40  ;;  %v439_v52 = vpop.f32.mrb[3].mxu0  ;;  %v567_v53 = vpop.f32.mrb[3].mxu1  ;;  %v576_v54 = vadd.f32 %v984_v50, %v1368_v40 }
  0xf5   :  { %1070 = vtanh.f32 %v573_v44  ;;  %v440_v55 = vadd.f32 %v1368_v40, %v439_v52  ;;  %v568_v56 = vadd.f32 %v1368_v40, %v567_v53 }
  0xf6   :  { %1072 = vtanh.f32 %v437_v47 }
  0xf7   :  { %1074 = vtanh.f32 %v565_v48 }
  0xf8   :  { %1076 = vtanh.f32 %v448_v51 }
  0xf9   :  { %1078 = vtanh.f32 %v576_v54  ;;  %v955_v57 = vpop.f32.mrb[4].mxu0  ;;  %v987_v58 = vpop.f32.mrb[4].mxu1 }
  0xfa   :  { %1080 = vtanh.f32 %v440_v55  ;;  %v461_v59 = vadd.f32 %v955_v57, %v1368_v40  ;;  %v589_v60 = vadd.f32 %v987_v58, %v1368_v40  ;;  %v452_v61 = vpop.f32.mrb[5].mxu0  ;;  %v580_v62 = vpop.f32.mrb[5].mxu1 }
  0xfb   :  { %1082 = vtanh.f32 %v568_v56  ;;  %v453_v63 = vadd.f32 %v1368_v40, %v452_v61  ;;  %v581_v0 = vadd.f32 %v1368_v40, %v580_v62  ;;  %v956_v1 = vpop.f32.mrb[6].mxu0  ;;  %v988_v2 = vpop.f32.mrb[6].mxu1 }
  0xfc   :  { %1084 = vtanh.f32 %v461_v59  ;;  %v464_v3 = vadd.f32 %v956_v1, %v1368_v40  ;;  %v455_v4 = vpop.f32.mrb[7].mxu0  ;;  %v583_v5 = vpop.f32.mrb[7].mxu1  ;;  %v592_v6 = vadd.f32 %v988_v2, %v1368_v40 }
  0xfd   :  { %1086 = vtanh.f32 %v589_v60  ;;  %v456_v8 = vadd.f32 %v1368_v40, %v455_v4  ;;  %v584_v10 = vadd.f32 %v1368_v40, %v583_v5 }
  0xfe   :  { %v1069_v7 = vpop.eup %1068  ;;  %1088 = vtanh.f32 %v453_v63 }
  0xff   :  { %v1071_v9 = vpop.eup %1070  ;;  %758 = vst.msk [vmem:[%s1693_s3 + $0x10] sm:$0xff] %vm755_vm2, %v1069_v7  ;;  %1090 = vtanh.f32 %v581_v0 }
 0x100   :  { %v1073_v11 = vpop.eup %1072  ;;  %790 = vst.msk [vmem:[%s1693_s3 + $0x110] sm:$0xff] %vm755_vm2, %v1071_v9  ;;  %1092 = vtanh.f32 %v464_v3 }
 0x101   :  { %v1075_v12 = vpop.eup %1074  ;;  %756 = vst.msk [vmem:[%s1693_s3] sm:$0xff] %vm755_vm2, %v1073_v11  ;;  %1094 = vtanh.f32 %v592_v6  ;;  %v959_v13 = vpop.f32.mrb[8].mxu0 }
 0x102   :  { %v991_v14 = vpop.f32.mrb[8].mxu1  ;;  %v1077_v15 = vpop.eup %1076  ;;  %788 = vst.msk [vmem:[%s1693_s3 + $0x100] sm:$0xff] %vm755_vm2, %v1075_v12  ;;  %1096 = vtanh.f32 %v456_v8  ;;  %v477_v16 = vadd.f32 %v959_v13, %v1368_v40 }
 0x103   :  { %v605_v17 = vadd.f32 %v991_v14, %v1368_v40  ;;  %v468_v18 = vpop.f32.mrb[9].mxu0  ;;  %v596_v19 = vpop.f32.mrb[9].mxu1  ;;  %759 = vst.msk [vmem:[%s1693_s3 + $0x18] sm:$0xff] %vm755_vm2, %v1077_v15  ;;  %1098 = vtanh.f32 %v584_v10 }
 0x104   :  { %v1079_v20 = vpop.eup %1078  ;;  %v469_v21 = vadd.f32 %v1368_v40, %v468_v18  ;;  %v597_v22 = vadd.f32 %v1368_v40, %v596_v19  ;;  %v960_v23 = vpop.f32.mrb[10].mxu0  ;;  %1100 = vtanh.f32 %v477_v16 }
 0x105   :  { %v992_v24 = vpop.f32.mrb[10].mxu1  ;;  %v1081_v25 = vpop.eup %1080  ;;  %791 = vst.msk [vmem:[%s1693_s3 + $0x118] sm:$0xff] %vm755_vm2, %v1079_v20  ;;  %v480_v26 = vadd.f32 %v960_v23, %v1368_v40  ;;  %1102 = vtanh.f32 %v605_v17 }
 0x106   :  { %v471_v27 = vpop.f32.mrb[11].mxu0  ;;  %v599_v28 = vpop.f32.mrb[11].mxu1  ;;  %757 = vst.msk [vmem:[%s1693_s3 + $0x8] sm:$0xff] %vm755_vm2, %v1081_v25  ;;  %v608_v30 = vadd.f32 %v992_v24, %v1368_v40  ;;  %1104 = vtanh.f32 %v469_v21 }
 0x107   :  { %v1083_v29 = vpop.eup %1082  ;;  %v472_v32 = vadd.f32 %v1368_v40, %v471_v27  ;;  %1106 = vtanh.f32 %v597_v22  ;;  %v600_v34 = vadd.f32 %v1368_v40, %v599_v28 }
 0x108   :  { %v1085_v31 = vpop.eup %1084  ;;  %789 = vst.msk [vmem:[%s1693_s3 + $0x108] sm:$0xff] %vm755_vm2, %v1083_v29  ;;  %1108 = vtanh.f32 %v480_v26 }
 0x109   :  { %v1087_v33 = vpop.eup %1086  ;;  %762 = vst.msk [vmem:[%s1693_s3 + $0x30] sm:$0xff] %vm755_vm2, %v1085_v31  ;;  %1110 = vtanh.f32 %v608_v30  ;;  %v963_v37 = vpop.f32.mrb[12].mxu0 }
 0x10a   :  { %v1089_v35 = vpop.eup %1088  ;;  %794 = vst.msk [vmem:[%s1693_s3 + $0x130] sm:$0xff] %vm755_vm2, %v1087_v33  ;;  %v995_v38 = vpop.f32.mrb[12].mxu1  ;;  %1112 = vtanh.f32 %v472_v32  ;;  %v493_v41 = vadd.f32 %v963_v37, %v1368_v40 }
 0x10b   :  { %v1091_v36 = vpop.eup %1090  ;;  %760 = vst.msk [vmem:[%s1693_s3 + $0x20] sm:$0xff] %vm755_vm2, %v1089_v35  ;;  %v621_v42 = vadd.f32 %v995_v38, %v1368_v40  ;;  %v484_v43 = vpop.f32.mrb[13].mxu0  ;;  %1114 = vtanh.f32 %v600_v34 }
 0x10c   :  { %v1093_v39 = vpop.eup %1092  ;;  %792 = vst.msk [vmem:[%s1693_s3 + $0x120] sm:$0xff] %vm755_vm2, %v1091_v36  ;;  %v612_v44 = vpop.f32.mrb[13].mxu1  ;;  %v485_v46 = vadd.f32 %v1368_v40, %v484_v43  ;;  %1116 = vtanh.f32 %v493_v41 }
 0x10d   :  { %v1095_v45 = vpop.eup %1094  ;;  %763 = vst.msk [vmem:[%s1693_s3 + $0x38] sm:$0xff] %vm755_vm2, %v1093_v39  ;;  %v613_v47 = vadd.f32 %v1368_v40, %v612_v44  ;;  %v964_v48 = vpop.f32.mrb[14].mxu0  ;;  %1118 = vtanh.f32 %v621_v42 }
 0x10e   :  { %v996_v49 = vpop.f32.mrb[14].mxu1  ;;  %v1097_v50 = vpop.eup %1096  ;;  %795 = vst.msk [vmem:[%s1693_s3 + $0x138] sm:$0xff] %vm755_vm2, %v1095_v45  ;;  %v496_v51 = vadd.f32 %v964_v48, %v1368_v40  ;;  %1120 = vtanh.f32 %v485_v46 }
 0x10f   :  { %v487_v52 = vpop.f32.mrb[15].mxu0  ;;  %v615_v53 = vpop.f32.mrb[15].mxu1  ;;  %761 = vst.msk [vmem:[%s1693_s3 + $0x28] sm:$0xff] %vm755_vm2, %v1097_v50  ;;  %v624_v55 = vadd.f32 %v996_v49, %v1368_v40  ;;  %1122 = vtanh.f32 %v613_v47 }
 0x110   :  { %v1099_v54 = vpop.eup %1098  ;;  %v488_v57 = vadd.f32 %v1368_v40, %v487_v52  ;;  %v616_v59 = vadd.f32 %v1368_v40, %v615_v53  ;;  %1124 = vtanh.f32 %v496_v51 }
 0x111   :  { %v1101_v56 = vpop.eup %1100  ;;  %793 = vst.msk [vmem:[%s1693_s3 + $0x128] sm:$0xff] %vm755_vm2, %v1099_v54  ;;  %1126 = vtanh.f32 %v624_v55  ;;  %v967_v62 = vpop.f32.mrb[16].mxu0 }
 0x112   :  { %v1103_v58 = vpop.eup %1102  ;;  %766 = vst.msk [vmem:[%s1693_s3 + $0x50] sm:$0xff] %vm755_vm2, %v1101_v56  ;;  %v999_v63 = vpop.f32.mrb[16].mxu1  ;;  %1128 = vtanh.f32 %v488_v57  ;;  %v509_v1 = vadd.f32 %v967_v62, %v1368_v40 }
 0x113   :  { %v1105_v60 = vpop.eup %1104  ;;  %798 = vst.msk [vmem:[%s1693_s3 + $0x150] sm:$0xff] %vm755_vm2, %v1103_v58  ;;  %v637_v2 = vadd.f32 %v999_v63, %v1368_v40  ;;  %v500_v3 = vpop.f32.mrb[17].mxu0  ;;  %1130 = vtanh.f32 %v616_v59 }
 0x114   :  { %v1107_v61 = vpop.eup %1106  ;;  %764 = vst.msk [vmem:[%s1693_s3 + $0x40] sm:$0xff] %vm755_vm2, %v1105_v60  ;;  %v628_v4 = vpop.f32.mrb[17].mxu1  ;;  %v501_v6 = vadd.f32 %v1368_v40, %v500_v3  ;;  %1132 = vtanh.f32 %v509_v1 }
 0x115   :  { %v1109_v0 = vpop.eup %1108  ;;  %796 = vst.msk [vmem:[%s1693_s3 + $0x140] sm:$0xff] %vm755_vm2, %v1107_v61  ;;  %v629_v7 = vadd.f32 %v1368_v40, %v628_v4  ;;  %v968_v8 = vpop.f32.mrb[18].mxu0  ;;  %1134 = vtanh.f32 %v637_v2 }
 0x116   :  { %v1111_v5 = vpop.eup %1110  ;;  %767 = vst.msk [vmem:[%s1693_s3 + $0x58] sm:$0xff] %vm755_vm2, %v1109_v0  ;;  %v1000_v9 = vpop.f32.mrb[18].mxu1  ;;  %v512_v11 = vadd.f32 %v968_v8, %v1368_v40  ;;  %1136 = vtanh.f32 %v501_v6 }
 0x117   :  { %v1113_v10 = vpop.eup %1112  ;;  %799 = vst.msk [vmem:[%s1693_s3 + $0x158] sm:$0xff] %vm755_vm2, %v1111_v5  ;;  %v503_v12 = vpop.f32.mrb[19].mxu0  ;;  %v640_v15 = vadd.f32 %v1000_v9, %v1368_v40  ;;  %1138 = vtanh.f32 %v629_v7 }
 0x118   :  { %v631_v13 = vpop.f32.mrb[19].mxu1  ;;  %v1115_v14 = vpop.eup %1114  ;;  %765 = vst.msk [vmem:[%s1693_s3 + $0x48] sm:$0xff] %vm755_vm2, %v1113_v10  ;;  %v504_v17 = vadd.f32 %v1368_v40, %v503_v12  ;;  %1140 = vtanh.f32 %v512_v11 }
 0x119   :  { %v1117_v16 = vpop.eup %1116  ;;  %797 = vst.msk [vmem:[%s1693_s3 + $0x148] sm:$0xff] %vm755_vm2, %v1115_v14  ;;  %v632_v19 = vadd.f32 %v1368_v40, %v631_v13  ;;  %1142 = vtanh.f32 %v640_v15  ;;  %v971_v22 = vpop.f32.mrb[20].mxu0 }
 0x11a   :  { %v1119_v18 = vpop.eup %1118  ;;  %770 = vst.msk [vmem:[%s1693_s3 + $0x70] sm:$0xff] %vm755_vm2, %v1117_v16  ;;  %v1003_v23 = vpop.f32.mrb[20].mxu1  ;;  %1144 = vtanh.f32 %v504_v17  ;;  %v525_v25 = vadd.f32 %v971_v22, %v1368_v40 }
 0x11b   :  { %v1121_v20 = vpop.eup %1120  ;;  %802 = vst.msk [vmem:[%s1693_s3 + $0x170] sm:$0xff] %vm755_vm2, %v1119_v18  ;;  %v653_v26 = vadd.f32 %v1003_v23, %v1368_v40  ;;  %v516_v27 = vpop.f32.mrb[21].mxu0  ;;  %1146 = vtanh.f32 %v632_v19 }
 0x11c   :  { %v1123_v21 = vpop.eup %1122  ;;  %768 = vst.msk [vmem:[%s1693_s3 + $0x60] sm:$0xff] %vm755_vm2, %v1121_v20  ;;  %v644_v28 = vpop.f32.mrb[21].mxu1  ;;  %v517_v30 = vadd.f32 %v1368_v40, %v516_v27  ;;  %1148 = vtanh.f32 %v525_v25 }
 0x11d   :  { %v1125_v24 = vpop.eup %1124  ;;  %800 = vst.msk [vmem:[%s1693_s3 + $0x160] sm:$0xff] %vm755_vm2, %v1123_v21  ;;  %v645_v31 = vadd.f32 %v1368_v40, %v644_v28  ;;  %v972_v32 = vpop.f32.mrb[22].mxu0  ;;  %1150 = vtanh.f32 %v653_v26 }
 0x11e   :  { %v1127_v29 = vpop.eup %1126  ;;  %771 = vst.msk [vmem:[%s1693_s3 + $0x78] sm:$0xff] %vm755_vm2, %v1125_v24  ;;  %v1004_v33 = vpop.f32.mrb[22].mxu1  ;;  %v528_v35 = vadd.f32 %v972_v32, %v1368_v40  ;;  %1152 = vtanh.f32 %v517_v30 }
 0x11f   :  { %v1129_v34 = vpop.eup %1128  ;;  %803 = vst.msk [vmem:[%s1693_s3 + $0x178] sm:$0xff] %vm755_vm2, %v1127_v29  ;;  %v519_v36 = vpop.f32.mrb[23].mxu0  ;;  %v656_v39 = vadd.f32 %v1004_v33, %v1368_v40  ;;  %1154 = vtanh.f32 %v645_v31 }
 0x120   :  { %v647_v37 = vpop.f32.mrb[23].mxu1  ;;  %v1131_v38 = vpop.eup %1130  ;;  %769 = vst.msk [vmem:[%s1693_s3 + $0x68] sm:$0xff] %vm755_vm2, %v1129_v34  ;;  %v520_v42 = vadd.f32 %v1368_v40, %v519_v36  ;;  %1156 = vtanh.f32 %v528_v35 }
 0x121   :  { %v1133_v41 = vpop.eup %1132  ;;  %801 = vst.msk [vmem:[%s1693_s3 + $0x168] sm:$0xff] %vm755_vm2, %v1131_v38  ;;  %v648_v44 = vadd.f32 %v1368_v40, %v647_v37  ;;  %1158 = vtanh.f32 %v656_v39  ;;  %v975_v47 = vpop.f32.mrb[24].mxu0 }
 0x122   :  { %v1135_v43 = vpop.eup %1134  ;;  %774 = vst.msk [vmem:[%s1693_s3 + $0x90] sm:$0xff] %vm755_vm2, %v1133_v41  ;;  %v1007_v48 = vpop.f32.mrb[24].mxu1  ;;  %1160 = vtanh.f32 %v520_v42  ;;  %v541_v50 = vadd.f32 %v975_v47, %v1368_v40 }
 0x123   :  { %v1137_v45 = vpop.eup %1136  ;;  %806 = vst.msk [vmem:[%s1693_s3 + $0x190] sm:$0xff] %vm755_vm2, %v1135_v43  ;;  %v669_v51 = vadd.f32 %v1007_v48, %v1368_v40  ;;  %v532_v52 = vpop.f32.mrb[25].mxu0  ;;  %1162 = vtanh.f32 %v648_v44 }
 0x124   :  { %v1139_v46 = vpop.eup %1138  ;;  %772 = vst.msk [vmem:[%s1693_s3 + $0x80] sm:$0xff] %vm755_vm2, %v1137_v45  ;;  %v660_v53 = vpop.f32.mrb[25].mxu1  ;;  %v533_v55 = vadd.f32 %v1368_v40, %v532_v52  ;;  %1164 = vtanh.f32 %v541_v50 }
 0x125   :  { %v1141_v49 = vpop.eup %1140  ;;  %804 = vst.msk [vmem:[%s1693_s3 + $0x180] sm:$0xff] %vm755_vm2, %v1139_v46  ;;  %v661_v56 = vadd.f32 %v1368_v40, %v660_v53  ;;  %v976_v57 = vpop.f32.mrb[26].mxu0  ;;  %1166 = vtanh.f32 %v669_v51 }
 0x126   :  { %v1143_v54 = vpop.eup %1142  ;;  %775 = vst.msk [vmem:[%s1693_s3 + $0x98] sm:$0xff] %vm755_vm2, %v1141_v49  ;;  %v1008_v58 = vpop.f32.mrb[26].mxu1  ;;  %v544_v60 = vadd.f32 %v976_v57, %v1368_v40  ;;  %1168 = vtanh.f32 %v533_v55 }
 0x127   :  { %v1145_v59 = vpop.eup %1144  ;;  %807 = vst.msk [vmem:[%s1693_s3 + $0x198] sm:$0xff] %vm755_vm2, %v1143_v54  ;;  %v535_v61 = vpop.f32.mrb[27].mxu0  ;;  %v672_v0 = vadd.f32 %v1008_v58, %v1368_v40  ;;  %1170 = vtanh.f32 %v661_v56 }
 0x128   :  { %v663_v62 = vpop.f32.mrb[27].mxu1  ;;  %v1147_v63 = vpop.eup %1146  ;;  %773 = vst.msk [vmem:[%s1693_s3 + $0x88] sm:$0xff] %vm755_vm2, %v1145_v59  ;;  %v536_v2 = vadd.f32 %v1368_v40, %v535_v61  ;;  %1172 = vtanh.f32 %v544_v60 }
 0x129   :  { %v1149_v1 = vpop.eup %1148  ;;  %805 = vst.msk [vmem:[%s1693_s3 + $0x188] sm:$0xff] %vm755_vm2, %v1147_v63  ;;  %v664_v4 = vadd.f32 %v1368_v40, %v663_v62  ;;  %1174 = vtanh.f32 %v672_v0  ;;  %v979_v7 = vpop.f32.mrb[28].mxu0 }
 0x12a   :  { %v1151_v3 = vpop.eup %1150  ;;  %778 = vst.msk [vmem:[%s1693_s3 + $0xb0] sm:$0xff] %vm755_vm2, %v1149_v1  ;;  %v1011_v8 = vpop.f32.mrb[28].mxu1  ;;  %1176 = vtanh.f32 %v536_v2  ;;  %v557_v10 = vadd.f32 %v979_v7, %v1368_v40 }
 0x12b   :  { %v1153_v5 = vpop.eup %1152  ;;  %810 = vst.msk [vmem:[%s1693_s3 + $0x1b0] sm:$0xff] %vm755_vm2, %v1151_v3  ;;  %v685_v11 = vadd.f32 %v1011_v8, %v1368_v40  ;;  %v548_v12 = vpop.f32.mrb[29].mxu0  ;;  %1178 = vtanh.f32 %v664_v4 }
 0x12c   :  { %v1155_v6 = vpop.eup %1154  ;;  %776 = vst.msk [vmem:[%s1693_s3 + $0xa0] sm:$0xff] %vm755_vm2, %v1153_v5  ;;  %v676_v13 = vpop.f32.mrb[29].mxu1  ;;  %v549_v15 = vadd.f32 %v1368_v40, %v548_v12  ;;  %1180 = vtanh.f32 %v557_v10 }
 0x12d   :  { %v1157_v9 = vpop.eup %1156  ;;  %808 = vst.msk [vmem:[%s1693_s3 + $0x1a0] sm:$0xff] %vm755_vm2, %v1155_v6  ;;  %v677_v16 = vadd.f32 %v1368_v40, %v676_v13  ;;  %v980_v17 = vpop.f32.mrb[30].mxu0  ;;  %1182 = vtanh.f32 %v685_v11 }
 0x12e   :  { %v1159_v14 = vpop.eup %1158  ;;  %779 = vst.msk [vmem:[%s1693_s3 + $0xb8] sm:$0xff] %vm755_vm2, %v1157_v9  ;;  %v1012_v18 = vpop.f32.mrb[30].mxu1  ;;  %v560_v20 = vadd.f32 %v980_v17, %v1368_v40  ;;  %1184 = vtanh.f32 %v549_v15 }
 0x12f   :  { %v1161_v19 = vpop.eup %1160  ;;  %811 = vst.msk [vmem:[%s1693_s3 + $0x1b8] sm:$0xff] %vm755_vm2, %v1159_v14  ;;  %v551_v21 = vpop.f32.mrb[31].mxu0  ;;  %v688_v24 = vadd.f32 %v1012_v18, %v1368_v40  ;;  %1186 = vtanh.f32 %v677_v16 }
 0x130   :  { %v679_v22 = vpop.f32.mrb[31].mxu1  ;;  %v1163_v23 = vpop.eup %1162  ;;  %777 = vst.msk [vmem:[%s1693_s3 + $0xa8] sm:$0xff] %vm755_vm2, %v1161_v19  ;;  %v552_v26 = vadd.f32 %v1368_v40, %v551_v21  ;;  %1188 = vtanh.f32 %v560_v20 }
 0x131   :  { %v1165_v25 = vpop.eup %1164  ;;  %809 = vst.msk [vmem:[%s1693_s3 + $0x1a8] sm:$0xff] %vm755_vm2, %v1163_v23  ;;  %v680_v28 = vadd.f32 %v1368_v40, %v679_v22  ;;  %1190 = vtanh.f32 %v688_v24 }
 0x132   :  { %v1167_v27 = vpop.eup %1166  ;;  %782 = vst.msk [vmem:[%s1693_s3 + $0xd0] sm:$0xff] %vm755_vm2, %v1165_v25  ;;  %1192 = vtanh.f32 %v552_v26 }
 0x133   :  { %v1169_v29 = vpop.eup %1168  ;;  %814 = vst.msk [vmem:[%s1693_s3 + $0x1d0] sm:$0xff] %vm755_vm2, %v1167_v27  ;;  %1194 = vtanh.f32 %v680_v28 }
 0x134   :  { %v1171_v30 = vpop.eup %1170  ;;  %780 = vst.msk [vmem:[%s1693_s3 + $0xc0] sm:$0xff] %vm755_vm2, %v1169_v29 }
 0x135   :  { %v1173_v31 = vpop.eup %1172  ;;  %812 = vst.msk [vmem:[%s1693_s3 + $0x1c0] sm:$0xff] %vm755_vm2, %v1171_v30 }
 0x136   :  { %v1175_v40 = vpop.eup %1174  ;;  %783 = vst.msk [vmem:[%s1693_s3 + $0xd8] sm:$0xff] %vm755_vm2, %v1173_v31 }
 0x137   :  { %v1177_v32 = vpop.eup %1176  ;;  %815 = vst.msk [vmem:[%s1693_s3 + $0x1d8] sm:$0xff] %vm755_vm2, %v1175_v40 }
 0x138   :  { %v1179_v33 = vpop.eup %1178  ;;  %781 = vst.msk [vmem:[%s1693_s3 + $0xc8] sm:$0xff] %vm755_vm2, %v1177_v32 }
 0x139   :  { %v1181_v34 = vpop.eup %1180  ;;  %813 = vst.msk [vmem:[%s1693_s3 + $0x1c8] sm:$0xff] %vm755_vm2, %v1179_v33 }
 0x13a   :  { %v1183_v35 = vpop.eup %1182  ;;  %786 = vst.msk [vmem:[%s1693_s3 + $0xf0] sm:$0xff] %vm755_vm2, %v1181_v34 }
 0x13b   :  { %v1185_v36 = vpop.eup %1184  ;;  %818 = vst.msk [vmem:[%s1693_s3 + $0x1f0] sm:$0xff] %vm755_vm2, %v1183_v35 }
 0x13c   :  { %v1187_v37 = vpop.eup %1186  ;;  %784 = vst.msk [vmem:[%s1693_s3 + $0xe0] sm:$0xff] %vm755_vm2, %v1185_v36 }
 0x13d   :  { %v1189_v38 = vpop.eup %1188  ;;  %816 = vst.msk [vmem:[%s1693_s3 + $0x1e0] sm:$0xff] %vm755_vm2, %v1187_v37 }
 0x13e   :  { %v1191_v39 = vpop.eup %1190  ;;  %787 = vst.msk [vmem:[%s1693_s3 + $0xf8] sm:$0xff] %vm755_vm2, %v1189_v38 }
 0x13f   :  { %v1193_v41 = vpop.eup %1192  ;;  %819 = vst.msk [vmem:[%s1693_s3 + $0x1f8] sm:$0xff] %vm755_vm2, %v1191_v39 }
 0x140   :  { %v1195_v42 = vpop.eup %1194  ;;  %785 = vst.msk [vmem:[%s1693_s3 + $0xe8] sm:$0xff] %vm755_vm2, %v1193_v41 }
 0x141   :  { %817 = vst.msk [vmem:[%s1693_s3 + $0x1e8] sm:$0xff] %vm755_vm2, %v1195_v42 }

// kernel: vae_forward.18
= control target key start
LH: loop header
LB: loop body
LE: loop exit
PB: predicated region body
PF: predicated region fallthrough
CT: control target
= control target key end

     0   :  { %16 = vsyncpa [#allocation3], 0  ;;  %v422_v36 = vlaneseq  ;;  %v10691_v37 = vmov 1966171168   ;;  %s14001_s0 = inlined_call_operand.vmem [shape: bf16[2,768], index: 0, kind: input, shape index: {}]   ;;  %s14002_s1 = inlined_call_operand.vmem [shape: bf16[768,800], index: 1, kind: input, shape index: {}]   ;;  %s14003_s2 = inlined_call_operand.vmem [shape: f32[1,800], index: 2, kind: input, shape index: {}]   ;;  %s14004_s3 = inlined_call_operand.vmem [shape: bf16[768,800], index: 3, kind: input, shape index: {}]   ;;  %s14005_s4 = inlined_call_operand.vmem [shape: f32[1,800], index: 4, kind: input, shape index: {}]   ;;  %s14006_s5 = inlined_call_operand.vmem [shape: f32[2,800], index: 5, kind: input, shape index: {}]   ;;  %s14007_s6 = inlined_call_operand.vmem [shape: bf16[800,768], index: 6, kind: input, shape index: {}]   ;;  %s14008_s7 = inlined_call_operand.vmem [shape: f32[1,768], index: 7, kind: input, shape index: {}]   ;;  %s14009_s8 = inlined_call_operand.hbm [shape: f32[2,800], index: 8, kind: output, shape index: {0}]   ;;  %s14010_s9 = inlined_call_operand.hbm [shape: f32[2,800], index: 9, kind: output, shape index: {1}]   ;;  %s14011_s10 = inlined_call_operand.vmem [shape: bf16[2,768], index: 10, kind: output, shape index: {2}]  }
   0x1   :  { %v9217_v0 = vld [vmem:[%s14002_s1 + $0x4] ss:$28 sps:$4 sm:$0xff]   ;;  %v9223_v4 = vld [vmem:[%s14002_s1 + $0x3c] ss:$28 sps:$4 sm:$0xff]   ;;  %v9229_v8 = vld [vmem:[%s14002_s1 + $0x74] ss:$28 sps:$4 sm:$0xff]   ;;  %v460_v38 = vunpack.c.l.s4 %v10691_v37 }
   0x2   :  { %v9219_v1 = vld [vmem:[%s14002_s1 + $0x384] ss:$28 sps:$4 sm:$0xff]   ;;  %2239 = vmatprep.subr.bf16.mxu1 %v9217_v0  ;;  %v9225_v5 = vld [vmem:[%s14002_s1 + $0x3bc] ss:$28 sps:$4 sm:$0xff]   ;;  %v9231_v9 = vld [vmem:[%s14002_s1 + $0x3f4] ss:$28 sps:$4 sm:$0xff]  }
   0x3   :  { %v9221_v2 = vld [vmem:[%s14002_s1] ss:$28 sps:$4 sm:$0xff]   ;;  %2280 = vmatprep.subr.bf16.mxu0 %v9219_v1  ;;  %v9227_v6 = vld [vmem:[%s14002_s1 + $0x38] ss:$28 sps:$4 sm:$0xff]   ;;  %v9233_v10 = vld [vmem:[%s14002_s1 + $0x70] ss:$28 sps:$4 sm:$0xff]   ;;  %v461_v43 = vunpack.c.0.s8 %v460_v38 }
   0x4   :  { %v9222_v3 = vld [vmem:[%s14002_s1 + $0x380] ss:$28 sps:$4 sm:$0xff]   ;;  %2240 = vmatpush1.bf16.msra.mxu1 %v9221_v2  ;;  %v9228_v7 = vld [vmem:[%s14002_s1 + $0x3b8] ss:$28 sps:$4 sm:$0xff]   ;;  %v9234_v11 = vld [vmem:[%s14002_s1 + $0x3f0] ss:$28 sps:$4 sm:$0xff]  }
   0x5   :  { %2281 = vmatpush1.bf16.msra.mxu0 %v9222_v3  ;;  %2241 = vmatprep.subr.bf16.mxu1 %v9223_v4  ;;  %v9235_v12 = vld [vmem:[%s14002_s1 + $0xac] ss:$28 sps:$4 sm:$0xff]   ;;  %v9241_v16 = vld [vmem:[%s14002_s1 + $0xe4] ss:$28 sps:$4 sm:$0xff]   ;;  %v9247_v20 = vld [vmem:[%s14002_s1 + $0x11c] ss:$28 sps:$4 sm:$0xff]  }
   0x6   :  { %2282 = vmatprep.subr.bf16.mxu0 %v9225_v5  ;;  %v9237_v13 = vld [vmem:[%s14002_s1 + $0x42c] ss:$28 sps:$4 sm:$0xff]   ;;  %v9243_v17 = vld [vmem:[%s14002_s1 + $0x464] ss:$28 sps:$4 sm:$0xff]   ;;  %v9249_v21 = vld [vmem:[%s14002_s1 + $0x49c] ss:$28 sps:$4 sm:$0xff]  }
   0x7   :  { %v9239_v14 = vld [vmem:[%s14002_s1 + $0xa8] ss:$28 sps:$4 sm:$0xff]   ;;  %v9245_v18 = vld [vmem:[%s14002_s1 + $0xe0] ss:$28 sps:$4 sm:$0xff]   ;;  %v9251_v22 = vld [vmem:[%s14002_s1 + $0x118] ss:$28 sps:$4 sm:$0xff]  }
   0x8   :  { %2242 = vmatpush1.bf16.msra.mxu1 %v9227_v6  ;;  %v9240_v15 = vld [vmem:[%s14002_s1 + $0x428] ss:$28 sps:$4 sm:$0xff]   ;;  %v9246_v19 = vld [vmem:[%s14002_s1 + $0x460] ss:$28 sps:$4 sm:$0xff]   ;;  %v9252_v23 = vld [vmem:[%s14002_s1 + $0x498] ss:$28 sps:$4 sm:$0xff]  }
   0x9   :  { %2283 = vmatpush1.bf16.msra.mxu0 %v9228_v7  ;;  %2243 = vmatprep.subr.bf16.mxu1 %v9229_v8  ;;  %v9253_v24 = vld [vmem:[%s14002_s1 + $0x154] ss:$28 sps:$4 sm:$0xff]   ;;  %v9259_v28 = vld [vmem:[%s14002_s1 + $0x18c] ss:$28 sps:$4 sm:$0xff]   ;;  %v9265_v32 = vld [vmem:[%s14002_s1 + $0x1c4] ss:$28 sps:$4 sm:$0xff]  }
   0xa   :  { %2284 = vmatprep.subr.bf16.mxu0 %v9231_v9  ;;  %v9255_v25 = vld [vmem:[%s14002_s1 + $0x4d4] ss:$28 sps:$4 sm:$0xff]   ;;  %v9261_v29 = vld [vmem:[%s14002_s1 + $0x50c] ss:$28 sps:$4 sm:$0xff]   ;;  %v9267_v33 = vld [vmem:[%s14002_s1 + $0x544] ss:$28 sps:$4 sm:$0xff]  }
   0xb   :  { %v9257_v26 = vld [vmem:[%s14002_s1 + $0x150] ss:$28 sps:$4 sm:$0xff]   ;;  %v9263_v30 = vld [vmem:[%s14002_s1 + $0x188] ss:$28 sps:$4 sm:$0xff]   ;;  %v9269_v34 = vld [vmem:[%s14002_s1 + $0x1c0] ss:$28 sps:$4 sm:$0xff]  }
   0xc   :  { %2244 = vmatpush1.bf16.msra.mxu1 %v9233_v10  ;;  %v9258_v27 = vld [vmem:[%s14002_s1 + $0x4d0] ss:$28 sps:$4 sm:$0xff]   ;;  %v9264_v31 = vld [vmem:[%s14002_s1 + $0x508] ss:$28 sps:$4 sm:$0xff]   ;;  %v9270_v35 = vld [vmem:[%s14002_s1 + $0x540] ss:$28 sps:$4 sm:$0xff]  }
   0xd   :  { %2285 = vmatpush1.bf16.msra.mxu0 %v9234_v11  ;;  %2245 = vmatprep.subr.bf16.mxu1 %v9235_v12  ;;  %v9271_v39 = vld [vmem:[%s14002_s1 + $0x1fc] ss:$28 sps:$4 sm:$0xff]   ;;  %v10868_v42 = vshrl.u32 %v422_v36, 7  ;;  %v9277_v45 = vld [vmem:[%s14002_s1 + $0x234] ss:$28 sps:$4 sm:$0xff]  }
   0xe   :  { %2286 = vmatprep.subr.bf16.mxu0 %v9237_v13  ;;  %v9273_v40 = vld [vmem:[%s14002_s1 + $0x57c] ss:$28 sps:$4 sm:$0xff]   ;;  %v9279_v46 = vld [vmem:[%s14002_s1 + $0x5b4] ss:$28 sps:$4 sm:$0xff]   ;;  %v9283_v50 = vld [vmem:[%s14002_s1 + $0x26c] ss:$28 sps:$4 sm:$0xff]  }
   0xf   :  { %v9275_v41 = vld [vmem:[%s14002_s1 + $0x1f8] ss:$28 sps:$4 sm:$0xff]   ;;  %v9281_v47 = vld [vmem:[%s14002_s1 + $0x230] ss:$28 sps:$4 sm:$0xff]   ;;  %v10886_v49 = vsub.s32 %v461_v43, %v10868_v42  ;;  %v35_v52 = vld [vmem:[%s14001_s0] sm:$0x3f] }
  0x10   :  { %2246 = vmatpush1.bf16.msra.mxu1 %v9239_v14  ;;  %v9276_v44 = vld [vmem:[%s14002_s1 + $0x578] ss:$28 sps:$4 sm:$0xff]   ;;  %v9282_v48 = vld [vmem:[%s14002_s1 + $0x5b0] ss:$28 sps:$4 sm:$0xff]   ;;  %v9287_v53 = vld [vmem:[%s14002_s1 + $0x268] ss:$28 sps:$4 sm:$0xff]   ;;  %v458_v5 = vcombine.high %v35_v52, %v35_v52 }
  0x11   :  { %2287 = vmatpush1.bf16.msra.mxu0 %v9240_v15  ;;  %2247 = vmatprep.subr.bf16.mxu1 %v9241_v16  ;;  %v9285_v51 = vld [vmem:[%s14002_s1 + $0x5ec] ss:$28 sps:$4 sm:$0xff]   ;;  %v465_v54 = vrot.slane %v35_v52, %v10886_v49  ;;  %v9289_v56 = vld [vmem:[%s14002_s1 + $0x2a4] ss:$28 sps:$4 sm:$0xff]   ;;  %v9295_v62 = vld [vmem:[%s14002_s1 + $0x2dc] ss:$28 sps:$4 sm:$0xff]  }
  0x12   :  { %2288 = vmatprep.subr.bf16.mxu0 %v9243_v17  ;;  %v9288_v55 = vld [vmem:[%s14002_s1 + $0x5e8] ss:$28 sps:$4 sm:$0xff]   ;;  %v9293_v59 = vld [vmem:[%s14002_s1 + $0x2a0] ss:$28 sps:$4 sm:$0xff]   ;;  %v9299_v1 = vld [vmem:[%s14002_s1 + $0x2d8] ss:$28 sps:$4 sm:$0xff]   ;;  %v10956_v10 = vrot.slane %v458_v5, %v10886_v49 }
  0x13   :  { %v9291_v57 = vld [vmem:[%s14002_s1 + $0x624] ss:$28 sps:$4 sm:$0xff]   ;;  %v473_v58 = vcombine.high %v465_v54, %v465_v54  ;;  %v9297_v63 = vld [vmem:[%s14002_s1 + $0x65c] ss:$28 sps:$4 sm:$0xff]   ;;  %v9301_v3 = vld [vmem:[%s14002_s1 + $0x314] ss:$28 sps:$4 sm:$0xff]   ;;  %v10962_v12 = vrot.slane %v465_v54, %v10886_v49 }
  0x14   :  { %2248 = vmatpush1.bf16.msra.mxu1 %v9245_v18  ;;  %v9294_v61 = vld [vmem:[%s14002_s1 + $0x620] ss:$28 sps:$4 sm:$0xff]   ;;  %v9300_v2 = vld [vmem:[%s14002_s1 + $0x658] ss:$28 sps:$4 sm:$0xff]   ;;  %v9305_v6 = vld [vmem:[%s14002_s1 + $0x310] ss:$28 sps:$4 sm:$0xff]   ;;  %v474_v16 = vcombine.high %v10956_v10, %v10956_v10 }
  0x15   :  { %2289 = vmatpush1.bf16.msra.mxu0 %v9246_v19  ;;  %2249 = vmatprep.subr.bf16.mxu1 %v9247_v20  ;;  %v10914_v60 = vrot.slane %v473_v58, %v10886_v49  ;;  %v9303_v4 = vld [vmem:[%s14002_s1 + $0x694] ss:$28 sps:$4 sm:$0xff]   ;;  %v9307_v8 = vld [vmem:[%s14002_s1 + $0x34c] ss:$28 sps:$4 sm:$0xff]   ;;  %v9315_v14 = vld [vmem:[%s14002_s1 + $0x704] ss:$28 sps:$4 sm:$0xff]   ;;  %v10980_v18 = vcombine.high %v10962_v12, %v10962_v12 }
  0x16   :  { %2290 = vmatprep.subr.bf16.mxu0 %v9249_v21  ;;  %v9306_v7 = vld [vmem:[%s14002_s1 + $0x690] ss:$28 sps:$4 sm:$0xff]   ;;  %v9311_v11 = vld [vmem:[%s14002_s1 + $0x348] ss:$28 sps:$4 sm:$0xff]   ;;  %v9313_v17 = vld [vmem:[%s14002_s1 + $0x700] ss:$28 sps:$4 sm:$0xff]  }
  0x17   :  { %v10927_v0 = vcombine.high %v10914_v60, %v10914_v60  ;;  %2271 = vmatprep.mubr.bf16.mxu1 %v10914_v60  ;;  %v9309_v9 = vld [vmem:[%s14002_s1 + $0x6cc] ss:$28 sps:$4 sm:$0xff]   ;;  %v9321_v20 = vld [vmem:[%s14002_s1 + $0x73c] ss:$28 sps:$4 sm:$0xff]   ;;  %v9324_v21 = vld [vmem:[%s14002_s1 + $0x44] ss:$28 sps:$4 sm:$0xff]  }
  0x18   :  { %2250 = vmatpush1.bf16.msra.mxu1 %v9251_v22  ;;  %v9312_v13 = vld [vmem:[%s14002_s1 + $0x6c8] ss:$28 sps:$4 sm:$0xff]   ;;  %v10992_v22 = vrot.slane %v474_v16, %v10886_v49  ;;  %v9345_v37 = vld [vmem:[%s14002_s1 + $0x81c] ss:$28 sps:$4 sm:$0xff]  }
  0x19   :  { %2291 = vmatpush1.bf16.msra.mxu0 %v9252_v23  ;;  %2251 = vmatprep.subr.bf16.mxu1 %v9253_v24  ;;  %v9318_v15 = vld [vmem:[%s14002_s1 + $0xc] ss:$28 sps:$4 sm:$0xff]   ;;  %v9319_v23 = vld [vmem:[%s14002_s1 + $0x738] ss:$28 sps:$4 sm:$0xff]   ;;  %v9322_v24 = vld [vmem:[%s14002_s1 + $0x40] ss:$28 sps:$4 sm:$0xff]  }
  0x1a   :  { %2292 = vmatprep.subr.bf16.mxu0 %v9255_v25  ;;  %2312 = vmatprep.mubr.bf16.mxu0 %v10927_v0  ;;  %v9316_v19 = vld [vmem:[%s14002_s1 + $0x8] ss:$28 sps:$4 sm:$0xff]   ;;  %v9327_v25 = vld [vmem:[%s14002_s1 + $0x774] ss:$28 sps:$4 sm:$0xff]   ;;  %v9354_v43 = vld [vmem:[%s14002_s1 + $0x15c] ss:$28 sps:$4 sm:$0xff]  }
  0x1b   :  { %v9340_v36 = vld [vmem:[%s14002_s1 + $0xe8] ss:$28 sps:$4 sm:$0xff]   ;;  %v9370_v58 = vld [vmem:[%s14002_s1 + $0x200] ss:$28 sps:$4 sm:$0xff]  }
  0x1c   :  { %2252 = vmatpush1.bf16.msra.mxu1 %v9257_v26  ;;  %v9330_v26 = vld [vmem:[%s14002_s1 + $0x7c] ss:$28 sps:$4 sm:$0xff]   ;;  %v9348_v38 = vld [vmem:[%s14002_s1 + $0x124] ss:$28 sps:$4 sm:$0xff]   ;;  %v9366_v52 = vld [vmem:[%s14002_s1 + $0x1cc] ss:$28 sps:$4 sm:$0xff]  }
  0x1d   :  { %2293 = vmatpush1.bf16.msra.mxu0 %v9258_v27  ;;  %2253 = vmatprep.subr.bf16.mxu1 %v9259_v28  ;;  %v9325_v27 = vld [vmem:[%s14002_s1 + $0x770] ss:$28 sps:$4 sm:$0xff]   ;;  %v9328_v28 = vld [vmem:[%s14002_s1 + $0x78] ss:$28 sps:$4 sm:$0xff]   ;;  %v9364_v54 = vld [vmem:[%s14002_s1 + $0x1c8] ss:$28 sps:$4 sm:$0xff]  }
  0x1e   :  { %2294 = vmatprep.subr.bf16.mxu0 %v9261_v29  ;;  %v9333_v29 = vld [vmem:[%s14002_s1 + $0x7ac] ss:$28 sps:$4 sm:$0xff]   ;;  %v9387_v5 = vld [vmem:[%s14002_s1 + $0x9a4] ss:$28 sps:$4 sm:$0xff]   ;;  %v9402_v16 = vld [vmem:[%s14002_s1 + $0x31c] ss:$28 sps:$4 sm:$0xff]  }
  0x20   :  { %2254 = vmatpush1.bf16.msra.mxu1 %v9263_v30  ;;  %v9336_v30 = vld [vmem:[%s14002_s1 + $0xb4] ss:$28 sps:$4 sm:$0xff]  }
  0x21   :  { %2295 = vmatpush1.bf16.msra.mxu0 %v9264_v31  ;;  %2255 = vmatprep.subr.bf16.mxu1 %v9265_v32  ;;  %v9331_v31 = vld [vmem:[%s14002_s1 + $0x7a8] ss:$28 sps:$4 sm:$0xff]   ;;  %v9334_v32 = vld [vmem:[%s14002_s1 + $0xb0] ss:$28 sps:$4 sm:$0xff]  }
  0x22   :  { %2296 = vmatprep.subr.bf16.mxu0 %v9267_v33  ;;  %v9339_v33 = vld [vmem:[%s14002_s1 + $0x7e4] ss:$28 sps:$4 sm:$0xff]  }
  0x24   :  { %2256 = vmatpush1.bf16.msra.mxu1 %v9269_v34  ;;  %v9342_v34 = vld [vmem:[%s14002_s1 + $0xec] ss:$28 sps:$4 sm:$0xff]  }
  0x25   :  { %2297 = vmatpush1.bf16.msra.mxu0 %v9270_v35  ;;  %2257 = vmatprep.subr.bf16.mxu1 %v9271_v39  ;;  %v9337_v35 = vld [vmem:[%s14002_s1 + $0x7e0] ss:$28 sps:$4 sm:$0xff]   ;;  %v9343_v39 = vld [vmem:[%s14002_s1 + $0x818] ss:$28 sps:$4 sm:$0xff]  }
  0x26   :  { %2298 = vmatprep.subr.bf16.mxu0 %v9273_v40  ;;  %v9346_v40 = vld [vmem:[%s14002_s1 + $0x120] ss:$28 sps:$4 sm:$0xff]  }
  0x28   :  { %2258 = vmatpush1.bf16.msra.mxu1 %v9275_v41  ;;  %v9351_v41 = vld [vmem:[%s14002_s1 + $0x854] ss:$28 sps:$4 sm:$0xff]  }
  0x29   :  { %2299 = vmatpush1.bf16.msra.mxu0 %v9276_v44  ;;  %2259 = vmatprep.subr.bf16.mxu1 %v9277_v45  ;;  %v9349_v44 = vld [vmem:[%s14002_s1 + $0x850] ss:$28 sps:$4 sm:$0xff]   ;;  %v9352_v45 = vld [vmem:[%s14002_s1 + $0x158] ss:$28 sps:$4 sm:$0xff]  }
  0x2a   :  { %2300 = vmatprep.subr.bf16.mxu0 %v9279_v46  ;;  %v9357_v46 = vld [vmem:[%s14002_s1 + $0x88c] ss:$28 sps:$4 sm:$0xff]  }
  0x2c   :  { %2260 = vmatpush1.bf16.msra.mxu1 %v9281_v47  ;;  %v9360_v47 = vld [vmem:[%s14002_s1 + $0x194] ss:$28 sps:$4 sm:$0xff]  }
  0x2d   :  { %2301 = vmatpush1.bf16.msra.mxu0 %v9282_v48  ;;  %2261 = vmatprep.subr.bf16.mxu1 %v9283_v50  ;;  %v9355_v48 = vld [vmem:[%s14002_s1 + $0x888] ss:$28 sps:$4 sm:$0xff]   ;;  %v9358_v50 = vld [vmem:[%s14002_s1 + $0x190] ss:$28 sps:$4 sm:$0xff]  }
  0x2e   :  { %2302 = vmatprep.subr.bf16.mxu0 %v9285_v51  ;;  %v9363_v51 = vld [vmem:[%s14002_s1 + $0x8c4] ss:$28 sps:$4 sm:$0xff]  }
  0x30   :  { %2262 = vmatpush1.bf16.msra.mxu1 %v9287_v53  ;;  %v9361_v53 = vld [vmem:[%s14002_s1 + $0x8c0] ss:$28 sps:$4 sm:$0xff]  }
  0x31   :  { %2303 = vmatpush1.bf16.msra.mxu0 %v9288_v55  ;;  %2263 = vmatprep.subr.bf16.mxu1 %v9289_v56  ;;  %v9369_v55 = vld [vmem:[%s14002_s1 + $0x8fc] ss:$28 sps:$4 sm:$0xff]   ;;  %v9372_v56 = vld [vmem:[%s14002_s1 + $0x204] ss:$28 sps:$4 sm:$0xff]  }
  0x32   :  { %2304 = vmatprep.subr.bf16.mxu0 %v9291_v57  ;;  %v9367_v57 = vld [vmem:[%s14002_s1 + $0x8f8] ss:$28 sps:$4 sm:$0xff]  }
  0x34   :  { %2264 = vmatpush1.bf16.msra.mxu1 %v9293_v59  ;;  %v9375_v59 = vld [vmem:[%s14002_s1 + $0x934] ss:$28 sps:$4 sm:$0xff]  }
  0x35   :  { %2305 = vmatpush1.bf16.msra.mxu0 %v9294_v61  ;;  %2265 = vmatprep.subr.bf16.mxu1 %v9295_v62  ;;  %v9378_v61 = vld [vmem:[%s14002_s1 + $0x23c] ss:$28 sps:$4 sm:$0xff]   ;;  %v9373_v62 = vld [vmem:[%s14002_s1 + $0x930] ss:$28 sps:$4 sm:$0xff]  }
  0x36   :  { %2306 = vmatprep.subr.bf16.mxu0 %v9297_v63  ;;  %v9376_v63 = vld [vmem:[%s14002_s1 + $0x238] ss:$28 sps:$4 sm:$0xff]  }
  0x38   :  { %2266 = vmatpush1.bf16.msra.mxu1 %v9299_v1  ;;  %v9381_v1 = vld [vmem:[%s14002_s1 + $0x96c] ss:$28 sps:$4 sm:$0xff]  }
  0x39   :  { %2307 = vmatpush1.bf16.msra.mxu0 %v9300_v2  ;;  %2267 = vmatprep.subr.bf16.mxu1 %v9301_v3  ;;  %v9384_v2 = vld [vmem:[%s14002_s1 + $0x274] ss:$28 sps:$4 sm:$0xff]   ;;  %v9379_v3 = vld [vmem:[%s14002_s1 + $0x968] ss:$28 sps:$4 sm:$0xff]  }
  0x3a   :  { %2308 = vmatprep.subr.bf16.mxu0 %v9303_v4  ;;  %v9382_v4 = vld [vmem:[%s14002_s1 + $0x270] ss:$28 sps:$4 sm:$0xff]  }
  0x3c   :  { %2268 = vmatpush1.bf16.msra.mxu1 %v9305_v6  ;;  %v9390_v6 = vld [vmem:[%s14002_s1 + $0x2ac] ss:$28 sps:$4 sm:$0xff]  }
  0x3d   :  { %2309 = vmatpush1.bf16.msra.mxu0 %v9306_v7  ;;  %2269 = vmatprep.subr.bf16.mxu1 %v9307_v8  ;;  %v9385_v7 = vld [vmem:[%s14002_s1 + $0x9a0] ss:$28 sps:$4 sm:$0xff]   ;;  %v9388_v8 = vld [vmem:[%s14002_s1 + $0x2a8] ss:$28 sps:$4 sm:$0xff]  }
  0x3e   :  { %2310 = vmatprep.subr.bf16.mxu0 %v9309_v9  ;;  %v9393_v9 = vld [vmem:[%s14002_s1 + $0x9dc] ss:$28 sps:$4 sm:$0xff]  }
  0x40   :  { %2270 = vmatpush1.bf16.msra.mxu1 %v9311_v11  ;;  %v9396_v11 = vld [vmem:[%s14002_s1 + $0x2e4] ss:$28 sps:$4 sm:$0xff]  }
  0x41   :  { %2311 = vmatpush1.bf16.msra.mxu0 %v9312_v13  ;;  %2362 = vmatprep.subr.bf16.mxu1 %v9318_v15  ;;  %v9391_v13 = vld [vmem:[%s14002_s1 + $0x9d8] ss:$28 sps:$4 sm:$0xff]  }
  0x42   :  { %2321 = vmatprep.subr.bf16.mxu0 %v9315_v14  ;;  %v9394_v14 = vld [vmem:[%s14002_s1 + $0x2e0] ss:$28 sps:$4 sm:$0xff]   ;;  %v9399_v15 = vld [vmem:[%s14002_s1 + $0xa14] ss:$28 sps:$4 sm:$0xff]  }
  0x43   :  { %2272 = vmatmul.mubr.bf16.vlgmr.msra.gmra.mrb[0].mxu1 %v10962_v12 }
  0x44   :  { %2313 = vmatmul.mubr.bf16.vlgmr.msra.gmra.mrb[0].mxu0 %v10980_v18  ;;  %2363 = vmatpush1.bf16.msra.mxu1 %v9316_v19  ;;  %v9400_v19 = vld [vmem:[%s14002_s1 + $0x318] ss:$28 sps:$4 sm:$0xff]  }
  0x45   :  { %2322 = vmatpush1.bf16.msra.mxu0 %v9313_v17  ;;  %2364 = vmatprep.subr.bf16.mxu1 %v9324_v21  ;;  %v9397_v17 = vld [vmem:[%s14002_s1 + $0xa10] ss:$28 sps:$4 sm:$0xff]  }
  0x46   :  { %2323 = vmatprep.subr.bf16.mxu0 %v9321_v20  ;;  %2353 = vmatprep.mubr.bf16.mxu0 %v10992_v22  ;;  %v9405_v20 = vld [vmem:[%s14002_s1 + $0xa4c] ss:$28 sps:$4 sm:$0xff]   ;;  %v9408_v21 = vld [vmem:[%s14002_s1 + $0x354] ss:$28 sps:$4 sm:$0xff]  }
  0x47   :  { %2394 = vmatprep.mubr.bf16.mxu1 %v10914_v60 }
  0x48   :  { %2365 = vmatpush1.bf16.msra.mxu1 %v9322_v24  ;;  %v9406_v24 = vld [vmem:[%s14002_s1 + $0x350] ss:$28 sps:$4 sm:$0xff]  }
  0x49   :  { %2324 = vmatpush1.bf16.msra.mxu0 %v9319_v23  ;;  %2366 = vmatprep.subr.bf16.mxu1 %v9330_v26  ;;  %v9403_v23 = vld [vmem:[%s14002_s1 + $0xa48] ss:$28 sps:$4 sm:$0xff]   ;;  %v9415_v26 = vld [vmem:[%s14002_s1 + $0x14] ss:$28 sps:$4 sm:$0xff]  }
  0x4a   :  { %2325 = vmatprep.subr.bf16.mxu0 %v9327_v25  ;;  %v9412_v25 = vld [vmem:[%s14002_s1 + $0x38c] ss:$28 sps:$4 sm:$0xff]  }
  0x4c   :  { %2367 = vmatpush1.bf16.msra.mxu1 %v9328_v28  ;;  %v9410_v28 = vld [vmem:[%s14002_s1 + $0x388] ss:$28 sps:$4 sm:$0xff]  }
  0x4d   :  { %2326 = vmatpush1.bf16.msra.mxu0 %v9325_v27  ;;  %2368 = vmatprep.subr.bf16.mxu1 %v9336_v30  ;;  %v11180_v27 = vrot.slane %v10956_v10, %v10886_v49  ;;  %v9418_v30 = vld [vmem:[%s14002_s1 + $0x3c4] ss:$28 sps:$4 sm:$0xff]   ;;  %v9421_v10 = vld [vmem:[%s14002_s1 + $0x4c] ss:$28 sps:$4 sm:$0xff]  }
  0x4e   :  { %2327 = vmatprep.subr.bf16.mxu0 %v9333_v29  ;;  %v9413_v29 = vld [vmem:[%s14002_s1 + $0x10] ss:$28 sps:$4 sm:$0xff]  }
  0x50   :  { %2369 = vmatpush1.bf16.msra.mxu1 %v9334_v32  ;;  %v9419_v32 = vld [vmem:[%s14002_s1 + $0x48] ss:$28 sps:$4 sm:$0xff]  }
  0x51   :  { %2328 = vmatpush1.bf16.msra.mxu0 %v9331_v31  ;;  %2370 = vmatprep.subr.bf16.mxu1 %v9342_v34  ;;  %v9416_v31 = vld [vmem:[%s14002_s1 + $0x3c0] ss:$28 sps:$4 sm:$0xff]  }
  0x52   :  { %2329 = vmatprep.subr.bf16.mxu0 %v9339_v33  ;;  %v9424_v33 = vld [vmem:[%s14002_s1 + $0x3fc] ss:$28 sps:$4 sm:$0xff]   ;;  %v9427_v34 = vld [vmem:[%s14002_s1 + $0x84] ss:$28 sps:$4 sm:$0xff]  }
  0x54   :  { %2371 = vmatpush1.bf16.msra.mxu1 %v9340_v36  ;;  %v9425_v36 = vld [vmem:[%s14002_s1 + $0x80] ss:$28 sps:$4 sm:$0xff]  }
  0x55   :  { %2330 = vmatpush1.bf16.msra.mxu0 %v9337_v35  ;;  %2372 = vmatprep.subr.bf16.mxu1 %v9348_v38  ;;  %v9422_v35 = vld [vmem:[%s14002_s1 + $0x3f8] ss:$28 sps:$4 sm:$0xff]  }
  0x56   :  { %2331 = vmatprep.subr.bf16.mxu0 %v9345_v37  ;;  %v9430_v37 = vld [vmem:[%s14002_s1 + $0x434] ss:$28 sps:$4 sm:$0xff]   ;;  %v9433_v38 = vld [vmem:[%s14002_s1 + $0xbc] ss:$28 sps:$4 sm:$0xff]  }
  0x58   :  { %2373 = vmatpush1.bf16.msra.mxu1 %v9346_v40  ;;  %v9431_v40 = vld [vmem:[%s14002_s1 + $0xb8] ss:$28 sps:$4 sm:$0xff]  }
  0x59   :  { %2332 = vmatpush1.bf16.msra.mxu0 %v9343_v39  ;;  %2374 = vmatprep.subr.bf16.mxu1 %v9354_v43  ;;  %v9428_v39 = vld [vmem:[%s14002_s1 + $0x430] ss:$28 sps:$4 sm:$0xff]  }
  0x5a   :  { %2333 = vmatprep.subr.bf16.mxu0 %v9351_v41  ;;  %v9436_v41 = vld [vmem:[%s14002_s1 + $0x46c] ss:$28 sps:$4 sm:$0xff]   ;;  %v9439_v43 = vld [vmem:[%s14002_s1 + $0xf4] ss:$28 sps:$4 sm:$0xff]  }
  0x5c   :  { %2375 = vmatpush1.bf16.msra.mxu1 %v9352_v45  ;;  %v9437_v45 = vld [vmem:[%s14002_s1 + $0xf0] ss:$28 sps:$4 sm:$0xff]  }
  0x5d   :  { %2334 = vmatpush1.bf16.msra.mxu0 %v9349_v44  ;;  %2376 = vmatprep.subr.bf16.mxu1 %v9360_v47  ;;  %v9434_v44 = vld [vmem:[%s14002_s1 + $0x468] ss:$28 sps:$4 sm:$0xff]  }
  0x5e   :  { %2335 = vmatprep.subr.bf16.mxu0 %v9357_v46  ;;  %v9442_v46 = vld [vmem:[%s14002_s1 + $0x4a4] ss:$28 sps:$4 sm:$0xff]   ;;  %v9445_v47 = vld [vmem:[%s14002_s1 + $0x12c] ss:$28 sps:$4 sm:$0xff]  }
  0x60   :  { %2377 = vmatpush1.bf16.msra.mxu1 %v9358_v50  ;;  %v9443_v50 = vld [vmem:[%s14002_s1 + $0x128] ss:$28 sps:$4 sm:$0xff]  }
  0x61   :  { %2336 = vmatpush1.bf16.msra.mxu0 %v9355_v48  ;;  %2378 = vmatprep.subr.bf16.mxu1 %v9366_v52  ;;  %v9440_v48 = vld [vmem:[%s14002_s1 + $0x4a0] ss:$28 sps:$4 sm:$0xff]  }
  0x62   :  { %2337 = vmatprep.subr.bf16.mxu0 %v9363_v51  ;;  %v9448_v51 = vld [vmem:[%s14002_s1 + $0x4dc] ss:$28 sps:$4 sm:$0xff]   ;;  %v9451_v52 = vld [vmem:[%s14002_s1 + $0x164] ss:$28 sps:$4 sm:$0xff]  }
  0x64   :  { %2379 = vmatpush1.bf16.msra.mxu1 %v9364_v54  ;;  %v9449_v54 = vld [vmem:[%s14002_s1 + $0x160] ss:$28 sps:$4 sm:$0xff]  }
  0x65   :  { %2338 = vmatpush1.bf16.msra.mxu0 %v9361_v53  ;;  %2380 = vmatprep.subr.bf16.mxu1 %v9372_v56  ;;  %v9446_v53 = vld [vmem:[%s14002_s1 + $0x4d8] ss:$28 sps:$4 sm:$0xff]  }
  0x66   :  { %2339 = vmatprep.subr.bf16.mxu0 %v9369_v55  ;;  %v9454_v55 = vld [vmem:[%s14002_s1 + $0x514] ss:$28 sps:$4 sm:$0xff]   ;;  %v9457_v56 = vld [vmem:[%s14002_s1 + $0x19c] ss:$28 sps:$4 sm:$0xff]  }
  0x68   :  { %2381 = vmatpush1.bf16.msra.mxu1 %v9370_v58  ;;  %v9455_v58 = vld [vmem:[%s14002_s1 + $0x198] ss:$28 sps:$4 sm:$0xff]  }
  0x69   :  { %2340 = vmatpush1.bf16.msra.mxu0 %v9367_v57  ;;  %2382 = vmatprep.subr.bf16.mxu1 %v9378_v61  ;;  %v9452_v57 = vld [vmem:[%s14002_s1 + $0x510] ss:$28 sps:$4 sm:$0xff]  }
  0x6a   :  { %2341 = vmatprep.subr.bf16.mxu0 %v9375_v59  ;;  %v9460_v59 = vld [vmem:[%s14002_s1 + $0x54c] ss:$28 sps:$4 sm:$0xff]   ;;  %v9463_v61 = vld [vmem:[%s14002_s1 + $0x1d4] ss:$28 sps:$4 sm:$0xff]  }
  0x6c   :  { %2383 = vmatpush1.bf16.msra.mxu1 %v9376_v63  ;;  %v9461_v63 = vld [vmem:[%s14002_s1 + $0x1d0] ss:$28 sps:$4 sm:$0xff]  }
  0x6d   :  { %2342 = vmatpush1.bf16.msra.mxu0 %v9373_v62  ;;  %2384 = vmatprep.subr.bf16.mxu1 %v9384_v2  ;;  %v9458_v62 = vld [vmem:[%s14002_s1 + $0x548] ss:$28 sps:$4 sm:$0xff]  }
  0x6e   :  { %2343 = vmatprep.subr.bf16.mxu0 %v9381_v1  ;;  %v9466_v1 = vld [vmem:[%s14002_s1 + $0x584] ss:$28 sps:$4 sm:$0xff]   ;;  %v9469_v2 = vld [vmem:[%s14002_s1 + $0x20c] ss:$28 sps:$4 sm:$0xff]  }
  0x70   :  { %2385 = vmatpush1.bf16.msra.mxu1 %v9382_v4  ;;  %v9467_v4 = vld [vmem:[%s14002_s1 + $0x208] ss:$28 sps:$4 sm:$0xff]  }
  0x71   :  { %2344 = vmatpush1.bf16.msra.mxu0 %v9379_v3  ;;  %2386 = vmatprep.subr.bf16.mxu1 %v9390_v6  ;;  %v9464_v3 = vld [vmem:[%s14002_s1 + $0x580] ss:$28 sps:$4 sm:$0xff]  }
  0x72   :  { %2345 = vmatprep.subr.bf16.mxu0 %v9387_v5  ;;  %v9472_v5 = vld [vmem:[%s14002_s1 + $0x5bc] ss:$28 sps:$4 sm:$0xff]   ;;  %v9475_v6 = vld [vmem:[%s14002_s1 + $0x244] ss:$28 sps:$4 sm:$0xff]  }
  0x74   :  { %2387 = vmatpush1.bf16.msra.mxu1 %v9388_v8  ;;  %v9473_v8 = vld [vmem:[%s14002_s1 + $0x240] ss:$28 sps:$4 sm:$0xff]  }
  0x75   :  { %2346 = vmatpush1.bf16.msra.mxu0 %v9385_v7  ;;  %2388 = vmatprep.subr.bf16.mxu1 %v9396_v11  ;;  %v9470_v7 = vld [vmem:[%s14002_s1 + $0x5b8] ss:$28 sps:$4 sm:$0xff]  }
  0x76   :  { %2347 = vmatprep.subr.bf16.mxu0 %v9393_v9  ;;  %v9478_v9 = vld [vmem:[%s14002_s1 + $0x5f4] ss:$28 sps:$4 sm:$0xff]   ;;  %v9481_v11 = vld [vmem:[%s14002_s1 + $0x27c] ss:$28 sps:$4 sm:$0xff]  }
  0x78   :  { %2389 = vmatpush1.bf16.msra.mxu1 %v9394_v14  ;;  %v9479_v14 = vld [vmem:[%s14002_s1 + $0x278] ss:$28 sps:$4 sm:$0xff]  }
  0x79   :  { %2348 = vmatpush1.bf16.msra.mxu0 %v9391_v13  ;;  %2390 = vmatprep.subr.bf16.mxu1 %v9402_v16  ;;  %v9476_v13 = vld [vmem:[%s14002_s1 + $0x5f0] ss:$28 sps:$4 sm:$0xff]  }
  0x7a   :  { %2349 = vmatprep.subr.bf16.mxu0 %v9399_v15  ;;  %v9484_v15 = vld [vmem:[%s14002_s1 + $0x62c] ss:$28 sps:$4 sm:$0xff]   ;;  %v9487_v16 = vld [vmem:[%s14002_s1 + $0x2b4] ss:$28 sps:$4 sm:$0xff]  }
  0x7c   :  { %2391 = vmatpush1.bf16.msra.mxu1 %v9400_v19  ;;  %v9485_v19 = vld [vmem:[%s14002_s1 + $0x2b0] ss:$28 sps:$4 sm:$0xff]  }
  0x7d   :  { %2350 = vmatpush1.bf16.msra.mxu0 %v9397_v17  ;;  %2392 = vmatprep.subr.bf16.mxu1 %v9408_v21  ;;  %v9482_v17 = vld [vmem:[%s14002_s1 + $0x628] ss:$28 sps:$4 sm:$0xff]  }
  0x7e   :  { %2351 = vmatprep.subr.bf16.mxu0 %v9405_v20  ;;  %v9490_v20 = vld [vmem:[%s14002_s1 + $0x664] ss:$28 sps:$4 sm:$0xff]   ;;  %v9493_v21 = vld [vmem:[%s14002_s1 + $0x2ec] ss:$28 sps:$4 sm:$0xff]  }
  0x80   :  { %2393 = vmatpush1.bf16.msra.mxu1 %v9406_v24  ;;  %v9491_v24 = vld [vmem:[%s14002_s1 + $0x2e8] ss:$28 sps:$4 sm:$0xff]  }
  0x81   :  { %2352 = vmatpush1.bf16.msra.mxu0 %v9403_v23  ;;  %2403 = vmatprep.subr.bf16.mxu1 %v9412_v25  ;;  %v9488_v23 = vld [vmem:[%s14002_s1 + $0x660] ss:$28 sps:$4 sm:$0xff]  }
  0x82   :  { %2485 = vmatprep.subr.bf16.mxu0 %v9415_v26  ;;  %v9496_v25 = vld [vmem:[%s14002_s1 + $0x69c] ss:$28 sps:$4 sm:$0xff]   ;;  %v9499_v26 = vld [vmem:[%s14002_s1 + $0x324] ss:$28 sps:$4 sm:$0xff]  }
  0x83   :  { %2395 = vmatmul.mubr.bf16.vlgmr.msra.gmra.mrb[4].mxu1 %v10962_v12 }
  0x84   :  { %2354 = vmatmul.mubr.bf16.vlgmr.msra.gmra.mrb[0].mxu0 %v11180_v27  ;;  %2404 = vmatpush1.bf16.msra.mxu1 %v9410_v28  ;;  %v9494_v28 = vld [vmem:[%s14002_s1 + $0x698] ss:$28 sps:$4 sm:$0xff]  }
  0x85   :  { %2486 = vmatpush1.bf16.msra.mxu0 %v9413_v29  ;;  %2405 = vmatprep.subr.bf16.mxu1 %v9418_v30  ;;  %v9497_v29 = vld [vmem:[%s14002_s1 + $0x320] ss:$28 sps:$4 sm:$0xff]   ;;  %v9502_v30 = vld [vmem:[%s14002_s1 + $0x6d4] ss:$28 sps:$4 sm:$0xff]  }
  0x86   :  { %2487 = vmatprep.subr.bf16.mxu0 %v9421_v10  ;;  %2435 = vmatprep.mubr.bf16.mxu1 %v10927_v0  ;;  %v9505_v10 = vld [vmem:[%s14002_s1 + $0x35c] ss:$28 sps:$4 sm:$0xff]  }
  0x87   :  { %2517 = vmatprep.mubr.bf16.mxu0 %v10914_v60 }
  0x88   :  { %2406 = vmatpush1.bf16.msra.mxu1 %v9416_v31  ;;  %v9500_v31 = vld [vmem:[%s14002_s1 + $0x6d0] ss:$28 sps:$4 sm:$0xff]  }
  0x89   :  { %2488 = vmatpush1.bf16.msra.mxu0 %v9419_v32  ;;  %2407 = vmatprep.subr.bf16.mxu1 %v9424_v33  ;;  %v9503_v32 = vld [vmem:[%s14002_s1 + $0x358] ss:$28 sps:$4 sm:$0xff]   ;;  %v9508_v33 = vld [vmem:[%s14002_s1 + $0x70c] ss:$28 sps:$4 sm:$0xff]  }
  0x8a   :  { %2489 = vmatprep.subr.bf16.mxu0 %v9427_v34  ;;  %v9511_v34 = vld [vmem:[%s14002_s1 + $0x394] ss:$28 sps:$4 sm:$0xff]  }
  0x8c   :  { %2408 = vmatpush1.bf16.msra.mxu1 %v9422_v35  ;;  %v9506_v35 = vld [vmem:[%s14002_s1 + $0x708] ss:$28 sps:$4 sm:$0xff]  }
  0x8d   :  { %2490 = vmatpush1.bf16.msra.mxu0 %v9425_v36  ;;  %2409 = vmatprep.subr.bf16.mxu1 %v9430_v37  ;;  %v9509_v36 = vld [vmem:[%s14002_s1 + $0x390] ss:$28 sps:$4 sm:$0xff]   ;;  %v9514_v37 = vld [vmem:[%s14002_s1 + $0x744] ss:$28 sps:$4 sm:$0xff]  }
  0x8e   :  { %2491 = vmatprep.subr.bf16.mxu0 %v9433_v38  ;;  %v9517_v38 = vld [vmem:[%s14002_s1 + $0x3cc] ss:$28 sps:$4 sm:$0xff]  }
  0x90   :  { %2410 = vmatpush1.bf16.msra.mxu1 %v9428_v39  ;;  %v9512_v39 = vld [vmem:[%s14002_s1 + $0x740] ss:$28 sps:$4 sm:$0xff]  }
  0x91   :  { %2492 = vmatpush1.bf16.msra.mxu0 %v9431_v40  ;;  %2411 = vmatprep.subr.bf16.mxu1 %v9436_v41  ;;  %v9515_v40 = vld [vmem:[%s14002_s1 + $0x3c8] ss:$28 sps:$4 sm:$0xff]   ;;  %v9520_v41 = vld [vmem:[%s14002_s1 + $0x77c] ss:$28 sps:$4 sm:$0xff]  }
  0x92   :  { %2493 = vmatprep.subr.bf16.mxu0 %v9439_v43  ;;  %v9523_v43 = vld [vmem:[%s14002_s1 + $0x404] ss:$28 sps:$4 sm:$0xff]  }
  0x94   :  { %2412 = vmatpush1.bf16.msra.mxu1 %v9434_v44  ;;  %v9518_v44 = vld [vmem:[%s14002_s1 + $0x778] ss:$28 sps:$4 sm:$0xff]  }
  0x95   :  { %2494 = vmatpush1.bf16.msra.mxu0 %v9437_v45  ;;  %2413 = vmatprep.subr.bf16.mxu1 %v9442_v46  ;;  %v9521_v45 = vld [vmem:[%s14002_s1 + $0x400] ss:$28 sps:$4 sm:$0xff]   ;;  %v9526_v46 = vld [vmem:[%s14002_s1 + $0x7b4] ss:$28 sps:$4 sm:$0xff]  }
  0x96   :  { %2495 = vmatprep.subr.bf16.mxu0 %v9445_v47  ;;  %v9529_v47 = vld [vmem:[%s14002_s1 + $0x43c] ss:$28 sps:$4 sm:$0xff]  }
  0x98   :  { %2414 = vmatpush1.bf16.msra.mxu1 %v9440_v48  ;;  %v9524_v48 = vld [vmem:[%s14002_s1 + $0x7b0] ss:$28 sps:$4 sm:$0xff]  }
  0x99   :  { %2496 = vmatpush1.bf16.msra.mxu0 %v9443_v50  ;;  %2415 = vmatprep.subr.bf16.mxu1 %v9448_v51  ;;  %v9527_v50 = vld [vmem:[%s14002_s1 + $0x438] ss:$28 sps:$4 sm:$0xff]   ;;  %v9532_v51 = vld [vmem:[%s14002_s1 + $0x7ec] ss:$28 sps:$4 sm:$0xff]  }
  0x9a   :  { %2497 = vmatprep.subr.bf16.mxu0 %v9451_v52  ;;  %v9535_v52 = vld [vmem:[%s14002_s1 + $0x474] ss:$28 sps:$4 sm:$0xff]  }
  0x9c   :  { %2416 = vmatpush1.bf16.msra.mxu1 %v9446_v53  ;;  %v9530_v53 = vld [vmem:[%s14002_s1 + $0x7e8] ss:$28 sps:$4 sm:$0xff]  }
  0x9d   :  { %2498 = vmatpush1.bf16.msra.mxu0 %v9449_v54  ;;  %2417 = vmatprep.subr.bf16.mxu1 %v9454_v55  ;;  %v9533_v54 = vld [vmem:[%s14002_s1 + $0x470] ss:$28 sps:$4 sm:$0xff]   ;;  %v9538_v55 = vld [vmem:[%s14002_s1 + $0x824] ss:$28 sps:$4 sm:$0xff]  }
  0x9e   :  { %2499 = vmatprep.subr.bf16.mxu0 %v9457_v56  ;;  %v9541_v56 = vld [vmem:[%s14002_s1 + $0x4ac] ss:$28 sps:$4 sm:$0xff]  }
  0xa0   :  { %2418 = vmatpush1.bf16.msra.mxu1 %v9452_v57  ;;  %v9536_v57 = vld [vmem:[%s14002_s1 + $0x820] ss:$28 sps:$4 sm:$0xff]  }
  0xa1   :  { %2500 = vmatpush1.bf16.msra.mxu0 %v9455_v58  ;;  %2419 = vmatprep.subr.bf16.mxu1 %v9460_v59  ;;  %v9539_v58 = vld [vmem:[%s14002_s1 + $0x4a8] ss:$28 sps:$4 sm:$0xff]   ;;  %v9544_v59 = vld [vmem:[%s14002_s1 + $0x85c] ss:$28 sps:$4 sm:$0xff]  }
  0xa2   :  { %2501 = vmatprep.subr.bf16.mxu0 %v9463_v61  ;;  %v9547_v61 = vld [vmem:[%s14002_s1 + $0x4e4] ss:$28 sps:$4 sm:$0xff]  }
  0xa4   :  { %2420 = vmatpush1.bf16.msra.mxu1 %v9458_v62  ;;  %v9542_v62 = vld [vmem:[%s14002_s1 + $0x858] ss:$28 sps:$4 sm:$0xff]  }
  0xa5   :  { %2502 = vmatpush1.bf16.msra.mxu0 %v9461_v63  ;;  %2421 = vmatprep.subr.bf16.mxu1 %v9466_v1  ;;  %v9545_v63 = vld [vmem:[%s14002_s1 + $0x4e0] ss:$28 sps:$4 sm:$0xff]   ;;  %v9550_v1 = vld [vmem:[%s14002_s1 + $0x894] ss:$28 sps:$4 sm:$0xff]  }
  0xa6   :  { %2503 = vmatprep.subr.bf16.mxu0 %v9469_v2  ;;  %v9553_v2 = vld [vmem:[%s14002_s1 + $0x51c] ss:$28 sps:$4 sm:$0xff]  }
  0xa8   :  { %2422 = vmatpush1.bf16.msra.mxu1 %v9464_v3  ;;  %v9548_v3 = vld [vmem:[%s14002_s1 + $0x890] ss:$28 sps:$4 sm:$0xff]  }
  0xa9   :  { %2504 = vmatpush1.bf16.msra.mxu0 %v9467_v4  ;;  %2423 = vmatprep.subr.bf16.mxu1 %v9472_v5  ;;  %v9551_v4 = vld [vmem:[%s14002_s1 + $0x518] ss:$28 sps:$4 sm:$0xff]   ;;  %v9556_v5 = vld [vmem:[%s14002_s1 + $0x8cc] ss:$28 sps:$4 sm:$0xff]  }
  0xaa   :  { %2505 = vmatprep.subr.bf16.mxu0 %v9475_v6  ;;  %v9559_v6 = vld [vmem:[%s14002_s1 + $0x554] ss:$28 sps:$4 sm:$0xff]  }
  0xac   :  { %2424 = vmatpush1.bf16.msra.mxu1 %v9470_v7  ;;  %v9554_v7 = vld [vmem:[%s14002_s1 + $0x8c8] ss:$28 sps:$4 sm:$0xff]  }
  0xad   :  { %2506 = vmatpush1.bf16.msra.mxu0 %v9473_v8  ;;  %2425 = vmatprep.subr.bf16.mxu1 %v9478_v9  ;;  %v9557_v8 = vld [vmem:[%s14002_s1 + $0x550] ss:$28 sps:$4 sm:$0xff]   ;;  %v9562_v9 = vld [vmem:[%s14002_s1 + $0x904] ss:$28 sps:$4 sm:$0xff]  }
  0xae   :  { %2507 = vmatprep.subr.bf16.mxu0 %v9481_v11  ;;  %v9565_v11 = vld [vmem:[%s14002_s1 + $0x58c] ss:$28 sps:$4 sm:$0xff]  }
  0xb0   :  { %2426 = vmatpush1.bf16.msra.mxu1 %v9476_v13  ;;  %v9560_v13 = vld [vmem:[%s14002_s1 + $0x900] ss:$28 sps:$4 sm:$0xff]  }
  0xb1   :  { %2508 = vmatpush1.bf16.msra.mxu0 %v9479_v14  ;;  %2427 = vmatprep.subr.bf16.mxu1 %v9484_v15  ;;  %v9563_v14 = vld [vmem:[%s14002_s1 + $0x588] ss:$28 sps:$4 sm:$0xff]   ;;  %v9568_v15 = vld [vmem:[%s14002_s1 + $0x93c] ss:$28 sps:$4 sm:$0xff]  }
  0xb2   :  { %2509 = vmatprep.subr.bf16.mxu0 %v9487_v16  ;;  %v9571_v16 = vld [vmem:[%s14002_s1 + $0x5c4] ss:$28 sps:$4 sm:$0xff]  }
  0xb4   :  { %2428 = vmatpush1.bf16.msra.mxu1 %v9482_v17  ;;  %v9566_v17 = vld [vmem:[%s14002_s1 + $0x938] ss:$28 sps:$4 sm:$0xff]  }
  0xb5   :  { %2510 = vmatpush1.bf16.msra.mxu0 %v9485_v19  ;;  %2429 = vmatprep.subr.bf16.mxu1 %v9490_v20  ;;  %v9569_v19 = vld [vmem:[%s14002_s1 + $0x5c0] ss:$28 sps:$4 sm:$0xff]   ;;  %v9574_v20 = vld [vmem:[%s14002_s1 + $0x974] ss:$28 sps:$4 sm:$0xff]  }
  0xb6   :  { %2511 = vmatprep.subr.bf16.mxu0 %v9493_v21  ;;  %v9577_v21 = vld [vmem:[%s14002_s1 + $0x5fc] ss:$28 sps:$4 sm:$0xff]  }
  0xb8   :  { %2430 = vmatpush1.bf16.msra.mxu1 %v9488_v23  ;;  %v9572_v23 = vld [vmem:[%s14002_s1 + $0x970] ss:$28 sps:$4 sm:$0xff]  }
  0xb9   :  { %2512 = vmatpush1.bf16.msra.mxu0 %v9491_v24  ;;  %2431 = vmatprep.subr.bf16.mxu1 %v9496_v25  ;;  %v9575_v24 = vld [vmem:[%s14002_s1 + $0x5f8] ss:$28 sps:$4 sm:$0xff]   ;;  %v9580_v25 = vld [vmem:[%s14002_s1 + $0x9ac] ss:$28 sps:$4 sm:$0xff]  }
  0xba   :  { %2513 = vmatprep.subr.bf16.mxu0 %v9499_v26  ;;  %v9583_v26 = vld [vmem:[%s14002_s1 + $0x634] ss:$28 sps:$4 sm:$0xff]  }
  0xbc   :  { %2432 = vmatpush1.bf16.msra.mxu1 %v9494_v28  ;;  %v9578_v28 = vld [vmem:[%s14002_s1 + $0x9a8] ss:$28 sps:$4 sm:$0xff]  }
  0xbd   :  { %2514 = vmatpush1.bf16.msra.mxu0 %v9497_v29  ;;  %2433 = vmatprep.subr.bf16.mxu1 %v9502_v30  ;;  %v9581_v29 = vld [vmem:[%s14002_s1 + $0x630] ss:$28 sps:$4 sm:$0xff]   ;;  %v9586_v30 = vld [vmem:[%s14002_s1 + $0x9e4] ss:$28 sps:$4 sm:$0xff]  }
  0xbe   :  { %2515 = vmatprep.subr.bf16.mxu0 %v9505_v10  ;;  %v9589_v10 = vld [vmem:[%s14002_s1 + $0x66c] ss:$28 sps:$4 sm:$0xff]  }
  0xc0   :  { %2434 = vmatpush1.bf16.msra.mxu1 %v9500_v31  ;;  %v9584_v31 = vld [vmem:[%s14002_s1 + $0x9e0] ss:$28 sps:$4 sm:$0xff]  }
  0xc1   :  { %2516 = vmatpush1.bf16.msra.mxu0 %v9503_v32  ;;  %2444 = vmatprep.subr.bf16.mxu1 %v9508_v33  ;;  %v9587_v32 = vld [vmem:[%s14002_s1 + $0x668] ss:$28 sps:$4 sm:$0xff]   ;;  %v9592_v33 = vld [vmem:[%s14002_s1 + $0xa1c] ss:$28 sps:$4 sm:$0xff]  }
  0xc2   :  { %2526 = vmatprep.subr.bf16.mxu0 %v9511_v34  ;;  %v9595_v34 = vld [vmem:[%s14002_s1 + $0x6a4] ss:$28 sps:$4 sm:$0xff]  }
  0xc3   :  { %2436 = vmatmul.mubr.bf16.vlgmr.msra.gmra.mrb[4].mxu1 %v10980_v18 }
  0xc4   :  { %2518 = vmatmul.mubr.bf16.vlgmr.msra.gmra.mrb[4].mxu0 %v10962_v12  ;;  %2445 = vmatpush1.bf16.msra.mxu1 %v9506_v35  ;;  %v9590_v35 = vld [vmem:[%s14002_s1 + $0xa18] ss:$28 sps:$4 sm:$0xff]  }
  0xc5   :  { %2527 = vmatpush1.bf16.msra.mxu0 %v9509_v36  ;;  %2446 = vmatprep.subr.bf16.mxu1 %v9514_v37  ;;  %v9593_v36 = vld [vmem:[%s14002_s1 + $0x6a0] ss:$28 sps:$4 sm:$0xff]   ;;  %v9598_v37 = vld [vmem:[%s14002_s1 + $0xa54] ss:$28 sps:$4 sm:$0xff]  }
  0xc6   :  { %2528 = vmatprep.subr.bf16.mxu0 %v9517_v38  ;;  %2476 = vmatprep.mubr.bf16.mxu1 %v10992_v22  ;;  %v9601_v38 = vld [vmem:[%s14002_s1 + $0x6dc] ss:$28 sps:$4 sm:$0xff]  }
  0xc7   :  { %2558 = vmatprep.mubr.bf16.mxu0 %v10927_v0 }
  0xc8   :  { %2447 = vmatpush1.bf16.msra.mxu1 %v9512_v39  ;;  %v9596_v39 = vld [vmem:[%s14002_s1 + $0xa50] ss:$28 sps:$4 sm:$0xff]  }
  0xc9   :  { %2529 = vmatpush1.bf16.msra.mxu0 %v9515_v40  ;;  %2448 = vmatprep.subr.bf16.mxu1 %v9520_v41  ;;  %v9599_v40 = vld [vmem:[%s14002_s1 + $0x6d8] ss:$28 sps:$4 sm:$0xff]  }
  0xca   :  { %2530 = vmatprep.subr.bf16.mxu0 %v9523_v43  ;;  %v9602_v41 = vld [vmem:[%s14002_s1 + $0x1d8] ss:$28 sps:$4 sm:$0xff]  }
  0xcb   :  { %v9606_v43 = vld [vmem:[%s14002_s1 + $0x714] ss:$28 sps:$4 sm:$0xff]  }
  0xcc   :  { %2449 = vmatpush1.bf16.msra.mxu1 %v9518_v44  ;;  %v9603_v44 = vld [vmem:[%s14002_s1 + $0x18] ss:$28 sps:$4 sm:$0xff]  }
  0xcd   :  { %2531 = vmatpush1.bf16.msra.mxu0 %v9521_v45  ;;  %2450 = vmatprep.subr.bf16.mxu1 %v9526_v46  ;;  %v9604_v45 = vld [vmem:[%s14002_s1 + $0x710] ss:$28 sps:$4 sm:$0xff]  }
  0xce   :  { %2532 = vmatprep.subr.bf16.mxu0 %v9529_v47  ;;  %v9607_v46 = vld [vmem:[%s14002_s1 + $0x210] ss:$28 sps:$4 sm:$0xff]  }
  0xcf   :  { %v9611_v47 = vld [vmem:[%s14002_s1 + $0x74c] ss:$28 sps:$4 sm:$0xff]  }
  0xd0   :  { %2451 = vmatpush1.bf16.msra.mxu1 %v9524_v48  ;;  %v9608_v48 = vld [vmem:[%s14002_s1 + $0x50] ss:$28 sps:$4 sm:$0xff]  }
  0xd1   :  { %2533 = vmatpush1.bf16.msra.mxu0 %v9527_v50  ;;  %2452 = vmatprep.subr.bf16.mxu1 %v9532_v51  ;;  %v9609_v50 = vld [vmem:[%s14002_s1 + $0x748] ss:$28 sps:$4 sm:$0xff]  }
  0xd2   :  { %2534 = vmatprep.subr.bf16.mxu0 %v9535_v52  ;;  %v9612_v51 = vld [vmem:[%s14002_s1 + $0x248] ss:$28 sps:$4 sm:$0xff]  }
  0xd3   :  { %v9616_v52 = vld [vmem:[%s14002_s1 + $0x784] ss:$28 sps:$4 sm:$0xff]  }
  0xd4   :  { %2453 = vmatpush1.bf16.msra.mxu1 %v9530_v53  ;;  %v9613_v53 = vld [vmem:[%s14002_s1 + $0x88] ss:$28 sps:$4 sm:$0xff]  }
  0xd5   :  { %2535 = vmatpush1.bf16.msra.mxu0 %v9533_v54  ;;  %2454 = vmatprep.subr.bf16.mxu1 %v9538_v55  ;;  %v9614_v54 = vld [vmem:[%s14002_s1 + $0x780] ss:$28 sps:$4 sm:$0xff]  }
  0xd6   :  { %2536 = vmatprep.subr.bf16.mxu0 %v9541_v56  ;;  %v9617_v55 = vld [vmem:[%s14002_s1 + $0x280] ss:$28 sps:$4 sm:$0xff]  }
  0xd7   :  { %v9621_v56 = vld [vmem:[%s14002_s1 + $0x7bc] ss:$28 sps:$4 sm:$0xff]  }
  0xd8   :  { %2455 = vmatpush1.bf16.msra.mxu1 %v9536_v57  ;;  %v9618_v57 = vld [vmem:[%s14002_s1 + $0xc0] ss:$28 sps:$4 sm:$0xff]  }
  0xd9   :  { %2537 = vmatpush1.bf16.msra.mxu0 %v9539_v58  ;;  %2456 = vmatprep.subr.bf16.mxu1 %v9544_v59  ;;  %v9619_v58 = vld [vmem:[%s14002_s1 + $0x7b8] ss:$28 sps:$4 sm:$0xff]  }
  0xda   :  { %2538 = vmatprep.subr.bf16.mxu0 %v9547_v61  ;;  %v9622_v59 = vld [vmem:[%s14002_s1 + $0x2b8] ss:$28 sps:$4 sm:$0xff]  }
  0xdb   :  { %v9626_v61 = vld [vmem:[%s14002_s1 + $0x7f4] ss:$28 sps:$4 sm:$0xff]  }
  0xdc   :  { %2457 = vmatpush1.bf16.msra.mxu1 %v9542_v62  ;;  %v9623_v62 = vld [vmem:[%s14002_s1 + $0xf8] ss:$28 sps:$4 sm:$0xff]  }
  0xdd   :  { %2539 = vmatpush1.bf16.msra.mxu0 %v9545_v63  ;;  %2458 = vmatprep.subr.bf16.mxu1 %v9550_v1  ;;  %v9624_v63 = vld [vmem:[%s14002_s1 + $0x7f0] ss:$28 sps:$4 sm:$0xff]  }
  0xde   :  { %2540 = vmatprep.subr.bf16.mxu0 %v9553_v2  ;;  %v9627_v1 = vld [vmem:[%s14002_s1 + $0x2f0] ss:$28 sps:$4 sm:$0xff]  }
  0xdf   :  { %v9631_v2 = vld [vmem:[%s14002_s1 + $0x82c] ss:$28 sps:$4 sm:$0xff]  }
  0xe0   :  { %2459 = vmatpush1.bf16.msra.mxu1 %v9548_v3  ;;  %v9628_v3 = vld [vmem:[%s14002_s1 + $0x130] ss:$28 sps:$4 sm:$0xff]  }
  0xe1   :  { %2541 = vmatpush1.bf16.msra.mxu0 %v9551_v4  ;;  %2460 = vmatprep.subr.bf16.mxu1 %v9556_v5  ;;  %v9629_v4 = vld [vmem:[%s14002_s1 + $0x828] ss:$28 sps:$4 sm:$0xff]  }
  0xe2   :  { %2542 = vmatprep.subr.bf16.mxu0 %v9559_v6  ;;  %v9632_v5 = vld [vmem:[%s14002_s1 + $0x328] ss:$28 sps:$4 sm:$0xff]  }
  0xe3   :  { %v9636_v6 = vld [vmem:[%s14002_s1 + $0x864] ss:$28 sps:$4 sm:$0xff]  }
  0xe4   :  { %2461 = vmatpush1.bf16.msra.mxu1 %v9554_v7 }
  0xe5   :  { %2543 = vmatpush1.bf16.msra.mxu0 %v9557_v8  ;;  %2462 = vmatprep.subr.bf16.mxu1 %v9562_v9 }
  0xe6   :  { %2544 = vmatprep.subr.bf16.mxu0 %v9565_v11  ;;  %v9633_v11 = vld [vmem:[%s14002_s1 + $0x168] ss:$28 sps:$4 sm:$0xff]  }
  0xe8   :  { %2463 = vmatpush1.bf16.msra.mxu1 %v9560_v13  ;;  %v9634_v13 = vld [vmem:[%s14002_s1 + $0x860] ss:$28 sps:$4 sm:$0xff]  }
  0xe9   :  { %2545 = vmatpush1.bf16.msra.mxu0 %v9563_v14  ;;  %2464 = vmatprep.subr.bf16.mxu1 %v9568_v15  ;;  %v9637_v15 = vld [vmem:[%s14002_s1 + $0x360] ss:$28 sps:$4 sm:$0xff]  }
  0xea   :  { %2546 = vmatprep.subr.bf16.mxu0 %v9571_v16  ;;  %v9641_v16 = vld [vmem:[%s14002_s1 + $0x89c] ss:$28 sps:$4 sm:$0xff]  }
  0xec   :  { %2465 = vmatpush1.bf16.msra.mxu1 %v9566_v17  ;;  %v9638_v17 = vld [vmem:[%s14002_s1 + $0x1a0] ss:$28 sps:$4 sm:$0xff]  }
  0xed   :  { %2547 = vmatpush1.bf16.msra.mxu0 %v9569_v19  ;;  %2466 = vmatprep.subr.bf16.mxu1 %v9574_v20  ;;  %v9639_v19 = vld [vmem:[%s14002_s1 + $0x898] ss:$28 sps:$4 sm:$0xff]  }
  0xee   :  { %2548 = vmatprep.subr.bf16.mxu0 %v9577_v21  ;;  %v9642_v20 = vld [vmem:[%s14002_s1 + $0x558] ss:$28 sps:$4 sm:$0xff]  }
  0xef   :  { %v9646_v21 = vld [vmem:[%s14002_s1 + $0x8d4] ss:$28 sps:$4 sm:$0xff]  }
  0xf0   :  { %2467 = vmatpush1.bf16.msra.mxu1 %v9572_v23  ;;  %v9643_v23 = vld [vmem:[%s14002_s1 + $0x398] ss:$28 sps:$4 sm:$0xff]  }
  0xf1   :  { %2549 = vmatpush1.bf16.msra.mxu0 %v9575_v24  ;;  %2468 = vmatprep.subr.bf16.mxu1 %v9580_v25  ;;  %v9644_v24 = vld [vmem:[%s14002_s1 + $0x8d0] ss:$28 sps:$4 sm:$0xff]  }
  0xf2   :  { %2550 = vmatprep.subr.bf16.mxu0 %v9583_v26  ;;  %v9647_v25 = vld [vmem:[%s14002_s1 + $0x590] ss:$28 sps:$4 sm:$0xff]  }
  0xf3   :  { %v9651_v26 = vld [vmem:[%s14002_s1 + $0x90c] ss:$28 sps:$4 sm:$0xff]  }
  0xf4   :  { %2469 = vmatpush1.bf16.msra.mxu1 %v9578_v28  ;;  %v9648_v28 = vld [vmem:[%s14002_s1 + $0x3d0] ss:$28 sps:$4 sm:$0xff]  }
  0xf5   :  { %2551 = vmatpush1.bf16.msra.mxu0 %v9581_v29  ;;  %2470 = vmatprep.subr.bf16.mxu1 %v9586_v30  ;;  %v9649_v29 = vld [vmem:[%s14002_s1 + $0x908] ss:$28 sps:$4 sm:$0xff]  }
  0xf6   :  { %2552 = vmatprep.subr.bf16.mxu0 %v9589_v10  ;;  %v9652_v30 = vld [vmem:[%s14002_s1 + $0x5c8] ss:$28 sps:$4 sm:$0xff]  }
  0xf7   :  { %v9656_v10 = vld [vmem:[%s14002_s1 + $0x944] ss:$28 sps:$4 sm:$0xff]  }
  0xf8   :  { %2471 = vmatpush1.bf16.msra.mxu1 %v9584_v31  ;;  %v9653_v31 = vld [vmem:[%s14002_s1 + $0x408] ss:$28 sps:$4 sm:$0xff]  }
  0xf9   :  { %2553 = vmatpush1.bf16.msra.mxu0 %v9587_v32  ;;  %2472 = vmatprep.subr.bf16.mxu1 %v9592_v33  ;;  %v9654_v32 = vld [vmem:[%s14002_s1 + $0x940] ss:$28 sps:$4 sm:$0xff]  }
  0xfa   :  { %2554 = vmatprep.subr.bf16.mxu0 %v9595_v34  ;;  %v9657_v33 = vld [vmem:[%s14002_s1 + $0x600] ss:$28 sps:$4 sm:$0xff]  }
  0xfb   :  { %v9661_v34 = vld [vmem:[%s14002_s1 + $0x97c] ss:$28 sps:$4 sm:$0xff]  }
  0xfc   :  { %2473 = vmatpush1.bf16.msra.mxu1 %v9590_v35  ;;  %v9658_v35 = vld [vmem:[%s14002_s1 + $0x440] ss:$28 sps:$4 sm:$0xff]  }
  0xfd   :  { %2555 = vmatpush1.bf16.msra.mxu0 %v9593_v36  ;;  %2474 = vmatprep.subr.bf16.mxu1 %v9598_v37  ;;  %v9659_v36 = vld [vmem:[%s14002_s1 + $0x978] ss:$28 sps:$4 sm:$0xff]  }
  0xfe   :  { %2556 = vmatprep.subr.bf16.mxu0 %v9601_v38  ;;  %v9662_v37 = vld [vmem:[%s14002_s1 + $0x638] ss:$28 sps:$4 sm:$0xff]  }
  0xff   :  { %v9666_v38 = vld [vmem:[%s14002_s1 + $0x9b4] ss:$28 sps:$4 sm:$0xff]  }
 0x100   :  { %2475 = vmatpush1.bf16.msra.mxu1 %v9596_v39  ;;  %v9663_v39 = vld [vmem:[%s14002_s1 + $0x478] ss:$28 sps:$4 sm:$0xff]  }
 0x101   :  { %2557 = vmatpush1.bf16.msra.mxu0 %v9599_v40  ;;  %8980 = vmatprep.subr.bf16.mxu1 %v9602_v41  ;;  %v9664_v40 = vld [vmem:[%s14002_s1 + $0x9b0] ss:$28 sps:$4 sm:$0xff]  }
 0x102   :  { %2567 = vmatprep.subr.bf16.mxu0 %v9606_v43  ;;  %v9667_v41 = vld [vmem:[%s14002_s1 + $0x670] ss:$28 sps:$4 sm:$0xff]  }
 0x103   :  { %2477 = vmatmul.mubr.bf16.vlgmr.msra.gmra.mrb[4].mxu1 %v11180_v27  ;;  %v9671_v43 = vld [vmem:[%s14002_s1 + $0x9ec] ss:$28 sps:$4 sm:$0xff]  }
 0x104   :  { %2559 = vmatmul.mubr.bf16.vlgmr.msra.gmra.mrb[4].mxu0 %v10980_v18  ;;  %8981 = vmatpush3.bf16.msra.mxu1 %v9603_v44  ;;  %v9668_v44 = vld [vmem:[%s14002_s1 + $0x4b0] ss:$28 sps:$4 sm:$0xff]  }
 0x105   :  { %2568 = vmatpush1.bf16.msra.mxu0 %v9604_v45  ;;  %8982 = vmatprep.subr.bf16.mxu1 %v9607_v46  ;;  %v9669_v45 = vld [vmem:[%s14002_s1 + $0x9e8] ss:$28 sps:$4 sm:$0xff]  }
 0x106   :  { %2569 = vmatprep.subr.bf16.mxu0 %v9611_v47  ;;  %2640 = vmatprep.mubr.bf16.mxu1 %v10914_v60  ;;  %v9672_v46 = vld [vmem:[%s14002_s1 + $0x6a8] ss:$28 sps:$4 sm:$0xff]  }
 0x107   :  { %2599 = vmatprep.mubr.bf16.mxu0 %v10992_v22  ;;  %v9676_v47 = vld [vmem:[%s14002_s1 + $0xa24] ss:$28 sps:$4 sm:$0xff]  }
 0x108   :  { %8983 = vmatpush3.bf16.msra.mxu1 %v9608_v48  ;;  %v9673_v48 = vld [vmem:[%s14002_s1 + $0x4e8] ss:$28 sps:$4 sm:$0xff]  }
 0x109   :  { %2570 = vmatpush1.bf16.msra.mxu0 %v9609_v50  ;;  %8984 = vmatprep.subr.bf16.mxu1 %v9612_v51  ;;  %v9674_v50 = vld [vmem:[%s14002_s1 + $0xa20] ss:$28 sps:$4 sm:$0xff]  }
 0x10a   :  { %2571 = vmatprep.subr.bf16.mxu0 %v9616_v52  ;;  %v9677_v51 = vld [vmem:[%s14002_s1 + $0x6e0] ss:$28 sps:$4 sm:$0xff]  }
 0x10b   :  { %v9681_v52 = vld [vmem:[%s14002_s1 + $0xa5c] ss:$28 sps:$4 sm:$0xff]  }
 0x10c   :  { %8985 = vmatpush3.bf16.msra.mxu1 %v9613_v53  ;;  %v9678_v53 = vld [vmem:[%s14002_s1 + $0x520] ss:$28 sps:$4 sm:$0xff]  }
 0x10d   :  { %2572 = vmatpush1.bf16.msra.mxu0 %v9614_v54  ;;  %8986 = vmatprep.subr.bf16.mxu1 %v9617_v55  ;;  %v9679_v54 = vld [vmem:[%s14002_s1 + $0xa58] ss:$28 sps:$4 sm:$0xff]  }
 0x10e   :  { %2573 = vmatprep.subr.bf16.mxu0 %v9621_v56  ;;  %v9682_v55 = vld [vmem:[%s14002_s1 + $0x8d8] ss:$28 sps:$4 sm:$0xff]   ;;  %v9686_v56 = vld [vmem:[%s14004_s3 + $0xc] ss:$28 sps:$4 sm:$0xff]  }
 0x110   :  { %8987 = vmatpush3.bf16.msra.mxu1 %v9618_v57  ;;  %v9683_v57 = vld [vmem:[%s14002_s1 + $0x718] ss:$28 sps:$4 sm:$0xff]  }
 0x111   :  { %2574 = vmatpush1.bf16.msra.mxu0 %v9619_v58  ;;  %8988 = vmatprep.subr.bf16.mxu1 %v9622_v59  ;;  %v9684_v58 = vld [vmem:[%s14004_s3 + $0x8] ss:$28 sps:$4 sm:$0xff]   ;;  %v9687_v59 = vld [vmem:[%s14002_s1 + $0x910] ss:$28 sps:$4 sm:$0xff]  }
 0x112   :  { %2575 = vmatprep.subr.bf16.mxu0 %v9626_v61  ;;  %v9691_v61 = vld [vmem:[%s14004_s3 + $0x44] ss:$28 sps:$4 sm:$0xff]  }
 0x114   :  { %8989 = vmatpush3.bf16.msra.mxu1 %v9623_v62  ;;  %v9688_v62 = vld [vmem:[%s14002_s1 + $0x750] ss:$28 sps:$4 sm:$0xff]  }
 0x115   :  { %2576 = vmatpush1.bf16.msra.mxu0 %v9624_v63  ;;  %8990 = vmatprep.subr.bf16.mxu1 %v9627_v1  ;;  %v9689_v63 = vld [vmem:[%s14004_s3 + $0x40] ss:$28 sps:$4 sm:$0xff]   ;;  %v9692_v1 = vld [vmem:[%s14002_s1 + $0x948] ss:$28 sps:$4 sm:$0xff]  }
 0x116   :  { %2577 = vmatprep.subr.bf16.mxu0 %v9631_v2  ;;  %v11650_v7 = vpop.f32.mrb[0].mxu1  ;;  %v9696_v2 = vld [vmem:[%s14004_s3 + $0x7c] ss:$28 sps:$4 sm:$0xff]  }
 0x117   :  { %v11652_v8 = vpop.f32.mrb[1].mxu1 }
 0x118   :  { %v2277_v9 = vpop.f32.mrb[2].mxu1  ;;  %8991 = vmatpush3.bf16.msra.mxu1 %v9628_v3  ;;  %v9693_v3 = vld [vmem:[%s14002_s1 + $0x788] ss:$28 sps:$4 sm:$0xff]  }
 0x119   :  { %2578 = vmatpush1.bf16.msra.mxu0 %v9629_v4  ;;  %v2278_v14 = vpop.f32.mrb[3].mxu1  ;;  %8992 = vmatprep.subr.bf16.mxu1 %v9632_v5  ;;  %v9694_v4 = vld [vmem:[%s14004_s3 + $0x78] ss:$28 sps:$4 sm:$0xff]   ;;  %v9697_v5 = vld [vmem:[%s14002_s1 + $0x980] ss:$28 sps:$4 sm:$0xff]  }
 0x11a   :  { %2579 = vmatprep.subr.bf16.mxu0 %v9636_v6  ;;  %v9701_v6 = vld [vmem:[%s14004_s3 + $0xb4] ss:$28 sps:$4 sm:$0xff]   ;;  %v420_v9 = vld [vmem:[%s14003_s2] sm:$0x7f] }
 0x11b   :  { %v9702_v14 = vld [vmem:[%s14002_s1 + $0x9b8] ss:$28 sps:$4 sm:$0xff]  }
 0x11c   :  { %8993 = vmatpush3.bf16.msra.mxu1 %v9633_v11  ;;  %v9698_v11 = vld [vmem:[%s14002_s1 + $0x7c0] ss:$28 sps:$4 sm:$0xff]  }
 0x11d   :  { %2580 = vmatpush1.bf16.msra.mxu0 %v9634_v13  ;;  %8994 = vmatprep.subr.bf16.mxu1 %v9637_v15  ;;  %v9699_v13 = vld [vmem:[%s14004_s3 + $0xb0] ss:$28 sps:$4 sm:$0xff]   ;;  %v11829_v15 = vsub.s32 0, %v10868_v42 }
 0x11e   :  { %2581 = vmatprep.subr.bf16.mxu0 %v9641_v16  ;;  %v9706_v16 = vld [vmem:[%s14004_s3 + $0xec] ss:$28 sps:$4 sm:$0xff]  }
 0x120   :  { %8995 = vmatpush3.bf16.msra.mxu1 %v9638_v17  ;;  %v11835_v17 = vsub.s32 1, %v10868_v42 }
 0x121   :  { %2582 = vmatpush1.bf16.msra.mxu0 %v9639_v19  ;;  %9002 = vmatprep.subr.bf16.mxu1 %v9642_v20  ;;  %v9703_v19 = vld [vmem:[%s14002_s1 + $0x7f8] ss:$28 sps:$4 sm:$0xff]   ;;  %v9704_v20 = vld [vmem:[%s14004_s3 + $0xe8] ss:$28 sps:$4 sm:$0xff]  }
 0x122   :  { %2583 = vmatprep.subr.bf16.mxu0 %v9646_v21  ;;  %v9707_v21 = vld [vmem:[%s14002_s1 + $0x9f0] ss:$28 sps:$4 sm:$0xff]  }
 0x123   :  { %2641 = vmatmul.mubr.bf16.vlgmr.msra.gmra.mrb[8].mxu1 %v10962_v12 }
 0x124   :  { %9003 = vmatpush3.bf16.msra.mxu1 %v9643_v23  ;;  %2680 = vmatprep.mubr.bf16.mxu1 %v10927_v0  ;;  %v425_v23 = vrot.slane %v420_v9, %v11829_v15 }
 0x125   :  { %2584 = vmatpush1.bf16.msra.mxu0 %v9644_v24  ;;  %9004 = vmatprep.subr.bf16.mxu1 %v9647_v25  ;;  %v9711_v24 = vld [vmem:[%s14004_s3 + $0x124] ss:$28 sps:$4 sm:$0xff]   ;;  %v429_v25 = vrot.slane %v420_v9, %v11835_v17  ;;  %v9763_v9 = vld [vmem:[%s14004_s3 + $0x31c] ss:$28 sps:$4 sm:$0xff]  }
 0x126   :  { %2585 = vmatprep.subr.bf16.mxu0 %v9651_v26  ;;  %v9708_v26 = vld [vmem:[%s14002_s1 + $0x830] ss:$28 sps:$4 sm:$0xff]  }
 0x128   :  { %9005 = vmatpush3.bf16.msra.mxu1 %v9648_v28  ;;  %v9709_v28 = vld [vmem:[%s14004_s3 + $0x120] ss:$28 sps:$4 sm:$0xff]  }
 0x129   :  { %2586 = vmatpush1.bf16.msra.mxu0 %v9649_v29  ;;  %9006 = vmatprep.subr.bf16.mxu1 %v9652_v30  ;;  %v2274_v29 = vadd.f32 %v11650_v7, %v425_v23  ;;  %v9712_v30 = vld [vmem:[%s14002_s1 + $0xa28] ss:$28 sps:$4 sm:$0xff]  }
 0x12a   :  { %2587 = vmatprep.subr.bf16.mxu0 %v9656_v10  ;;  %v9716_v10 = vld [vmem:[%s14004_s3 + $0x15c] ss:$28 sps:$4 sm:$0xff]   ;;  %v9775_v23 = vld [vmem:[%s14004_s3 + $0x38c] ss:$28 sps:$4 sm:$0xff]  }
 0x12c   :  { %9007 = vmatpush3.bf16.msra.mxu1 %v9653_v31  ;;  %v2276_v31 = vadd.f32 %v11652_v8, %v429_v25  ;;  %v9717_v8 = vld [vmem:[%s14002_s1 + $0xa60] ss:$28 sps:$4 sm:$0xff]   ;;  %v9773_v25 = vld [vmem:[%s14004_s3 + $0x388] ss:$28 sps:$4 sm:$0xff]  }
 0x12d   :  { %2588 = vmatpush1.bf16.msra.mxu0 %v9654_v32  ;;  %9008 = vmatprep.subr.bf16.mxu1 %v9657_v33  ;;  %v9713_v33 = vld [vmem:[%s14002_s1 + $0x868] ss:$28 sps:$4 sm:$0xff]  }
 0x12e   :  { %2589 = vmatprep.subr.bf16.mxu0 %v9661_v34 }
 0x130   :  { %9009 = vmatpush3.bf16.msra.mxu1 %v9658_v35 }
 0x131   :  { %2590 = vmatpush1.bf16.msra.mxu0 %v9659_v36  ;;  %9010 = vmatprep.subr.bf16.mxu1 %v9662_v37  ;;  %v9714_v36 = vld [vmem:[%s14004_s3 + $0x158] ss:$28 sps:$4 sm:$0xff]  }
 0x132   :  { %2591 = vmatprep.subr.bf16.mxu0 %v9666_v38  ;;  %v9721_v38 = vld [vmem:[%s14004_s3 + $0x194] ss:$28 sps:$4 sm:$0xff]  }
 0x134   :  { %9011 = vmatpush3.bf16.msra.mxu1 %v9663_v39 }
 0x135   :  { %2592 = vmatpush1.bf16.msra.mxu0 %v9664_v40  ;;  %9012 = vmatprep.subr.bf16.mxu1 %v9667_v41  ;;  %v9718_v40 = vld [vmem:[%s14002_s1 + $0x8a0] ss:$28 sps:$4 sm:$0xff]   ;;  %v9719_v41 = vld [vmem:[%s14004_s3 + $0x190] ss:$28 sps:$4 sm:$0xff]  }
 0x136   :  { %2593 = vmatprep.subr.bf16.mxu0 %v9671_v43  ;;  %v9724_v43 = vld [vmem:[%s14004_s3 + $0x4] ss:$28 sps:$4 sm:$0xff]  }
 0x138   :  { %9013 = vmatpush3.bf16.msra.mxu1 %v9668_v44  ;;  %v9727_v44 = vld [vmem:[%s14004_s3 + $0x1cc] ss:$28 sps:$4 sm:$0xff]  }
 0x139   :  { %2594 = vmatpush1.bf16.msra.mxu0 %v9669_v45  ;;  %9014 = vmatprep.subr.bf16.mxu1 %v9672_v46  ;;  %v9722_v45 = vld [vmem:[%s14004_s3] ss:$28 sps:$4 sm:$0xff]   ;;  %v9725_v46 = vld [vmem:[%s14004_s3 + $0x1c8] ss:$28 sps:$4 sm:$0xff]  }
 0x13a   :  { %2595 = vmatprep.subr.bf16.mxu0 %v9676_v47  ;;  %v9730_v47 = vld [vmem:[%s14004_s3 + $0x3c] ss:$28 sps:$4 sm:$0xff]  }
 0x13c   :  { %9015 = vmatpush3.bf16.msra.mxu1 %v9673_v48  ;;  %v9733_v48 = vld [vmem:[%s14004_s3 + $0x204] ss:$28 sps:$4 sm:$0xff]  }
 0x13d   :  { %2596 = vmatpush1.bf16.msra.mxu0 %v9674_v50  ;;  %9016 = vmatprep.subr.bf16.mxu1 %v9677_v51  ;;  %v9728_v50 = vld [vmem:[%s14004_s3 + $0x38] ss:$28 sps:$4 sm:$0xff]   ;;  %v9731_v51 = vld [vmem:[%s14004_s3 + $0x200] ss:$28 sps:$4 sm:$0xff]  }
 0x13e   :  { %2597 = vmatprep.subr.bf16.mxu0 %v9681_v52  ;;  %v9736_v52 = vld [vmem:[%s14004_s3 + $0x74] ss:$28 sps:$4 sm:$0xff]  }
 0x140   :  { %9017 = vmatpush3.bf16.msra.mxu1 %v9678_v53  ;;  %v9739_v53 = vld [vmem:[%s14004_s3 + $0x23c] ss:$28 sps:$4 sm:$0xff]  }
 0x141   :  { %2598 = vmatpush1.bf16.msra.mxu0 %v9679_v54  ;;  %9024 = vmatprep.subr.bf16.mxu1 %v9682_v55  ;;  %v9734_v54 = vld [vmem:[%s14004_s3 + $0x70] ss:$28 sps:$4 sm:$0xff]   ;;  %v9737_v55 = vld [vmem:[%s14004_s3 + $0x238] ss:$28 sps:$4 sm:$0xff]  }
 0x142   :  { %5000 = vmatprep.subr.bf16.mxu0 %v9686_v56  ;;  %v9742_v56 = vld [vmem:[%s14004_s3 + $0xac] ss:$28 sps:$4 sm:$0xff]  }
 0x143   :  { %2681 = vmatmul.mubr.bf16.vlgmr.msra.gmra.mrb[12].mxu1 %v10980_v18 }
 0x144   :  { %2600 = vmatmul.mubr.bf16.vlgmr.msra.gmra.mrb[4].mxu0 %v11180_v27  ;;  %9025 = vmatpush3.bf16.msra.mxu1 %v9683_v57  ;;  %v9745_v57 = vld [vmem:[%s14004_s3 + $0x274] ss:$28 sps:$4 sm:$0xff]  }
 0x145   :  { %5001 = vmatpush1.bf16.msra.mxu0 %v9684_v58  ;;  %9026 = vmatprep.subr.bf16.mxu1 %v9687_v59  ;;  %v9740_v58 = vld [vmem:[%s14004_s3 + $0xa8] ss:$28 sps:$4 sm:$0xff]   ;;  %v9743_v59 = vld [vmem:[%s14004_s3 + $0x270] ss:$28 sps:$4 sm:$0xff]  }
 0x146   :  { %5002 = vmatprep.subr.bf16.mxu0 %v9691_v61  ;;  %2720 = vmatprep.mubr.bf16.mxu1 %v10992_v22  ;;  %v9748_v61 = vld [vmem:[%s14004_s3 + $0xe4] ss:$28 sps:$4 sm:$0xff]  }
 0x147   :  { %5032 = vmatprep.mubr.bf16.mxu0 %v10914_v60 }
 0x148   :  { %9027 = vmatpush3.bf16.msra.mxu1 %v9688_v62  ;;  %v9751_v62 = vld [vmem:[%s14004_s3 + $0x2ac] ss:$28 sps:$4 sm:$0xff]  }
 0x149   :  { %5003 = vmatpush1.bf16.msra.mxu0 %v9689_v63  ;;  %9028 = vmatprep.subr.bf16.mxu1 %v9692_v1  ;;  %v9746_v63 = vld [vmem:[%s14004_s3 + $0xe0] ss:$28 sps:$4 sm:$0xff]   ;;  %v9749_v1 = vld [vmem:[%s14004_s3 + $0x2a8] ss:$28 sps:$4 sm:$0xff]  }
 0x14a   :  { %5004 = vmatprep.subr.bf16.mxu0 %v9696_v2  ;;  %v9754_v2 = vld [vmem:[%s14004_s3 + $0x11c] ss:$28 sps:$4 sm:$0xff]  }
 0x14c   :  { %9029 = vmatpush3.bf16.msra.mxu1 %v9693_v3  ;;  %v9757_v3 = vld [vmem:[%s14004_s3 + $0x2e4] ss:$28 sps:$4 sm:$0xff]  }
 0x14d   :  { %5005 = vmatpush1.bf16.msra.mxu0 %v9694_v4  ;;  %9030 = vmatprep.subr.bf16.mxu1 %v9697_v5  ;;  %v9752_v4 = vld [vmem:[%s14004_s3 + $0x118] ss:$28 sps:$4 sm:$0xff]   ;;  %v9755_v5 = vld [vmem:[%s14004_s3 + $0x2e0] ss:$28 sps:$4 sm:$0xff]  }
 0x14e   :  { %5006 = vmatprep.subr.bf16.mxu0 %v9701_v6  ;;  %v9760_v6 = vld [vmem:[%s14004_s3 + $0x154] ss:$28 sps:$4 sm:$0xff]  }
 0x150   :  { %9031 = vmatpush3.bf16.msra.mxu1 %v9698_v11  ;;  %v9758_v11 = vld [vmem:[%s14004_s3 + $0x150] ss:$28 sps:$4 sm:$0xff]  }
 0x151   :  { %5007 = vmatpush1.bf16.msra.mxu0 %v9699_v13  ;;  %9032 = vmatprep.subr.bf16.mxu1 %v9702_v14  ;;  %v9761_v13 = vld [vmem:[%s14004_s3 + $0x318] ss:$28 sps:$4 sm:$0xff]   ;;  %v9766_v14 = vld [vmem:[%s14004_s3 + $0x18c] ss:$28 sps:$4 sm:$0xff]  }
 0x152   :  { %5008 = vmatprep.subr.bf16.mxu0 %v9706_v16  ;;  %v9769_v16 = vld [vmem:[%s14004_s3 + $0x354] ss:$28 sps:$4 sm:$0xff]  }
 0x154   :  { %9033 = vmatpush3.bf16.msra.mxu1 %v9703_v19  ;;  %v9764_v19 = vld [vmem:[%s14004_s3 + $0x188] ss:$28 sps:$4 sm:$0xff]  }
 0x155   :  { %5009 = vmatpush1.bf16.msra.mxu0 %v9704_v20  ;;  %9034 = vmatprep.subr.bf16.mxu1 %v9707_v21  ;;  %v9767_v20 = vld [vmem:[%s14004_s3 + $0x350] ss:$28 sps:$4 sm:$0xff]   ;;  %v9772_v21 = vld [vmem:[%s14004_s3 + $0x1c4] ss:$28 sps:$4 sm:$0xff]  }
 0x156   :  { %5010 = vmatprep.subr.bf16.mxu0 %v9711_v24  ;;  %v9770_v24 = vld [vmem:[%s14004_s3 + $0x1c0] ss:$28 sps:$4 sm:$0xff]  }
 0x157   :  { %v2355_v32 = vpop.f32.mrb[0].mxu0 }
 0x158   :  { %v11868_v34 = vadd.f32 %v2355_v32, %v2274_v29  ;;  %v2357_v7 = vpop.f32.mrb[1].mxu0  ;;  %9035 = vmatpush3.bf16.msra.mxu1 %v9708_v26  ;;  %v9778_v26 = vld [vmem:[%s14004_s3 + $0x1fc] ss:$28 sps:$4 sm:$0xff]   ;;  %v9782_v32 = vld [vmem:[%s14004_s3 + $0x230] ss:$28 sps:$4 sm:$0xff]  }
 0x159   :  { %v11870_v35 = vadd.f32 %v2357_v7, %v2276_v31  ;;  %5011 = vmatpush1.bf16.msra.mxu0 %v9709_v28  ;;  %v2359_v37 = vpop.f32.mrb[2].mxu0  ;;  %9036 = vmatprep.subr.bf16.mxu1 %v9712_v30  ;;  %v9781_v28 = vld [vmem:[%s14004_s3 + $0x3c4] ss:$28 sps:$4 sm:$0xff]   ;;  %v9776_v29 = vld [vmem:[%s14004_s3 + $0x1f8] ss:$28 sps:$4 sm:$0xff]  }
 0x15a   :  { %5012 = vmatprep.subr.bf16.mxu0 %v9716_v10  ;;  %v2360_v39 = vpop.f32.mrb[3].mxu0  ;;  %v9779_v30 = vld [vmem:[%s14004_s3 + $0x3c0] ss:$28 sps:$4 sm:$0xff]   ;;  %v9784_v10 = vld [vmem:[%s14004_s3 + $0x234] ss:$28 sps:$4 sm:$0xff]  }
 0x15b   :  { %v9787_v31 = vld [vmem:[%s14004_s3 + $0x3fc] ss:$28 sps:$4 sm:$0xff]   ;;  %v9790_v7 = vld [vmem:[%s14004_s3 + $0x26c] ss:$28 sps:$4 sm:$0xff]  }
 0x15c   :  { %9037 = vmatpush3.bf16.msra.mxu1 %v9713_v33  ;;  %v9785_v33 = vld [vmem:[%s14004_s3 + $0x3f8] ss:$28 sps:$4 sm:$0xff]   ;;  %v9788_v37 = vld [vmem:[%s14004_s3 + $0x268] ss:$28 sps:$4 sm:$0xff]  }
 0x15d   :  { %5013 = vmatpush1.bf16.msra.mxu0 %v9714_v36  ;;  %9038 = vmatprep.subr.bf16.mxu1 %v9717_v8  ;;  %v9793_v36 = vld [vmem:[%s14004_s3 + $0x434] ss:$28 sps:$4 sm:$0xff]   ;;  %v9799_v39 = vld [vmem:[%s14004_s3 + $0x46c] ss:$28 sps:$4 sm:$0xff]  }
 0x15e   :  { %5014 = vmatprep.subr.bf16.mxu0 %v9721_v38  ;;  %v9791_v8 = vld [vmem:[%s14004_s3 + $0x430] ss:$28 sps:$4 sm:$0xff]   ;;  %v9796_v38 = vld [vmem:[%s14004_s3 + $0x2a4] ss:$28 sps:$4 sm:$0xff]  }
 0x160   :  { %9039 = vmatpush3.bf16.msra.mxu1 %v9718_v40  ;;  %v9794_v40 = vld [vmem:[%s14004_s3 + $0x2a0] ss:$28 sps:$4 sm:$0xff]  }
 0x161   :  { %5015 = vmatpush1.bf16.msra.mxu0 %v9719_v41  ;;  %4877 = vmatprep.subr.bf16.mxu1 %v9724_v43  ;;  %v9797_v41 = vld [vmem:[%s14004_s3 + $0x468] ss:$28 sps:$4 sm:$0xff]   ;;  %v9802_v43 = vld [vmem:[%s14004_s3 + $0x2dc] ss:$28 sps:$4 sm:$0xff]  }
 0x162   :  { %5016 = vmatprep.subr.bf16.mxu0 %v9727_v44  ;;  %v9805_v44 = vld [vmem:[%s14004_s3 + $0x4a4] ss:$28 sps:$4 sm:$0xff]  }
 0x163   :  { %2721 = vmatmul.mubr.bf16.vlgmr.msra.gmra.mrb[16].mxu1 %v11180_v27 }
 0x164   :  { %4878 = vmatpush1.bf16.msra.mxu1 %v9722_v45  ;;  %4909 = vmatprep.mubr.bf16.mxu1 %v10914_v60  ;;  %v9800_v45 = vld [vmem:[%s14004_s3 + $0x2d8] ss:$28 sps:$4 sm:$0xff]  }
 0x165   :  { %5017 = vmatpush1.bf16.msra.mxu0 %v9725_v46  ;;  %4879 = vmatprep.subr.bf16.mxu1 %v9730_v47  ;;  %v9803_v46 = vld [vmem:[%s14004_s3 + $0x4a0] ss:$28 sps:$4 sm:$0xff]   ;;  %v9808_v47 = vld [vmem:[%s14004_s3 + $0x314] ss:$28 sps:$4 sm:$0xff]  }
 0x166   :  { %5018 = vmatprep.subr.bf16.mxu0 %v9733_v48  ;;  %v9811_v48 = vld [vmem:[%s14004_s3 + $0x4dc] ss:$28 sps:$4 sm:$0xff]  }
 0x168   :  { %4880 = vmatpush1.bf16.msra.mxu1 %v9728_v50  ;;  %v9806_v50 = vld [vmem:[%s14004_s3 + $0x310] ss:$28 sps:$4 sm:$0xff]  }
 0x169   :  { %5019 = vmatpush1.bf16.msra.mxu0 %v9731_v51  ;;  %4881 = vmatprep.subr.bf16.mxu1 %v9736_v52  ;;  %v9809_v51 = vld [vmem:[%s14004_s3 + $0x4d8] ss:$28 sps:$4 sm:$0xff]   ;;  %v9814_v52 = vld [vmem:[%s14004_s3 + $0x34c] ss:$28 sps:$4 sm:$0xff]  }
 0x16a   :  { %5020 = vmatprep.subr.bf16.mxu0 %v9739_v53  ;;  %v9817_v53 = vld [vmem:[%s14004_s3 + $0x514] ss:$28 sps:$4 sm:$0xff]  }
 0x16c   :  { %4882 = vmatpush1.bf16.msra.mxu1 %v9734_v54  ;;  %v9812_v54 = vld [vmem:[%s14004_s3 + $0x348] ss:$28 sps:$4 sm:$0xff]  }
 0x16d   :  { %5021 = vmatpush1.bf16.msra.mxu0 %v9737_v55  ;;  %4883 = vmatprep.subr.bf16.mxu1 %v9742_v56  ;;  %v9815_v55 = vld [vmem:[%s14004_s3 + $0x510] ss:$28 sps:$4 sm:$0xff]   ;;  %v9820_v56 = vld [vmem:[%s14004_s3 + $0x384] ss:$28 sps:$4 sm:$0xff]  }
 0x16e   :  { %5022 = vmatprep.subr.bf16.mxu0 %v9745_v57  ;;  %v9823_v57 = vld [vmem:[%s14004_s3 + $0x54c] ss:$28 sps:$4 sm:$0xff]  }
 0x170   :  { %4884 = vmatpush1.bf16.msra.mxu1 %v9740_v58  ;;  %v9818_v58 = vld [vmem:[%s14004_s3 + $0x380] ss:$28 sps:$4 sm:$0xff]  }
 0x171   :  { %5023 = vmatpush1.bf16.msra.mxu0 %v9743_v59  ;;  %4885 = vmatprep.subr.bf16.mxu1 %v9748_v61  ;;  %v9821_v59 = vld [vmem:[%s14004_s3 + $0x548] ss:$28 sps:$4 sm:$0xff]   ;;  %v9826_v61 = vld [vmem:[%s14004_s3 + $0x3bc] ss:$28 sps:$4 sm:$0xff]  }
 0x172   :  { %5024 = vmatprep.subr.bf16.mxu0 %v9751_v62  ;;  %v9829_v62 = vld [vmem:[%s14004_s3 + $0x584] ss:$28 sps:$4 sm:$0xff]  }
 0x174   :  { %4886 = vmatpush1.bf16.msra.mxu1 %v9746_v63  ;;  %v9824_v63 = vld [vmem:[%s14004_s3 + $0x3b8] ss:$28 sps:$4 sm:$0xff]  }
 0x175   :  { %5025 = vmatpush1.bf16.msra.mxu0 %v9749_v1  ;;  %4887 = vmatprep.subr.bf16.mxu1 %v9754_v2  ;;  %v9827_v1 = vld [vmem:[%s14004_s3 + $0x580] ss:$28 sps:$4 sm:$0xff]   ;;  %v9832_v2 = vld [vmem:[%s14004_s3 + $0x3f4] ss:$28 sps:$4 sm:$0xff]  }
 0x176   :  { %5026 = vmatprep.subr.bf16.mxu0 %v9757_v3  ;;  %v9835_v3 = vld [vmem:[%s14004_s3 + $0x5bc] ss:$28 sps:$4 sm:$0xff]  }
 0x178   :  { %4888 = vmatpush1.bf16.msra.mxu1 %v9752_v4  ;;  %v9830_v4 = vld [vmem:[%s14004_s3 + $0x3f0] ss:$28 sps:$4 sm:$0xff]  }
 0x179   :  { %5027 = vmatpush1.bf16.msra.mxu0 %v9755_v5  ;;  %4889 = vmatprep.subr.bf16.mxu1 %v9760_v6  ;;  %v9833_v5 = vld [vmem:[%s14004_s3 + $0x5b8] ss:$28 sps:$4 sm:$0xff]   ;;  %v9838_v6 = vld [vmem:[%s14004_s3 + $0x42c] ss:$28 sps:$4 sm:$0xff]  }
 0x17a   :  { %5028 = vmatprep.subr.bf16.mxu0 %v9763_v9  ;;  %v9841_v9 = vld [vmem:[%s14004_s3 + $0x5f4] ss:$28 sps:$4 sm:$0xff]  }
 0x17c   :  { %4890 = vmatpush1.bf16.msra.mxu1 %v9758_v11  ;;  %v9836_v11 = vld [vmem:[%s14004_s3 + $0x428] ss:$28 sps:$4 sm:$0xff]  }
 0x17d   :  { %5029 = vmatpush1.bf16.msra.mxu0 %v9761_v13  ;;  %4891 = vmatprep.subr.bf16.mxu1 %v9766_v14  ;;  %v9839_v13 = vld [vmem:[%s14004_s3 + $0x5f0] ss:$28 sps:$4 sm:$0xff]   ;;  %v9844_v14 = vld [vmem:[%s14004_s3 + $0x464] ss:$28 sps:$4 sm:$0xff]  }
 0x17e   :  { %5030 = vmatprep.subr.bf16.mxu0 %v9769_v16  ;;  %v9847_v16 = vld [vmem:[%s14004_s3 + $0x62c] ss:$28 sps:$4 sm:$0xff]  }
 0x180   :  { %4892 = vmatpush1.bf16.msra.mxu1 %v9764_v19  ;;  %v9842_v19 = vld [vmem:[%s14004_s3 + $0x460] ss:$28 sps:$4 sm:$0xff]  }
 0x181   :  { %5031 = vmatpush1.bf16.msra.mxu0 %v9767_v20  ;;  %4893 = vmatprep.subr.bf16.mxu1 %v9772_v21  ;;  %v9845_v20 = vld [vmem:[%s14004_s3 + $0x628] ss:$28 sps:$4 sm:$0xff]   ;;  %v9850_v21 = vld [vmem:[%s14004_s3 + $0x49c] ss:$28 sps:$4 sm:$0xff]  }
 0x182   :  { %5041 = vmatprep.subr.bf16.mxu0 %v9775_v23  ;;  %v9853_v23 = vld [vmem:[%s14004_s3 + $0x664] ss:$28 sps:$4 sm:$0xff]  }
 0x184   :  { %5033 = vmatmul.mubr.bf16.vlgmr.msra.gmra.mrb[8].mxu0 %v10962_v12  ;;  %4894 = vmatpush1.bf16.msra.mxu1 %v9770_v24  ;;  %v9848_v24 = vld [vmem:[%s14004_s3 + $0x498] ss:$28 sps:$4 sm:$0xff]  }
 0x185   :  { %5042 = vmatpush1.bf16.msra.mxu0 %v9773_v25  ;;  %4895 = vmatprep.subr.bf16.mxu1 %v9778_v26  ;;  %v9851_v25 = vld [vmem:[%s14004_s3 + $0x660] ss:$28 sps:$4 sm:$0xff]   ;;  %v9856_v26 = vld [vmem:[%s14004_s3 + $0x4d4] ss:$28 sps:$4 sm:$0xff]  }
 0x186   :  { %5043 = vmatprep.subr.bf16.mxu0 %v9781_v28  ;;  %5073 = vmatprep.mubr.bf16.mxu0 %v10927_v0  ;;  %v9859_v28 = vld [vmem:[%s14004_s3 + $0x69c] ss:$28 sps:$4 sm:$0xff]  }
 0x188   :  { %4896 = vmatpush1.bf16.msra.mxu1 %v9776_v29  ;;  %v9854_v29 = vld [vmem:[%s14004_s3 + $0x4d0] ss:$28 sps:$4 sm:$0xff]  }
 0x189   :  { %5044 = vmatpush1.bf16.msra.mxu0 %v9779_v30  ;;  %4897 = vmatprep.subr.bf16.mxu1 %v9784_v10  ;;  %v9857_v30 = vld [vmem:[%s14004_s3 + $0x698] ss:$28 sps:$4 sm:$0xff]   ;;  %v9862_v10 = vld [vmem:[%s14004_s3 + $0x50c] ss:$28 sps:$4 sm:$0xff]  }
 0x18a   :  { %5045 = vmatprep.subr.bf16.mxu0 %v9787_v31  ;;  %v9865_v31 = vld [vmem:[%s14004_s3 + $0x6d4] ss:$28 sps:$4 sm:$0xff]  }
 0x18c   :  { %4898 = vmatpush1.bf16.msra.mxu1 %v9782_v32  ;;  %v9860_v32 = vld [vmem:[%s14004_s3 + $0x508] ss:$28 sps:$4 sm:$0xff]  }
 0x18d   :  { %5046 = vmatpush1.bf16.msra.mxu0 %v9785_v33  ;;  %4899 = vmatprep.subr.bf16.mxu1 %v9790_v7  ;;  %v9863_v33 = vld [vmem:[%s14004_s3 + $0x6d0] ss:$28 sps:$4 sm:$0xff]   ;;  %v9868_v7 = vld [vmem:[%s14004_s3 + $0x544] ss:$28 sps:$4 sm:$0xff]  }
 0x18e   :  { %5047 = vmatprep.subr.bf16.mxu0 %v9793_v36  ;;  %v9871_v36 = vld [vmem:[%s14004_s3 + $0x70c] ss:$28 sps:$4 sm:$0xff]  }
 0x190   :  { %4900 = vmatpush1.bf16.msra.mxu1 %v9788_v37  ;;  %v9866_v37 = vld [vmem:[%s14004_s3 + $0x540] ss:$28 sps:$4 sm:$0xff]  }
 0x191   :  { %5048 = vmatpush1.bf16.msra.mxu0 %v9791_v8  ;;  %4901 = vmatprep.subr.bf16.mxu1 %v9796_v38  ;;  %v9869_v8 = vld [vmem:[%s14004_s3 + $0x708] ss:$28 sps:$4 sm:$0xff]   ;;  %v9874_v38 = vld [vmem:[%s14004_s3 + $0x57c] ss:$28 sps:$4 sm:$0xff]  }
 0x192   :  { %5049 = vmatprep.subr.bf16.mxu0 %v9799_v39  ;;  %v9877_v39 = vld [vmem:[%s14004_s3 + $0x744] ss:$28 sps:$4 sm:$0xff]  }
 0x194   :  { %4902 = vmatpush1.bf16.msra.mxu1 %v9794_v40  ;;  %v9872_v40 = vld [vmem:[%s14004_s3 + $0x578] ss:$28 sps:$4 sm:$0xff]  }
 0x195   :  { %5050 = vmatpush1.bf16.msra.mxu0 %v9797_v41  ;;  %4903 = vmatprep.subr.bf16.mxu1 %v9802_v43  ;;  %v9875_v41 = vld [vmem:[%s14004_s3 + $0x740] ss:$28 sps:$4 sm:$0xff]   ;;  %v9880_v43 = vld [vmem:[%s14004_s3 + $0x5b4] ss:$28 sps:$4 sm:$0xff]  }
 0x196   :  { %5051 = vmatprep.subr.bf16.mxu0 %v9805_v44  ;;  %v9883_v44 = vld [vmem:[%s14004_s3 + $0x77c] ss:$28 sps:$4 sm:$0xff]  }
 0x198   :  { %4904 = vmatpush1.bf16.msra.mxu1 %v9800_v45  ;;  %v9878_v45 = vld [vmem:[%s14004_s3 + $0x5b0] ss:$28 sps:$4 sm:$0xff]  }
 0x199   :  { %5052 = vmatpush1.bf16.msra.mxu0 %v9803_v46  ;;  %4905 = vmatprep.subr.bf16.mxu1 %v9808_v47  ;;  %v9881_v46 = vld [vmem:[%s14004_s3 + $0x778] ss:$28 sps:$4 sm:$0xff]   ;;  %v9886_v47 = vld [vmem:[%s14004_s3 + $0x5ec] ss:$28 sps:$4 sm:$0xff]  }
 0x19a   :  { %5053 = vmatprep.subr.bf16.mxu0 %v9811_v48  ;;  %v9889_v48 = vld [vmem:[%s14004_s3 + $0x7b4] ss:$28 sps:$4 sm:$0xff]  }
 0x19c   :  { %4906 = vmatpush1.bf16.msra.mxu1 %v9806_v50  ;;  %v9884_v50 = vld [vmem:[%s14004_s3 + $0x5e8] ss:$28 sps:$4 sm:$0xff]  }
 0x19d   :  { %5054 = vmatpush1.bf16.msra.mxu0 %v9809_v51  ;;  %4907 = vmatprep.subr.bf16.mxu1 %v9814_v52  ;;  %v9887_v51 = vld [vmem:[%s14004_s3 + $0x7b0] ss:$28 sps:$4 sm:$0xff]   ;;  %v9892_v52 = vld [vmem:[%s14004_s3 + $0x624] ss:$28 sps:$4 sm:$0xff]  }
 0x19e   :  { %5055 = vmatprep.subr.bf16.mxu0 %v9817_v53  ;;  %v9895_v53 = vld [vmem:[%s14004_s3 + $0x7ec] ss:$28 sps:$4 sm:$0xff]  }
 0x1a0   :  { %4908 = vmatpush1.bf16.msra.mxu1 %v9812_v54  ;;  %v9890_v54 = vld [vmem:[%s14004_s3 + $0x620] ss:$28 sps:$4 sm:$0xff]  }
 0x1a1   :  { %5056 = vmatpush1.bf16.msra.mxu0 %v9815_v55  ;;  %4918 = vmatprep.subr.bf16.mxu1 %v9820_v56  ;;  %v9893_v55 = vld [vmem:[%s14004_s3 + $0x7e8] ss:$28 sps:$4 sm:$0xff]   ;;  %v12244_v56 = vsub.s32 2, %v10868_v42 }
 0x1a2   :  { %5057 = vmatprep.subr.bf16.mxu0 %v9823_v57  ;;  %v12247_v57 = vsub.s32 3, %v10868_v42 }
 0x1a3   :  { %4910 = vmatmul.mubr.bf16.vlgmr.msra.gmra.mrb[20].mxu1 %v10962_v12 }
 0x1a4   :  { %4919 = vmatpush1.bf16.msra.mxu1 %v9818_v58  ;;  %4950 = vmatprep.mubr.bf16.mxu1 %v10927_v0  ;;  %v9898_v58 = vld [vmem:[%s14004_s3 + $0x65c] ss:$28 sps:$4 sm:$0xff]  }
 0x1a5   :  { %5058 = vmatpush1.bf16.msra.mxu0 %v9821_v59  ;;  %4920 = vmatprep.subr.bf16.mxu1 %v9826_v61  ;;  %v9901_v59 = vld [vmem:[%s14004_s3 + $0x824] ss:$28 sps:$4 sm:$0xff]   ;;  %v10692_v61 = vmov 1983009808  }
 0x1a6   :  { %5059 = vmatprep.subr.bf16.mxu0 %v9829_v62  ;;  %v5376_v62 = vunpack.c.l.s4 %v10692_v61  ;;  %v9944_v61 = vld [vmem:[%s14004_s3 + $0x818] ss:$28 sps:$4 sm:$0xff]  }
 0x1a8   :  { %4921 = vmatpush1.bf16.msra.mxu1 %v9824_v63  ;;  %v9896_v63 = vld [vmem:[%s14004_s3 + $0x658] ss:$28 sps:$4 sm:$0xff]  }
 0x1a9   :  { %5060 = vmatpush1.bf16.msra.mxu0 %v9827_v1  ;;  %4922 = vmatprep.subr.bf16.mxu1 %v9832_v2  ;;  %v9899_v1 = vld [vmem:[%s14004_s3 + $0x820] ss:$28 sps:$4 sm:$0xff]  }
 0x1aa   :  { %5061 = vmatprep.subr.bf16.mxu0 %v9835_v3  ;;  %v12264_v2 = vld [vmem:[%s14003_s2] sm:$0x7f] }
 0x1ab   :  { %v433_v3 = vrot.slane %v12264_v2, %v12244_v56 }
 0x1ac   :  { %4923 = vmatpush1.bf16.msra.mxu1 %v9830_v4  ;;  %v437_v4 = vrot.slane %v12264_v2, %v12247_v57 }
 0x1ad   :  { %5062 = vmatpush1.bf16.msra.mxu0 %v9833_v5  ;;  %4924 = vmatprep.subr.bf16.mxu1 %v9838_v6  ;;  %v9904_v5 = vld [vmem:[%s14004_s3 + $0x694] ss:$28 sps:$4 sm:$0xff]   ;;  %v9907_v6 = vld [vmem:[%s14004_s3 + $0x85c] ss:$28 sps:$4 sm:$0xff]  }
 0x1ae   :  { %5063 = vmatprep.subr.bf16.mxu0 %v9841_v9  ;;  %v5377_v9 = vunpack.c.0.s8 %v5376_v62  ;;  %v9947_v62 = vld [vmem:[%s14004_s3 + $0x9e0] ss:$28 sps:$4 sm:$0xff]  }
 0x1b0   :  { %4925 = vmatpush1.bf16.msra.mxu1 %v9836_v11 }
 0x1b1   :  { %5064 = vmatpush1.bf16.msra.mxu0 %v9839_v13  ;;  %4926 = vmatprep.subr.bf16.mxu1 %v9844_v14  ;;  %v9902_v13 = vld [vmem:[%s14004_s3 + $0x690] ss:$28 sps:$4 sm:$0xff]   ;;  %v9905_v14 = vld [vmem:[%s14004_s3 + $0x858] ss:$28 sps:$4 sm:$0xff]  }
 0x1b2   :  { %5065 = vmatprep.subr.bf16.mxu0 %v9847_v16 }
 0x1b4   :  { %4927 = vmatpush1.bf16.msra.mxu1 %v9842_v19 }
 0x1b5   :  { %5066 = vmatpush1.bf16.msra.mxu0 %v9845_v20  ;;  %4928 = vmatprep.subr.bf16.mxu1 %v9850_v21  ;;  %v5373_v20 = vcombine.low %v11868_v34, %v11870_v35 }
 0x1b6   :  { %5067 = vmatprep.subr.bf16.mxu0 %v9853_v23 }
 0x1b8   :  { %4929 = vmatpush1.bf16.msra.mxu1 %v9848_v24  ;;  %v9910_v24 = vld [vmem:[%s14004_s3 + $0x6cc] ss:$28 sps:$4 sm:$0xff]  }
 0x1b9   :  { %5068 = vmatpush1.bf16.msra.mxu0 %v9851_v25  ;;  %4930 = vmatprep.subr.bf16.mxu1 %v9856_v26  ;;  %v9913_v25 = vld [vmem:[%s14004_s3 + $0x894] ss:$28 sps:$4 sm:$0xff]   ;;  %v12295_v26 = vsub.s32 %v5377_v9, %v10868_v42 }
 0x1ba   :  { %5069 = vmatprep.subr.bf16.mxu0 %v9859_v28 }
 0x1bc   :  { %4931 = vmatpush1.bf16.msra.mxu1 %v9854_v29 }
 0x1bd   :  { %5070 = vmatpush1.bf16.msra.mxu0 %v9857_v30  ;;  %4932 = vmatprep.subr.bf16.mxu1 %v9862_v10  ;;  %v9908_v30 = vld [vmem:[%s14004_s3 + $0x6c8] ss:$28 sps:$4 sm:$0xff]   ;;  %v9911_v10 = vld [vmem:[%s14004_s3 + $0x890] ss:$28 sps:$4 sm:$0xff]  }
 0x1be   :  { %5071 = vmatprep.subr.bf16.mxu0 %v9865_v31  ;;  %v9916_v31 = vld [vmem:[%s14004_s3 + $0x704] ss:$28 sps:$4 sm:$0xff]  }
 0x1c0   :  { %4933 = vmatpush1.bf16.msra.mxu1 %v9860_v32  ;;  %v9919_v32 = vld [vmem:[%s14004_s3 + $0x8cc] ss:$28 sps:$4 sm:$0xff]  }
 0x1c1   :  { %5072 = vmatpush1.bf16.msra.mxu0 %v9863_v33  ;;  %4934 = vmatprep.subr.bf16.mxu1 %v9868_v7  ;;  %v5381_v33 = vrot.slane %v5373_v20, %v12295_v26  ;;  %v9956_v20 = vld [vmem:[%s14004_s3 + $0x888] ss:$28 sps:$4 sm:$0xff]  }
 0x1c2   :  { %5082 = vmatprep.subr.bf16.mxu0 %v9871_v36  ;;  %v9914_v36 = vld [vmem:[%s14004_s3 + $0x700] ss:$28 sps:$4 sm:$0xff]  }
 0x1c4   :  { %5074 = vmatmul.mubr.bf16.vlgmr.msra.gmra.mrb[8].mxu0 %v10980_v18  ;;  %4935 = vmatpush1.bf16.msra.mxu1 %v9866_v37  ;;  %v9917_v37 = vld [vmem:[%s14004_s3 + $0x8c8] ss:$28 sps:$4 sm:$0xff]  }
 0x1c5   :  { %5083 = vmatpush1.bf16.msra.mxu0 %v9869_v8  ;;  %4936 = vmatprep.subr.bf16.mxu1 %v9874_v38  ;;  %v9922_v38 = vld [vmem:[%s14004_s3 + $0x73c] ss:$28 sps:$4 sm:$0xff]  }
 0x1c6   :  { %5084 = vmatprep.subr.bf16.mxu0 %v9877_v39  ;;  %5114 = vmatprep.mubr.bf16.mxu0 %v10992_v22  ;;  %v9925_v39 = vld [vmem:[%s14004_s3 + $0x904] ss:$28 sps:$4 sm:$0xff]  }
 0x1c8   :  { %4937 = vmatpush1.bf16.msra.mxu1 %v9872_v40  ;;  %v9920_v40 = vld [vmem:[%s14004_s3 + $0x738] ss:$28 sps:$4 sm:$0xff]  }
 0x1c9   :  { %5085 = vmatpush1.bf16.msra.mxu0 %v9875_v41  ;;  %4938 = vmatprep.subr.bf16.mxu1 %v9880_v43  ;;  %v9923_v41 = vld [vmem:[%s14004_s3 + $0x900] ss:$28 sps:$4 sm:$0xff]   ;;  %v9928_v43 = vld [vmem:[%s14004_s3 + $0x774] ss:$28 sps:$4 sm:$0xff]  }
 0x1ca   :  { %5086 = vmatprep.subr.bf16.mxu0 %v9883_v44  ;;  %v9931_v44 = vld [vmem:[%s14004_s3 + $0x93c] ss:$28 sps:$4 sm:$0xff]  }
 0x1cc   :  { %4939 = vmatpush1.bf16.msra.mxu1 %v9878_v45  ;;  %v9926_v45 = vld [vmem:[%s14004_s3 + $0x770] ss:$28 sps:$4 sm:$0xff]  }
 0x1cd   :  { %5087 = vmatpush1.bf16.msra.mxu0 %v9881_v46  ;;  %4940 = vmatprep.subr.bf16.mxu1 %v9886_v47  ;;  %v9929_v46 = vld [vmem:[%s14004_s3 + $0x938] ss:$28 sps:$4 sm:$0xff]   ;;  %v9934_v47 = vld [vmem:[%s14004_s3 + $0x7ac] ss:$28 sps:$4 sm:$0xff]  }
 0x1ce   :  { %5088 = vmatprep.subr.bf16.mxu0 %v9889_v48  ;;  %v9937_v48 = vld [vmem:[%s14004_s3 + $0x974] ss:$28 sps:$4 sm:$0xff]  }
 0x1d0   :  { %4941 = vmatpush1.bf16.msra.mxu1 %v9884_v50  ;;  %v9932_v50 = vld [vmem:[%s14004_s3 + $0x7a8] ss:$28 sps:$4 sm:$0xff]  }
 0x1d1   :  { %5089 = vmatpush1.bf16.msra.mxu0 %v9887_v51  ;;  %4942 = vmatprep.subr.bf16.mxu1 %v9892_v52  ;;  %v9935_v51 = vld [vmem:[%s14004_s3 + $0x970] ss:$28 sps:$4 sm:$0xff]   ;;  %v9940_v52 = vld [vmem:[%s14004_s3 + $0x7e4] ss:$28 sps:$4 sm:$0xff]  }
 0x1d2   :  { %5090 = vmatprep.subr.bf16.mxu0 %v9895_v53  ;;  %v9943_v53 = vld [vmem:[%s14004_s3 + $0x9ac] ss:$28 sps:$4 sm:$0xff]  }
 0x1d4   :  { %4943 = vmatpush1.bf16.msra.mxu1 %v9890_v54  ;;  %v9938_v54 = vld [vmem:[%s14004_s3 + $0x7e0] ss:$28 sps:$4 sm:$0xff]  }
 0x1d5   :  { %5091 = vmatpush1.bf16.msra.mxu0 %v9893_v55  ;;  %4944 = vmatprep.subr.bf16.mxu1 %v9898_v58  ;;  %v9941_v55 = vld [vmem:[%s14004_s3 + $0x9a8] ss:$28 sps:$4 sm:$0xff]   ;;  %v9946_v58 = vld [vmem:[%s14004_s3 + $0x81c] ss:$28 sps:$4 sm:$0xff]  }
 0x1d6   :  { %5092 = vmatprep.subr.bf16.mxu0 %v9901_v59  ;;  %v2478_v11 = vpop.f32.mrb[4].mxu1  ;;  %v9949_v59 = vld [vmem:[%s14004_s3 + $0x9e4] ss:$28 sps:$4 sm:$0xff]  }
 0x1d7   :  { %v12282_v16 = vadd.f32 %v2478_v11, %v433_v3  ;;  %v2480_v19 = vpop.f32.mrb[5].mxu1 }
 0x1d8   :  { %v12286_v21 = vadd.f32 %v2480_v19, %v437_v4  ;;  %v2482_v23 = vpop.f32.mrb[6].mxu1  ;;  %4945 = vmatpush1.bf16.msra.mxu1 %v9896_v63  ;;  %v9952_v63 = vld [vmem:[%s14004_s3 + $0x854] ss:$28 sps:$4 sm:$0xff]  }
 0x1d9   :  { %5093 = vmatpush1.bf16.msra.mxu0 %v9899_v1  ;;  %v2483_v28 = vpop.f32.mrb[7].mxu1  ;;  %4946 = vmatprep.subr.bf16.mxu1 %v9904_v5  ;;  %v9955_v1 = vld [vmem:[%s14004_s3 + $0xa1c] ss:$28 sps:$4 sm:$0xff]   ;;  %v9950_v4 = vld [vmem:[%s14004_s3 + $0x850] ss:$28 sps:$4 sm:$0xff]  }
 0x1da   :  { %5094 = vmatprep.subr.bf16.mxu0 %v9907_v6  ;;  %v5374_v29 = vcombine.low %v12282_v16, %v12286_v21  ;;  %v9953_v5 = vld [vmem:[%s14004_s3 + $0xa18] ss:$28 sps:$4 sm:$0xff]   ;;  %v9959_v23 = vld [vmem:[%s14004_s3 + $0xa50] ss:$28 sps:$4 sm:$0xff]  }
 0x1db   :  { %v9967_v28 = vld [vmem:[%s14004_s3 + $0x8fc] ss:$28 sps:$4 sm:$0xff]  }
 0x1dc   :  { %4947 = vmatpush1.bf16.msra.mxu1 %v9902_v13  ;;  %v5388_v7 = vrot.slane %v5374_v29, %v12295_v26  ;;  %v9958_v13 = vld [vmem:[%s14004_s3 + $0x88c] ss:$28 sps:$4 sm:$0xff]   ;;  %v9965_v29 = vld [vmem:[%s14004_s3 + $0x8f8] ss:$28 sps:$4 sm:$0xff]  }
 0x1dd   :  { %5095 = vmatpush1.bf16.msra.mxu0 %v9905_v14  ;;  %4948 = vmatprep.subr.bf16.mxu1 %v9910_v24  ;;  %v9961_v14 = vld [vmem:[%s14004_s3 + $0xa54] ss:$28 sps:$4 sm:$0xff]   ;;  %v9964_v24 = vld [vmem:[%s14004_s3 + $0x8c4] ss:$28 sps:$4 sm:$0xff]  }
 0x1de   :  { %5096 = vmatprep.subr.bf16.mxu0 %v9913_v25  ;;  %v5389_v8 = vcombine.low %v5381_v33, %v5388_v7  ;;  %v9962_v25 = vld [vmem:[%s14004_s3 + $0x8c0] ss:$28 sps:$4 sm:$0xff]   ;;  %v448_v7 = vsub.s32 6, %v10868_v42 }
 0x1df   :  { %v9976_v33 = vld [vmem:[%s14004_s3 + $0x9a4] ss:$28 sps:$4 sm:$0xff]  }
 0x1e0   :  { %4949 = vmatpush1.bf16.msra.mxu1 %v9908_v30  ;;  %5408 = vst [vmem:[#allocation2] sm:$0xff] %v5389_v8  ;;  %v9970_v30 = vld [vmem:[%s14004_s3 + $0x934] ss:$28 sps:$4 sm:$0xff]   ;;  %v449_v8 = vrot.slane %v12264_v2, %v448_v7 }
 0x1e1   :  { %5097 = vmatpush1.bf16.msra.mxu0 %v9911_v10  ;;  %4959 = vmatprep.subr.bf16.mxu1 %v9916_v31  ;;  %v9968_v10 = vld [vmem:[%s14004_s3 + $0x930] ss:$28 sps:$4 sm:$0xff]  }
 0x1e2   :  { %5098 = vmatprep.subr.bf16.mxu0 %v9919_v32  ;;  %v9973_v31 = vld [vmem:[%s14004_s3 + $0x96c] ss:$28 sps:$4 sm:$0xff]  }
 0x1e3   :  { %4951 = vmatmul.mubr.bf16.vlgmr.msra.gmra.mrb[20].mxu1 %v10980_v18  ;;  %v9971_v32 = vld [vmem:[%s14004_s3 + $0x968] ss:$28 sps:$4 sm:$0xff]  }
 0x1e4   :  { %4960 = vmatpush1.bf16.msra.mxu1 %v9914_v36  ;;  %4991 = vmatprep.mubr.bf16.mxu1 %v10992_v22  ;;  %v9974_v36 = vld [vmem:[%s14004_s3 + $0x9a0] ss:$28 sps:$4 sm:$0xff]  }
 0x1e5   :  { %5099 = vmatpush1.bf16.msra.mxu0 %v9917_v37  ;;  %4961 = vmatprep.subr.bf16.mxu1 %v9922_v38  ;;  %v9979_v37 = vld [vmem:[%s14004_s3 + $0x9dc] ss:$28 sps:$4 sm:$0xff]  }
 0x1e6   :  { %5100 = vmatprep.subr.bf16.mxu0 %v9925_v39  ;;  %v9977_v38 = vld [vmem:[%s14004_s3 + $0x9d8] ss:$28 sps:$4 sm:$0xff]  }
 0x1e7   :  { %v9982_v39 = vld [vmem:[%s14004_s3 + $0xa14] ss:$28 sps:$4 sm:$0xff]  }
 0x1e8   :  { %4962 = vmatpush1.bf16.msra.mxu1 %v9920_v40 }
 0x1e9   :  { %5101 = vmatpush1.bf16.msra.mxu0 %v9923_v41  ;;  %4963 = vmatprep.subr.bf16.mxu1 %v9928_v43 }
 0x1ea   :  { %5102 = vmatprep.subr.bf16.mxu0 %v9931_v44 }
 0x1ec   :  { %4964 = vmatpush1.bf16.msra.mxu1 %v9926_v45  ;;  %v10076_v45 = vld [vmem:[%s14004_s3 + $0x558] ss:$28 sps:$4 sm:$0xff]  }
 0x1ed   :  { %5103 = vmatpush1.bf16.msra.mxu0 %v9929_v46  ;;  %4965 = vmatprep.subr.bf16.mxu1 %v9934_v47 }
 0x1ee   :  { %5104 = vmatprep.subr.bf16.mxu0 %v9937_v48 }
 0x1f0   :  { %4966 = vmatpush1.bf16.msra.mxu1 %v9932_v50 }
 0x1f1   :  { %5105 = vmatpush1.bf16.msra.mxu0 %v9935_v51  ;;  %4967 = vmatprep.subr.bf16.mxu1 %v9940_v52  ;;  %v9980_v51 = vld [vmem:[%s14004_s3 + $0xa10] ss:$28 sps:$4 sm:$0xff]   ;;  %v10077_v52 = vld [vmem:[%s14004_s3 + $0x398] ss:$28 sps:$4 sm:$0xff]  }
 0x1f2   :  { %5106 = vmatprep.subr.bf16.mxu0 %v9943_v53 }
 0x1f4   :  { %4968 = vmatpush1.bf16.msra.mxu1 %v9938_v54 }
 0x1f5   :  { %5107 = vmatpush1.bf16.msra.mxu0 %v9941_v55  ;;  %4969 = vmatprep.subr.bf16.mxu1 %v9946_v58  ;;  %v9985_v55 = vld [vmem:[%s14004_s3 + $0xa4c] ss:$28 sps:$4 sm:$0xff]  }
 0x1f6   :  { %5108 = vmatprep.subr.bf16.mxu0 %v9949_v59  ;;  %v8996_v3 = vpop.f32.mrb[8].mxu1  ;;  %v10081_v59 = vld [vmem:[%s14004_s3 + $0x590] ss:$28 sps:$4 sm:$0xff]  }
 0x1f7   :  { %v8997_v6 = vpop.f32.mrb[9].mxu1 }
 0x1f8   :  { %v8998_v9 = vadd.f32 %v8997_v6, %v8996_v3  ;;  %v8999_v11 = vpop.f32.mrb[10].mxu1  ;;  %4970 = vmatpush1.bf16.msra.mxu1 %v9944_v61  ;;  %v9983_v61 = vld [vmem:[%s14004_s3 + $0xa48] ss:$28 sps:$4 sm:$0xff]   ;;  %v9986_v3 = vld [vmem:[%s14004_s3 + $0x10] ss:$28 sps:$4 sm:$0xff]  }
 0x1f9   :  { %5109 = vmatpush1.bf16.msra.mxu0 %v9947_v62  ;;  %v9000_v19 = vpop.f32.mrb[11].mxu1  ;;  %4971 = vmatprep.subr.bf16.mxu1 %v9952_v63  ;;  %v9988_v62 = vld [vmem:[%s14004_s3 + $0x14] ss:$28 sps:$4 sm:$0xff]   ;;  %v10091_v6 = vld [vmem:[%s14004_s3 + $0x600] ss:$28 sps:$4 sm:$0xff]  }
 0x1fa   :  { %5110 = vmatprep.subr.bf16.mxu0 %v9955_v1  ;;  %v2643_v46 = vadd.f32 %v8998_v9, %v449_v8  ;;  %v10082_v63 = vld [vmem:[%s14004_s3 + $0x3d0] ss:$28 sps:$4 sm:$0xff]   ;;  %v10086_v1 = vld [vmem:[%s14004_s3 + $0x5c8] ss:$28 sps:$4 sm:$0xff]   ;;  %v9992_v19 = vld [vmem:[%s14004_s3 + $0x80] ss:$28 sps:$4 sm:$0xff]  }
 0x1fb   :  { %v9989_v9 = vld [vmem:[%s14004_s3 + $0x48] ss:$28 sps:$4 sm:$0xff]  }
 0x1fc   :  { %4972 = vmatpush1.bf16.msra.mxu1 %v9950_v4  ;;  %v9991_v4 = vld [vmem:[%s14004_s3 + $0x4c] ss:$28 sps:$4 sm:$0xff]   ;;  %v9994_v11 = vld [vmem:[%s14004_s3 + $0x84] ss:$28 sps:$4 sm:$0xff]  }
 0x1fd   :  { %5111 = vmatpush1.bf16.msra.mxu0 %v9953_v5  ;;  %4973 = vmatprep.subr.bf16.mxu1 %v9958_v13  ;;  %v10087_v5 = vld [vmem:[%s14004_s3 + $0x408] ss:$28 sps:$4 sm:$0xff]   ;;  %v10092_v13 = vld [vmem:[%s14004_s3 + $0x440] ss:$28 sps:$4 sm:$0xff]  }
 0x1fe   :  { %5112 = vmatprep.subr.bf16.mxu0 %v9961_v14  ;;  %v10096_v14 = vld [vmem:[%s14004_s3 + $0x638] ss:$28 sps:$4 sm:$0xff]   ;;  %v10107_v8 = vld [vmem:[%s14004_s3 + $0x4e8] ss:$28 sps:$4 sm:$0xff]  }
 0x200   :  { %4974 = vmatpush1.bf16.msra.mxu1 %v9956_v20  ;;  %v9997_v20 = vld [vmem:[%s14004_s3 + $0xbc] ss:$28 sps:$4 sm:$0xff]  }
 0x201   :  { %5113 = vmatpush1.bf16.msra.mxu0 %v9959_v23  ;;  %4975 = vmatprep.subr.bf16.mxu1 %v9964_v24  ;;  %v10097_v23 = vld [vmem:[%s14004_s3 + $0x478] ss:$28 sps:$4 sm:$0xff]   ;;  %v12519_v24 = vsub.s32 4, %v10868_v42 }
 0x202   :  { %9068 = vmatprep.subr.bf16.mxu0 %v10076_v45 }
 0x204   :  { %5115 = vmatmul.mubr.bf16.vlgmr.msra.gmra.mrb[8].mxu0 %v11180_v27  ;;  %4976 = vmatpush1.bf16.msra.mxu1 %v9962_v25  ;;  %v12522_v25 = vsub.s32 5, %v10868_v42 }
 0x205   :  { %5318 = vmatprep.mubr.bf16.mxu0 %v10927_v0  ;;  %4977 = vmatprep.subr.bf16.mxu1 %v9967_v28  ;;  %v10101_v28 = vld [vmem:[%s14004_s3 + $0x670] ss:$28 sps:$4 sm:$0xff]  }
 0x206   :  { %9069 = vmatpush3.bf16.msra.mxu0 %v10077_v52 }
 0x207   :  { %9070 = vmatprep.subr.bf16.mxu0 %v10081_v59 }
 0x208   :  { %4978 = vmatpush1.bf16.msra.mxu1 %v9965_v29  ;;  %v9995_v29 = vld [vmem:[%s14004_s3 + $0xb8] ss:$28 sps:$4 sm:$0xff]  }
 0x209   :  { %4979 = vmatprep.subr.bf16.mxu1 %v9970_v30  ;;  %v10000_v30 = vld [vmem:[%s14004_s3 + $0xf4] ss:$28 sps:$4 sm:$0xff]  }
 0x20a   :  { %9071 = vmatpush3.bf16.msra.mxu0 %v10082_v63 }
 0x20b   :  { %9072 = vmatprep.subr.bf16.mxu0 %v10086_v1 }
 0x20c   :  { %4980 = vmatpush1.bf16.msra.mxu1 %v9968_v10  ;;  %v10102_v10 = vld [vmem:[%s14004_s3 + $0x4b0] ss:$28 sps:$4 sm:$0xff]  }
 0x20d   :  { %4981 = vmatprep.subr.bf16.mxu1 %v9973_v31  ;;  %v10106_v31 = vld [vmem:[%s14004_s3 + $0x6a8] ss:$28 sps:$4 sm:$0xff]  }
 0x20e   :  { %9073 = vmatpush3.bf16.msra.mxu0 %v10087_v5 }
 0x20f   :  { %9074 = vmatprep.subr.bf16.mxu0 %v10091_v6 }
 0x210   :  { %4982 = vmatpush1.bf16.msra.mxu1 %v9971_v32  ;;  %v441_v32 = vrot.slane %v12264_v2, %v12519_v24 }
 0x211   :  { %4983 = vmatprep.subr.bf16.mxu1 %v9976_v33  ;;  %v445_v33 = vrot.slane %v12264_v2, %v12522_v25  ;;  %v10111_v2 = vld [vmem:[%s14004_s3 + $0x6e0] ss:$28 sps:$4 sm:$0xff]  }
 0x212   :  { %9075 = vmatpush3.bf16.msra.mxu0 %v10092_v13 }
 0x213   :  { %9076 = vmatprep.subr.bf16.mxu0 %v10096_v14 }
 0x214   :  { %4984 = vmatpush1.bf16.msra.mxu1 %v9974_v36  ;;  %v9998_v36 = vld [vmem:[%s14004_s3 + $0xf0] ss:$28 sps:$4 sm:$0xff]  }
 0x215   :  { %4985 = vmatprep.subr.bf16.mxu1 %v9979_v37  ;;  %v10003_v37 = vld [vmem:[%s14004_s3 + $0x12c] ss:$28 sps:$4 sm:$0xff]  }
 0x216   :  { %v9018_v40 = vpop.f32.mrb[12].mxu1  ;;  %9077 = vmatpush3.bf16.msra.mxu0 %v10097_v23 }
 0x217   :  { %v12450_v41 = vpop.f32.mrb[4].mxu0  ;;  %v9019_v43 = vpop.f32.mrb[13].mxu1  ;;  %9078 = vmatprep.subr.bf16.mxu0 %v10101_v28 }
 0x218   :  { %v12452_v44 = vpop.f32.mrb[5].mxu0  ;;  %v9020_v47 = vadd.f32 %v9019_v43, %v9018_v40  ;;  %v9021_v48 = vpop.f32.mrb[14].mxu1  ;;  %4986 = vmatpush1.bf16.msra.mxu1 %v9977_v38 }
 0x219   :  { %v2605_v50 = vpop.f32.mrb[6].mxu0  ;;  %v9022_v53 = vpop.f32.mrb[15].mxu1  ;;  %4987 = vmatprep.subr.bf16.mxu1 %v9982_v39 }
 0x21a   :  { %v2606_v54 = vpop.f32.mrb[7].mxu0  ;;  %v12466_v58 = vadd.f32 %v9020_v47, %v2643_v46  ;;  %9079 = vmatpush3.bf16.msra.mxu0 %v10102_v10 }
 0x21b   :  { %9080 = vmatprep.subr.bf16.mxu0 %v10106_v31 }
 0x21c   :  { %4988 = vmatpush1.bf16.msra.mxu1 %v9980_v51 }
 0x21d   :  { %4989 = vmatprep.subr.bf16.mxu1 %v9985_v55 }
 0x21e   :  { %9081 = vmatpush3.bf16.msra.mxu0 %v10107_v8 }
 0x220   :  { %4990 = vmatpush1.bf16.msra.mxu1 %v9983_v61 }
 0x221   :  { %5123 = vmatprep.subr.bf16.mxu1 %v9988_v62 }
 0x223   :  { %4992 = vmatmul.mubr.bf16.vlgmr.msra.gmra.mrb[20].mxu1 %v11180_v27 }
 0x224   :  { %5124 = vmatpush1.bf16.msra.mxu1 %v9986_v3  ;;  %5155 = vmatprep.mubr.bf16.mxu1 %v10914_v60 }
 0x225   :  { %5125 = vmatprep.subr.bf16.mxu1 %v9991_v4 }
 0x228   :  { %5126 = vmatpush1.bf16.msra.mxu1 %v9989_v9 }
 0x229   :  { %5127 = vmatprep.subr.bf16.mxu1 %v9994_v11 }
 0x22c   :  { %5128 = vmatpush1.bf16.msra.mxu1 %v9992_v19 }
 0x22d   :  { %5129 = vmatprep.subr.bf16.mxu1 %v9997_v20 }
 0x230   :  { %5130 = vmatpush1.bf16.msra.mxu1 %v9995_v29 }
 0x231   :  { %5131 = vmatprep.subr.bf16.mxu1 %v10000_v30 }
 0x232   :  { %17 = vsyncpa [#allocation5], 0  ;;  %v12556_v38 = vadd.f32 %v12450_v41, %v441_v32  ;;  %v12559_v39 = vadd.f32 %v12452_v44, %v445_v33  ;;  %v10001_v40 = vld [vmem:[%s14004_s3 + $0x128] ss:$28 sps:$4 sm:$0xff]   ;;  %v10112_v43 = vld [vmem:[%s14004_s3 + $0x520] ss:$28 sps:$4 sm:$0xff]   ;;  %9082 = vmatprep.subr.bf16.mxu0 %v10111_v2 }
 0x233   :  { %v10006_v45 = vld [vmem:[%s14004_s3 + $0x164] ss:$28 sps:$4 sm:$0xff]   ;;  %9083 = vmatpush3.bf16.msra.mxu0 %v10112_v43  ;;  %v10116_v44 = vld [vmem:[%s14004_s3 + $0x8d8] ss:$28 sps:$4 sm:$0xff]   ;;  %vm5409_vm0 = vcmask 1041408   ;;  %vm5410_vm1 = vcmask 1043458  }
 0x234   :  { %5132 = vmatpush1.bf16.msra.mxu1 %v9998_v36  ;;  %v5390_v47 = vcombine.low %v12556_v38, %v12559_v39  ;;  %v10004_v51 = vld [vmem:[%s14004_s3 + $0x160] ss:$28 sps:$4 sm:$0xff]   ;;  %v10117_v52 = vld [vmem:[%s14004_s3 + $0x718] ss:$28 sps:$4 sm:$0xff]   ;;  %9090 = vmatprep.subr.bf16.mxu0 %v10116_v44  ;;  %vm5411_vm2 = vmor %vm5410_vm1, %vm5409_vm0  ;;  %vm5412_vm3 = vcmask 259076   ;;  %vm7414_vm5 = vcmask 261120  }
 0x235   :  { %5133 = vmatprep.subr.bf16.mxu1 %v10003_v37  ;;  %v10009_v54 = vld [vmem:[%s14004_s3 + $0x19c] ss:$28 sps:$4 sm:$0xff]   ;;  %v10121_v59 = vld [vmem:[%s14004_s3 + $0x910] ss:$28 sps:$4 sm:$0xff]   ;;  %vm12604_vm4 = vmor %vm5412_vm3, %vm5411_vm2 }
 0x236   :  { %v9040_v41 = vpop.f32.mrb[16].mxu1  ;;  %5319 = vmatmul.mubr.bf16.vlgmr.msra.gmra.mrb[12].mxu0 %v10980_v18  ;;  %v5397_v61 = vrot.slane %v5390_v47, %v12295_v26  ;;  %v10122_v63 = vld [vmem:[%s14004_s3 + $0x750] ss:$28 sps:$4 sm:$0xff]   ;;  %v10126_v5 = vld [vmem:[%s14004_s3 + $0x948] ss:$28 sps:$4 sm:$0xff]  }
 0x237   :  { %v9041_v46 = vpop.f32.mrb[17].mxu1  ;;  %9091 = vmatpush3.bf16.msra.mxu0 %v10117_v52  ;;  %5358 = vmatprep.mubr.bf16.mxu0 %v10992_v22  ;;  %v10012_v1 = vld [vmem:[%s14004_s3 + $0x1d4] ss:$28 sps:$4 sm:$0xff]   ;;  %v10127_v9 = vld [vmem:[%s14004_s3 + $0x788] ss:$28 sps:$4 sm:$0xff]  }
 0x238   :  { %v9042_v48 = vadd.f32 %v9041_v46, %v9040_v41  ;;  %v9043_v50 = vpop.f32.mrb[18].mxu1  ;;  %5134 = vmatpush1.bf16.msra.mxu1 %v10001_v40  ;;  %9092 = vmatprep.subr.bf16.mxu0 %v10121_v59  ;;  %v10010_v6 = vld [vmem:[%s14004_s3 + $0x1d0] ss:$28 sps:$4 sm:$0xff]   ;;  %v10131_v13 = vld [vmem:[%s14004_s3 + $0x980] ss:$28 sps:$4 sm:$0xff]  }
 0x239   :  { %v9044_v53 = vpop.f32.mrb[19].mxu1  ;;  %5135 = vmatprep.subr.bf16.mxu1 %v10006_v45  ;;  %v10015_v11 = vld [vmem:[%s14004_s3 + $0x20c] ss:$28 sps:$4 sm:$0xff]   ;;  %v10132_v19 = vld [vmem:[%s14004_s3 + $0x7c0] ss:$28 sps:$4 sm:$0xff]  }
 0x23a   :  { %v12585_v55 = vadd.f32 %v9042_v48, %v12466_v58  ;;  %v10007_v58 = vld [vmem:[%s14004_s3 + $0x198] ss:$28 sps:$4 sm:$0xff]   ;;  %v10013_v14 = vld [vmem:[%s14004_s3 + $0x208] ss:$28 sps:$4 sm:$0xff]   ;;  %v10016_v28 = vld [vmem:[%s14004_s3 + $0x240] ss:$28 sps:$4 sm:$0xff]  }
 0x23b   :  { %9093 = vmatpush3.bf16.msra.mxu0 %v10122_v63  ;;  %v10018_v20 = vld [vmem:[%s14004_s3 + $0x244] ss:$28 sps:$4 sm:$0xff]   ;;  %v10136_v23 = vld [vmem:[%s14004_s3 + $0x9b8] ss:$28 sps:$4 sm:$0xff]   ;;  %v10141_v10 = vld [vmem:[%s14004_s3 + $0x9f0] ss:$28 sps:$4 sm:$0xff]  }
 0x23c   :  { %v5404_v62 = vrot.slane %v12585_v55, %v12295_v26  ;;  %5136 = vmatpush1.bf16.msra.mxu1 %v10004_v51  ;;  %9094 = vmatprep.subr.bf16.mxu0 %v10126_v5  ;;  %v10137_v29 = vld [vmem:[%s14004_s3 + $0x7f8] ss:$28 sps:$4 sm:$0xff]   ;;  %v10142_v32 = vld [vmem:[%s14004_s3 + $0x830] ss:$28 sps:$4 sm:$0xff]   ;;  %v10146_v36 = vld [vmem:[%s14004_s3 + $0xa28] ss:$28 sps:$4 sm:$0xff]  }
 0x23d   :  { %5137 = vmatprep.subr.bf16.mxu1 %v10009_v54  ;;  %v10021_v30 = vld [vmem:[%s14004_s3 + $0x27c] ss:$28 sps:$4 sm:$0xff]   ;;  %v10024_v33 = vld [vmem:[%s14004_s3 + $0x2b4] ss:$28 sps:$4 sm:$0xff]   ;;  %v10147_v8 = vld [vmem:[%s14004_s3 + $0x868] ss:$28 sps:$4 sm:$0xff]  }
 0x23e   :  { %v5405_v4 = vcombine.low %v5397_v61, %v5404_v62  ;;  %v10019_v31 = vld [vmem:[%s14004_s3 + $0x278] ss:$28 sps:$4 sm:$0xff]   ;;  %v10022_v37 = vld [vmem:[%s14004_s3 + $0x2b0] ss:$28 sps:$4 sm:$0xff]   ;;  %v10151_v40 = vld [vmem:[%s14004_s3 + $0xa60] ss:$28 sps:$4 sm:$0xff]  }
 0x23f   :  { %9095 = vmatpush3.bf16.msra.mxu0 %v10127_v9  ;;  %v10027_v2 = vld [vmem:[%s14004_s3 + $0x2ec] ss:$28 sps:$4 sm:$0xff]   ;;  %v10152_v45 = vld [vmem:[%s14004_s3 + $0x8a0] ss:$28 sps:$4 sm:$0xff]   ;;  %v10031_v51 = vld [vmem:[%s14004_s3 + $0x358] ss:$28 sps:$4 sm:$0xff]  }
 0x240   :  { %5138 = vmatpush1.bf16.msra.mxu1 %v10007_v58  ;;  %5414 = vst.msk [vmem:[#allocation2 + $0x8] sm:$0x3f] %vm12604_vm4, %v5405_v4  ;;  %9096 = vmatprep.subr.bf16.mxu0 %v10131_v13  ;;  %v10025_v43 = vld [vmem:[%s14004_s3 + $0x2e8] ss:$28 sps:$4 sm:$0xff]   ;;  %v10028_v44 = vld [vmem:[%s14004_s3 + $0x320] ss:$28 sps:$4 sm:$0xff]  }
 0x241   :  { %5139 = vmatprep.subr.bf16.mxu1 %v10012_v1  ;;  %v10030_v41 = vld [vmem:[%s14004_s3 + $0x324] ss:$28 sps:$4 sm:$0xff]   ;;  %v10033_v48 = vld [vmem:[%s14004_s3 + $0x35c] ss:$28 sps:$4 sm:$0xff]   ;;  %v10164_v50 = vld [vmem:[%s14007_s6 + $0x34] ss:$24 sps:$4 sm:$0xff]  }
 0x242   :  { %v10158_v46 = vld [vmem:[%s14007_s6 + $0x4] ss:$24 sps:$4 sm:$0xff]   ;;  %v10156_v47 = vld [vmem:[%s14007_s6] ss:$24 sps:$4 sm:$0xff]   ;;  %v10162_v52 = vld [vmem:[%s14007_s6 + $0x30] ss:$24 sps:$4 sm:$0xff]  }
 0x243   :  { %9097 = vmatpush3.bf16.msra.mxu0 %v10132_v19  ;;  %v10036_v53 = vld [vmem:[%s14004_s3 + $0x394] ss:$28 sps:$4 sm:$0xff]   ;;  %v10170_v54 = vld [vmem:[%s14007_s6 + $0x64] ss:$24 sps:$4 sm:$0xff]   ;;  %v10168_v61 = vld [vmem:[%s14007_s6 + $0x60] ss:$24 sps:$4 sm:$0xff]  }
 0x244   :  { %5140 = vmatpush1.bf16.msra.mxu1 %v10010_v6  ;;  %9098 = vmatprep.subr.bf16.mxu0 %v10136_v23  ;;  %v10034_v59 = vld [vmem:[%s14004_s3 + $0x390] ss:$28 sps:$4 sm:$0xff]   ;;  %v10037_v63 = vld [vmem:[%s14004_s3 + $0x3c8] ss:$28 sps:$4 sm:$0xff]   ;;  %v10178_v6 = vld [vmem:[%s14007_s6 + $0xc0] ss:$24 sps:$4 sm:$0xff]  }
 0x245   :  { %5141 = vmatprep.subr.bf16.mxu1 %v10015_v11  ;;  %v10039_v62 = vld [vmem:[%s14004_s3 + $0x3cc] ss:$28 sps:$4 sm:$0xff]   ;;  %v10042_v4 = vld [vmem:[%s14004_s3 + $0x404] ss:$28 sps:$4 sm:$0xff]   ;;  %v10045_v9 = vld [vmem:[%s14004_s3 + $0x43c] ss:$28 sps:$4 sm:$0xff]  }
 0x246   :  { %v10175_v58 = vld [vmem:[%s14007_s6 + $0x94] ss:$24 sps:$4 sm:$0xff]   ;;  %v10173_v1 = vld [vmem:[%s14007_s6 + $0x90] ss:$24 sps:$4 sm:$0xff]   ;;  %v10180_v5 = vld [vmem:[%s14007_s6 + $0xc4] ss:$24 sps:$4 sm:$0xff]  }
 0x247   :  { %9099 = vmatpush3.bf16.msra.mxu0 %v10137_v29  ;;  %v10185_v11 = vld [vmem:[%s14007_s6 + $0xf4] ss:$24 sps:$4 sm:$0xff]  }
 0x248   :  { %5142 = vmatpush1.bf16.msra.mxu1 %v10013_v14  ;;  %9100 = vmatprep.subr.bf16.mxu0 %v10141_v10  ;;  %v10043_v13 = vld [vmem:[%s14004_s3 + $0x438] ss:$28 sps:$4 sm:$0xff]   ;;  %v10183_v14 = vld [vmem:[%s14007_s6 + $0xf0] ss:$24 sps:$4 sm:$0xff]  }
 0x249   :  { %5143 = vmatprep.subr.bf16.mxu1 %v10018_v20  ;;  %v10048_v19 = vld [vmem:[%s14004_s3 + $0x474] ss:$28 sps:$4 sm:$0xff]   ;;  %v10190_v20 = vld [vmem:[%s14007_s6 + $0x124] ss:$24 sps:$4 sm:$0xff]   ;;  %v10051_v29 = vld [vmem:[%s14004_s3 + $0x4ac] ss:$28 sps:$4 sm:$0xff]  }
 0x24a   :  { %v10046_v23 = vld [vmem:[%s14004_s3 + $0x470] ss:$28 sps:$4 sm:$0xff]   ;;  %v10049_v10 = vld [vmem:[%s14004_s3 + $0x4a8] ss:$28 sps:$4 sm:$0xff]  }
 0x24b   :  { %9101 = vmatpush3.bf16.msra.mxu0 %v10142_v32  ;;  %v10054_v32 = vld [vmem:[%s14004_s3 + $0x4e4] ss:$28 sps:$4 sm:$0xff]  }
 0x24c   :  { %5144 = vmatpush1.bf16.msra.mxu1 %v10016_v28  ;;  %9102 = vmatprep.subr.bf16.mxu0 %v10146_v36  ;;  %v10188_v28 = vld [vmem:[%s14007_s6 + $0x120] ss:$24 sps:$4 sm:$0xff]  }
 0x24d   :  { %5145 = vmatprep.subr.bf16.mxu1 %v10021_v30  ;;  %v10195_v30 = vld [vmem:[%s14007_s6 + $0x154] ss:$24 sps:$4 sm:$0xff]   ;;  %v10052_v36 = vld [vmem:[%s14004_s3 + $0x4e0] ss:$28 sps:$4 sm:$0xff]  }
 0x24f   :  { %9103 = vmatpush3.bf16.msra.mxu0 %v10147_v8  ;;  %v10057_v8 = vld [vmem:[%s14004_s3 + $0x51c] ss:$28 sps:$4 sm:$0xff]  }
 0x250   :  { %5146 = vmatpush1.bf16.msra.mxu1 %v10019_v31  ;;  %9104 = vmatprep.subr.bf16.mxu0 %v10151_v40  ;;  %v10193_v31 = vld [vmem:[%s14007_s6 + $0x150] ss:$24 sps:$4 sm:$0xff]   ;;  %v10055_v40 = vld [vmem:[%s14004_s3 + $0x518] ss:$28 sps:$4 sm:$0xff]  }
 0x251   :  { %5147 = vmatprep.subr.bf16.mxu1 %v10024_v33  ;;  %v10200_v33 = vld [vmem:[%s14007_s6 + $0x184] ss:$24 sps:$4 sm:$0xff]  }
 0x253   :  { %9105 = vmatpush3.bf16.msra.mxu0 %v10152_v45  ;;  %v10060_v45 = vld [vmem:[%s14004_s3 + $0x554] ss:$28 sps:$4 sm:$0xff]  }
 0x254   :  { %5148 = vmatpush1.bf16.msra.mxu1 %v10022_v37  ;;  %7418 = vmatprep.subr.bf16.mxu0 %v10158_v46  ;;  %v10198_v37 = vld [vmem:[%s14007_s6 + $0x180] ss:$24 sps:$4 sm:$0xff]   ;;  %v10058_v46 = vld [vmem:[%s14004_s3 + $0x550] ss:$28 sps:$4 sm:$0xff]  }
 0x255   :  { %5149 = vmatprep.subr.bf16.mxu1 %v10027_v2  ;;  %v10205_v2 = vld [vmem:[%s14007_s6 + $0x1b4] ss:$24 sps:$4 sm:$0xff]  }
 0x256   :  { %5359 = vmatmul.mubr.bf16.vlgmr.msra.gmra.mrb[16].mxu0 %v11180_v27 }
 0x257   :  { %7419 = vmatpush1.bf16.msra.mxu0 %v10156_v47  ;;  %v10063_v47 = vld [vmem:[%s14004_s3 + $0x58c] ss:$28 sps:$4 sm:$0xff]  }
 0x258   :  { %5150 = vmatpush1.bf16.msra.mxu1 %v10025_v43  ;;  %7420 = vmatprep.subr.bf16.mxu0 %v10164_v50  ;;  %v10203_v43 = vld [vmem:[%s14007_s6 + $0x1b0] ss:$24 sps:$4 sm:$0xff]  }
 0x259   :  { %5151 = vmatprep.subr.bf16.mxu1 %v10030_v41  ;;  %v10210_v41 = vld [vmem:[%s14007_s6 + $0x1e4] ss:$24 sps:$4 sm:$0xff]  }
 0x25a   :  { %v10061_v50 = vld [vmem:[%s14004_s3 + $0x588] ss:$28 sps:$4 sm:$0xff]  }
 0x25b   :  { %7421 = vmatpush1.bf16.msra.mxu0 %v10162_v52  ;;  %v10066_v52 = vld [vmem:[%s14004_s3 + $0x5c4] ss:$28 sps:$4 sm:$0xff]  }
 0x25c   :  { %5152 = vmatpush1.bf16.msra.mxu1 %v10028_v44  ;;  %7422 = vmatprep.subr.bf16.mxu0 %v10170_v54  ;;  %v10208_v44 = vld [vmem:[%s14007_s6 + $0x1e0] ss:$24 sps:$4 sm:$0xff]  }
 0x25d   :  { %5153 = vmatprep.subr.bf16.mxu1 %v10033_v48  ;;  %v10216_v48 = vld [vmem:[%s14007_s6 + $0x214] ss:$24 sps:$4 sm:$0xff]   ;;  %v10064_v54 = vld [vmem:[%s14004_s3 + $0x5c0] ss:$28 sps:$4 sm:$0xff]  }
 0x25f   :  { %7423 = vmatpush1.bf16.msra.mxu0 %v10168_v61  ;;  %v10069_v61 = vld [vmem:[%s14004_s3 + $0x5fc] ss:$28 sps:$4 sm:$0xff]  }
 0x260   :  { %5154 = vmatpush1.bf16.msra.mxu1 %v10031_v51  ;;  %7424 = vmatprep.subr.bf16.mxu0 %v10175_v58  ;;  %v10214_v51 = vld [vmem:[%s14007_s6 + $0x210] ss:$24 sps:$4 sm:$0xff]   ;;  %v10067_v58 = vld [vmem:[%s14004_s3 + $0x5f8] ss:$28 sps:$4 sm:$0xff]  }
 0x261   :  { %5164 = vmatprep.subr.bf16.mxu1 %v10036_v53  ;;  %v10222_v53 = vld [vmem:[%s14007_s6 + $0x244] ss:$24 sps:$4 sm:$0xff]  }
 0x263   :  { %5156 = vmatmul.mubr.bf16.vlgmr.msra.gmra.mrb[24].mxu1 %v10962_v12  ;;  %7425 = vmatpush1.bf16.msra.mxu0 %v10173_v1  ;;  %v10072_v1 = vld [vmem:[%s14004_s3 + $0x634] ss:$28 sps:$4 sm:$0xff]  }
 0x264   :  { %5165 = vmatpush1.bf16.msra.mxu1 %v10034_v59  ;;  %5196 = vmatprep.mubr.bf16.mxu1 %v10927_v0  ;;  %v10040_v0 = vld [vmem:[%s14004_s3 + $0x400] ss:$28 sps:$4 sm:$0xff]  }
 0x265   :  { %5166 = vmatprep.subr.bf16.mxu1 %v10039_v62  ;;  %7426 = vmatprep.subr.bf16.mxu0 %v10180_v5  ;;  %v10220_v59 = vld [vmem:[%s14007_s6 + $0x240] ss:$24 sps:$4 sm:$0xff]   ;;  %v10228_v62 = vld [vmem:[%s14007_s6 + $0x274] ss:$24 sps:$4 sm:$0xff]  }
 0x266   :  { %v10070_v5 = vld [vmem:[%s14004_s3 + $0x630] ss:$28 sps:$4 sm:$0xff]  }
 0x267   :  { %7427 = vmatpush1.bf16.msra.mxu0 %v10178_v6  ;;  %v10075_v6 = vld [vmem:[%s14004_s3 + $0x66c] ss:$28 sps:$4 sm:$0xff]  }
 0x268   :  { %5167 = vmatpush1.bf16.msra.mxu1 %v10037_v63  ;;  %7428 = vmatprep.subr.bf16.mxu0 %v10185_v11  ;;  %v10226_v63 = vld [vmem:[%s14007_s6 + $0x270] ss:$24 sps:$4 sm:$0xff]  }
 0x269   :  { %5168 = vmatprep.subr.bf16.mxu1 %v10042_v4  ;;  %v10234_v4 = vld [vmem:[%s14007_s6 + $0x2a4] ss:$24 sps:$4 sm:$0xff]  }
 0x26a   :  { %v10073_v11 = vld [vmem:[%s14004_s3 + $0x668] ss:$28 sps:$4 sm:$0xff]  }
 0x26b   :  { %7429 = vmatpush1.bf16.msra.mxu0 %v10183_v14  ;;  %v10080_v14 = vld [vmem:[%s14004_s3 + $0x6a4] ss:$28 sps:$4 sm:$0xff]  }
 0x26c   :  { %5169 = vmatpush1.bf16.msra.mxu1 %v10040_v0  ;;  %7430 = vmatprep.subr.bf16.mxu0 %v10190_v20  ;;  %v10232_v0 = vld [vmem:[%s14007_s6 + $0x2a0] ss:$24 sps:$4 sm:$0xff]  }
 0x26d   :  { %5170 = vmatprep.subr.bf16.mxu1 %v10045_v9  ;;  %v10240_v9 = vld [vmem:[%s14007_s6 + $0x2d4] ss:$24 sps:$4 sm:$0xff]   ;;  %v10078_v20 = vld [vmem:[%s14004_s3 + $0x6a0] ss:$28 sps:$4 sm:$0xff]  }
 0x26f   :  { %7431 = vmatpush1.bf16.msra.mxu0 %v10188_v28  ;;  %v10083_v28 = vld [vmem:[%s14004_s3 + $0x6d8] ss:$28 sps:$4 sm:$0xff]  }
 0x270   :  { %5171 = vmatpush1.bf16.msra.mxu1 %v10043_v13  ;;  %7432 = vmatprep.subr.bf16.mxu0 %v10195_v30  ;;  %v10238_v13 = vld [vmem:[%s14007_s6 + $0x2d0] ss:$24 sps:$4 sm:$0xff]  }
 0x271   :  { %5172 = vmatprep.subr.bf16.mxu1 %v10048_v19  ;;  %v10246_v19 = vld [vmem:[%s14007_s6 + $0x304] ss:$24 sps:$4 sm:$0xff]   ;;  %v10088_v30 = vld [vmem:[%s14004_s3 + $0x710] ss:$28 sps:$4 sm:$0xff]  }
 0x273   :  { %7433 = vmatpush1.bf16.msra.mxu0 %v10193_v31  ;;  %v10093_v31 = vld [vmem:[%s14004_s3 + $0x748] ss:$28 sps:$4 sm:$0xff]  }
 0x274   :  { %5173 = vmatpush1.bf16.msra.mxu1 %v10046_v23  ;;  %7434 = vmatprep.subr.bf16.mxu0 %v10200_v33  ;;  %v10085_v23 = vld [vmem:[%s14004_s3 + $0x6dc] ss:$28 sps:$4 sm:$0xff]  }
 0x275   :  { %5174 = vmatprep.subr.bf16.mxu1 %v10051_v29  ;;  %v10090_v29 = vld [vmem:[%s14004_s3 + $0x714] ss:$28 sps:$4 sm:$0xff]   ;;  %v10098_v33 = vld [vmem:[%s14004_s3 + $0x780] ss:$28 sps:$4 sm:$0xff]  }
 0x277   :  { %7435 = vmatpush1.bf16.msra.mxu0 %v10198_v37  ;;  %v10108_v37 = vld [vmem:[%s14004_s3 + $0x7f0] ss:$28 sps:$4 sm:$0xff]  }
 0x278   :  { %5175 = vmatpush1.bf16.msra.mxu1 %v10049_v10  ;;  %7436 = vmatprep.subr.bf16.mxu0 %v10205_v2  ;;  %v10095_v10 = vld [vmem:[%s14004_s3 + $0x74c] ss:$28 sps:$4 sm:$0xff]  }
 0x279   :  { %5176 = vmatprep.subr.bf16.mxu1 %v10054_v32  ;;  %v10100_v32 = vld [vmem:[%s14004_s3 + $0x784] ss:$28 sps:$4 sm:$0xff]  }
 0x27a   :  { %v10113_v2 = vld [vmem:[%s14004_s3 + $0x828] ss:$28 sps:$4 sm:$0xff]  }
 0x27b   :  { %7437 = vmatpush1.bf16.msra.mxu0 %v10203_v43  ;;  %v10118_v43 = vld [vmem:[%s14004_s3 + $0x860] ss:$28 sps:$4 sm:$0xff]  }
 0x27c   :  { %5177 = vmatpush1.bf16.msra.mxu1 %v10052_v36  ;;  %7438 = vmatprep.subr.bf16.mxu0 %v10210_v41  ;;  %v10110_v36 = vld [vmem:[%s14004_s3 + $0x7f4] ss:$28 sps:$4 sm:$0xff]  }
 0x27d   :  { %5178 = vmatprep.subr.bf16.mxu1 %v10057_v8  ;;  %v10115_v8 = vld [vmem:[%s14004_s3 + $0x82c] ss:$28 sps:$4 sm:$0xff]   ;;  %v10123_v41 = vld [vmem:[%s14004_s3 + $0x898] ss:$28 sps:$4 sm:$0xff]  }
 0x27f   :  { %7439 = vmatpush1.bf16.msra.mxu0 %v10208_v44  ;;  %v10128_v44 = vld [vmem:[%s14004_s3 + $0x8d0] ss:$28 sps:$4 sm:$0xff]  }
 0x280   :  { %5179 = vmatpush1.bf16.msra.mxu1 %v10055_v40  ;;  %7440 = vmatprep.subr.bf16.mxu0 %v10216_v48  ;;  %v10120_v40 = vld [vmem:[%s14004_s3 + $0x864] ss:$28 sps:$4 sm:$0xff]  }
 0x281   :  { %5180 = vmatprep.subr.bf16.mxu1 %v10060_v45  ;;  %v10125_v45 = vld [vmem:[%s14004_s3 + $0x89c] ss:$28 sps:$4 sm:$0xff]   ;;  %v10133_v48 = vld [vmem:[%s14004_s3 + $0x908] ss:$28 sps:$4 sm:$0xff]  }
 0x283   :  { %7441 = vmatpush1.bf16.msra.mxu0 %v10214_v51  ;;  %v10138_v51 = vld [vmem:[%s14004_s3 + $0x940] ss:$28 sps:$4 sm:$0xff]  }
 0x284   :  { %5181 = vmatpush1.bf16.msra.mxu1 %v10058_v46  ;;  %7442 = vmatprep.subr.bf16.mxu0 %v10222_v53  ;;  %v10130_v46 = vld [vmem:[%s14004_s3 + $0x8d4] ss:$28 sps:$4 sm:$0xff]  }
 0x285   :  { %5182 = vmatprep.subr.bf16.mxu1 %v10063_v47  ;;  %v10135_v47 = vld [vmem:[%s14004_s3 + $0x90c] ss:$28 sps:$4 sm:$0xff]   ;;  %v10143_v53 = vld [vmem:[%s14004_s3 + $0x978] ss:$28 sps:$4 sm:$0xff]  }
 0x287   :  { %7443 = vmatpush1.bf16.msra.mxu0 %v10220_v59  ;;  %v10148_v59 = vld [vmem:[%s14004_s3 + $0x9b0] ss:$28 sps:$4 sm:$0xff]  }
 0x288   :  { %5183 = vmatpush1.bf16.msra.mxu1 %v10061_v50  ;;  %7444 = vmatprep.subr.bf16.mxu0 %v10228_v62  ;;  %v10140_v50 = vld [vmem:[%s14004_s3 + $0x944] ss:$28 sps:$4 sm:$0xff]   ;;  %v10155_v62 = vld [vmem:[%s14004_s3 + $0x9ec] ss:$28 sps:$4 sm:$0xff]  }
 0x289   :  { %5184 = vmatprep.subr.bf16.mxu1 %v10066_v52  ;;  %v10145_v52 = vld [vmem:[%s14004_s3 + $0x97c] ss:$28 sps:$4 sm:$0xff]  }
 0x28b   :  { %7445 = vmatpush1.bf16.msra.mxu0 %v10226_v63  ;;  %v10153_v63 = vld [vmem:[%s14004_s3 + $0x9e8] ss:$28 sps:$4 sm:$0xff]  }
 0x28c   :  { %5185 = vmatpush1.bf16.msra.mxu1 %v10064_v54  ;;  %7446 = vmatprep.subr.bf16.mxu0 %v10234_v4  ;;  %v10150_v54 = vld [vmem:[%s14004_s3 + $0x9b4] ss:$28 sps:$4 sm:$0xff]   ;;  %v10161_v4 = vld [vmem:[%s14004_s3 + $0xa24] ss:$28 sps:$4 sm:$0xff]  }
 0x28d   :  { %5186 = vmatprep.subr.bf16.mxu1 %v10069_v61  ;;  %v12972_v61 = vld [vmem:[%s14005_s4] sm:$0x7f] }
 0x28f   :  { %7447 = vmatpush1.bf16.msra.mxu0 %v10232_v0 }
 0x290   :  { %5187 = vmatpush1.bf16.msra.mxu1 %v10067_v58  ;;  %7448 = vmatprep.subr.bf16.mxu0 %v10240_v9  ;;  %v3125_v58 = vrot.slane %v12972_v61, %v12244_v56 }
 0x291   :  { %5188 = vmatprep.subr.bf16.mxu1 %v10072_v1  ;;  %v3129_v1 = vrot.slane %v12972_v61, %v12247_v57 }
 0x293   :  { %7449 = vmatpush1.bf16.msra.mxu0 %v10238_v13  ;;  %v10159_v13 = vld [vmem:[%s14004_s3 + $0xa20] ss:$28 sps:$4 sm:$0xff]  }
 0x294   :  { %5189 = vmatpush1.bf16.msra.mxu1 %v10070_v5  ;;  %7459 = vmatprep.subr.bf16.mxu0 %v10246_v19 }
 0x295   :  { %5190 = vmatprep.subr.bf16.mxu1 %v10075_v6 }
 0x298   :  { %5191 = vmatpush1.bf16.msra.mxu1 %v10073_v11 }
 0x299   :  { %5192 = vmatprep.subr.bf16.mxu1 %v10080_v14 }
 0x29c   :  { %5193 = vmatpush1.bf16.msra.mxu1 %v10078_v20  ;;  %v10167_v20 = vld [vmem:[%s14004_s3 + $0xa5c] ss:$28 sps:$4 sm:$0xff]  }
 0x29d   :  { %5194 = vmatprep.subr.bf16.mxu1 %v10085_v23 }
 0x2a0   :  { %5195 = vmatpush1.bf16.msra.mxu1 %v10083_v28 }
 0x2a1   :  { %5205 = vmatprep.subr.bf16.mxu1 %v10090_v29 }
 0x2a3   :  { %5197 = vmatmul.mubr.bf16.vlgmr.msra.gmra.mrb[24].mxu1 %v10980_v18  ;;  %v10105_v18 = vld [vmem:[%s14004_s3 + $0x7bc] ss:$28 sps:$4 sm:$0xff]  }
 0x2a4   :  { %5206 = vmatpush1.bf16.msra.mxu1 %v10088_v30  ;;  %5237 = vmatprep.mubr.bf16.mxu1 %v10992_v22  ;;  %v10103_v22 = vld [vmem:[%s14004_s3 + $0x7b8] ss:$28 sps:$4 sm:$0xff]  }
 0x2a5   :  { %5207 = vmatprep.subr.bf16.mxu1 %v10095_v10  ;;  %v10165_v10 = vld [vmem:[%s14004_s3 + $0xa58] ss:$28 sps:$4 sm:$0xff]  }
 0x2a8   :  { %5208 = vmatpush1.bf16.msra.mxu1 %v10093_v31  ;;  %v10171_v31 = vld [vmem:[%s14004_s3 + $0x1d8] ss:$28 sps:$4 sm:$0xff]  }
 0x2a9   :  { %5209 = vmatprep.subr.bf16.mxu1 %v10100_v32  ;;  %v10172_v32 = vld [vmem:[%s14004_s3 + $0x18] ss:$28 sps:$4 sm:$0xff]  }
 0x2ac   :  { %5210 = vmatpush1.bf16.msra.mxu1 %v10098_v33  ;;  %v10176_v33 = vld [vmem:[%s14004_s3 + $0x210] ss:$28 sps:$4 sm:$0xff]  }
 0x2ad   :  { %5211 = vmatprep.subr.bf16.mxu1 %v10105_v18  ;;  %v10177_v18 = vld [vmem:[%s14004_s3 + $0x50] ss:$28 sps:$4 sm:$0xff]  }
 0x2b0   :  { %5212 = vmatpush1.bf16.msra.mxu1 %v10103_v22  ;;  %v10181_v22 = vld [vmem:[%s14004_s3 + $0x248] ss:$28 sps:$4 sm:$0xff]  }
 0x2b1   :  { %5213 = vmatprep.subr.bf16.mxu1 %v10110_v36 }
 0x2b4   :  { %5214 = vmatpush1.bf16.msra.mxu1 %v10108_v37 }
 0x2b5   :  { %5215 = vmatprep.subr.bf16.mxu1 %v10115_v8 }
 0x2b8   :  { %5216 = vmatpush1.bf16.msra.mxu1 %v10113_v2  ;;  %v10187_v2 = vld [vmem:[%s14004_s3 + $0xc0] ss:$28 sps:$4 sm:$0xff]  }
 0x2b9   :  { %5217 = vmatprep.subr.bf16.mxu1 %v10120_v40  ;;  %v10191_v40 = vld [vmem:[%s14004_s3 + $0x2b8] ss:$28 sps:$4 sm:$0xff]  }
 0x2bc   :  { %5218 = vmatpush1.bf16.msra.mxu1 %v10118_v43  ;;  %v10192_v43 = vld [vmem:[%s14004_s3 + $0xf8] ss:$28 sps:$4 sm:$0xff]  }
 0x2bd   :  { %5219 = vmatprep.subr.bf16.mxu1 %v10125_v45  ;;  %v10196_v45 = vld [vmem:[%s14004_s3 + $0x2f0] ss:$28 sps:$4 sm:$0xff]  }
 0x2c0   :  { %5220 = vmatpush1.bf16.msra.mxu1 %v10123_v41  ;;  %v3117_v41 = vrot.slane %v12972_v61, %v11829_v15 }
 0x2c1   :  { %5221 = vmatprep.subr.bf16.mxu1 %v10130_v46  ;;  %v3121_v46 = vrot.slane %v12972_v61, %v11835_v17 }
 0x2c4   :  { %5222 = vmatpush1.bf16.msra.mxu1 %v10128_v44  ;;  %v10197_v44 = vld [vmem:[%s14004_s3 + $0x130] ss:$28 sps:$4 sm:$0xff]  }
 0x2c5   :  { %5223 = vmatprep.subr.bf16.mxu1 %v10135_v47  ;;  %v10201_v47 = vld [vmem:[%s14004_s3 + $0x328] ss:$28 sps:$4 sm:$0xff]  }
 0x2c8   :  { %5224 = vmatpush1.bf16.msra.mxu1 %v10133_v48 }
 0x2c9   :  { %5225 = vmatprep.subr.bf16.mxu1 %v10140_v50 }
 0x2cc   :  { %5226 = vmatpush1.bf16.msra.mxu1 %v10138_v51 }
 0x2cd   :  { %5227 = vmatprep.subr.bf16.mxu1 %v10145_v52 }
 0x2d0   :  { %5228 = vmatpush1.bf16.msra.mxu1 %v10143_v53 }
 0x2d1   :  { %5229 = vmatprep.subr.bf16.mxu1 %v10150_v54  ;;  %v10202_v54 = vld [vmem:[%s14004_s3 + $0x168] ss:$28 sps:$4 sm:$0xff]  }
 0x2d4   :  { %5230 = vmatpush1.bf16.msra.mxu1 %v10148_v59 }
 0x2d5   :  { %5231 = vmatprep.subr.bf16.mxu1 %v10155_v62 }
 0x2d7   :  { %v5116_v5 = vpop.f32.mrb[8].mxu0 }
 0x2d8   :  { %v12987_v0 = vadd.f32 %v5116_v5, %v3125_v58  ;;  %v5118_v6 = vpop.f32.mrb[9].mxu0  ;;  %5232 = vmatpush1.bf16.msra.mxu1 %v10153_v63  ;;  %v10206_v58 = vld [vmem:[%s14004_s3 + $0x360] ss:$28 sps:$4 sm:$0xff]  }
 0x2d9   :  { %v12989_v9 = vadd.f32 %v5118_v6, %v3129_v1  ;;  %v5120_v11 = vpop.f32.mrb[10].mxu0  ;;  %5233 = vmatprep.subr.bf16.mxu1 %v10161_v4 }
 0x2da   :  { %v5463_v14 = vmul.f32 0.5, %v12987_v0  ;;  %v5121_v19 = vpop.f32.mrb[11].mxu0  ;;  %v10213_v11 = vld [vmem:[%s14007_s6 + $0xc] ss:$24 sps:$4 sm:$0xff]  }
 0x2db   :  { %v5423_v23 = vcombine.low %v12987_v0, %v12989_v9  ;;  %v5464_v28 = vmul.f32 0.5, %v12989_v9  ;;  %v10207_v9 = vld [vmem:[%s14004_s3 + $0x1a0] ss:$28 sps:$4 sm:$0xff]  }
 0x2dc   :  { %v5472_v29 = vmul.f32 1.442695, %v5463_v14  ;;  %5234 = vmatpush1.bf16.msra.mxu1 %v10159_v13  ;;  %v10211_v14 = vld [vmem:[%s14007_s6 + $0x8] ss:$24 sps:$4 sm:$0xff]   ;;  %v10219_v19 = vld [vmem:[%s14007_s6 + $0x3c] ss:$24 sps:$4 sm:$0xff]  }
 0x2dd   :  { %v5474_v30 = vmul.f32 1.442695, %v5464_v28  ;;  %5235 = vmatprep.subr.bf16.mxu1 %v10167_v20  ;;  %v5437_v5 = vrot.slane %v5423_v23, %v12295_v26  ;;  %v10217_v20 = vld [vmem:[%s14007_s6 + $0x38] ss:$24 sps:$4 sm:$0xff]   ;;  %v10225_v23 = vld [vmem:[%s14007_s6 + $0x6c] ss:$24 sps:$4 sm:$0xff]  }
 0x2de   :  { %10628 = vpow2.f32 %v5472_v29 }
 0x2df   :  { %10630 = vpow2.f32 %v5474_v30  ;;  %v10223_v30 = vld [vmem:[%s14007_s6 + $0x68] ss:$24 sps:$4 sm:$0xff]  }
 0x2e0   :  { %5236 = vmatpush1.bf16.msra.mxu1 %v10165_v10 }
 0x2e1   :  { %9046 = vmatprep.subr.bf16.mxu1 %v10171_v31 }
 0x2e3   :  { %5238 = vmatmul.mubr.bf16.vlgmr.msra.gmra.mrb[24].mxu1 %v11180_v27  ;;  %v10182_v27 = vld [vmem:[%s14004_s3 + $0x88] ss:$28 sps:$4 sm:$0xff]  }
 0x2e4   :  { %9047 = vmatpush3.bf16.msra.mxu1 %v10172_v32  ;;  %5278 = vmatprep.mubr.bf16.mxu1 %v10914_v60  ;;  %v10186_v60 = vld [vmem:[%s14004_s3 + $0x280] ss:$28 sps:$4 sm:$0xff]   ;;  %s10695_s3 = smov [#allocation4]  }
 0x2e5   :  { %9048 = vmatprep.subr.bf16.mxu1 %v10176_v33  ;;  %v10229_v33 = vld [vmem:[%s14007_s6 + $0x98] ss:$24 sps:$4 sm:$0xff]   ;;  %s7986_s21 = sshll.u32 %s10695_s3, 4  ;;  %s7987_s21 = int_to_ptr.vmem [resolvable:$true] %s7986_s21 }
 0x2e8   :  { %v13021_v36 = vpop.eup %10628  ;;  %9049 = vmatpush3.bf16.msra.mxu1 %v10177_v18  ;;  %v5459_v18 = vld [vmem:[%s14006_s5] sm:$0xff] }
 0x2e9   :  { %v13023_v37 = vpop.eup %10630  ;;  %9050 = vmatprep.subr.bf16.mxu1 %v10181_v22  ;;  %v10237_v22 = vld [vmem:[%s14007_s6 + $0xcc] ss:$24 sps:$4 sm:$0xff]  }
 0x2ea   :  { %v5490_v8 = vcombine.low %v13021_v36, %v13023_v37 }
 0x2ec   :  { %9051 = vmatpush3.bf16.msra.mxu1 %v10182_v27  ;;  %v5504_v32 = vrot.slane %v5490_v8, %v12295_v26  ;;  %v10235_v27 = vld [vmem:[%s14007_s6 + $0xc8] ss:$24 sps:$4 sm:$0xff]   ;;  %v10243_v8 = vld [vmem:[%s14007_s6 + $0xfc] ss:$24 sps:$4 sm:$0xff]  }
 0x2ed   :  { %9052 = vmatprep.subr.bf16.mxu1 %v10186_v60 }
 0x2f0   :  { %9053 = vmatpush3.bf16.msra.mxu1 %v10187_v2 }
 0x2f1   :  { %9054 = vmatprep.subr.bf16.mxu1 %v10191_v40 }
 0x2f4   :  { %9055 = vmatpush3.bf16.msra.mxu1 %v10192_v43 }
 0x2f5   :  { %9056 = vmatprep.subr.bf16.mxu1 %v10196_v45  ;;  %v10241_v45 = vld [vmem:[%s14007_s6 + $0xf8] ss:$24 sps:$4 sm:$0xff]  }
 0x2f6   :  { %v4993_v48 = vpop.f32.mrb[20].mxu1 }
 0x2f7   :  { %v9120_v50 = vadd.f32 %v4993_v48, %v3117_v41  ;;  %v4995_v51 = vpop.f32.mrb[21].mxu1 }
 0x2f8   :  { %v9121_v52 = vadd.f32 %v4995_v51, %v3121_v46  ;;  %v4997_v53 = vpop.f32.mrb[22].mxu1  ;;  %9057 = vmatpush3.bf16.msra.mxu1 %v10197_v44 }
 0x2f9   :  { %v5461_v59 = vmul.f32 0.5, %v9120_v50  ;;  %v4998_v62 = vpop.f32.mrb[23].mxu1  ;;  %9058 = vmatprep.subr.bf16.mxu1 %v10201_v47  ;;  %v10249_v47 = vld [vmem:[%s14007_s6 + $0x12c] ss:$24 sps:$4 sm:$0xff]  }
 0x2fa   :  { %v5422_v63 = vcombine.low %v9120_v50, %v9121_v52  ;;  %v5462_v1 = vmul.f32 0.5, %v9121_v52  ;;  %v10244_v50 = vld [vmem:[%s14007_s6 + $0x300] ss:$24 sps:$4 sm:$0xff]   ;;  %v10252_v52 = vld [vmem:[%s14007_s6 + $0x334] ss:$24 sps:$4 sm:$0xff]  }
 0x2fb   :  { %v5468_v4 = vmul.f32 1.442695, %v5461_v59  ;;  %v10253_v59 = vld [vmem:[%s14007_s6 + $0x158] ss:$24 sps:$4 sm:$0xff]   ;;  %v10258_v62 = vld [vmem:[%s14007_s6 + $0x364] ss:$24 sps:$4 sm:$0xff]  }
 0x2fc   :  { %v5430_v0 = vrot.slane %v5422_v63, %v12295_v26  ;;  %v5470_v6 = vmul.f32 1.442695, %v5462_v1  ;;  %9059 = vmatpush3.bf16.msra.mxu1 %v10202_v54  ;;  %v10250_v54 = vld [vmem:[%s14007_s6 + $0x330] ss:$24 sps:$4 sm:$0xff]   ;;  %v10256_v63 = vld [vmem:[%s14007_s6 + $0x360] ss:$24 sps:$4 sm:$0xff]  }
 0x2fd   :  { %10632 = vpow2.f32 %v5468_v4  ;;  %9060 = vmatprep.subr.bf16.mxu1 %v10206_v58  ;;  %v10261_v58 = vld [vmem:[%s14007_s6 + $0x18c] ss:$24 sps:$4 sm:$0xff]   ;;  %v10259_v1 = vld [vmem:[%s14007_s6 + $0x188] ss:$24 sps:$4 sm:$0xff]  }
 0x2fe   :  { %10634 = vpow2.f32 %v5470_v6  ;;  %v5438_v13 = vcombine.low %v5430_v0, %v5437_v5  ;;  %v10264_v4 = vld [vmem:[%s14007_s6 + $0x394] ss:$24 sps:$4 sm:$0xff]   ;;  %v10262_v0 = vld [vmem:[%s14007_s6 + $0x390] ss:$24 sps:$4 sm:$0xff]  }
 0x2ff   :  { %v10267_v5 = vld [vmem:[%s14007_s6 + $0x1bc] ss:$24 sps:$4 sm:$0xff]   ;;  %v10265_v6 = vld [vmem:[%s14007_s6 + $0x1b8] ss:$24 sps:$4 sm:$0xff]  }
 0x300   :  { %9061 = vmatpush3.bf16.msra.mxu1 %v10207_v9  ;;  %5457 = vst [vmem:[#allocation4] sm:$0xff] %v5438_v13  ;;  %v10270_v9 = vld [vmem:[%s14007_s6 + $0x3c4] ss:$24 sps:$4 sm:$0xff]   ;;  %v10268_v13 = vld [vmem:[%s14007_s6 + $0x3c0] ss:$24 sps:$4 sm:$0xff]  }
 0x301   :  { %7582 = vmatprep.subr.bf16.mxu1 %v10213_v11  ;;  %v10273_v11 = vld [vmem:[%s14007_s6 + $0x1ec] ss:$24 sps:$4 sm:$0xff]  }
 0x303   :  { %5279 = vmatmul.mubr.bf16.vlgmr.msra.gmra.mrb[28].mxu1 %v10962_v12  ;;  %v10231_v12 = vld [vmem:[%s14007_s6 + $0x9c] ss:$24 sps:$4 sm:$0xff]  }
 0x304   :  { %7583 = vmatpush1.bf16.msra.mxu1 %v10211_v14  ;;  %v10271_v14 = vld [vmem:[%s14007_s6 + $0x1e8] ss:$24 sps:$4 sm:$0xff]  }
 0x305   :  { %7584 = vmatprep.subr.bf16.mxu1 %v10219_v19  ;;  %v10276_v19 = vld [vmem:[%s14007_s6 + $0x3f4] ss:$24 sps:$4 sm:$0xff]  }
 0x307   :  { %v10633_v28 = vpop.eup %10632 }
 0x308   :  { %v10635_v29 = vpop.eup %10634  ;;  %7585 = vmatpush1.bf16.msra.mxu1 %v10217_v20  ;;  %v10279_v20 = vld [vmem:[%s14007_s6 + $0x21c] ss:$24 sps:$4 sm:$0xff]  }
 0x309   :  { %v5489_v10 = vcombine.low %v10633_v28, %v10635_v29  ;;  %7586 = vmatprep.subr.bf16.mxu1 %v10225_v23  ;;  %v10274_v23 = vld [vmem:[%s14007_s6 + $0x3f0] ss:$24 sps:$4 sm:$0xff]   ;;  %v10282_v29 = vld [vmem:[%s14007_s6 + $0x424] ss:$24 sps:$4 sm:$0xff]  }
 0x30a   :  { %v10277_v28 = vld [vmem:[%s14007_s6 + $0x218] ss:$24 sps:$4 sm:$0xff]  }
 0x30b   :  { %v5497_v31 = vrot.slane %v5489_v10, %v12295_v26  ;;  %v10280_v10 = vld [vmem:[%s14007_s6 + $0x420] ss:$24 sps:$4 sm:$0xff]  }
 0x30c   :  { %7587 = vmatpush1.bf16.msra.mxu1 %v10223_v30  ;;  %v10285_v30 = vld [vmem:[%s14007_s6 + $0x24c] ss:$24 sps:$4 sm:$0xff]  }
 0x30d   :  { %7588 = vmatprep.subr.bf16.mxu1 %v10231_v12  ;;  %v5505_v36 = vcombine.low %v5497_v31, %v5504_v32  ;;  %v10283_v12 = vld [vmem:[%s14007_s6 + $0x248] ss:$24 sps:$4 sm:$0xff]   ;;  %v10288_v31 = vld [vmem:[%s14007_s6 + $0x454] ss:$24 sps:$4 sm:$0xff]  }
 0x30e   :  { %v10291_v32 = vld [vmem:[%s14007_s6 + $0x27c] ss:$24 sps:$4 sm:$0xff]  }
 0x30f   :  { %v5524_v37 = vmul.f32 %v5505_v36, %v5459_v18  ;;  %v10289_v18 = vld [vmem:[%s14007_s6 + $0x278] ss:$24 sps:$4 sm:$0xff]   ;;  %v10297_v36 = vld [vmem:[%s14007_s6 + $0x2ac] ss:$24 sps:$4 sm:$0xff]  }
 0x310   :  { %7589 = vmatpush1.bf16.msra.mxu1 %v10229_v33  ;;  %v10286_v33 = vld [vmem:[%s14007_s6 + $0x450] ss:$24 sps:$4 sm:$0xff]  }
 0x311   :  { %7590 = vmatprep.subr.bf16.mxu1 %v10237_v22  ;;  %v5535_v60 = vrot.slane %v5524_v37, %v12295_v26  ;;  %v5528_v2 = vcombine.high %v5524_v37, %v5524_v37  ;;  %v10294_v22 = vld [vmem:[%s14007_s6 + $0x484] ss:$24 sps:$4 sm:$0xff]   ;;  %v10292_v37 = vld [vmem:[%s14007_s6 + $0x480] ss:$24 sps:$4 sm:$0xff]  }
 0x313   :  { %v5543_v40 = vcombine.high %v5535_v60, %v5535_v60  ;;  %v13107_v43 = vrot.slane %v5528_v2, %v12295_v26  ;;  %v5568_v41 = vadd.f32 %v11868_v34, %v5535_v60  ;;  %v10303_v60 = vld [vmem:[%s14007_s6 + $0x2dc] ss:$24 sps:$4 sm:$0xff]   ;;  %v9084_v2 = vpop.f32.mrb[12].mxu0 }
 0x314   :  { %7591 = vmatpush1.bf16.msra.mxu1 %v10235_v27  ;;  %v10295_v27 = vld [vmem:[%s14007_s6 + $0x2a8] ss:$24 sps:$4 sm:$0xff]  }
 0x315   :  { %7592 = vmatprep.subr.bf16.mxu1 %v10243_v8  ;;  %v5569_v46 = vadd.f32 %v11870_v35, %v5543_v40  ;;  %v5544_v44 = vcombine.high %v13107_v43, %v13107_v43  ;;  %v13125_v34 = vpack.c.bf16 %v5568_v41, %v5568_v41  ;;  %v10247_v35 = vld [vmem:[%s14007_s6 + $0x128] ss:$24 sps:$4 sm:$0xff]   ;;  %v10300_v8 = vld [vmem:[%s14007_s6 + $0x4b4] ss:$24 sps:$4 sm:$0xff]   ;;  %v9085_v40 = vpop.f32.mrb[13].mxu0 }
 0x316   :  { %v9087_v41 = vpop.f32.mrb[14].mxu0 }
 0x317   :  { %v13119_v48 = vpack.c.bf16 %v5569_v46, %v5569_v46  ;;  %v5571_v51 = vadd.f32 %v12286_v21, %v5544_v44  ;;  %v10255_v21 = vld [vmem:[%s14007_s6 + $0x15c] ss:$24 sps:$4 sm:$0xff]   ;;  %v10301_v46 = vld [vmem:[%s14007_s6 + $0x2d8] ss:$24 sps:$4 sm:$0xff]   ;;  %v10346_v41 = vld [vmem:[%s14007_s6 + $0x488] ss:$24 sps:$4 sm:$0xff]  }
 0x318   :  { %7593 = vmatpush1.bf16.msra.mxu1 %v10241_v45  ;;  %v10298_v45 = vld [vmem:[%s14007_s6 + $0x4b0] ss:$24 sps:$4 sm:$0xff]   ;;  %v10306_v44 = vld [vmem:[%s14007_s6 + $0x4e4] ss:$24 sps:$4 sm:$0xff]  }
 0x319   :  { %7450 = vmatprep.mubr.bf16.mxu0 %v13119_v48  ;;  %7614 = vmatprep.mubr.bf16.mxu1 %v13119_v48  ;;  %v13135_v53 = vpack.c.bf16 %v5571_v51, %v5571_v51  ;;  %v13250_v51 = vadd.f32 %v9085_v40, %v9084_v2  ;;  %v10348_v40 = vld [vmem:[%s14007_s6 + $0x48c] ss:$24 sps:$4 sm:$0xff]  }
 0x31a   :  { %7451 = vmatmul.mubr.bf16.vlgmr.msra.gmra.mrb[20].mxu0 %v13125_v34  ;;  %7594 = vmatprep.subr.bf16.mxu1 %v10249_v47  ;;  %v9088_v47 = vpop.f32.mrb[15].mxu0 }
 0x31b   :  { %7460 = vmatpush1.bf16.msra.mxu0 %v10244_v50  ;;  %7491 = vmatprep.mubr.bf16.mxu0 %v13135_v53  ;;  %v10309_v50 = vld [vmem:[%s14007_s6 + $0x30c] ss:$24 sps:$4 sm:$0xff]   ;;  %v10388_v47 = vld [vmem:[%s14007_s6 + $0x690] ss:$24 sps:$4 sm:$0xff]  }
 0x31c   :  { %7595 = vmatpush1.bf16.msra.mxu1 %v10247_v35  ;;  %7461 = vmatprep.subr.bf16.mxu0 %v10252_v52  ;;  %v10304_v35 = vld [vmem:[%s14007_s6 + $0x4e0] ss:$24 sps:$4 sm:$0xff]  }
 0x31d   :  { %7596 = vmatprep.subr.bf16.mxu1 %v10255_v21  ;;  %v10307_v52 = vld [vmem:[%s14007_s6 + $0x308] ss:$24 sps:$4 sm:$0xff]   ;;  %v10312_v21 = vld [vmem:[%s14007_s6 + $0x514] ss:$24 sps:$4 sm:$0xff]  }
 0x31f   :  { %7462 = vmatpush1.bf16.msra.mxu0 %v10250_v54  ;;  %v10315_v54 = vld [vmem:[%s14007_s6 + $0x33c] ss:$24 sps:$4 sm:$0xff]  }
 0x320   :  { %7597 = vmatpush1.bf16.msra.mxu1 %v10253_v59  ;;  %7463 = vmatprep.subr.bf16.mxu0 %v10258_v62  ;;  %v10310_v59 = vld [vmem:[%s14007_s6 + $0x510] ss:$24 sps:$4 sm:$0xff]  }
 0x321   :  { %7598 = vmatprep.subr.bf16.mxu1 %v10261_v58  ;;  %v10313_v62 = vld [vmem:[%s14007_s6 + $0x338] ss:$24 sps:$4 sm:$0xff]   ;;  %v10318_v58 = vld [vmem:[%s14007_s6 + $0x544] ss:$24 sps:$4 sm:$0xff]  }
 0x323   :  { %7464 = vmatpush1.bf16.msra.mxu0 %v10256_v63  ;;  %v10321_v63 = vld [vmem:[%s14007_s6 + $0x36c] ss:$24 sps:$4 sm:$0xff]  }
 0x324   :  { %7599 = vmatpush1.bf16.msra.mxu1 %v10259_v1  ;;  %7465 = vmatprep.subr.bf16.mxu0 %v10264_v4  ;;  %v10316_v1 = vld [vmem:[%s14007_s6 + $0x540] ss:$24 sps:$4 sm:$0xff]  }
 0x325   :  { %7600 = vmatprep.subr.bf16.mxu1 %v10267_v5  ;;  %v10319_v4 = vld [vmem:[%s14007_s6 + $0x368] ss:$24 sps:$4 sm:$0xff]   ;;  %v10324_v5 = vld [vmem:[%s14007_s6 + $0x574] ss:$24 sps:$4 sm:$0xff]  }
 0x327   :  { %7466 = vmatpush1.bf16.msra.mxu0 %v10262_v0  ;;  %v10327_v0 = vld [vmem:[%s14007_s6 + $0x39c] ss:$24 sps:$4 sm:$0xff]  }
 0x328   :  { %7601 = vmatpush1.bf16.msra.mxu1 %v10265_v6  ;;  %7467 = vmatprep.subr.bf16.mxu0 %v10270_v9  ;;  %v10322_v6 = vld [vmem:[%s14007_s6 + $0x570] ss:$24 sps:$4 sm:$0xff]  }
 0x329   :  { %7602 = vmatprep.subr.bf16.mxu1 %v10273_v11  ;;  %v10325_v9 = vld [vmem:[%s14007_s6 + $0x398] ss:$24 sps:$4 sm:$0xff]   ;;  %v10330_v11 = vld [vmem:[%s14007_s6 + $0x5a4] ss:$24 sps:$4 sm:$0xff]  }
 0x32b   :  { %7468 = vmatpush1.bf16.msra.mxu0 %v10268_v13  ;;  %v10333_v13 = vld [vmem:[%s14007_s6 + $0x3cc] ss:$24 sps:$4 sm:$0xff]  }
 0x32c   :  { %7603 = vmatpush1.bf16.msra.mxu1 %v10271_v14  ;;  %7469 = vmatprep.subr.bf16.mxu0 %v10276_v19  ;;  %v10328_v14 = vld [vmem:[%s14007_s6 + $0x5a0] ss:$24 sps:$4 sm:$0xff]  }
 0x32d   :  { %7604 = vmatprep.subr.bf16.mxu1 %v10279_v20  ;;  %v10331_v19 = vld [vmem:[%s14007_s6 + $0x3c8] ss:$24 sps:$4 sm:$0xff]   ;;  %v10336_v20 = vld [vmem:[%s14007_s6 + $0x5d4] ss:$24 sps:$4 sm:$0xff]  }
 0x32f   :  { %7470 = vmatpush1.bf16.msra.mxu0 %v10274_v23  ;;  %v10339_v23 = vld [vmem:[%s14007_s6 + $0x3fc] ss:$24 sps:$4 sm:$0xff]  }
 0x330   :  { %7605 = vmatpush1.bf16.msra.mxu1 %v10277_v28  ;;  %7471 = vmatprep.subr.bf16.mxu0 %v10282_v29  ;;  %v10334_v28 = vld [vmem:[%s14007_s6 + $0x5d0] ss:$24 sps:$4 sm:$0xff]  }
 0x331   :  { %7606 = vmatprep.subr.bf16.mxu1 %v10285_v30  ;;  %v10337_v29 = vld [vmem:[%s14007_s6 + $0x3f8] ss:$24 sps:$4 sm:$0xff]   ;;  %v5570_v30 = vadd.f32 %v12282_v16, %v13107_v43  ;;  %v10340_v16 = vld [vmem:[%s14007_s6 + $0x428] ss:$24 sps:$4 sm:$0xff]   ;;  %v10378_v43 = vld [vmem:[%s14007_s6 + $0x634] ss:$24 sps:$4 sm:$0xff]  }
 0x333   :  { %7472 = vmatpush1.bf16.msra.mxu0 %v10280_v10  ;;  %v10372_v10 = vld [vmem:[%s14007_s6 + $0x604] ss:$24 sps:$4 sm:$0xff]  }
 0x334   :  { %7607 = vmatpush1.bf16.msra.mxu1 %v10283_v12  ;;  %7473 = vmatprep.subr.bf16.mxu0 %v10288_v31  ;;  %v10342_v12 = vld [vmem:[%s14007_s6 + $0x42c] ss:$24 sps:$4 sm:$0xff]   ;;  %v10370_v31 = vld [vmem:[%s14007_s6 + $0x600] ss:$24 sps:$4 sm:$0xff]  }
 0x335   :  { %7608 = vmatprep.subr.bf16.mxu1 %v10291_v32  ;;  %v13331_v32 = vpack.c.bf16 %v5570_v30, %v5570_v30  ;;  %v10424_v30 = vld [vmem:[%s14007_s6 + $0x7b0] ss:$24 sps:$4 sm:$0xff]  }
 0x337   :  { %7474 = vmatpush1.bf16.msra.mxu0 %v10286_v33  ;;  %v9106_v33 = vpop.f32.mrb[16].mxu0 }
 0x338   :  { %7609 = vmatpush1.bf16.msra.mxu1 %v10289_v18  ;;  %7475 = vmatprep.subr.bf16.mxu0 %v10294_v22  ;;  %v10345_v18 = vld [vmem:[%s14007_s6 + $0x45c] ss:$24 sps:$4 sm:$0xff]   ;;  %v9107_v22 = vpop.f32.mrb[17].mxu0 }
 0x339   :  { %7610 = vmatprep.subr.bf16.mxu1 %v10297_v36  ;;  %v9109_v36 = vpop.f32.mrb[18].mxu0  ;;  %v13352_v2 = vadd.f32 %v9107_v22, %v9106_v33  ;;  %v10438_v33 = vld [vmem:[%s14007_s6 + $0x814] ss:$24 sps:$4 sm:$0xff]   ;;  %v10436_v22 = vld [vmem:[%s14007_s6 + $0x810] ss:$24 sps:$4 sm:$0xff]  }
 0x33a   :  { %v10379_v36 = vld [vmem:[%s14007_s6 + $0x638] ss:$24 sps:$4 sm:$0xff]  }
 0x33b   :  { %7476 = vmatpush1.bf16.msra.mxu0 %v10292_v37  ;;  %v10376_v37 = vld [vmem:[%s14007_s6 + $0x630] ss:$24 sps:$4 sm:$0xff]  }
 0x33c   :  { %7611 = vmatpush1.bf16.msra.mxu1 %v10295_v27  ;;  %7477 = vmatprep.subr.bf16.mxu0 %v10300_v8  ;;  %v9110_v27 = vpop.f32.mrb[19].mxu0  ;;  %v10343_v8 = vld [vmem:[%s14007_s6 + $0x458] ss:$24 sps:$4 sm:$0xff]  }
 0x33d   :  { %7612 = vmatprep.subr.bf16.mxu1 %v10303_v60  ;;  %v10384_v60 = vld [vmem:[%s14007_s6 + $0x664] ss:$24 sps:$4 sm:$0xff]  }
 0x33e   :  { %v10387_v27 = vld [vmem:[%s14007_s6 + $0x66c] ss:$24 sps:$4 sm:$0xff]  }
 0x33f   :  { %7478 = vmatpush1.bf16.msra.mxu0 %v10298_v45  ;;  %v10382_v45 = vld [vmem:[%s14007_s6 + $0x660] ss:$24 sps:$4 sm:$0xff]  }
 0x340   :  { %7613 = vmatpush1.bf16.msra.mxu1 %v10301_v46  ;;  %7479 = vmatprep.subr.bf16.mxu0 %v10306_v44  ;;  %v10390_v46 = vld [vmem:[%s14007_s6 + $0x694] ss:$24 sps:$4 sm:$0xff]  }
 0x341   :  { %7623 = vmatprep.subr.bf16.mxu1 %v10309_v50  ;;  %v10351_v44 = vld [vmem:[%s14007_s6 + $0x4bc] ss:$24 sps:$4 sm:$0xff]   ;;  %v10349_v50 = vld [vmem:[%s14007_s6 + $0x4b8] ss:$24 sps:$4 sm:$0xff]  }
 0x343   :  { %7480 = vmatpush1.bf16.msra.mxu0 %v10304_v35  ;;  %7615 = vmatmul.mubr.bf16.vlgmr.msra.gmra.mrb[32].mxu1 %v13125_v34  ;;  %v10396_v35 = vld [vmem:[%s14007_s6 + $0x6c4] ss:$24 sps:$4 sm:$0xff]  }
 0x344   :  { %7624 = vmatpush1.bf16.msra.mxu1 %v10307_v52  ;;  %7655 = vmatprep.mubr.bf16.mxu1 %v13135_v53  ;;  %v10354_v52 = vld [vmem:[%s14007_s6 + $0x4ec] ss:$24 sps:$4 sm:$0xff]  }
 0x345   :  { %7481 = vmatprep.subr.bf16.mxu0 %v10312_v21  ;;  %7625 = vmatprep.subr.bf16.mxu1 %v10315_v54  ;;  %v10394_v21 = vld [vmem:[%s14007_s6 + $0x6c0] ss:$24 sps:$4 sm:$0xff]  }
 0x346   :  { %v10352_v54 = vld [vmem:[%s14007_s6 + $0x4e8] ss:$24 sps:$4 sm:$0xff]  }
 0x347   :  { %7482 = vmatpush1.bf16.msra.mxu0 %v10310_v59  ;;  %v10402_v59 = vld [vmem:[%s14007_s6 + $0x6f4] ss:$24 sps:$4 sm:$0xff]  }
 0x348   :  { %7626 = vmatpush1.bf16.msra.mxu1 %v10313_v62  ;;  %7483 = vmatprep.subr.bf16.mxu0 %v10318_v58  ;;  %v10357_v62 = vld [vmem:[%s14007_s6 + $0x51c] ss:$24 sps:$4 sm:$0xff]   ;;  %v10400_v58 = vld [vmem:[%s14007_s6 + $0x6f0] ss:$24 sps:$4 sm:$0xff]  }
 0x349   :  { %7627 = vmatprep.subr.bf16.mxu1 %v10321_v63  ;;  %v10355_v63 = vld [vmem:[%s14007_s6 + $0x518] ss:$24 sps:$4 sm:$0xff]  }
 0x34b   :  { %7484 = vmatpush1.bf16.msra.mxu0 %v10316_v1  ;;  %v10408_v1 = vld [vmem:[%s14007_s6 + $0x724] ss:$24 sps:$4 sm:$0xff]  }
 0x34c   :  { %7628 = vmatpush1.bf16.msra.mxu1 %v10319_v4  ;;  %7485 = vmatprep.subr.bf16.mxu0 %v10324_v5  ;;  %v10360_v4 = vld [vmem:[%s14007_s6 + $0x54c] ss:$24 sps:$4 sm:$0xff]   ;;  %v10406_v5 = vld [vmem:[%s14007_s6 + $0x720] ss:$24 sps:$4 sm:$0xff]  }
 0x34d   :  { %7629 = vmatprep.subr.bf16.mxu1 %v10327_v0  ;;  %v10358_v0 = vld [vmem:[%s14007_s6 + $0x548] ss:$24 sps:$4 sm:$0xff]  }
 0x34f   :  { %7486 = vmatpush1.bf16.msra.mxu0 %v10322_v6  ;;  %v10414_v6 = vld [vmem:[%s14007_s6 + $0x754] ss:$24 sps:$4 sm:$0xff]  }
 0x350   :  { %7630 = vmatpush1.bf16.msra.mxu1 %v10325_v9  ;;  %7487 = vmatprep.subr.bf16.mxu0 %v10330_v11  ;;  %v10363_v9 = vld [vmem:[%s14007_s6 + $0x57c] ss:$24 sps:$4 sm:$0xff]   ;;  %v10412_v11 = vld [vmem:[%s14007_s6 + $0x750] ss:$24 sps:$4 sm:$0xff]  }
 0x351   :  { %7631 = vmatprep.subr.bf16.mxu1 %v10333_v13  ;;  %v10361_v13 = vld [vmem:[%s14007_s6 + $0x578] ss:$24 sps:$4 sm:$0xff]  }
 0x353   :  { %7488 = vmatpush1.bf16.msra.mxu0 %v10328_v14  ;;  %v10420_v14 = vld [vmem:[%s14007_s6 + $0x784] ss:$24 sps:$4 sm:$0xff]  }
 0x354   :  { %7632 = vmatpush1.bf16.msra.mxu1 %v10331_v19  ;;  %7489 = vmatprep.subr.bf16.mxu0 %v10336_v20  ;;  %v10366_v19 = vld [vmem:[%s14007_s6 + $0x5ac] ss:$24 sps:$4 sm:$0xff]   ;;  %v10418_v20 = vld [vmem:[%s14007_s6 + $0x780] ss:$24 sps:$4 sm:$0xff]  }
 0x355   :  { %7633 = vmatprep.subr.bf16.mxu1 %v10339_v23  ;;  %v10364_v23 = vld [vmem:[%s14007_s6 + $0x5a8] ss:$24 sps:$4 sm:$0xff]  }
 0x357   :  { %7490 = vmatpush1.bf16.msra.mxu0 %v10334_v28  ;;  %v10426_v28 = vld [vmem:[%s14007_s6 + $0x7b4] ss:$24 sps:$4 sm:$0xff]  }
 0x358   :  { %7634 = vmatpush1.bf16.msra.mxu1 %v10337_v29  ;;  %7500 = vmatprep.subr.bf16.mxu0 %v10372_v10  ;;  %v10369_v29 = vld [vmem:[%s14007_s6 + $0x5dc] ss:$24 sps:$4 sm:$0xff]   ;;  %v10367_v10 = vld [vmem:[%s14007_s6 + $0x5d8] ss:$24 sps:$4 sm:$0xff]  }
 0x359   :  { %7635 = vmatprep.subr.bf16.mxu1 %v10342_v12  ;;  %v10432_v12 = vld [vmem:[%s14007_s6 + $0x7e4] ss:$24 sps:$4 sm:$0xff]  }
 0x35a   :  { %7492 = vmatmul.mubr.bf16.vlgmr.msra.gmra.mrb[20].mxu0 %v13331_v32 }
 0x35b   :  { %7501 = vmatpush1.bf16.msra.mxu0 %v10370_v31  ;;  %v10375_v31 = vld [vmem:[%s14007_s6 + $0x60c] ss:$24 sps:$4 sm:$0xff]  }
 0x35c   :  { %7636 = vmatpush1.bf16.msra.mxu1 %v10340_v16  ;;  %7502 = vmatprep.subr.bf16.mxu0 %v10378_v43  ;;  %v10430_v16 = vld [vmem:[%s14007_s6 + $0x7e0] ss:$24 sps:$4 sm:$0xff]  }
 0x35d   :  { %7637 = vmatprep.subr.bf16.mxu1 %v10345_v18  ;;  %v10373_v43 = vld [vmem:[%s14007_s6 + $0x608] ss:$24 sps:$4 sm:$0xff]   ;;  %v10381_v18 = vld [vmem:[%s14007_s6 + $0x63c] ss:$24 sps:$4 sm:$0xff]  }
 0x35f   :  { %7503 = vmatpush1.bf16.msra.mxu0 %v10376_v37  ;;  %v10444_v37 = vld [vmem:[%s14007_s6 + $0x844] ss:$24 sps:$4 sm:$0xff]  }
 0x360   :  { %7638 = vmatpush1.bf16.msra.mxu1 %v10343_v8  ;;  %7504 = vmatprep.subr.bf16.mxu0 %v10384_v60  ;;  %v10442_v8 = vld [vmem:[%s14007_s6 + $0x840] ss:$24 sps:$4 sm:$0xff]  }
 0x361   :  { %7639 = vmatprep.subr.bf16.mxu1 %v10348_v40  ;;  %v10385_v60 = vld [vmem:[%s14007_s6 + $0x668] ss:$24 sps:$4 sm:$0xff]   ;;  %v10450_v40 = vld [vmem:[%s14007_s6 + $0x874] ss:$24 sps:$4 sm:$0xff]  }
 0x363   :  { %7505 = vmatpush1.bf16.msra.mxu0 %v10382_v45  ;;  %v10393_v45 = vld [vmem:[%s14007_s6 + $0x69c] ss:$24 sps:$4 sm:$0xff]  }
 0x364   :  { %7640 = vmatpush1.bf16.msra.mxu1 %v10346_v41  ;;  %7506 = vmatprep.subr.bf16.mxu0 %v10390_v46  ;;  %v10448_v41 = vld [vmem:[%s14007_s6 + $0x870] ss:$24 sps:$4 sm:$0xff]  }
 0x365   :  { %7641 = vmatprep.subr.bf16.mxu1 %v10351_v44  ;;  %v10391_v46 = vld [vmem:[%s14007_s6 + $0x698] ss:$24 sps:$4 sm:$0xff]   ;;  %v10456_v44 = vld [vmem:[%s14007_s6 + $0x8a4] ss:$24 sps:$4 sm:$0xff]  }
 0x367   :  { %7507 = vmatpush1.bf16.msra.mxu0 %v10388_v47  ;;  %v10399_v47 = vld [vmem:[%s14007_s6 + $0x6cc] ss:$24 sps:$4 sm:$0xff]  }
 0x368   :  { %7642 = vmatpush1.bf16.msra.mxu1 %v10349_v50  ;;  %7508 = vmatprep.subr.bf16.mxu0 %v10396_v35  ;;  %v10454_v50 = vld [vmem:[%s14007_s6 + $0x8a0] ss:$24 sps:$4 sm:$0xff]  }
 0x369   :  { %7643 = vmatprep.subr.bf16.mxu1 %v10354_v52  ;;  %v10397_v35 = vld [vmem:[%s14007_s6 + $0x6c8] ss:$24 sps:$4 sm:$0xff]   ;;  %v10462_v52 = vld [vmem:[%s14007_s6 + $0x8d4] ss:$24 sps:$4 sm:$0xff]  }
 0x36b   :  { %7509 = vmatpush1.bf16.msra.mxu0 %v10394_v21  ;;  %v10405_v21 = vld [vmem:[%s14007_s6 + $0x6fc] ss:$24 sps:$4 sm:$0xff]  }
 0x36c   :  { %7644 = vmatpush1.bf16.msra.mxu1 %v10352_v54  ;;  %7510 = vmatprep.subr.bf16.mxu0 %v10402_v59  ;;  %v10460_v54 = vld [vmem:[%s14007_s6 + $0x8d0] ss:$24 sps:$4 sm:$0xff]  }
 0x36d   :  { %7645 = vmatprep.subr.bf16.mxu1 %v10357_v62  ;;  %v10403_v59 = vld [vmem:[%s14007_s6 + $0x6f8] ss:$24 sps:$4 sm:$0xff]   ;;  %v10468_v62 = vld [vmem:[%s14007_s6 + $0x904] ss:$24 sps:$4 sm:$0xff]  }
 0x36f   :  { %7511 = vmatpush1.bf16.msra.mxu0 %v10400_v58  ;;  %v10411_v58 = vld [vmem:[%s14007_s6 + $0x72c] ss:$24 sps:$4 sm:$0xff]  }
 0x370   :  { %7646 = vmatpush1.bf16.msra.mxu1 %v10355_v63  ;;  %7512 = vmatprep.subr.bf16.mxu0 %v10408_v1  ;;  %v10409_v63 = vld [vmem:[%s14007_s6 + $0x728] ss:$24 sps:$4 sm:$0xff]   ;;  %v10417_v1 = vld [vmem:[%s14007_s6 + $0x75c] ss:$24 sps:$4 sm:$0xff]  }
 0x371   :  { %7647 = vmatprep.subr.bf16.mxu1 %v10360_v4  ;;  %v10415_v4 = vld [vmem:[%s14007_s6 + $0x758] ss:$24 sps:$4 sm:$0xff]  }
 0x373   :  { %7513 = vmatpush1.bf16.msra.mxu0 %v10406_v5  ;;  %v10423_v5 = vld [vmem:[%s14007_s6 + $0x78c] ss:$24 sps:$4 sm:$0xff]  }
 0x374   :  { %7648 = vmatpush1.bf16.msra.mxu1 %v10358_v0  ;;  %7514 = vmatprep.subr.bf16.mxu0 %v10414_v6  ;;  %v10421_v0 = vld [vmem:[%s14007_s6 + $0x788] ss:$24 sps:$4 sm:$0xff]   ;;  %v10429_v6 = vld [vmem:[%s14007_s6 + $0x7bc] ss:$24 sps:$4 sm:$0xff]  }
 0x375   :  { %7649 = vmatprep.subr.bf16.mxu1 %v10363_v9  ;;  %v10427_v9 = vld [vmem:[%s14007_s6 + $0x7b8] ss:$24 sps:$4 sm:$0xff]  }
 0x377   :  { %7515 = vmatpush1.bf16.msra.mxu0 %v10412_v11  ;;  %v10435_v11 = vld [vmem:[%s14007_s6 + $0x7ec] ss:$24 sps:$4 sm:$0xff]  }
 0x378   :  { %7650 = vmatpush1.bf16.msra.mxu1 %v10361_v13  ;;  %7516 = vmatprep.subr.bf16.mxu0 %v10420_v14  ;;  %v10433_v13 = vld [vmem:[%s14007_s6 + $0x7e8] ss:$24 sps:$4 sm:$0xff]   ;;  %v10441_v14 = vld [vmem:[%s14007_s6 + $0x81c] ss:$24 sps:$4 sm:$0xff]  }
 0x379   :  { %7651 = vmatprep.subr.bf16.mxu1 %v10366_v19  ;;  %v10439_v19 = vld [vmem:[%s14007_s6 + $0x818] ss:$24 sps:$4 sm:$0xff]  }
 0x37b   :  { %7517 = vmatpush1.bf16.msra.mxu0 %v10418_v20  ;;  %v10447_v20 = vld [vmem:[%s14007_s6 + $0x84c] ss:$24 sps:$4 sm:$0xff]  }
 0x37c   :  { %7652 = vmatpush1.bf16.msra.mxu1 %v10364_v23  ;;  %7518 = vmatprep.subr.bf16.mxu0 %v10426_v28  ;;  %v10445_v23 = vld [vmem:[%s14007_s6 + $0x848] ss:$24 sps:$4 sm:$0xff]   ;;  %v10453_v28 = vld [vmem:[%s14007_s6 + $0x87c] ss:$24 sps:$4 sm:$0xff]  }
 0x37d   :  { %7653 = vmatprep.subr.bf16.mxu1 %v10369_v29  ;;  %v3133_v29 = vrot.slane %v12972_v61, %v12519_v24 }
 0x37f   :  { %7519 = vmatpush1.bf16.msra.mxu0 %v10424_v30  ;;  %v3137_v30 = vrot.slane %v12972_v61, %v12522_v25 }
 0x380   :  { %7654 = vmatpush1.bf16.msra.mxu1 %v10367_v10  ;;  %7520 = vmatprep.subr.bf16.mxu0 %v10432_v12  ;;  %v10451_v10 = vld [vmem:[%s14007_s6 + $0x878] ss:$24 sps:$4 sm:$0xff]   ;;  %v10459_v12 = vld [vmem:[%s14007_s6 + $0x8ac] ss:$24 sps:$4 sm:$0xff]  }
 0x381   :  { %7664 = vmatprep.subr.bf16.mxu1 %v10375_v31 }
 0x383   :  { %7656 = vmatmul.mubr.bf16.vlgmr.msra.gmra.mrb[32].mxu1 %v13331_v32  ;;  %7521 = vmatpush1.bf16.msra.mxu0 %v10430_v16 }
 0x384   :  { %7665 = vmatpush1.bf16.msra.mxu1 %v10373_v43  ;;  %7522 = vmatprep.subr.bf16.mxu0 %v10438_v33 }
 0x385   :  { %7666 = vmatprep.subr.bf16.mxu1 %v10381_v18 }
 0x387   :  { %7523 = vmatpush1.bf16.msra.mxu0 %v10436_v22  ;;  %v10457_v22 = vld [vmem:[%s14007_s6 + $0x8a8] ss:$24 sps:$4 sm:$0xff]  }
 0x388   :  { %7667 = vmatpush1.bf16.msra.mxu1 %v10379_v36  ;;  %7524 = vmatprep.subr.bf16.mxu0 %v10444_v37 }
 0x389   :  { %7668 = vmatprep.subr.bf16.mxu1 %v10387_v27  ;;  %v10465_v27 = vld [vmem:[%s14007_s6 + $0x8dc] ss:$24 sps:$4 sm:$0xff]  }
 0x38b   :  { %7525 = vmatpush1.bf16.msra.mxu0 %v10442_v8 }
 0x38c   :  { %7669 = vmatpush1.bf16.msra.mxu1 %v10385_v60  ;;  %7526 = vmatprep.subr.bf16.mxu0 %v10450_v40 }
 0x38d   :  { %7670 = vmatprep.subr.bf16.mxu1 %v10393_v45 }
 0x38f   :  { %7527 = vmatpush1.bf16.msra.mxu0 %v10448_v41  ;;  %v10463_v41 = vld [vmem:[%s14007_s6 + $0x8d8] ss:$24 sps:$4 sm:$0xff]  }
 0x390   :  { %7671 = vmatpush1.bf16.msra.mxu1 %v10391_v46  ;;  %7528 = vmatprep.subr.bf16.mxu0 %v10456_v44  ;;  %v10471_v46 = vld [vmem:[%s14007_s6 + $0x90c] ss:$24 sps:$4 sm:$0xff]  }
 0x391   :  { %7672 = vmatprep.subr.bf16.mxu1 %v10399_v47 }
 0x393   :  { %7529 = vmatpush1.bf16.msra.mxu0 %v10454_v50 }
 0x394   :  { %7673 = vmatpush1.bf16.msra.mxu1 %v10397_v35  ;;  %7530 = vmatprep.subr.bf16.mxu0 %v10462_v52  ;;  %v3141_v52 = vrot.slane %v12972_v61, %v448_v7 }
 0x395   :  { %7674 = vmatprep.subr.bf16.mxu1 %v10405_v21 }
 0x397   :  { %7531 = vmatpush1.bf16.msra.mxu0 %v10460_v54 }
 0x398   :  { %7675 = vmatpush1.bf16.msra.mxu1 %v10403_v59  ;;  %7541 = vmatprep.subr.bf16.mxu0 %v10468_v62 }
 0x399   :  { %7676 = vmatprep.subr.bf16.mxu1 %v10411_v58 }
 0x39c   :  { %7677 = vmatpush1.bf16.msra.mxu1 %v10409_v63 }
 0x39d   :  { %7678 = vmatprep.subr.bf16.mxu1 %v10417_v1 }
 0x3a0   :  { %7679 = vmatpush1.bf16.msra.mxu1 %v10415_v4 }
 0x3a1   :  { %7680 = vmatprep.subr.bf16.mxu1 %v10423_v5 }
 0x3a4   :  { %7681 = vmatpush1.bf16.msra.mxu1 %v10421_v0 }
 0x3a5   :  { %7682 = vmatprep.subr.bf16.mxu1 %v10429_v6 }
 0x3a8   :  { %7683 = vmatpush1.bf16.msra.mxu1 %v10427_v9 }
 0x3a9   :  { %7684 = vmatprep.subr.bf16.mxu1 %v10435_v11 }
 0x3ac   :  { %7685 = vmatpush1.bf16.msra.mxu1 %v10433_v13 }
 0x3ad   :  { %7686 = vmatprep.subr.bf16.mxu1 %v10441_v14 }
 0x3b0   :  { %7687 = vmatpush1.bf16.msra.mxu1 %v10439_v19 }
 0x3b1   :  { %7688 = vmatprep.subr.bf16.mxu1 %v10447_v20 }
 0x3b4   :  { %7689 = vmatpush1.bf16.msra.mxu1 %v10445_v23  ;;  %v10466_v23 = vld [vmem:[%s14007_s6 + $0x900] ss:$24 sps:$4 sm:$0xff]  }
 0x3b5   :  { %7690 = vmatprep.subr.bf16.mxu1 %v10453_v28  ;;  %v10469_v28 = vld [vmem:[%s14007_s6 + $0x908] ss:$24 sps:$4 sm:$0xff]  }
 0x3b6   :  { %v5239_v31 = vpop.f32.mrb[24].mxu1 }
 0x3b7   :  { %v9124_v16 = vadd.f32 %v5239_v31, %v3133_v29  ;;  %v5241_v43 = vpop.f32.mrb[25].mxu1  ;;  %v10480_v31 = vld [vmem:[%s14007_s6 + $0x14] ss:$24 sps:$4 sm:$0xff]  }
 0x3b8   :  { %v9125_v33 = vadd.f32 %v5241_v43, %v3137_v30  ;;  %v5243_v18 = vpop.f32.mrb[26].mxu1  ;;  %7691 = vmatpush1.bf16.msra.mxu1 %v10451_v10  ;;  %v10474_v10 = vld [vmem:[%s14007_s6 + $0x934] ss:$24 sps:$4 sm:$0xff]   ;;  %v10693_v43 = vmov 0  }
 0x3b9   :  { %v5465_v36 = vmul.f32 0.5, %v9124_v16  ;;  %v5244_v37 = vpop.f32.mrb[27].mxu1  ;;  %7692 = vmatprep.subr.bf16.mxu1 %v10459_v12  ;;  %v10475_v12 = vld [vmem:[%s14007_s6 + $0x938] ss:$24 sps:$4 sm:$0xff]  }
 0x3ba   :  { %v5439_v8 = vcombine.low %v9124_v16, %v9125_v33  ;;  %v5466_v60 = vmul.f32 0.5, %v9125_v33  ;;  %v10478_v18 = vld [vmem:[%s14007_s6 + $0x10] ss:$24 sps:$4 sm:$0xff]  }
 0x3bb   :  { %v5476_v40 = vmul.f32 1.442695, %v5465_v36  ;;  %v10486_v36 = vld [vmem:[%s14007_s6 + $0x74] ss:$24 sps:$4 sm:$0xff]   ;;  %v10484_v37 = vld [vmem:[%s14007_s6 + $0x70] ss:$24 sps:$4 sm:$0xff]  }
 0x3bc   :  { %v5478_v45 = vmul.f32 1.442695, %v5466_v60  ;;  %7693 = vmatpush1.bf16.msra.mxu1 %v10457_v22  ;;  %v5446_v4 = vrot.slane %v5439_v8, %v12295_v26  ;;  %v10492_v8 = vld [vmem:[%s14007_s6 + $0xd4] ss:$24 sps:$4 sm:$0xff]   ;;  %v10490_v60 = vld [vmem:[%s14007_s6 + $0xd0] ss:$24 sps:$4 sm:$0xff]  }
 0x3bd   :  { %10636 = vpow2.f32 %v5476_v40  ;;  %7694 = vmatprep.subr.bf16.mxu1 %v10465_v27  ;;  %v10489_v27 = vld [vmem:[%s14007_s6 + $0xa4] ss:$24 sps:$4 sm:$0xff]  }
 0x3be   :  { %10638 = vpow2.f32 %v5478_v45  ;;  %v10495_v40 = vld [vmem:[%s14007_s6 + $0x104] ss:$24 sps:$4 sm:$0xff]   ;;  %v10493_v45 = vld [vmem:[%s14007_s6 + $0x100] ss:$24 sps:$4 sm:$0xff]  }
 0x3c0   :  { %7695 = vmatpush1.bf16.msra.mxu1 %v10463_v41  ;;  %v10498_v41 = vld [vmem:[%s14007_s6 + $0x134] ss:$24 sps:$4 sm:$0xff]  }
 0x3c1   :  { %7705 = vmatprep.subr.bf16.mxu1 %v10471_v46  ;;  %v10496_v46 = vld [vmem:[%s14007_s6 + $0x130] ss:$24 sps:$4 sm:$0xff]  }
 0x3c7   :  { %v10637_v44 = vpop.eup %10636 }
 0x3c8   :  { %v10639_v47 = vpop.eup %10638 }
 0x3c9   :  { %v5506_v50 = vcombine.low %v10637_v44, %v10639_v47  ;;  %v10501_v44 = vld [vmem:[%s14007_s6 + $0x164] ss:$24 sps:$4 sm:$0xff]   ;;  %v10499_v47 = vld [vmem:[%s14007_s6 + $0x160] ss:$24 sps:$4 sm:$0xff]  }
 0x3cb   :  { %v5513_v7 = vrot.slane %v5506_v50, %v12295_v26  ;;  %v10504_v50 = vld [vmem:[%s14007_s6 + $0x194] ss:$24 sps:$4 sm:$0xff]  }
 0x3d6   :  { %v9062_v35 = vpop.f32.mrb[28].mxu1 }
 0x3d7   :  { %v9063_v21 = vpop.f32.mrb[29].mxu1 }
 0x3d8   :  { %v9064_v54 = vadd.f32 %v9063_v21, %v9062_v35  ;;  %v9065_v59 = vpop.f32.mrb[30].mxu1  ;;  %v10502_v35 = vld [vmem:[%s14007_s6 + $0x190] ss:$24 sps:$4 sm:$0xff]   ;;  %v10505_v21 = vld [vmem:[%s14007_s6 + $0x1c0] ss:$24 sps:$4 sm:$0xff]  }
 0x3d9   :  { %v9066_v62 = vpop.f32.mrb[31].mxu1  ;;  %v10508_v59 = vld [vmem:[%s14007_s6 + $0x1f0] ss:$24 sps:$4 sm:$0xff]  }
 0x3da   :  { %v5281_v58 = vadd.f32 %v9064_v54, %v3141_v52  ;;  %v10507_v52 = vld [vmem:[%s14007_s6 + $0x1c4] ss:$24 sps:$4 sm:$0xff]   ;;  %v10510_v54 = vld [vmem:[%s14007_s6 + $0x1f4] ss:$24 sps:$4 sm:$0xff]  }
 0x3db   :  { %v10513_v62 = vld [vmem:[%s14007_s6 + $0x224] ss:$24 sps:$4 sm:$0xff]  }
 0x3dc   :  { %v5321_v63 = vadd.f32 %v13250_v51, %v5281_v58  ;;  %v5460_v51 = vld [vmem:[%s14006_s5 + $0x8] sm:$0x3f]  ;;  %v10511_v58 = vld [vmem:[%s14007_s6 + $0x220] ss:$24 sps:$4 sm:$0xff]  }
 0x3de   :  { %v5361_v1 = vadd.f32 %v13352_v2, %v5321_v63  ;;  %v10516_v63 = vld [vmem:[%s14007_s6 + $0x254] ss:$24 sps:$4 sm:$0xff]  }
 0x3e0   :  { %v5453_v5 = vrot.slane %v5361_v1, %v12295_v26  ;;  %v5467_v0 = vmul.f32 0.5, %v5361_v1  ;;  %v10514_v1 = vld [vmem:[%s14007_s6 + $0x250] ss:$24 sps:$4 sm:$0xff]  }
 0x3e2   :  { %v5480_v6 = vmul.f32 1.442695, %v5467_v0  ;;  %v5454_v9 = vcombine.low %v5446_v4, %v5453_v5  ;;  %v10519_v4 = vld [vmem:[%s14007_s6 + $0x284] ss:$24 sps:$4 sm:$0xff]   ;;  %v10517_v5 = vld [vmem:[%s14007_s6 + $0x280] ss:$24 sps:$4 sm:$0xff]  }
 0x3e3   :  { %v10522_v0 = vld [vmem:[%s14007_s6 + $0x2b4] ss:$24 sps:$4 sm:$0xff]  }
 0x3e4   :  { %10640 = vpow2.f32 %v5480_v6  ;;  %5458 = vst.msk [vmem:[#allocation4 + $0x8] sm:$0x3f] %vm12604_vm4, %v5454_v9  ;;  %v10520_v6 = vld [vmem:[%s14007_s6 + $0x2b0] ss:$24 sps:$4 sm:$0xff]   ;;  %v10525_v9 = vld [vmem:[%s14007_s6 + $0x2e4] ss:$24 sps:$4 sm:$0xff]  }
 0x3ee   :  { %v10641_v42 = vpop.eup %10640 }
 0x3ef   :  { %v5520_v61 = vrot.slane %v10641_v42, %v12295_v26  ;;  %v10523_v42 = vld [vmem:[%s14007_s6 + $0x2e0] ss:$24 sps:$4 sm:$0xff]  }
 0x3f1   :  { %v5521_v2 = vcombine.low %v5513_v7, %v5520_v61  ;;  %v10528_v7 = vld [vmem:[%s14007_s6 + $0x314] ss:$24 sps:$4 sm:$0xff]   ;;  %v10526_v61 = vld [vmem:[%s14007_s6 + $0x310] ss:$24 sps:$4 sm:$0xff]  }
 0x3f3   :  { %v5525_v11 = vmul.f32 %v5521_v2, %v5460_v51  ;;  %v10531_v51 = vld [vmem:[%s14007_s6 + $0x344] ss:$24 sps:$4 sm:$0xff]   ;;  %v10529_v2 = vld [vmem:[%s14007_s6 + $0x340] ss:$24 sps:$4 sm:$0xff]  }
 0x3f5   :  { %v5552_v13 = vrot.slane %v5525_v11, %v12295_v26  ;;  %v5545_v29 = vcombine.high %v5525_v11, %v5525_v11  ;;  %v10534_v11 = vld [vmem:[%s14007_s6 + $0x374] ss:$24 sps:$4 sm:$0xff]  }
 0x3f7   :  { %v5560_v14 = vcombine.high %v5552_v13, %v5552_v13  ;;  %v5572_v19 = vadd.f32 %v12556_v38, %v5552_v13  ;;  %v10477_v38 = vld [vmem:[%s14007_s6 + $0x93c] ss:$24 sps:$4 sm:$0xff]   ;;  %v5559_v16 = vrot.slane %v5545_v29, %v12295_v26  ;;  %v10532_v13 = vld [vmem:[%s14007_s6 + $0x370] ss:$24 sps:$4 sm:$0xff]  }
 0x3f8   :  { %v10483_v26 = vld [vmem:[%s14007_s6 + $0x44] ss:$24 sps:$4 sm:$0xff]   ;;  %v10544_v29 = vld [vmem:[%s14007_s6 + $0x430] ss:$24 sps:$4 sm:$0xff]  }
 0x3f9   :  { %v5573_v20 = vadd.f32 %v12559_v39, %v5560_v14  ;;  %v13615_v30 = vpack.c.bf16 %v5572_v19, %v5572_v19  ;;  %v10472_v39 = vld [vmem:[%s14007_s6 + $0x930] ss:$24 sps:$4 sm:$0xff]   ;;  %v5574_v33 = vadd.f32 %v5559_v16, %v12585_v55  ;;  %v10481_v55 = vld [vmem:[%s14007_s6 + $0x40] ss:$24 sps:$4 sm:$0xff]   ;;  %v10540_v14 = vld [vmem:[%s14007_s6 + $0x3d4] ss:$24 sps:$4 sm:$0xff]  }
 0x3fa   :  { %v10538_v19 = vld [vmem:[%s14007_s6 + $0x3d0] ss:$24 sps:$4 sm:$0xff]   ;;  %v10553_v16 = vld [vmem:[%s14007_s6 + $0x4c0] ss:$24 sps:$4 sm:$0xff]  }
 0x3fb   :  { %v13607_v3 = vpack.c.bf16 %v5573_v20, %v5573_v20  ;;  %v13643_v22 = vpack.c.bf16 %v5574_v33, %v5574_v33  ;;  %v10543_v20 = vld [vmem:[%s14007_s6 + $0x404] ss:$24 sps:$4 sm:$0xff]   ;;  %v10558_v33 = vld [vmem:[%s14007_s6 + $0x4f4] ss:$24 sps:$4 sm:$0xff]  }
 0x3fd   :  { %7532 = vmatprep.mubr.bf16.mxu0 %v13607_v3  ;;  %7696 = vmatprep.mubr.bf16.mxu1 %v13607_v3 }
 0x3fe   :  { %7533 = vmatmul.mubr.bf16.vlgmr.msra.gmra.mrb[20].mxu0 %v13615_v30  ;;  %7697 = vmatmul.mubr.bf16.vlgmr.msra.gmra.mrb[32].mxu1 %v13615_v30 }
 0x3ff   :  { %7542 = vmatpush1.bf16.msra.mxu0 %v10466_v23  ;;  %7706 = vmatpush1.bf16.msra.mxu1 %v10469_v28  ;;  %v10541_v23 = vld [vmem:[%s14007_s6 + $0x400] ss:$24 sps:$4 sm:$0xff]   ;;  %v10546_v28 = vld [vmem:[%s14007_s6 + $0x434] ss:$24 sps:$4 sm:$0xff]  }
 0x400   :  { %7543 = vmatprep.subr.bf16.mxu0 %v10474_v10  ;;  %7707 = vmatprep.subr.bf16.mxu1 %v10477_v38  ;;  %v10549_v10 = vld [vmem:[%s14007_s6 + $0x464] ss:$24 sps:$4 sm:$0xff]   ;;  %v10547_v38 = vld [vmem:[%s14007_s6 + $0x460] ss:$24 sps:$4 sm:$0xff]  }
 0x401   :  { %7573 = vmatprep.mubr.bf16.mxu0 %v10693_v43  ;;  %7737 = vmatprep.mubr.bf16.mxu1 %v10693_v43 }
 0x403   :  { %7544 = vmatpush1.bf16.msra.mxu0 %v10472_v39  ;;  %7708 = vmatpush1.bf16.msra.mxu1 %v10475_v12  ;;  %v10552_v39 = vld [vmem:[%s14007_s6 + $0x494] ss:$24 sps:$4 sm:$0xff]   ;;  %v10550_v12 = vld [vmem:[%s14007_s6 + $0x490] ss:$24 sps:$4 sm:$0xff]  }
 0x404   :  { %7746 = vmatprep.subr.bf16.mxu0 %v10480_v31  ;;  %v10555_v31 = vld [vmem:[%s14007_s6 + $0x4c4] ss:$24 sps:$4 sm:$0xff]  }
 0x40a   :  { %8974 = vmatmul.mubr.msk.bf16.vlgmr.msra.gmra.mrb[20].mxu0 %vm7414_vm5, %v13643_v22  ;;  %8975 = vmatmul.mubr.msk.bf16.vlgmr.msra.gmra.mrb[32].mxu1 %vm7414_vm5, %v13643_v22 }
 0x40b   :  { %7747 = vmatpush1.bf16.msra.mxu0 %v10478_v18  ;;  %7778 = vmatprep.mubr.bf16.mxu0 %v13119_v48  ;;  %v10487_v48 = vld [vmem:[%s14007_s6 + $0xa0] ss:$24 sps:$4 sm:$0xff]   ;;  %v10556_v18 = vld [vmem:[%s14007_s6 + $0x4f0] ss:$24 sps:$4 sm:$0xff]  }
 0x40c   :  { %7748 = vmatprep.subr.bf16.mxu0 %v10483_v26  ;;  %v10561_v26 = vld [vmem:[%s14007_s6 + $0x524] ss:$24 sps:$4 sm:$0xff]  }
 0x40f   :  { %7749 = vmatpush1.bf16.msra.mxu0 %v10481_v55  ;;  %v10559_v55 = vld [vmem:[%s14007_s6 + $0x520] ss:$24 sps:$4 sm:$0xff]  }
 0x410   :  { %7750 = vmatprep.subr.bf16.mxu0 %v10486_v36  ;;  %v10564_v36 = vld [vmem:[%s14007_s6 + $0x554] ss:$24 sps:$4 sm:$0xff]  }
 0x413   :  { %7751 = vmatpush1.bf16.msra.mxu0 %v10484_v37  ;;  %v10562_v37 = vld [vmem:[%s14007_s6 + $0x550] ss:$24 sps:$4 sm:$0xff]  }
 0x414   :  { %7752 = vmatprep.subr.bf16.mxu0 %v10489_v27  ;;  %v10567_v27 = vld [vmem:[%s14007_s6 + $0x584] ss:$24 sps:$4 sm:$0xff]  }
 0x417   :  { %7753 = vmatpush1.bf16.msra.mxu0 %v10487_v48  ;;  %v10565_v48 = vld [vmem:[%s14007_s6 + $0x580] ss:$24 sps:$4 sm:$0xff]  }
 0x418   :  { %7754 = vmatprep.subr.bf16.mxu0 %v10492_v8  ;;  %v10570_v8 = vld [vmem:[%s14007_s6 + $0x5b4] ss:$24 sps:$4 sm:$0xff]  }
 0x41b   :  { %7755 = vmatpush1.bf16.msra.mxu0 %v10490_v60  ;;  %v10568_v60 = vld [vmem:[%s14007_s6 + $0x5b0] ss:$24 sps:$4 sm:$0xff]  }
 0x41c   :  { %7756 = vmatprep.subr.bf16.mxu0 %v10495_v40  ;;  %v10573_v40 = vld [vmem:[%s14007_s6 + $0x5e4] ss:$24 sps:$4 sm:$0xff]  }
 0x41f   :  { %7757 = vmatpush1.bf16.msra.mxu0 %v10493_v45  ;;  %v10571_v45 = vld [vmem:[%s14007_s6 + $0x5e0] ss:$24 sps:$4 sm:$0xff]  }
 0x420   :  { %7758 = vmatprep.subr.bf16.mxu0 %v10498_v41  ;;  %v10576_v41 = vld [vmem:[%s14007_s6 + $0x614] ss:$24 sps:$4 sm:$0xff]  }
 0x423   :  { %7759 = vmatpush1.bf16.msra.mxu0 %v10496_v46  ;;  %v10574_v46 = vld [vmem:[%s14007_s6 + $0x610] ss:$24 sps:$4 sm:$0xff]  }
 0x424   :  { %7760 = vmatprep.subr.bf16.mxu0 %v10501_v44  ;;  %v10579_v44 = vld [vmem:[%s14007_s6 + $0x644] ss:$24 sps:$4 sm:$0xff]  }
 0x427   :  { %7761 = vmatpush1.bf16.msra.mxu0 %v10499_v47  ;;  %v10577_v47 = vld [vmem:[%s14007_s6 + $0x640] ss:$24 sps:$4 sm:$0xff]  }
 0x428   :  { %7762 = vmatprep.subr.bf16.mxu0 %v10504_v50  ;;  %v10582_v50 = vld [vmem:[%s14007_s6 + $0x674] ss:$24 sps:$4 sm:$0xff]  }
 0x42b   :  { %7763 = vmatpush1.bf16.msra.mxu0 %v10502_v35  ;;  %v10580_v35 = vld [vmem:[%s14007_s6 + $0x670] ss:$24 sps:$4 sm:$0xff]  }
 0x42c   :  { %7764 = vmatprep.subr.bf16.mxu0 %v10507_v52  ;;  %v10588_v52 = vld [vmem:[%s14007_s6 + $0x6d4] ss:$24 sps:$4 sm:$0xff]  }
 0x42f   :  { %7765 = vmatpush1.bf16.msra.mxu0 %v10505_v21  ;;  %v10586_v21 = vld [vmem:[%s14007_s6 + $0x6d0] ss:$24 sps:$4 sm:$0xff]  }
 0x430   :  { %7766 = vmatprep.subr.bf16.mxu0 %v10510_v54  ;;  %v10591_v54 = vld [vmem:[%s14007_s6 + $0x704] ss:$24 sps:$4 sm:$0xff]  }
 0x433   :  { %7767 = vmatpush1.bf16.msra.mxu0 %v10508_v59  ;;  %v10589_v59 = vld [vmem:[%s14007_s6 + $0x700] ss:$24 sps:$4 sm:$0xff]  }
 0x434   :  { %7768 = vmatprep.subr.bf16.mxu0 %v10513_v62  ;;  %v10594_v62 = vld [vmem:[%s14007_s6 + $0x734] ss:$24 sps:$4 sm:$0xff]  }
 0x437   :  { %7769 = vmatpush1.bf16.msra.mxu0 %v10511_v58  ;;  %v10592_v58 = vld [vmem:[%s14007_s6 + $0x730] ss:$24 sps:$4 sm:$0xff]  }
 0x438   :  { %7770 = vmatprep.subr.bf16.mxu0 %v10516_v63  ;;  %v10597_v63 = vld [vmem:[%s14007_s6 + $0x764] ss:$24 sps:$4 sm:$0xff]  }
 0x43b   :  { %7771 = vmatpush1.bf16.msra.mxu0 %v10514_v1  ;;  %v10595_v1 = vld [vmem:[%s14007_s6 + $0x760] ss:$24 sps:$4 sm:$0xff]  }
 0x43c   :  { %7772 = vmatprep.subr.bf16.mxu0 %v10519_v4  ;;  %v10600_v4 = vld [vmem:[%s14007_s6 + $0x794] ss:$24 sps:$4 sm:$0xff]  }
 0x43f   :  { %7773 = vmatpush1.bf16.msra.mxu0 %v10517_v5  ;;  %v10598_v5 = vld [vmem:[%s14007_s6 + $0x790] ss:$24 sps:$4 sm:$0xff]  }
 0x440   :  { %7774 = vmatprep.subr.bf16.mxu0 %v10522_v0  ;;  %v10603_v0 = vld [vmem:[%s14007_s6 + $0x7c4] ss:$24 sps:$4 sm:$0xff]  }
 0x443   :  { %7775 = vmatpush1.bf16.msra.mxu0 %v10520_v6  ;;  %v10601_v6 = vld [vmem:[%s14007_s6 + $0x7c0] ss:$24 sps:$4 sm:$0xff]  }
 0x444   :  { %7776 = vmatprep.subr.bf16.mxu0 %v10525_v9  ;;  %v10606_v9 = vld [vmem:[%s14007_s6 + $0x7f4] ss:$24 sps:$4 sm:$0xff]  }
 0x447   :  { %7777 = vmatpush1.bf16.msra.mxu0 %v10523_v42  ;;  %v10604_v42 = vld [vmem:[%s14007_s6 + $0x7f0] ss:$24 sps:$4 sm:$0xff]  }
 0x448   :  { %7787 = vmatprep.subr.bf16.mxu0 %v10528_v7  ;;  %v10609_v7 = vld [vmem:[%s14007_s6 + $0x824] ss:$24 sps:$4 sm:$0xff]  }
 0x44a   :  { %7779 = vmatmul.mubr.bf16.vlgmr.msra.gmra.mrb[24].mxu0 %v13125_v34  ;;  %v10537_v34 = vld [vmem:[%s14007_s6 + $0x3a4] ss:$24 sps:$4 sm:$0xff]  }
 0x44b   :  { %7788 = vmatpush1.bf16.msra.mxu0 %v10526_v61  ;;  %7819 = vmatprep.mubr.bf16.mxu0 %v13135_v53  ;;  %v10535_v53 = vld [vmem:[%s14007_s6 + $0x3a0] ss:$24 sps:$4 sm:$0xff]  }
 0x44c   :  { %7789 = vmatprep.subr.bf16.mxu0 %v10531_v51  ;;  %v10607_v61 = vld [vmem:[%s14007_s6 + $0x820] ss:$24 sps:$4 sm:$0xff]   ;;  %v10612_v51 = vld [vmem:[%s14007_s6 + $0x854] ss:$24 sps:$4 sm:$0xff]  }
 0x44f   :  { %7790 = vmatpush1.bf16.msra.mxu0 %v10529_v2  ;;  %v10610_v2 = vld [vmem:[%s14007_s6 + $0x850] ss:$24 sps:$4 sm:$0xff]  }
 0x450   :  { %7791 = vmatprep.subr.bf16.mxu0 %v10534_v11  ;;  %v10615_v11 = vld [vmem:[%s14007_s6 + $0x884] ss:$24 sps:$4 sm:$0xff]  }
 0x453   :  { %7792 = vmatpush1.bf16.msra.mxu0 %v10532_v13  ;;  %v10613_v13 = vld [vmem:[%s14007_s6 + $0x880] ss:$24 sps:$4 sm:$0xff]  }
 0x454   :  { %7793 = vmatprep.subr.bf16.mxu0 %v10537_v34  ;;  %v10618_v34 = vld [vmem:[%s14007_s6 + $0x8b4] ss:$24 sps:$4 sm:$0xff]  }
 0x457   :  { %7794 = vmatpush1.bf16.msra.mxu0 %v10535_v53  ;;  %v10616_v53 = vld [vmem:[%s14007_s6 + $0x8b0] ss:$24 sps:$4 sm:$0xff]  }
 0x458   :  { %7795 = vmatprep.subr.bf16.mxu0 %v10540_v14  ;;  %v10621_v14 = vld [vmem:[%s14007_s6 + $0x8e4] ss:$24 sps:$4 sm:$0xff]  }
 0x45b   :  { %7796 = vmatpush1.bf16.msra.mxu0 %v10538_v19  ;;  %v10619_v19 = vld [vmem:[%s14007_s6 + $0x8e0] ss:$24 sps:$4 sm:$0xff]  }
 0x45c   :  { %7797 = vmatprep.subr.bf16.mxu0 %v10543_v20  ;;  %v10624_v20 = vld [vmem:[%s14007_s6 + $0x914] ss:$24 sps:$4 sm:$0xff]  }
 0x45f   :  { %7798 = vmatpush1.bf16.msra.mxu0 %v10541_v23  ;;  %v10622_v23 = vld [vmem:[%s14007_s6 + $0x910] ss:$24 sps:$4 sm:$0xff]  }
 0x460   :  { %7799 = vmatprep.subr.bf16.mxu0 %v10546_v28  ;;  %v10627_v28 = vld [vmem:[%s14007_s6 + $0x944] ss:$24 sps:$4 sm:$0xff]  }
 0x463   :  { %7800 = vmatpush1.bf16.msra.mxu0 %v10544_v29  ;;  %v10625_v29 = vld [vmem:[%s14007_s6 + $0x940] ss:$24 sps:$4 sm:$0xff]  }
 0x464   :  { %7801 = vmatprep.subr.bf16.mxu0 %v10549_v10  ;;  %v13955_v10 = vld [vmem:[%s14008_s7] sm:$0x3f] }
 0x467   :  { %7802 = vmatpush1.bf16.msra.mxu0 %v10547_v38  ;;  %v5895_v38 = vrot.slane %v13955_v10, %v12244_v56 }
 0x468   :  { %7803 = vmatprep.subr.bf16.mxu0 %v10552_v39  ;;  %v5891_v39 = vrot.slane %v13955_v10, %v11835_v17 }
 0x46b   :  { %7804 = vmatpush1.bf16.msra.mxu0 %v10550_v12 }
 0x46c   :  { %7805 = vmatprep.subr.bf16.mxu0 %v10555_v31 }
 0x46f   :  { %7806 = vmatpush1.bf16.msra.mxu0 %v10553_v16 }
 0x470   :  { %7807 = vmatprep.subr.bf16.mxu0 %v10558_v33 }
 0x473   :  { %7808 = vmatpush1.bf16.msra.mxu0 %v10556_v18 }
 0x474   :  { %7809 = vmatprep.subr.bf16.mxu0 %v10561_v26 }
 0x477   :  { %7810 = vmatpush1.bf16.msra.mxu0 %v10559_v55 }
 0x478   :  { %7811 = vmatprep.subr.bf16.mxu0 %v10564_v36 }
 0x47b   :  { %7812 = vmatpush1.bf16.msra.mxu0 %v10562_v37 }
 0x47c   :  { %7813 = vmatprep.subr.bf16.mxu0 %v10567_v27 }
 0x47f   :  { %7814 = vmatpush1.bf16.msra.mxu0 %v10565_v48 }
 0x480   :  { %7815 = vmatprep.subr.bf16.mxu0 %v10570_v8 }
 0x483   :  { %7816 = vmatpush1.bf16.msra.mxu0 %v10568_v60 }
 0x484   :  { %7817 = vmatprep.subr.bf16.mxu0 %v10573_v40 }
 0x487   :  { %7818 = vmatpush1.bf16.msra.mxu0 %v10571_v45 }
 0x488   :  { %7828 = vmatprep.subr.bf16.mxu0 %v10576_v41 }
 0x48a   :  { %7820 = vmatmul.mubr.bf16.vlgmr.msra.gmra.mrb[24].mxu0 %v13331_v32  ;;  %v10585_v32 = vld [vmem:[%s14007_s6 + $0x6a4] ss:$24 sps:$4 sm:$0xff]  }
 0x48b   :  { %7829 = vmatpush1.bf16.msra.mxu0 %v10574_v46  ;;  %7860 = vmatprep.mubr.bf16.mxu0 %v13607_v3  ;;  %v10583_v3 = vld [vmem:[%s14007_s6 + $0x6a0] ss:$24 sps:$4 sm:$0xff]   ;;  %s10694_s6 = smov [#allocation2]  }
 0x48c   :  { %7830 = vmatprep.subr.bf16.mxu0 %v10579_v44  ;;  %s7976_s7 = sshll.u32 %s10694_s6, 4  ;;  %s7977_s7 = int_to_ptr.vmem [resolvable:$true] %s7976_s7 }
 0x48d   :  { %s10643_s22 = scalar_lea.vmem %s7977_s7, 224  ;;  %p10648_p1 = scmp.lt.s32.totalorder %s7977_s7, %s7977_s7 }
 0x48e   :  { %p10644_p0 = scmp.ne.s32.totalorder %s7977_s7, %s10643_s22  ;;  %p10649_p2 = scmp.lt.s32.totalorder %s10643_s22, %s10643_s22 }
 0x48f   :  { %7831 = vmatpush1.bf16.msra.mxu0 %v10577_v47 }
 0x490   :  { %7832 = vmatprep.subr.bf16.mxu0 %v10582_v50  ;;  %p10650_p3 = por %p10649_p2, %p10648_p1 }
 0x492   :  { %p10651_p4 = pnand %p10650_p3, %p10644_p0 }
 0x493   :  { %7833 = vmatpush1.bf16.msra.mxu0 %v10580_v35 }
 0x494   :  { %7834 = vmatprep.subr.bf16.mxu0 %v10585_v32 }
 0x497   :  { %7835 = vmatpush1.bf16.msra.mxu0 %v10583_v3 }
 0x498   :  { %7836 = vmatprep.subr.bf16.mxu0 %v10588_v52 }
 0x49b   :  { %7837 = vmatpush1.bf16.msra.mxu0 %v10586_v21 }
 0x49c   :  { %7838 = vmatprep.subr.bf16.mxu0 %v10591_v54 }
 0x49f   :  { %7839 = vmatpush1.bf16.msra.mxu0 %v10589_v59 }
 0x4a0   :  { %7840 = vmatprep.subr.bf16.mxu0 %v10594_v62 }
 0x4a3   :  { %7841 = vmatpush1.bf16.msra.mxu0 %v10592_v58 }
 0x4a4   :  { %7842 = vmatprep.subr.bf16.mxu0 %v10597_v63 }
 0x4a7   :  { %7843 = vmatpush1.bf16.msra.mxu0 %v10595_v1 }
 0x4a8   :  { %7844 = vmatprep.subr.bf16.mxu0 %v10600_v4 }
 0x4ab   :  { %7845 = vmatpush1.bf16.msra.mxu0 %v10598_v5 }
 0x4ac   :  { %7846 = vmatprep.subr.bf16.mxu0 %v10603_v0 }
 0x4af   :  { %7847 = vmatpush1.bf16.msra.mxu0 %v10601_v6 }
 0x4b0   :  { %7848 = vmatprep.subr.bf16.mxu0 %v10606_v9 }
 0x4b3   :  { %7849 = vmatpush1.bf16.msra.mxu0 %v10604_v42 }
 0x4b4   :  { %7850 = vmatprep.subr.bf16.mxu0 %v10609_v7 }
 0x4b7   :  { %7851 = vmatpush1.bf16.msra.mxu0 %v10607_v61 }
 0x4b8   :  { %7852 = vmatprep.subr.bf16.mxu0 %v10612_v51 }
 0x4bb   :  { %7853 = vmatpush1.bf16.msra.mxu0 %v10610_v2 }
 0x4bc   :  { %7854 = vmatprep.subr.bf16.mxu0 %v10615_v11 }
 0x4bf   :  { %7855 = vmatpush1.bf16.msra.mxu0 %v10613_v13 }
 0x4c0   :  { %7856 = vmatprep.subr.bf16.mxu0 %v10618_v34 }
 0x4c3   :  { %7857 = vmatpush1.bf16.msra.mxu0 %v10616_v53 }
 0x4c4   :  { %7858 = vmatprep.subr.bf16.mxu0 %v10621_v14 }
 0x4c7   :  { %7859 = vmatpush1.bf16.msra.mxu0 %v10619_v19 }
 0x4c8   :  { %7869 = vmatprep.subr.bf16.mxu0 %v10624_v20 }
 0x4ca   :  { %7861 = vmatmul.mubr.bf16.vlgmr.msra.gmra.mrb[24].mxu0 %v13615_v30  ;;  %v5887_v30 = vrot.slane %v13955_v10, %v11829_v15 }
 0x4cb   :  { %7870 = vmatpush1.bf16.msra.mxu0 %v10622_v23  ;;  %7901 = vmatprep.mubr.bf16.mxu0 %v10693_v43  ;;  %v5899_v43 = vrot.slane %v13955_v10, %v12247_v57 }
 0x4cc   :  { %7871 = vmatprep.subr.bf16.mxu0 %v10627_v28 }
 0x4cf   :  { %7872 = vmatpush1.bf16.msra.mxu0 %v10625_v29 }
 0x4d6   :  { %8976 = vmatmul.mubr.msk.bf16.vlgmr.msra.gmra.mrb[24].mxu0 %vm7414_vm5, %v13643_v22 }
 0x4dd   :  { %v7575_v12 = vpop.f32.mrb[20].mxu0  ;;  %v7739_v31 = vpop.f32.mrb[32].mxu1 }
 0x4de   :  { %v9126_v22 = vadd.f32 %v7575_v12, %v5887_v30  ;;  %v9128_v16 = vadd.f32 %v7739_v31, %v5895_v38  ;;  %v7577_v33 = vpop.f32.mrb[21].mxu0  ;;  %v7741_v18 = vpop.f32.mrb[33].mxu1 }
 0x4df   :  { %v9127_v26 = vadd.f32 %v7577_v33, %v5891_v39  ;;  %v9129_v55 = vadd.f32 %v7741_v18, %v5899_v43  ;;  %v7579_v36 = vpop.f32.mrb[22].mxu0  ;;  %v7743_v37 = vpop.f32.mrb[34].mxu1 }
 0x4e0   :  { %v7910_v15 = vmax.f32 %v9126_v22, 0.0  ;;  %v7912_v27 = vmax.f32 %v9128_v16, 0.0  ;;  %v7580_v48 = vpop.f32.mrb[23].mxu0  ;;  %v7744_v56 = vpop.f32.mrb[35].mxu1 }
 0x4e1   :  { %v7911_v8 = vmax.f32 %v9127_v26, 0.0  ;;  %v7913_v60 = vmax.f32 %v9129_v55, 0.0 }
 0x4e3   :  { %v8977_v17 = vpack.c.bf16 %v7911_v8, %v7910_v15  ;;  %v8978_v40 = vpack.c.bf16 %v7913_v60, %v7912_v27 }
 0x4e5   :  { %v7937_v57 = vrot.slane %v8977_v17, %v10886_v49  ;;  %v7944_v45 = vrot.slane %v8978_v40, %v10886_v49 }
 0x4e7   :  { %v7952_v41 = vcombine.low %v7937_v57, %v7944_v45 }
 0x4e8   :  { %10654 = shalt.err (!%p10651_p4)
}
 0x4e9   :  { %s10655_s24 = scalar_lea.hbm %s14009_s8, 224 }
 0x4ea   :  { %p10656_p5 = scmp.ne.s32.totalorder %s14009_s8, %s10655_s24  ;;  %p10659_p6 = scmp.lt.u32.totalorder %s10655_s24, %s14009_s8 }
 0x4ec   :  { %p10661_p7 = pnand %p10659_p6, %p10656_p5 }
 0x4ee   :  { %10664 = shalt.err (!%p10661_p7)
}
 0x4ef   :  { %7979 = dma.vmem_to_hbm [thread:$0]  %s7977_s7, 224, %s14009_s8, [#allocation3]  }
 0x4f0   :  { %s10665_s11 = scalar_lea.vmem %s7987_s21, 224  ;;  %p10670_p9 = scmp.lt.s32.totalorder %s7987_s21, %s7987_s21 }
 0x4f1   :  { %p10666_p8 = scmp.ne.s32.totalorder %s7987_s21, %s10665_s11  ;;  %p10671_p10 = scmp.lt.s32.totalorder %s10665_s11, %s10665_s11 }
 0x4f3   :  { %p10672_p11 = por %p10671_p10, %p10670_p9 }
 0x4f5   :  { %p10673_p12 = pnand %p10672_p11, %p10666_p8 }
 0x4f7   :  { %10676 = shalt.err (!%p10673_p12)
}
 0x4f8   :  { %s10677_s0 = scalar_lea.hbm %s14010_s9, 224 }
 0x4f9   :  { %p10678_p13 = scmp.ne.s32.totalorder %s14010_s9, %s10677_s0  ;;  %p10681_p0 = scmp.lt.u32.totalorder %s10677_s0, %s14010_s9 }
 0x4fb   :  { %p10683_p1 = pnand %p10681_p0, %p10678_p13 }
 0x4fd   :  { %10686 = shalt.err (!%p10683_p1)
}
 0x4fe   :  { %7989 = dma.vmem_to_hbm [thread:$0]  %s7987_s21, 224, %s14010_s9, [#allocation5]   ;;  %v5903_v46 = vrot.slane %v13955_v10, %v12519_v24  ;;  %v5907_v44 = vrot.slane %v13955_v10, %v12522_v25  ;;  %v7959_v58 = vrot.slane %v7952_v41, %v10886_v49 }
 0x5a9   :  { %v7903_v47 = vpop.f32.mrb[24].mxu0 }
 0x5aa   :  { %v9130_v50 = vadd.f32 %v7903_v47, %v5903_v46  ;;  %v7905_v35 = vpop.f32.mrb[25].mxu0 }
 0x5ab   :  { %v9131_v32 = vadd.f32 %v7905_v35, %v5907_v44  ;;  %v7907_v3 = vpop.f32.mrb[26].mxu0 }
 0x5ac   :  { %v7914_v52 = vmax.f32 %v9130_v50, 0.0  ;;  %v7908_v21 = vpop.f32.mrb[27].mxu0 }
 0x5ad   :  { %v7915_v54 = vmax.f32 %v9131_v32, 0.0 }
 0x5af   :  { %v8979_v59 = vpack.c.bf16 %v7915_v54, %v7914_v52 }
 0x5b1   :  { %v7951_v62 = vrot.slane %v8979_v59, %v10886_v49 }
 0x5b3   :  { %v7966_v63 = vrot.slane %v7951_v62, %v10886_v49 }
 0x5b5   :  { %v7967_v1 = vcombine.low %v7959_v58, %v7966_v63 }
 0x5b7   :  { %7969 = vst [vmem:[%s14011_s10] sm:$0x3f] %v7967_v1 }
 0x5b8   :  { %10687 = dma.done.wait [#allocation3], 224  }
 0x5b9   :  { %10688 = vsyncadd [#allocation3], 4294967072 }
 0x5ba   :  { %10689 = dma.done.wait [#allocation5], 224  }
 0x5bb   :  { %10690 = vsyncadd [#allocation5], 4294967072 }
 0x5bc   :  { %8000 = vsyncpa [#allocation3], 1 }
 0x5bd   :  { %8001 = vsyncpa [#allocation5], 1 }

</bundles_post_ra>
